<compile_context>
chip_gen: v5e
topology: v5e:2x2
jax: 0.10.0
libtpu: 0.0.40
codegen_flags: <defaults>
</compile_context>

<pallas_src>
import functools
import math
from typing import NamedTuple

import jax
import jax.numpy as jnp
from jax.experimental import pallas as pl
from jax.experimental.pallas import tpu as pltpu

# ----------------------------- configuration --------------------------------
VOCAB = 100          # vocab_size
VOCAB_PAD = 128      # lane-dense padded vocab (final projection / one-hot gather)
EMB = 32             # embedding_dim
HIDDEN = 32          # hidden_dim
NUM_LAYERS = 2       # num_layers
NUM_HEADS = 2        # num_heads
NUM_DOWNSAMPLES = 2  # num_downsamples
COND_DIM = 16        # condition_dim
MAX_SEQ = 8
BATCH = 2
SEQ = 8

assert NUM_LAYERS % NUM_DOWNSAMPLES == 0


def _pick_mxu_dtype():
    """bf16 matmul operands on v6e/v7x (MXU-native, halves weight vreg traffic);
    f32 on v5e / unknown chips.  Accumulation is always f32."""
    try:
        kind = jax.devices()[0].device_kind.lower()
    except Exception:
        return jnp.float32
    return jnp.bfloat16 if ("v6" in kind or "v7" in kind) else jnp.float32


MXU_DTYPE = _pick_mxu_dtype()


# ----------------------------- parameter packing ------------------------------
class Handle(NamedTuple):
    """Static descriptor of one parameter inside a packed blob."""
    blob: str
    off: int    # row offset (multiple of 8)
    din: int    # rows (1 for bias / LayerNorm vectors)
    dout: int   # valid columns


class _Packer:
    """Packs every parameter into two lane-dense f32 blobs.

    Instead of ~130 separate kernel operands (each a tiny HBM->VMEM DMA sitting
    on the critical path of a grid-less kernel), the whole model arrives in two
    DMAs and is addressed inside the kernel with free static slices.
    """
    _LANES = {"w128": 128, "w512": 512}

    def __init__(self):
        self._parts = {k: [] for k in self._LANES}
        self._off = {k: 0 for k in self._LANES}

    def add(self, arr) -> Handle:
        arr = jnp.asarray(arr, jnp.float32)
        if arr.ndim == 1:
            arr = arr[None, :]
        din, dout = arr.shape
        blob = "w128" if dout <= 128 else "w512"
        lane = self._LANES[blob]
        assert dout <= lane, (din, dout)
        rows = ((din + 7) // 8) * 8          # keep row offsets 8-sublane aligned
        padded = jnp.zeros((rows, lane), jnp.float32).at[:din, :dout].set(arr)
        off = self._off[blob]
        self._parts[blob].append(padded)
        self._off[blob] += rows
        return Handle(blob, off, din, dout)

    def finalize(self):
        blobs = {}
        for k, lane in self._LANES.items():
            parts = self._parts[k] or [jnp.zeros((8, lane), jnp.float32)]
            blobs[k] = jnp.concatenate(parts, axis=0)
        return blobs


class _KeyGen:
    def __init__(self, seed):
        self._key = jax.random.PRNGKey(seed)

    def __call__(self):
        self._key, sub = jax.random.split(self._key)
        return sub


def init_params(seed=0):
    """Returns (layout, blobs): a static Handle tree + two packed f32 blobs."""
    kg = _KeyGen(seed)
    pk = _Packer()
    bpl = NUM_LAYERS // NUM_DOWNSAMPLES

    def lin(din, dout, scale=0.02):
        w = jax.random.normal(kg(), (din, dout), jnp.float32) * scale
        return pk.add(w), pk.add(jnp.zeros((dout,), jnp.float32))

    def ln(d):
        return (pk.add(jnp.ones((d,), jnp.float32)),
                pk.add(jnp.zeros((d,), jnp.float32)))

    def res_block(d, d_time):
        blk = {}
        blk["ln1_g"], blk["ln1_b"] = ln(d)
        blk["ln2_g"], blk["ln2_b"] = ln(d)
        blk["wqkv"], blk["bqkv"] = lin(d, 3 * d)        # fused Q/K/V projection
        blk["wo"], blk["bo"] = lin(d, d)
        blk["time_w"], blk["time_b"] = lin(d_time, d)
        blk["ff1_w"], blk["ff1_b"] = lin(d, 4 * d)
        blk["ff2_w"], blk["ff2_b"] = lin(4 * d, d)
        return blk

    def cross_block(d, dc):
        # TODO(synk): q/k projections + pre-LN of CrossAttentionBlock are dead for
        # a single condition token (softmax over one key == 1); only v/out kept.
        cb = {}
        cb["wv"], cb["bv"] = lin(dc, d)
        cb["wo"], cb["bo"] = lin(d, d)
        return cb

    net = {}
    tok = jax.random.normal(kg(), (VOCAB, EMB), jnp.float32) * 0.02
    net["tok_emb"] = pk.add(jnp.pad(tok, ((0, VOCAB_PAD - VOCAB), (0, 0))))
    net["pos_emb"] = pk.add(jax.random.normal(kg(), (MAX_SEQ, EMB), jnp.float32) * 0.02)
    net["time1_w"], net["time1_b"] = lin(EMB, HIDDEN)
    net["time2_w"], net["time2_b"] = lin(HIDDEN, HIDDEN)
    net["input_w"], net["input_b"] = lin(EMB, HIDDEN)

    enc, d = [], HIDDEN
    for _ in range(NUM_DOWNSAMPLES):
        lvl = {"blocks": [res_block(d, HIDDEN) for _ in range(bpl)]}
        lvl["down_ln_g"], lvl["down_ln_b"] = ln(d)
        lvl["down_w"], lvl["down_b"] = lin(d, 2 * d)
        enc.append(lvl)
        d *= 2
    net["encoder"] = enc

    net["middle"] = [res_block(d, HIDDEN) for _ in range(2)]

    dec = []
    for _ in range(NUM_DOWNSAMPLES):
        lvl = {}
        lvl["up_ln_g"], lvl["up_ln_b"] = ln(d)
        lvl["up_w"], lvl["up_b"] = lin(d, d // 2)
        d //= 2
        lvl["blocks"] = [res_block(d, HIDDEN) for _ in range(bpl)]
        dec.append(lvl)
    net["decoder"] = dec

    # condition cross-attention blocks for the dims the decoder actually visits
    net["cond_blocks"] = {}
    dd = HIDDEN * (2 ** NUM_DOWNSAMPLES)
    for _ in range(NUM_DOWNSAMPLES):
        dd //= 2
        net["cond_blocks"][dd] = [cross_block(dd, COND_DIM) for _ in range(bpl)]

    net["final_ln_g"], net["final_ln_b"] = ln(HIDDEN)
    fw = jax.random.normal(kg(), (HIDDEN, VOCAB), jnp.float32) * 0.02
    net["final_w"] = pk.add(jnp.pad(fw, ((0, 0), (0, VOCAB_PAD - VOCAB))))
    net["final_b"] = pk.add(jnp.zeros((VOCAB_PAD,), jnp.float32))

    return net, pk.finalize()


# ----------------------------- fused UNet kernel ------------------------------
def _unet_kernel(x_ref, t_ref, cond_ref, w128_ref, w512_ref, out_ref, *,
                 net, cfg, use_condition, guidance_scale):
    f32 = jnp.float32
    blob_refs = {"w128": w128_ref, "w512": w512_ref}
    B, S = x_ref.shape
    M = B * S

    def W(h: Handle):
        # static slice of a packed blob — free (no extra DMA, no dynamic index)
        return blob_refs[h.blob][h.off:h.off + h.din, 0:h.dout]

    def mm(a, wh, bh=None):
        y = jnp.dot(a.astype(MXU_DTYPE), W(wh).astype(MXU_DTYPE),
                    preferred_element_type=f32)
        if bh is not None:
            y = y + W(bh)
        return y

    def layernorm(x, gh, bh):
        mu = jnp.mean(x, axis=-1, keepdims=True)
        xc = x - mu
        var = jnp.mean(xc * xc, axis=-1, keepdims=True)
        return xc * jax.lax.rsqrt(var + 1e-5) * W(gh) + W(bh)

    # ---- token + positional embedding (one-hot gather on the MXU, exact f32) --
    ids = x_ref[...]
    iota_v = jax.lax.broadcasted_iota(jnp.int32, (B, S, VOCAB_PAD), 2)
    onehot = (ids[:, :, None] == iota_v).astype(f32)
    tok = jnp.dot(onehot.reshape(M, VOCAB_PAD), W(net["tok_emb"]),
                  preferred_element_type=f32)
    tok = tok.reshape(B, S, EMB) + W(net["pos_emb"])[None, :S, :]

    # ---- sinusoidal timestep embedding + MLP (SiLU) ----------------------------
    half = EMB // 2
    k_idx = jax.lax.broadcasted_iota(jnp.int32, (1, half), 1).astype(f32)
    freqs = jnp.exp(k_idx * (-math.log(10000.0) / half))       # [1, half]
    args = t_ref[...] * freqs                                   # [B, half]
    te = jnp.concatenate([jnp.sin(args), jnp.cos(args)], axis=-1)
    te = jax.nn.silu(mm(te, net["time1_w"], net["time1_b"]))
    te = mm(te, net["time2_w"], net["time2_b"])                 # [B, HIDDEN]

    cond = cond_ref[...].astype(f32)                            # [B, COND_DIM]

    # ---- transformer building blocks -------------------------------------------
    def self_attention(hn3, blk, n_heads):
        B_, S_, D = hn3.shape
        dh = D // n_heads
        qkv = mm(hn3.reshape(B_ * S_, D), blk["wqkv"], blk["bqkv"])   # [M, 3D]

        def split_heads(base):
            hs = [qkv[:, base + h * dh: base + (h + 1) * dh] for h in range(n_heads)]
            # heads land on the leading (batch) axis -> no lane-splitting reshapes
            return jnp.stack(hs, axis=0).reshape(n_heads * B_, S_, dh)

        qh, kh, vh = split_heads(0), split_heads(D), split_heads(2 * D)
        s = jnp.einsum("bqd,bkd->bqk", qh.astype(MXU_DTYPE), kh.astype(MXU_DTYPE),
                       preferred_element_type=f32) * (1.0 / math.sqrt(dh))
        s = s - jnp.max(s, axis=-1, keepdims=True)
        p = jnp.exp(s)
        p = p / jnp.sum(p, axis=-1, keepdims=True)                    # one softmax
        o = jnp.einsum("bqk,bkd->bqd", p.astype(MXU_DTYPE), vh.astype(MXU_DTYPE),
                       preferred_element_type=f32)                    # [(H*B),S,dh]
        o = o.reshape(n_heads, B_, S_, dh)
        o = jnp.concatenate([o[h] for h in range(n_heads)], axis=-1)  # [B,S,D]
        out = mm(o.reshape(B_ * S_, D), blk["wo"], blk["bo"])         # one Wo matmul
        return out.reshape(B_, S_, D)

    def residual_block(h3, blk, n_heads):
        # TODO(synk): attention mask is not implemented (mask=None path only).
        B_, S_, D = h3.shape
        hn = layernorm(h3, blk["ln1_g"], blk["ln1_b"])
        h3 = h3 + self_attention(hn, blk, n_heads)
        tp = mm(te, blk["time_w"], blk["time_b"])                     # [B, D]
        h3 = h3 + tp[:, None, :]
        hn2 = layernorm(h3, blk["ln2_g"], blk["ln2_b"])
        ff = mm(hn2.reshape(B_ * S_, D), blk["ff1_w"], blk["ff1_b"])
        # TODO(synk): PyTorch nn.GELU() is exact erf-GELU; tanh approximation used.
        ff = jax.nn.gelu(ff, approximate=True)
        ff = mm(ff, blk["ff2_w"], blk["ff2_b"])
        return h3 + ff.reshape(B_, S_, D)

    def cross_attention_block(h3, cb):
        # Single condition token: softmax over one key == 1, so q/k projections
        # and the pre-LN are mathematically dead; the block reduces to
        # h + broadcast((cond @ Wv + bv) @ Wo + bo).
        # TODO(synk): only valid for single-token conditions.
        v = mm(cond, cb["wv"], cb["bv"])     # [B, D]
        o = mm(v, cb["wo"], cb["bo"])        # [B, D]
        return h3 + o[:, None, :]

    # ---- input projection --------------------------------------------------------
    h3 = mm(tok.reshape(M, EMB), net["input_w"], net["input_b"]).reshape(B, S, HIDDEN)

    # ---- encoder -------------------------------------------------------------------
    skips = []
    for level in net["encoder"]:
        for blk in level["blocks"]:
            h3 = residual_block(h3, blk, NUM_HEADS)
        skips.append(h3)
        D = h3.shape[-1]
        hn = layernorm(h3, level["down_ln_g"], level["down_ln_b"])
        h3 = mm(hn.reshape(M, D), level["down_w"], level["down_b"]).reshape(B, S, 2 * D)

    # ---- middle --------------------------------------------------------------------
    for blk in net["middle"]:
        h3 = residual_block(h3, blk, NUM_HEADS * 2)

    # ---- decoder -------------------------------------------------------------------
    def up_skip_blocks(h, i):
        level = net["decoder"][i]
        D = h.shape[-1]
        hn = layernorm(h, level["up_ln_g"], level["up_ln_b"])
        h = mm(hn.reshape(M, D), level["up_w"], level["up_b"]).reshape(B, S, D // 2)
        h = h + skips[len(skips) - i - 1]
        for blk in level["blocks"]:
            h = residual_block(h, blk, NUM_HEADS)
        return h

    def cross_at_level(h, i):
        cbs = net["cond_blocks"][h.shape[-1]]
        return cross_attention_block(h, cbs[i % len(cbs)])

    def tail(h, use_cond):
        """From just after decoder level 0's residual blocks to padded logits."""
        if use_cond:
            h = cross_at_level(h, 0)
        for i in range(1, NUM_DOWNSAMPLES):
            h = up_skip_blocks(h, i)
            if use_cond:
                h = cross_at_level(h, i)
        D = h.shape[-1]
        hn = layernorm(h, net["final_ln_g"], net["final_ln_b"])
        return mm(hn.reshape(M, D), net["final_w"],
                  net["final_b"]).reshape(B, S, VOCAB_PAD)   # lane-dense 128 store

    # The condition only enters at the first decoder cross-attention, so
    # everything up to and including decoder level 0's residual blocks is shared
    # between the CFG branches and is computed ONCE.
    h3 = up_skip_blocks(h3, 0)

    if cfg:
        logits_c = tail(h3, True)
        logits_u = tail(h3, False)
        logits = logits_u + guidance_scale * (logits_c - logits_u)
    else:
        logits = tail(h3, use_condition)

    out_ref[...] = logits.astype(out_ref.dtype)


# ----------------------------- wrapper ----------------------------------------
def make_forward(net):
    """Builds the jitted forward; `net` (static Handle layout) is closed over."""

    def run(blobs, x, t, condition, *, guidance_scale, use_condition):
        B, S = x.shape
        cfg = bool(use_condition) and (float(guidance_scale) != 1.0)
        kernel = functools.partial(
            _unet_kernel, net=net, cfg=cfg, use_condition=bool(use_condition),
            guidance_scale=float(guidance_scale))

        n_weight = sum(int(b.size) for b in blobs.values())
        bytes_accessed = 4 * (n_weight + x.size + t.size + condition.size
                              + B * S * VOCAB_PAD)
        cost = pl.CostEstimate(
            flops=int(2 * B * S * n_weight * (1.5 if cfg else 1.0)),
            transcendentals=int(20 * B * S * HIDDEN * (2 ** NUM_DOWNSAMPLES)),
            bytes_accessed=int(bytes_accessed))

        logits = pl.pallas_call(
            kernel,
            out_shape=jax.ShapeDtypeStruct((B, S, VOCAB_PAD), jnp.float32),
            in_specs=[pl.BlockSpec(memory_space=pltpu.MemorySpace.VMEM)] * 5,
            out_specs=pl.BlockSpec(memory_space=pltpu.MemorySpace.VMEM),
            cost_estimate=cost,
            # TODO(synk): on v7x the batch (or the two CFG tails) could be sharded
            # across the 2 TensorCores with a leading "parallel" grid axis.
        )(x, t.astype(jnp.float32).reshape(B, 1), condition,
          blobs["w128"], blobs["w512"])
        return logits[:, :, :VOCAB]

    return jax.jit(run, static_argnames=("guidance_scale", "use_condition"))


def cfg_forward(forward_fn, blobs, x, t, condition=None, guidance_scale=1.0):
    """CodeClassifierFreeGuidanceUNet.forward (eval mode, mask=None)."""
    use_condition = condition is not None
    if condition is None:
        condition = jnp.zeros((x.shape[0], COND_DIM), jnp.float32)
    return forward_fn(blobs, x, t, condition,
                      guidance_scale=float(guidance_scale),
                      use_condition=use_condition)


# --------------------------------- main ----------------------------------------
if __name__ == "__main__":
    net, blobs = init_params(seed=0)
    forward = make_forward(net)

    key = jax.random.PRNGKey(0)
    kx, kt, kc = jax.random.split(key, 3)
    x = jax.random.randint(kx, (BATCH, SEQ), 0, VOCAB, dtype=jnp.int32)
    t = jax.random.randint(kt, (BATCH,), 0, 1000, dtype=jnp.int32)
    condition = jax.random.normal(kc, (BATCH, COND_DIM), jnp.float32)

    logits = cfg_forward(forward, blobs, x, t, condition, guidance_scale=2.0)
    logits = jax.block_until_ready(logits)

    assert logits.shape == (BATCH, SEQ, VOCAB), logits.shape
    assert bool(jnp.all(jnp.isfinite(logits)))
    print("KERNEL_OK")
</pallas_src>

<mosaic_0001>
module attributes {stable_mosaic.version = 11 : i64} {
  func.func @_unet_kernel(%arg0: memref<2x8xi32, #tpu.memory_space<vmem>>, %arg1: memref<2x1xf32, #tpu.memory_space<vmem>>, %arg2: memref<2x16xf32, #tpu.memory_space<vmem>>, %arg3: memref<3784x128xf32, #tpu.memory_space<vmem>>, %arg4: memref<832x512xf32, #tpu.memory_space<vmem>>, %arg5: memref<2x8x128xf32, #tpu.memory_space<vmem>>) attributes {dimension_semantics = [], scalar_prefetch = 0 : i64, scratch_operands = 0 : i64, tpu.core_type = #tpu.core_type<tc>} {
    %c0 = arith.constant 0 : index
    %c0_0 = arith.constant 0 : index
    %0 = vector.load %arg0[%c0, %c0_0] : memref<2x8xi32, #tpu.memory_space<vmem>>, vector<2x8xi32>
    %1 = tpu.iota {dimensions = array<i32: 2>} : vector<2x8x128xi32>
    %2 = vector.shape_cast %0 : vector<2x8xi32> to vector<2x8x1xi32>
    %3 = vector.broadcast %2 : vector<2x8x1xi32> to vector<2x8x128xi32>
    %4 = arith.cmpi eq, %3, %1 : vector<2x8x128xi32>
    %5 = arith.extui %4 : vector<2x8x128xi1> to vector<2x8x128xi32>
    %6 = arith.sitofp %5 : vector<2x8x128xi32> to vector<2x8x128xf32>
    %7 = vector.shape_cast %6 : vector<2x8x128xf32> to vector<16x128xf32>
    %c0_1 = arith.constant 0 : index
    %c0_2 = arith.constant 0 : index
    %8 = vector.load %arg3[%c0_1, %c0_2] : memref<3784x128xf32, #tpu.memory_space<vmem>>, vector<128x32xf32>
    %cst = arith.constant dense<0.000000e+00> : vector<16x32xf32>
    %9 = tpu.matmul %7, %8, %cst {dimension_numbers = #tpu.dot_dimension_numbers<[1], [0], [0], [1], [0, 0, 1, 1], [], []>} : vector<16x128xf32>, vector<128x32xf32>, vector<16x32xf32> -> vector<16x32xf32>
    %10 = vector.shape_cast %9 : vector<16x32xf32> to vector<2x8x32xf32>
    %c128 = arith.constant 128 : index
    %c0_3 = arith.constant 0 : index
    %11 = vector.load %arg3[%c128, %c0_3] : memref<3784x128xf32, #tpu.memory_space<vmem>>, vector<8x32xf32>
    %12 = vector.shape_cast %11 : vector<8x32xf32> to vector<1x8x32xf32>
    %13 = vector.broadcast %12 : vector<1x8x32xf32> to vector<2x8x32xf32>
    %14 = arith.addf %10, %13 : vector<2x8x32xf32>
    %15 = tpu.iota {dimensions = array<i32: 1>} : vector<1x16xi32>
    %16 = arith.sitofp %15 : vector<1x16xi32> to vector<1x16xf32>
    %cst_4 = arith.constant -0.575646281 : f32
    %17 = vector.broadcast %cst_4 : f32 to vector<1x16xf32>
    %18 = arith.mulf %16, %17 : vector<1x16xf32>
    %19 = math.exp %18 : vector<1x16xf32>
    %c0_5 = arith.constant 0 : index
    %c0_6 = arith.constant 0 : index
    %20 = vector.load %arg1[%c0_5, %c0_6] : memref<2x1xf32, #tpu.memory_space<vmem>>, vector<2x1xf32>
    %21 = vector.broadcast %20 : vector<2x1xf32> to vector<2x16xf32>
    %22 = vector.broadcast %19 : vector<1x16xf32> to vector<2x16xf32>
    %23 = arith.mulf %21, %22 : vector<2x16xf32>
    %24 = math.sin %23 : vector<2x16xf32>
    %25 = math.cos %23 : vector<2x16xf32>
    %26 = tpu.concatenate %24, %25 in 1 : vector<2x16xf32>, vector<2x16xf32> -> vector<2x32xf32>
    %c136 = arith.constant 136 : index
    %c0_7 = arith.constant 0 : index
    %27 = vector.load %arg3[%c136, %c0_7] : memref<3784x128xf32, #tpu.memory_space<vmem>>, vector<32x32xf32>
    %cst_8 = arith.constant dense<0.000000e+00> : vector<2x32xf32>
    %28 = tpu.matmul %26, %27, %cst_8 {dimension_numbers = #tpu.dot_dimension_numbers<[1], [0], [0], [1], [0, 0, 1, 1], [], []>} : vector<2x32xf32>, vector<32x32xf32>, vector<2x32xf32> -> vector<2x32xf32>
    %c168 = arith.constant 168 : index
    %c0_9 = arith.constant 0 : index
    %29 = vector.load %arg3[%c168, %c0_9] : memref<3784x128xf32, #tpu.memory_space<vmem>>, vector<1x32xf32>
    %30 = vector.broadcast %29 : vector<1x32xf32> to vector<2x32xf32>
    %31 = arith.addf %28, %30 : vector<2x32xf32>
    %32 = arith.negf %31 : vector<2x32xf32>
    %33 = math.exp %32 : vector<2x32xf32>
    %cst_10 = arith.constant 1.000000e+00 : f32
    %34 = vector.broadcast %cst_10 : f32 to vector<2x32xf32>
    %35 = arith.addf %34, %33 : vector<2x32xf32>
    %36 = arith.divf %34, %35 : vector<2x32xf32>
    %37 = arith.mulf %31, %36 : vector<2x32xf32>
    %c176 = arith.constant 176 : index
    %c0_11 = arith.constant 0 : index
    %38 = vector.load %arg3[%c176, %c0_11] : memref<3784x128xf32, #tpu.memory_space<vmem>>, vector<32x32xf32>
    %cst_12 = arith.constant dense<0.000000e+00> : vector<2x32xf32>
    %39 = tpu.matmul %37, %38, %cst_12 {dimension_numbers = #tpu.dot_dimension_numbers<[1], [0], [0], [1], [0, 0, 1, 1], [], []>} : vector<2x32xf32>, vector<32x32xf32>, vector<2x32xf32> -> vector<2x32xf32>
    %c208 = arith.constant 208 : index
    %c0_13 = arith.constant 0 : index
    %40 = vector.load %arg3[%c208, %c0_13] : memref<3784x128xf32, #tpu.memory_space<vmem>>, vector<1x32xf32>
    %41 = vector.broadcast %40 : vector<1x32xf32> to vector<2x32xf32>
    %42 = arith.addf %39, %41 : vector<2x32xf32>
    %c0_14 = arith.constant 0 : index
    %c0_15 = arith.constant 0 : index
    %43 = vector.load %arg2[%c0_14, %c0_15] : memref<2x16xf32, #tpu.memory_space<vmem>>, vector<2x16xf32>
    %44 = vector.shape_cast %14 : vector<2x8x32xf32> to vector<16x32xf32>
    %c216 = arith.constant 216 : index
    %c0_16 = arith.constant 0 : index
    %45 = vector.load %arg3[%c216, %c0_16] : memref<3784x128xf32, #tpu.memory_space<vmem>>, vector<32x32xf32>
    %cst_17 = arith.constant dense<0.000000e+00> : vector<16x32xf32>
    %46 = tpu.matmul %44, %45, %cst_17 {dimension_numbers = #tpu.dot_dimension_numbers<[1], [0], [0], [1], [0, 0, 1, 1], [], []>} : vector<16x32xf32>, vector<32x32xf32>, vector<16x32xf32> -> vector<16x32xf32>
    %c248 = arith.constant 248 : index
    %c0_18 = arith.constant 0 : index
    %47 = vector.load %arg3[%c248, %c0_18] : memref<3784x128xf32, #tpu.memory_space<vmem>>, vector<1x32xf32>
    %48 = vector.broadcast %47 : vector<1x32xf32> to vector<16x32xf32>
    %49 = arith.addf %46, %48 : vector<16x32xf32>
    %50 = vector.shape_cast %49 : vector<16x32xf32> to vector<2x8x32xf32>
    %cst_19 = arith.constant dense<0.000000e+00> : vector<2x8xf32>
    %51 = vector.multi_reduction <add>, %50, %cst_19 [2] : vector<2x8x32xf32> to vector<2x8xf32>
    %52 = vector.shape_cast %51 : vector<2x8xf32> to vector<2x8x1xf32>
    %cst_20 = arith.constant 3.200000e+01 : f32
    %53 = vector.broadcast %cst_20 : f32 to vector<2x8x1xf32>
    %54 = arith.divf %52, %53 : vector<2x8x1xf32>
    %55 = vector.broadcast %54 : vector<2x8x1xf32> to vector<2x8x32xf32>
    %56 = arith.subf %50, %55 : vector<2x8x32xf32>
    %57 = arith.mulf %56, %56 : vector<2x8x32xf32>
    %cst_21 = arith.constant dense<0.000000e+00> : vector<2x8xf32>
    %58 = vector.multi_reduction <add>, %57, %cst_21 [2] : vector<2x8x32xf32> to vector<2x8xf32>
    %59 = vector.shape_cast %58 : vector<2x8xf32> to vector<2x8x1xf32>
    %cst_22 = arith.constant 3.200000e+01 : f32
    %60 = vector.broadcast %cst_22 : f32 to vector<2x8x1xf32>
    %61 = arith.divf %59, %60 : vector<2x8x1xf32>
    %cst_23 = arith.constant 9.99999974E-6 : f32
    %62 = vector.broadcast %cst_23 : f32 to vector<2x8x1xf32>
    %63 = arith.addf %61, %62 : vector<2x8x1xf32>
    %64 = math.rsqrt %63 : vector<2x8x1xf32>
    %65 = vector.broadcast %64 : vector<2x8x1xf32> to vector<2x8x32xf32>
    %66 = arith.mulf %56, %65 : vector<2x8x32xf32>
    %c256 = arith.constant 256 : index
    %c0_24 = arith.constant 0 : index
    %67 = vector.load %arg3[%c256, %c0_24] : memref<3784x128xf32, #tpu.memory_space<vmem>>, vector<1x32xf32>
    %68 = vector.shape_cast %67 : vector<1x32xf32> to vector<1x1x32xf32>
    %69 = vector.broadcast %68 : vector<1x1x32xf32> to vector<2x8x32xf32>
    %70 = arith.mulf %66, %69 : vector<2x8x32xf32>
    %c264 = arith.constant 264 : index
    %c0_25 = arith.constant 0 : index
    %71 = vector.load %arg3[%c264, %c0_25] : memref<3784x128xf32, #tpu.memory_space<vmem>>, vector<1x32xf32>
    %72 = vector.shape_cast %71 : vector<1x32xf32> to vector<1x1x32xf32>
    %73 = vector.broadcast %72 : vector<1x1x32xf32> to vector<2x8x32xf32>
    %74 = arith.addf %70, %73 : vector<2x8x32xf32>
    %75 = vector.shape_cast %74 : vector<2x8x32xf32> to vector<16x32xf32>
    %c288 = arith.constant 288 : index
    %c0_26 = arith.constant 0 : index
    %76 = vector.load %arg3[%c288, %c0_26] : memref<3784x128xf32, #tpu.memory_space<vmem>>, vector<32x96xf32>
    %cst_27 = arith.constant dense<0.000000e+00> : vector<16x96xf32>
    %77 = tpu.matmul %75, %76, %cst_27 {dimension_numbers = #tpu.dot_dimension_numbers<[1], [0], [0], [1], [0, 0, 1, 1], [], []>} : vector<16x32xf32>, vector<32x96xf32>, vector<16x96xf32> -> vector<16x96xf32>
    %c320 = arith.constant 320 : index
    %c0_28 = arith.constant 0 : index
    %78 = vector.load %arg3[%c320, %c0_28] : memref<3784x128xf32, #tpu.memory_space<vmem>>, vector<1x96xf32>
    %79 = vector.broadcast %78 : vector<1x96xf32> to vector<16x96xf32>
    %80 = arith.addf %77, %79 : vector<16x96xf32>
    %81 = vector.extract_strided_slice %80 {offsets = [0, 0], sizes = [16, 16], strides = [1, 1]} : vector<16x96xf32> to vector<16x16xf32>
    %82 = vector.extract_strided_slice %80 {offsets = [0, 16], sizes = [16, 16], strides = [1, 1]} : vector<16x96xf32> to vector<16x16xf32>
    %83 = vector.shape_cast %81 : vector<16x16xf32> to vector<1x16x16xf32>
    %84 = vector.shape_cast %82 : vector<16x16xf32> to vector<1x16x16xf32>
    %85 = tpu.concatenate %83, %84 in 0 : vector<1x16x16xf32>, vector<1x16x16xf32> -> vector<2x16x16xf32>
    %86 = vector.shape_cast %85 : vector<2x16x16xf32> to vector<4x8x16xf32>
    %87 = vector.extract_strided_slice %80 {offsets = [0, 32], sizes = [16, 16], strides = [1, 1]} : vector<16x96xf32> to vector<16x16xf32>
    %88 = vector.extract_strided_slice %80 {offsets = [0, 48], sizes = [16, 16], strides = [1, 1]} : vector<16x96xf32> to vector<16x16xf32>
    %89 = vector.shape_cast %87 : vector<16x16xf32> to vector<1x16x16xf32>
    %90 = vector.shape_cast %88 : vector<16x16xf32> to vector<1x16x16xf32>
    %91 = tpu.concatenate %89, %90 in 0 : vector<1x16x16xf32>, vector<1x16x16xf32> -> vector<2x16x16xf32>
    %92 = vector.shape_cast %91 : vector<2x16x16xf32> to vector<4x8x16xf32>
    %93 = vector.extract_strided_slice %80 {offsets = [0, 64], sizes = [16, 16], strides = [1, 1]} : vector<16x96xf32> to vector<16x16xf32>
    %94 = vector.extract_strided_slice %80 {offsets = [0, 80], sizes = [16, 16], strides = [1, 1]} : vector<16x96xf32> to vector<16x16xf32>
    %95 = vector.shape_cast %93 : vector<16x16xf32> to vector<1x16x16xf32>
    %96 = vector.shape_cast %94 : vector<16x16xf32> to vector<1x16x16xf32>
    %97 = tpu.concatenate %95, %96 in 0 : vector<1x16x16xf32>, vector<1x16x16xf32> -> vector<2x16x16xf32>
    %98 = vector.shape_cast %97 : vector<2x16x16xf32> to vector<4x8x16xf32>
    "tpu.trace_start"() <{level = 10 : i32, message = "bqd,bkd->bqk"}> : () -> ()
    %cst_29 = arith.constant dense<0.000000e+00> : vector<4x8x8xf32>
    %99 = tpu.matmul %86, %92, %cst_29 {dimension_numbers = #tpu.dot_dimension_numbers<[2], [2], [1], [1], [0, 0, 0, 1, 1, 1], [0], [0]>} : vector<4x8x16xf32>, vector<4x8x16xf32>, vector<4x8x8xf32> -> vector<4x8x8xf32>
    "tpu.trace_stop"() : () -> ()
    %cst_30 = arith.constant 2.500000e-01 : f32
    %100 = vector.broadcast %cst_30 : f32 to vector<4x8x8xf32>
    %101 = arith.mulf %99, %100 : vector<4x8x8xf32>
    %cst_31 = arith.constant dense<0xFF800000> : vector<4x8xf32>
    %102 = vector.multi_reduction <maximumf>, %101, %cst_31 [2] : vector<4x8x8xf32> to vector<4x8xf32>
    %103 = vector.shape_cast %102 : vector<4x8xf32> to vector<4x8x1xf32>
    %104 = vector.broadcast %103 : vector<4x8x1xf32> to vector<4x8x8xf32>
    %105 = arith.subf %101, %104 : vector<4x8x8xf32>
    %106 = math.exp %105 : vector<4x8x8xf32>
    %cst_32 = arith.constant dense<0.000000e+00> : vector<4x8xf32>
    %107 = vector.multi_reduction <add>, %106, %cst_32 [2] : vector<4x8x8xf32> to vector<4x8xf32>
    %108 = vector.shape_cast %107 : vector<4x8xf32> to vector<4x8x1xf32>
    %109 = vector.broadcast %108 : vector<4x8x1xf32> to vector<4x8x8xf32>
    %110 = arith.divf %106, %109 : vector<4x8x8xf32>
    "tpu.trace_start"() <{level = 10 : i32, message = "bqk,bkd->bqd"}> : () -> ()
    %cst_33 = arith.constant dense<0.000000e+00> : vector<4x8x16xf32>
    %111 = tpu.matmul %110, %98, %cst_33 {dimension_numbers = #tpu.dot_dimension_numbers<[2], [1], [1], [2], [0, 0, 0, 1, 1, 2], [0], [0]>} : vector<4x8x8xf32>, vector<4x8x16xf32>, vector<4x8x16xf32> -> vector<4x8x16xf32>
    "tpu.trace_stop"() : () -> ()
    %112 = vector.shape_cast %111 : vector<4x8x16xf32> to vector<2x2x8x16xf32>
    %113 = vector.extract_strided_slice %112 {offsets = [0, 0, 0, 0], sizes = [1, 2, 8, 16], strides = [1, 1, 1, 1]} : vector<2x2x8x16xf32> to vector<1x2x8x16xf32>
    %114 = vector.shape_cast %113 : vector<1x2x8x16xf32> to vector<2x8x16xf32>
    %115 = vector.extract_strided_slice %112 {offsets = [1, 0, 0, 0], sizes = [1, 2, 8, 16], strides = [1, 1, 1, 1]} : vector<2x2x8x16xf32> to vector<1x2x8x16xf32>
    %116 = vector.shape_cast %115 : vector<1x2x8x16xf32> to vector<2x8x16xf32>
    %117 = tpu.concatenate %114, %116 in 2 : vector<2x8x16xf32>, vector<2x8x16xf32> -> vector<2x8x32xf32>
    %118 = vector.shape_cast %117 : vector<2x8x32xf32> to vector<16x32xf32>
    %c328 = arith.constant 328 : index
    %c0_34 = arith.constant 0 : index
    %119 = vector.load %arg3[%c328, %c0_34] : memref<3784x128xf32, #tpu.memory_space<vmem>>, vector<32x32xf32>
    %cst_35 = arith.constant dense<0.000000e+00> : vector<16x32xf32>
    %120 = tpu.matmul %118, %119, %cst_35 {dimension_numbers = #tpu.dot_dimension_numbers<[1], [0], [0], [1], [0, 0, 1, 1], [], []>} : vector<16x32xf32>, vector<32x32xf32>, vector<16x32xf32> -> vector<16x32xf32>
    %c360 = arith.constant 360 : index
    %c0_36 = arith.constant 0 : index
    %121 = vector.load %arg3[%c360, %c0_36] : memref<3784x128xf32, #tpu.memory_space<vmem>>, vector<1x32xf32>
    %122 = vector.broadcast %121 : vector<1x32xf32> to vector<16x32xf32>
    %123 = arith.addf %120, %122 : vector<16x32xf32>
    %124 = vector.shape_cast %123 : vector<16x32xf32> to vector<2x8x32xf32>
    %125 = arith.addf %50, %124 : vector<2x8x32xf32>
    %c368 = arith.constant 368 : index
    %c0_37 = arith.constant 0 : index
    %126 = vector.load %arg3[%c368, %c0_37] : memref<3784x128xf32, #tpu.memory_space<vmem>>, vector<32x32xf32>
    %cst_38 = arith.constant dense<0.000000e+00> : vector<2x32xf32>
    %127 = tpu.matmul %42, %126, %cst_38 {dimension_numbers = #tpu.dot_dimension_numbers<[1], [0], [0], [1], [0, 0, 1, 1], [], []>} : vector<2x32xf32>, vector<32x32xf32>, vector<2x32xf32> -> vector<2x32xf32>
    %c400 = arith.constant 400 : index
    %c0_39 = arith.constant 0 : index
    %128 = vector.load %arg3[%c400, %c0_39] : memref<3784x128xf32, #tpu.memory_space<vmem>>, vector<1x32xf32>
    %129 = vector.broadcast %128 : vector<1x32xf32> to vector<2x32xf32>
    %130 = arith.addf %127, %129 : vector<2x32xf32>
    %131 = vector.shape_cast %130 : vector<2x32xf32> to vector<2x1x32xf32>
    %132 = vector.broadcast %131 : vector<2x1x32xf32> to vector<2x8x32xf32>
    %133 = arith.addf %125, %132 : vector<2x8x32xf32>
    %cst_40 = arith.constant dense<0.000000e+00> : vector<2x8xf32>
    %134 = vector.multi_reduction <add>, %133, %cst_40 [2] : vector<2x8x32xf32> to vector<2x8xf32>
    %135 = vector.shape_cast %134 : vector<2x8xf32> to vector<2x8x1xf32>
    %cst_41 = arith.constant 3.200000e+01 : f32
    %136 = vector.broadcast %cst_41 : f32 to vector<2x8x1xf32>
    %137 = arith.divf %135, %136 : vector<2x8x1xf32>
    %138 = vector.broadcast %137 : vector<2x8x1xf32> to vector<2x8x32xf32>
    %139 = arith.subf %133, %138 : vector<2x8x32xf32>
    %140 = arith.mulf %139, %139 : vector<2x8x32xf32>
    %cst_42 = arith.constant dense<0.000000e+00> : vector<2x8xf32>
    %141 = vector.multi_reduction <add>, %140, %cst_42 [2] : vector<2x8x32xf32> to vector<2x8xf32>
    %142 = vector.shape_cast %141 : vector<2x8xf32> to vector<2x8x1xf32>
    %cst_43 = arith.constant 3.200000e+01 : f32
    %143 = vector.broadcast %cst_43 : f32 to vector<2x8x1xf32>
    %144 = arith.divf %142, %143 : vector<2x8x1xf32>
    %cst_44 = arith.constant 9.99999974E-6 : f32
    %145 = vector.broadcast %cst_44 : f32 to vector<2x8x1xf32>
    %146 = arith.addf %144, %145 : vector<2x8x1xf32>
    %147 = math.rsqrt %146 : vector<2x8x1xf32>
    %148 = vector.broadcast %147 : vector<2x8x1xf32> to vector<2x8x32xf32>
    %149 = arith.mulf %139, %148 : vector<2x8x32xf32>
    %c272 = arith.constant 272 : index
    %c0_45 = arith.constant 0 : index
    %150 = vector.load %arg3[%c272, %c0_45] : memref<3784x128xf32, #tpu.memory_space<vmem>>, vector<1x32xf32>
    %151 = vector.shape_cast %150 : vector<1x32xf32> to vector<1x1x32xf32>
    %152 = vector.broadcast %151 : vector<1x1x32xf32> to vector<2x8x32xf32>
    %153 = arith.mulf %149, %152 : vector<2x8x32xf32>
    %c280 = arith.constant 280 : index
    %c0_46 = arith.constant 0 : index
    %154 = vector.load %arg3[%c280, %c0_46] : memref<3784x128xf32, #tpu.memory_space<vmem>>, vector<1x32xf32>
    %155 = vector.shape_cast %154 : vector<1x32xf32> to vector<1x1x32xf32>
    %156 = vector.broadcast %155 : vector<1x1x32xf32> to vector<2x8x32xf32>
    %157 = arith.addf %153, %156 : vector<2x8x32xf32>
    %158 = vector.shape_cast %157 : vector<2x8x32xf32> to vector<16x32xf32>
    %c408 = arith.constant 408 : index
    %c0_47 = arith.constant 0 : index
    %159 = vector.load %arg3[%c408, %c0_47] : memref<3784x128xf32, #tpu.memory_space<vmem>>, vector<32x128xf32>
    %cst_48 = arith.constant dense<0.000000e+00> : vector<16x128xf32>
    %160 = tpu.matmul %158, %159, %cst_48 {dimension_numbers = #tpu.dot_dimension_numbers<[1], [0], [0], [1], [0, 0, 1, 1], [], []>} : vector<16x32xf32>, vector<32x128xf32>, vector<16x128xf32> -> vector<16x128xf32>
    %c440 = arith.constant 440 : index
    %c0_49 = arith.constant 0 : index
    %161 = vector.load %arg3[%c440, %c0_49] : memref<3784x128xf32, #tpu.memory_space<vmem>>, vector<1x128xf32>
    %162 = vector.broadcast %161 : vector<1x128xf32> to vector<16x128xf32>
    %163 = arith.addf %160, %162 : vector<16x128xf32>
    %164 = arith.mulf %163, %163 : vector<16x128xf32>
    %165 = arith.mulf %163, %164 : vector<16x128xf32>
    %cst_50 = arith.constant 4.471500e-02 : f32
    %166 = vector.broadcast %cst_50 : f32 to vector<16x128xf32>
    %167 = arith.mulf %166, %165 : vector<16x128xf32>
    %168 = arith.addf %163, %167 : vector<16x128xf32>
    %cst_51 = arith.constant 0.797884583 : f32
    %169 = vector.broadcast %cst_51 : f32 to vector<16x128xf32>
    %170 = arith.mulf %169, %168 : vector<16x128xf32>
    %171 = math.tanh %170 : vector<16x128xf32>
    %cst_52 = arith.constant 1.000000e+00 : f32
    %172 = vector.broadcast %cst_52 : f32 to vector<16x128xf32>
    %173 = arith.addf %172, %171 : vector<16x128xf32>
    %cst_53 = arith.constant 5.000000e-01 : f32
    %174 = vector.broadcast %cst_53 : f32 to vector<16x128xf32>
    %175 = arith.mulf %174, %173 : vector<16x128xf32>
    %176 = arith.mulf %163, %175 : vector<16x128xf32>
    %c448 = arith.constant 448 : index
    %c0_54 = arith.constant 0 : index
    %177 = vector.load %arg3[%c448, %c0_54] : memref<3784x128xf32, #tpu.memory_space<vmem>>, vector<128x32xf32>
    %cst_55 = arith.constant dense<0.000000e+00> : vector<16x32xf32>
    %178 = tpu.matmul %176, %177, %cst_55 {dimension_numbers = #tpu.dot_dimension_numbers<[1], [0], [0], [1], [0, 0, 1, 1], [], []>} : vector<16x128xf32>, vector<128x32xf32>, vector<16x32xf32> -> vector<16x32xf32>
    %c576 = arith.constant 576 : index
    %c0_56 = arith.constant 0 : index
    %179 = vector.load %arg3[%c576, %c0_56] : memref<3784x128xf32, #tpu.memory_space<vmem>>, vector<1x32xf32>
    %180 = vector.broadcast %179 : vector<1x32xf32> to vector<16x32xf32>
    %181 = arith.addf %178, %180 : vector<16x32xf32>
    %182 = vector.shape_cast %181 : vector<16x32xf32> to vector<2x8x32xf32>
    %183 = arith.addf %133, %182 : vector<2x8x32xf32>
    %cst_57 = arith.constant dense<0.000000e+00> : vector<2x8xf32>
    %184 = vector.multi_reduction <add>, %183, %cst_57 [2] : vector<2x8x32xf32> to vector<2x8xf32>
    %185 = vector.shape_cast %184 : vector<2x8xf32> to vector<2x8x1xf32>
    %cst_58 = arith.constant 3.200000e+01 : f32
    %186 = vector.broadcast %cst_58 : f32 to vector<2x8x1xf32>
    %187 = arith.divf %185, %186 : vector<2x8x1xf32>
    %188 = vector.broadcast %187 : vector<2x8x1xf32> to vector<2x8x32xf32>
    %189 = arith.subf %183, %188 : vector<2x8x32xf32>
    %190 = arith.mulf %189, %189 : vector<2x8x32xf32>
    %cst_59 = arith.constant dense<0.000000e+00> : vector<2x8xf32>
    %191 = vector.multi_reduction <add>, %190, %cst_59 [2] : vector<2x8x32xf32> to vector<2x8xf32>
    %192 = vector.shape_cast %191 : vector<2x8xf32> to vector<2x8x1xf32>
    %cst_60 = arith.constant 3.200000e+01 : f32
    %193 = vector.broadcast %cst_60 : f32 to vector<2x8x1xf32>
    %194 = arith.divf %192, %193 : vector<2x8x1xf32>
    %cst_61 = arith.constant 9.99999974E-6 : f32
    %195 = vector.broadcast %cst_61 : f32 to vector<2x8x1xf32>
    %196 = arith.addf %194, %195 : vector<2x8x1xf32>
    %197 = math.rsqrt %196 : vector<2x8x1xf32>
    %198 = vector.broadcast %197 : vector<2x8x1xf32> to vector<2x8x32xf32>
    %199 = arith.mulf %189, %198 : vector<2x8x32xf32>
    %c584 = arith.constant 584 : index
    %c0_62 = arith.constant 0 : index
    %200 = vector.load %arg3[%c584, %c0_62] : memref<3784x128xf32, #tpu.memory_space<vmem>>, vector<1x32xf32>
    %201 = vector.shape_cast %200 : vector<1x32xf32> to vector<1x1x32xf32>
    %202 = vector.broadcast %201 : vector<1x1x32xf32> to vector<2x8x32xf32>
    %203 = arith.mulf %199, %202 : vector<2x8x32xf32>
    %c592 = arith.constant 592 : index
    %c0_63 = arith.constant 0 : index
    %204 = vector.load %arg3[%c592, %c0_63] : memref<3784x128xf32, #tpu.memory_space<vmem>>, vector<1x32xf32>
    %205 = vector.shape_cast %204 : vector<1x32xf32> to vector<1x1x32xf32>
    %206 = vector.broadcast %205 : vector<1x1x32xf32> to vector<2x8x32xf32>
    %207 = arith.addf %203, %206 : vector<2x8x32xf32>
    %208 = vector.shape_cast %207 : vector<2x8x32xf32> to vector<16x32xf32>
    %c600 = arith.constant 600 : index
    %c0_64 = arith.constant 0 : index
    %209 = vector.load %arg3[%c600, %c0_64] : memref<3784x128xf32, #tpu.memory_space<vmem>>, vector<32x64xf32>
    %cst_65 = arith.constant dense<0.000000e+00> : vector<16x64xf32>
    %210 = tpu.matmul %208, %209, %cst_65 {dimension_numbers = #tpu.dot_dimension_numbers<[1], [0], [0], [1], [0, 0, 1, 1], [], []>} : vector<16x32xf32>, vector<32x64xf32>, vector<16x64xf32> -> vector<16x64xf32>
    %c632 = arith.constant 632 : index
    %c0_66 = arith.constant 0 : index
    %211 = vector.load %arg3[%c632, %c0_66] : memref<3784x128xf32, #tpu.memory_space<vmem>>, vector<1x64xf32>
    %212 = vector.broadcast %211 : vector<1x64xf32> to vector<16x64xf32>
    %213 = arith.addf %210, %212 : vector<16x64xf32>
    %214 = vector.shape_cast %213 : vector<16x64xf32> to vector<2x8x64xf32>
    %cst_67 = arith.constant dense<0.000000e+00> : vector<2x8xf32>
    %215 = vector.multi_reduction <add>, %214, %cst_67 [2] : vector<2x8x64xf32> to vector<2x8xf32>
    %216 = vector.shape_cast %215 : vector<2x8xf32> to vector<2x8x1xf32>
    %cst_68 = arith.constant 6.400000e+01 : f32
    %217 = vector.broadcast %cst_68 : f32 to vector<2x8x1xf32>
    %218 = arith.divf %216, %217 : vector<2x8x1xf32>
    %219 = vector.broadcast %218 : vector<2x8x1xf32> to vector<2x8x64xf32>
    %220 = arith.subf %214, %219 : vector<2x8x64xf32>
    %221 = arith.mulf %220, %220 : vector<2x8x64xf32>
    %cst_69 = arith.constant dense<0.000000e+00> : vector<2x8xf32>
    %222 = vector.multi_reduction <add>, %221, %cst_69 [2] : vector<2x8x64xf32> to vector<2x8xf32>
    %223 = vector.shape_cast %222 : vector<2x8xf32> to vector<2x8x1xf32>
    %cst_70 = arith.constant 6.400000e+01 : f32
    %224 = vector.broadcast %cst_70 : f32 to vector<2x8x1xf32>
    %225 = arith.divf %223, %224 : vector<2x8x1xf32>
    %cst_71 = arith.constant 9.99999974E-6 : f32
    %226 = vector.broadcast %cst_71 : f32 to vector<2x8x1xf32>
    %227 = arith.addf %225, %226 : vector<2x8x1xf32>
    %228 = math.rsqrt %227 : vector<2x8x1xf32>
    %229 = vector.broadcast %228 : vector<2x8x1xf32> to vector<2x8x64xf32>
    %230 = arith.mulf %220, %229 : vector<2x8x64xf32>
    %c640 = arith.constant 640 : index
    %c0_72 = arith.constant 0 : index
    %231 = vector.load %arg3[%c640, %c0_72] : memref<3784x128xf32, #tpu.memory_space<vmem>>, vector<1x64xf32>
    %232 = vector.shape_cast %231 : vector<1x64xf32> to vector<1x1x64xf32>
    %233 = vector.broadcast %232 : vector<1x1x64xf32> to vector<2x8x64xf32>
    %234 = arith.mulf %230, %233 : vector<2x8x64xf32>
    %c648 = arith.constant 648 : index
    %c0_73 = arith.constant 0 : index
    %235 = vector.load %arg3[%c648, %c0_73] : memref<3784x128xf32, #tpu.memory_space<vmem>>, vector<1x64xf32>
    %236 = vector.shape_cast %235 : vector<1x64xf32> to vector<1x1x64xf32>
    %237 = vector.broadcast %236 : vector<1x1x64xf32> to vector<2x8x64xf32>
    %238 = arith.addf %234, %237 : vector<2x8x64xf32>
    %239 = vector.shape_cast %238 : vector<2x8x64xf32> to vector<16x64xf32>
    %c0_74 = arith.constant 0 : index
    %c0_75 = arith.constant 0 : index
    %240 = vector.load %arg4[%c0_74, %c0_75] : memref<832x512xf32, #tpu.memory_space<vmem>>, vector<64x192xf32>
    %cst_76 = arith.constant dense<0.000000e+00> : vector<16x192xf32>
    %241 = tpu.matmul %239, %240, %cst_76 {dimension_numbers = #tpu.dot_dimension_numbers<[1], [0], [0], [1], [0, 0, 1, 1], [], []>} : vector<16x64xf32>, vector<64x192xf32>, vector<16x192xf32> -> vector<16x192xf32>
    %c64 = arith.constant 64 : index
    %c0_77 = arith.constant 0 : index
    %242 = vector.load %arg4[%c64, %c0_77] : memref<832x512xf32, #tpu.memory_space<vmem>>, vector<1x192xf32>
    %243 = vector.broadcast %242 : vector<1x192xf32> to vector<16x192xf32>
    %244 = arith.addf %241, %243 : vector<16x192xf32>
    %245 = vector.extract_strided_slice %244 {offsets = [0, 0], sizes = [16, 32], strides = [1, 1]} : vector<16x192xf32> to vector<16x32xf32>
    %246 = vector.extract_strided_slice %244 {offsets = [0, 32], sizes = [16, 32], strides = [1, 1]} : vector<16x192xf32> to vector<16x32xf32>
    %247 = vector.shape_cast %245 : vector<16x32xf32> to vector<1x16x32xf32>
    %248 = vector.shape_cast %246 : vector<16x32xf32> to vector<1x16x32xf32>
    %249 = tpu.concatenate %247, %248 in 0 : vector<1x16x32xf32>, vector<1x16x32xf32> -> vector<2x16x32xf32>
    %250 = vector.shape_cast %249 : vector<2x16x32xf32> to vector<4x8x32xf32>
    %251 = vector.extract_strided_slice %244 {offsets = [0, 64], sizes = [16, 32], strides = [1, 1]} : vector<16x192xf32> to vector<16x32xf32>
    %252 = vector.extract_strided_slice %244 {offsets = [0, 96], sizes = [16, 32], strides = [1, 1]} : vector<16x192xf32> to vector<16x32xf32>
    %253 = vector.shape_cast %251 : vector<16x32xf32> to vector<1x16x32xf32>
    %254 = vector.shape_cast %252 : vector<16x32xf32> to vector<1x16x32xf32>
    %255 = tpu.concatenate %253, %254 in 0 : vector<1x16x32xf32>, vector<1x16x32xf32> -> vector<2x16x32xf32>
    %256 = vector.shape_cast %255 : vector<2x16x32xf32> to vector<4x8x32xf32>
    %257 = vector.extract_strided_slice %244 {offsets = [0, 128], sizes = [16, 32], strides = [1, 1]} : vector<16x192xf32> to vector<16x32xf32>
    %258 = vector.extract_strided_slice %244 {offsets = [0, 160], sizes = [16, 32], strides = [1, 1]} : vector<16x192xf32> to vector<16x32xf32>
    %259 = vector.shape_cast %257 : vector<16x32xf32> to vector<1x16x32xf32>
    %260 = vector.shape_cast %258 : vector<16x32xf32> to vector<1x16x32xf32>
    %261 = tpu.concatenate %259, %260 in 0 : vector<1x16x32xf32>, vector<1x16x32xf32> -> vector<2x16x32xf32>
    %262 = vector.shape_cast %261 : vector<2x16x32xf32> to vector<4x8x32xf32>
    "tpu.trace_start"() <{level = 10 : i32, message = "bqd,bkd->bqk"}> : () -> ()
    %cst_78 = arith.constant dense<0.000000e+00> : vector<4x8x8xf32>
    %263 = tpu.matmul %250, %256, %cst_78 {dimension_numbers = #tpu.dot_dimension_numbers<[2], [2], [1], [1], [0, 0, 0, 1, 1, 1], [0], [0]>} : vector<4x8x32xf32>, vector<4x8x32xf32>, vector<4x8x8xf32> -> vector<4x8x8xf32>
    "tpu.trace_stop"() : () -> ()
    %cst_79 = arith.constant 0.176776692 : f32
    %264 = vector.broadcast %cst_79 : f32 to vector<4x8x8xf32>
    %265 = arith.mulf %263, %264 : vector<4x8x8xf32>
    %cst_80 = arith.constant dense<0xFF800000> : vector<4x8xf32>
    %266 = vector.multi_reduction <maximumf>, %265, %cst_80 [2] : vector<4x8x8xf32> to vector<4x8xf32>
    %267 = vector.shape_cast %266 : vector<4x8xf32> to vector<4x8x1xf32>
    %268 = vector.broadcast %267 : vector<4x8x1xf32> to vector<4x8x8xf32>
    %269 = arith.subf %265, %268 : vector<4x8x8xf32>
    %270 = math.exp %269 : vector<4x8x8xf32>
    %cst_81 = arith.constant dense<0.000000e+00> : vector<4x8xf32>
    %271 = vector.multi_reduction <add>, %270, %cst_81 [2] : vector<4x8x8xf32> to vector<4x8xf32>
    %272 = vector.shape_cast %271 : vector<4x8xf32> to vector<4x8x1xf32>
    %273 = vector.broadcast %272 : vector<4x8x1xf32> to vector<4x8x8xf32>
    %274 = arith.divf %270, %273 : vector<4x8x8xf32>
    "tpu.trace_start"() <{level = 10 : i32, message = "bqk,bkd->bqd"}> : () -> ()
    %cst_82 = arith.constant dense<0.000000e+00> : vector<4x8x32xf32>
    %275 = tpu.matmul %274, %262, %cst_82 {dimension_numbers = #tpu.dot_dimension_numbers<[2], [1], [1], [2], [0, 0, 0, 1, 1, 2], [0], [0]>} : vector<4x8x8xf32>, vector<4x8x32xf32>, vector<4x8x32xf32> -> vector<4x8x32xf32>
    "tpu.trace_stop"() : () -> ()
    %276 = vector.shape_cast %275 : vector<4x8x32xf32> to vector<2x2x8x32xf32>
    %277 = vector.extract_strided_slice %276 {offsets = [0, 0, 0, 0], sizes = [1, 2, 8, 32], strides = [1, 1, 1, 1]} : vector<2x2x8x32xf32> to vector<1x2x8x32xf32>
    %278 = vector.shape_cast %277 : vector<1x2x8x32xf32> to vector<2x8x32xf32>
    %279 = vector.extract_strided_slice %276 {offsets = [1, 0, 0, 0], sizes = [1, 2, 8, 32], strides = [1, 1, 1, 1]} : vector<2x2x8x32xf32> to vector<1x2x8x32xf32>
    %280 = vector.shape_cast %279 : vector<1x2x8x32xf32> to vector<2x8x32xf32>
    %281 = tpu.concatenate %278, %280 in 2 : vector<2x8x32xf32>, vector<2x8x32xf32> -> vector<2x8x64xf32>
    %282 = vector.shape_cast %281 : vector<2x8x64xf32> to vector<16x64xf32>
    %c672 = arith.constant 672 : index
    %c0_83 = arith.constant 0 : index
    %283 = vector.load %arg3[%c672, %c0_83] : memref<3784x128xf32, #tpu.memory_space<vmem>>, vector<64x64xf32>
    %cst_84 = arith.constant dense<0.000000e+00> : vector<16x64xf32>
    %284 = tpu.matmul %282, %283, %cst_84 {dimension_numbers = #tpu.dot_dimension_numbers<[1], [0], [0], [1], [0, 0, 1, 1], [], []>} : vector<16x64xf32>, vector<64x64xf32>, vector<16x64xf32> -> vector<16x64xf32>
    %c736 = arith.constant 736 : index
    %c0_85 = arith.constant 0 : index
    %285 = vector.load %arg3[%c736, %c0_85] : memref<3784x128xf32, #tpu.memory_space<vmem>>, vector<1x64xf32>
    %286 = vector.broadcast %285 : vector<1x64xf32> to vector<16x64xf32>
    %287 = arith.addf %284, %286 : vector<16x64xf32>
    %288 = vector.shape_cast %287 : vector<16x64xf32> to vector<2x8x64xf32>
    %289 = arith.addf %214, %288 : vector<2x8x64xf32>
    %c744 = arith.constant 744 : index
    %c0_86 = arith.constant 0 : index
    %290 = vector.load %arg3[%c744, %c0_86] : memref<3784x128xf32, #tpu.memory_space<vmem>>, vector<32x64xf32>
    %cst_87 = arith.constant dense<0.000000e+00> : vector<2x64xf32>
    %291 = tpu.matmul %42, %290, %cst_87 {dimension_numbers = #tpu.dot_dimension_numbers<[1], [0], [0], [1], [0, 0, 1, 1], [], []>} : vector<2x32xf32>, vector<32x64xf32>, vector<2x64xf32> -> vector<2x64xf32>
    %c776 = arith.constant 776 : index
    %c0_88 = arith.constant 0 : index
    %292 = vector.load %arg3[%c776, %c0_88] : memref<3784x128xf32, #tpu.memory_space<vmem>>, vector<1x64xf32>
    %293 = vector.broadcast %292 : vector<1x64xf32> to vector<2x64xf32>
    %294 = arith.addf %291, %293 : vector<2x64xf32>
    %295 = vector.shape_cast %294 : vector<2x64xf32> to vector<2x1x64xf32>
    %296 = vector.broadcast %295 : vector<2x1x64xf32> to vector<2x8x64xf32>
    %297 = arith.addf %289, %296 : vector<2x8x64xf32>
    %cst_89 = arith.constant dense<0.000000e+00> : vector<2x8xf32>
    %298 = vector.multi_reduction <add>, %297, %cst_89 [2] : vector<2x8x64xf32> to vector<2x8xf32>
    %299 = vector.shape_cast %298 : vector<2x8xf32> to vector<2x8x1xf32>
    %cst_90 = arith.constant 6.400000e+01 : f32
    %300 = vector.broadcast %cst_90 : f32 to vector<2x8x1xf32>
    %301 = arith.divf %299, %300 : vector<2x8x1xf32>
    %302 = vector.broadcast %301 : vector<2x8x1xf32> to vector<2x8x64xf32>
    %303 = arith.subf %297, %302 : vector<2x8x64xf32>
    %304 = arith.mulf %303, %303 : vector<2x8x64xf32>
    %cst_91 = arith.constant dense<0.000000e+00> : vector<2x8xf32>
    %305 = vector.multi_reduction <add>, %304, %cst_91 [2] : vector<2x8x64xf32> to vector<2x8xf32>
    %306 = vector.shape_cast %305 : vector<2x8xf32> to vector<2x8x1xf32>
    %cst_92 = arith.constant 6.400000e+01 : f32
    %307 = vector.broadcast %cst_92 : f32 to vector<2x8x1xf32>
    %308 = arith.divf %306, %307 : vector<2x8x1xf32>
    %cst_93 = arith.constant 9.99999974E-6 : f32
    %309 = vector.broadcast %cst_93 : f32 to vector<2x8x1xf32>
    %310 = arith.addf %308, %309 : vector<2x8x1xf32>
    %311 = math.rsqrt %310 : vector<2x8x1xf32>
    %312 = vector.broadcast %311 : vector<2x8x1xf32> to vector<2x8x64xf32>
    %313 = arith.mulf %303, %312 : vector<2x8x64xf32>
    %c656 = arith.constant 656 : index
    %c0_94 = arith.constant 0 : index
    %314 = vector.load %arg3[%c656, %c0_94] : memref<3784x128xf32, #tpu.memory_space<vmem>>, vector<1x64xf32>
    %315 = vector.shape_cast %314 : vector<1x64xf32> to vector<1x1x64xf32>
    %316 = vector.broadcast %315 : vector<1x1x64xf32> to vector<2x8x64xf32>
    %317 = arith.mulf %313, %316 : vector<2x8x64xf32>
    %c664 = arith.constant 664 : index
    %c0_95 = arith.constant 0 : index
    %318 = vector.load %arg3[%c664, %c0_95] : memref<3784x128xf32, #tpu.memory_space<vmem>>, vector<1x64xf32>
    %319 = vector.shape_cast %318 : vector<1x64xf32> to vector<1x1x64xf32>
    %320 = vector.broadcast %319 : vector<1x1x64xf32> to vector<2x8x64xf32>
    %321 = arith.addf %317, %320 : vector<2x8x64xf32>
    %322 = vector.shape_cast %321 : vector<2x8x64xf32> to vector<16x64xf32>
    %c72 = arith.constant 72 : index
    %c0_96 = arith.constant 0 : index
    %323 = vector.load %arg4[%c72, %c0_96] : memref<832x512xf32, #tpu.memory_space<vmem>>, vector<64x256xf32>
    %cst_97 = arith.constant dense<0.000000e+00> : vector<16x256xf32>
    %324 = tpu.matmul %322, %323, %cst_97 {dimension_numbers = #tpu.dot_dimension_numbers<[1], [0], [0], [1], [0, 0, 1, 1], [], []>} : vector<16x64xf32>, vector<64x256xf32>, vector<16x256xf32> -> vector<16x256xf32>
    %c136_98 = arith.constant 136 : index
    %c0_99 = arith.constant 0 : index
    %325 = vector.load %arg4[%c136_98, %c0_99] : memref<832x512xf32, #tpu.memory_space<vmem>>, vector<1x256xf32>
    %326 = vector.broadcast %325 : vector<1x256xf32> to vector<16x256xf32>
    %327 = arith.addf %324, %326 : vector<16x256xf32>
    %328 = arith.mulf %327, %327 : vector<16x256xf32>
    %329 = arith.mulf %327, %328 : vector<16x256xf32>
    %cst_100 = arith.constant 4.471500e-02 : f32
    %330 = vector.broadcast %cst_100 : f32 to vector<16x256xf32>
    %331 = arith.mulf %330, %329 : vector<16x256xf32>
    %332 = arith.addf %327, %331 : vector<16x256xf32>
    %cst_101 = arith.constant 0.797884583 : f32
    %333 = vector.broadcast %cst_101 : f32 to vector<16x256xf32>
    %334 = arith.mulf %333, %332 : vector<16x256xf32>
    %335 = math.tanh %334 : vector<16x256xf32>
    %cst_102 = arith.constant 1.000000e+00 : f32
    %336 = vector.broadcast %cst_102 : f32 to vector<16x256xf32>
    %337 = arith.addf %336, %335 : vector<16x256xf32>
    %cst_103 = arith.constant 5.000000e-01 : f32
    %338 = vector.broadcast %cst_103 : f32 to vector<16x256xf32>
    %339 = arith.mulf %338, %337 : vector<16x256xf32>
    %340 = arith.mulf %327, %339 : vector<16x256xf32>
    %c784 = arith.constant 784 : index
    %c0_104 = arith.constant 0 : index
    %341 = vector.load %arg3[%c784, %c0_104] : memref<3784x128xf32, #tpu.memory_space<vmem>>, vector<256x64xf32>
    %cst_105 = arith.constant dense<0.000000e+00> : vector<16x64xf32>
    %342 = tpu.matmul %340, %341, %cst_105 {dimension_numbers = #tpu.dot_dimension_numbers<[1], [0], [0], [1], [0, 0, 1, 1], [], []>} : vector<16x256xf32>, vector<256x64xf32>, vector<16x64xf32> -> vector<16x64xf32>
    %c1040 = arith.constant 1040 : index
    %c0_106 = arith.constant 0 : index
    %343 = vector.load %arg3[%c1040, %c0_106] : memref<3784x128xf32, #tpu.memory_space<vmem>>, vector<1x64xf32>
    %344 = vector.broadcast %343 : vector<1x64xf32> to vector<16x64xf32>
    %345 = arith.addf %342, %344 : vector<16x64xf32>
    %346 = vector.shape_cast %345 : vector<16x64xf32> to vector<2x8x64xf32>
    %347 = arith.addf %297, %346 : vector<2x8x64xf32>
    %cst_107 = arith.constant dense<0.000000e+00> : vector<2x8xf32>
    %348 = vector.multi_reduction <add>, %347, %cst_107 [2] : vector<2x8x64xf32> to vector<2x8xf32>
    %349 = vector.shape_cast %348 : vector<2x8xf32> to vector<2x8x1xf32>
    %cst_108 = arith.constant 6.400000e+01 : f32
    %350 = vector.broadcast %cst_108 : f32 to vector<2x8x1xf32>
    %351 = arith.divf %349, %350 : vector<2x8x1xf32>
    %352 = vector.broadcast %351 : vector<2x8x1xf32> to vector<2x8x64xf32>
    %353 = arith.subf %347, %352 : vector<2x8x64xf32>
    %354 = arith.mulf %353, %353 : vector<2x8x64xf32>
    %cst_109 = arith.constant dense<0.000000e+00> : vector<2x8xf32>
    %355 = vector.multi_reduction <add>, %354, %cst_109 [2] : vector<2x8x64xf32> to vector<2x8xf32>
    %356 = vector.shape_cast %355 : vector<2x8xf32> to vector<2x8x1xf32>
    %cst_110 = arith.constant 6.400000e+01 : f32
    %357 = vector.broadcast %cst_110 : f32 to vector<2x8x1xf32>
    %358 = arith.divf %356, %357 : vector<2x8x1xf32>
    %cst_111 = arith.constant 9.99999974E-6 : f32
    %359 = vector.broadcast %cst_111 : f32 to vector<2x8x1xf32>
    %360 = arith.addf %358, %359 : vector<2x8x1xf32>
    %361 = math.rsqrt %360 : vector<2x8x1xf32>
    %362 = vector.broadcast %361 : vector<2x8x1xf32> to vector<2x8x64xf32>
    %363 = arith.mulf %353, %362 : vector<2x8x64xf32>
    %c1048 = arith.constant 1048 : index
    %c0_112 = arith.constant 0 : index
    %364 = vector.load %arg3[%c1048, %c0_112] : memref<3784x128xf32, #tpu.memory_space<vmem>>, vector<1x64xf32>
    %365 = vector.shape_cast %364 : vector<1x64xf32> to vector<1x1x64xf32>
    %366 = vector.broadcast %365 : vector<1x1x64xf32> to vector<2x8x64xf32>
    %367 = arith.mulf %363, %366 : vector<2x8x64xf32>
    %c1056 = arith.constant 1056 : index
    %c0_113 = arith.constant 0 : index
    %368 = vector.load %arg3[%c1056, %c0_113] : memref<3784x128xf32, #tpu.memory_space<vmem>>, vector<1x64xf32>
    %369 = vector.shape_cast %368 : vector<1x64xf32> to vector<1x1x64xf32>
    %370 = vector.broadcast %369 : vector<1x1x64xf32> to vector<2x8x64xf32>
    %371 = arith.addf %367, %370 : vector<2x8x64xf32>
    %372 = vector.shape_cast %371 : vector<2x8x64xf32> to vector<16x64xf32>
    %c1064 = arith.constant 1064 : index
    %c0_114 = arith.constant 0 : index
    %373 = vector.load %arg3[%c1064, %c0_114] : memref<3784x128xf32, #tpu.memory_space<vmem>>, vector<64x128xf32>
    %cst_115 = arith.constant dense<0.000000e+00> : vector<16x128xf32>
    %374 = tpu.matmul %372, %373, %cst_115 {dimension_numbers = #tpu.dot_dimension_numbers<[1], [0], [0], [1], [0, 0, 1, 1], [], []>} : vector<16x64xf32>, vector<64x128xf32>, vector<16x128xf32> -> vector<16x128xf32>
    %c1128 = arith.constant 1128 : index
    %c0_116 = arith.constant 0 : index
    %375 = vector.load %arg3[%c1128, %c0_116] : memref<3784x128xf32, #tpu.memory_space<vmem>>, vector<1x128xf32>
    %376 = vector.broadcast %375 : vector<1x128xf32> to vector<16x128xf32>
    %377 = arith.addf %374, %376 : vector<16x128xf32>
    %378 = vector.shape_cast %377 : vector<16x128xf32> to vector<2x8x128xf32>
    %cst_117 = arith.constant dense<0.000000e+00> : vector<2x8xf32>
    %379 = vector.multi_reduction <add>, %378, %cst_117 [2] : vector<2x8x128xf32> to vector<2x8xf32>
    %380 = vector.shape_cast %379 : vector<2x8xf32> to vector<2x8x1xf32>
    %cst_118 = arith.constant 1.280000e+02 : f32
    %381 = vector.broadcast %cst_118 : f32 to vector<2x8x1xf32>
    %382 = arith.divf %380, %381 : vector<2x8x1xf32>
    %383 = vector.broadcast %382 : vector<2x8x1xf32> to vector<2x8x128xf32>
    %384 = arith.subf %378, %383 : vector<2x8x128xf32>
    %385 = arith.mulf %384, %384 : vector<2x8x128xf32>
    %cst_119 = arith.constant dense<0.000000e+00> : vector<2x8xf32>
    %386 = vector.multi_reduction <add>, %385, %cst_119 [2] : vector<2x8x128xf32> to vector<2x8xf32>
    %387 = vector.shape_cast %386 : vector<2x8xf32> to vector<2x8x1xf32>
    %cst_120 = arith.constant 1.280000e+02 : f32
    %388 = vector.broadcast %cst_120 : f32 to vector<2x8x1xf32>
    %389 = arith.divf %387, %388 : vector<2x8x1xf32>
    %cst_121 = arith.constant 9.99999974E-6 : f32
    %390 = vector.broadcast %cst_121 : f32 to vector<2x8x1xf32>
    %391 = arith.addf %389, %390 : vector<2x8x1xf32>
    %392 = math.rsqrt %391 : vector<2x8x1xf32>
    %393 = vector.broadcast %392 : vector<2x8x1xf32> to vector<2x8x128xf32>
    %394 = arith.mulf %384, %393 : vector<2x8x128xf32>
    %c1136 = arith.constant 1136 : index
    %c0_122 = arith.constant 0 : index
    %395 = vector.load %arg3[%c1136, %c0_122] : memref<3784x128xf32, #tpu.memory_space<vmem>>, vector<1x128xf32>
    %396 = vector.shape_cast %395 : vector<1x128xf32> to vector<1x1x128xf32>
    %397 = vector.broadcast %396 : vector<1x1x128xf32> to vector<2x8x128xf32>
    %398 = arith.mulf %394, %397 : vector<2x8x128xf32>
    %c1144 = arith.constant 1144 : index
    %c0_123 = arith.constant 0 : index
    %399 = vector.load %arg3[%c1144, %c0_123] : memref<3784x128xf32, #tpu.memory_space<vmem>>, vector<1x128xf32>
    %400 = vector.shape_cast %399 : vector<1x128xf32> to vector<1x1x128xf32>
    %401 = vector.broadcast %400 : vector<1x1x128xf32> to vector<2x8x128xf32>
    %402 = arith.addf %398, %401 : vector<2x8x128xf32>
    %403 = vector.shape_cast %402 : vector<2x8x128xf32> to vector<16x128xf32>
    %c144 = arith.constant 144 : index
    %c0_124 = arith.constant 0 : index
    %404 = vector.load %arg4[%c144, %c0_124] : memref<832x512xf32, #tpu.memory_space<vmem>>, vector<128x384xf32>
    %cst_125 = arith.constant dense<0.000000e+00> : vector<16x384xf32>
    %405 = tpu.matmul %403, %404, %cst_125 {dimension_numbers = #tpu.dot_dimension_numbers<[1], [0], [0], [1], [0, 0, 1, 1], [], []>} : vector<16x128xf32>, vector<128x384xf32>, vector<16x384xf32> -> vector<16x384xf32>
    %c272_126 = arith.constant 272 : index
    %c0_127 = arith.constant 0 : index
    %406 = vector.load %arg4[%c272_126, %c0_127] : memref<832x512xf32, #tpu.memory_space<vmem>>, vector<1x384xf32>
    %407 = vector.broadcast %406 : vector<1x384xf32> to vector<16x384xf32>
    %408 = arith.addf %405, %407 : vector<16x384xf32>
    %409 = vector.extract_strided_slice %408 {offsets = [0, 0], sizes = [16, 32], strides = [1, 1]} : vector<16x384xf32> to vector<16x32xf32>
    %410 = vector.extract_strided_slice %408 {offsets = [0, 32], sizes = [16, 32], strides = [1, 1]} : vector<16x384xf32> to vector<16x32xf32>
    %411 = vector.extract_strided_slice %408 {offsets = [0, 64], sizes = [16, 32], strides = [1, 1]} : vector<16x384xf32> to vector<16x32xf32>
    %412 = vector.extract_strided_slice %408 {offsets = [0, 96], sizes = [16, 32], strides = [1, 1]} : vector<16x384xf32> to vector<16x32xf32>
    %413 = vector.shape_cast %409 : vector<16x32xf32> to vector<1x16x32xf32>
    %414 = vector.shape_cast %410 : vector<16x32xf32> to vector<1x16x32xf32>
    %415 = vector.shape_cast %411 : vector<16x32xf32> to vector<1x16x32xf32>
    %416 = vector.shape_cast %412 : vector<16x32xf32> to vector<1x16x32xf32>
    %417 = tpu.concatenate %413, %414, %415, %416 in 0 : vector<1x16x32xf32>, vector<1x16x32xf32>, vector<1x16x32xf32>, vector<1x16x32xf32> -> vector<4x16x32xf32>
    %418 = vector.shape_cast %417 : vector<4x16x32xf32> to vector<8x8x32xf32>
    %419 = vector.extract_strided_slice %408 {offsets = [0, 128], sizes = [16, 32], strides = [1, 1]} : vector<16x384xf32> to vector<16x32xf32>
    %420 = vector.extract_strided_slice %408 {offsets = [0, 160], sizes = [16, 32], strides = [1, 1]} : vector<16x384xf32> to vector<16x32xf32>
    %421 = vector.extract_strided_slice %408 {offsets = [0, 192], sizes = [16, 32], strides = [1, 1]} : vector<16x384xf32> to vector<16x32xf32>
    %422 = vector.extract_strided_slice %408 {offsets = [0, 224], sizes = [16, 32], strides = [1, 1]} : vector<16x384xf32> to vector<16x32xf32>
    %423 = vector.shape_cast %419 : vector<16x32xf32> to vector<1x16x32xf32>
    %424 = vector.shape_cast %420 : vector<16x32xf32> to vector<1x16x32xf32>
    %425 = vector.shape_cast %421 : vector<16x32xf32> to vector<1x16x32xf32>
    %426 = vector.shape_cast %422 : vector<16x32xf32> to vector<1x16x32xf32>
    %427 = tpu.concatenate %423, %424, %425, %426 in 0 : vector<1x16x32xf32>, vector<1x16x32xf32>, vector<1x16x32xf32>, vector<1x16x32xf32> -> vector<4x16x32xf32>
    %428 = vector.shape_cast %427 : vector<4x16x32xf32> to vector<8x8x32xf32>
    %429 = vector.extract_strided_slice %408 {offsets = [0, 256], sizes = [16, 32], strides = [1, 1]} : vector<16x384xf32> to vector<16x32xf32>
    %430 = vector.extract_strided_slice %408 {offsets = [0, 288], sizes = [16, 32], strides = [1, 1]} : vector<16x384xf32> to vector<16x32xf32>
    %431 = vector.extract_strided_slice %408 {offsets = [0, 320], sizes = [16, 32], strides = [1, 1]} : vector<16x384xf32> to vector<16x32xf32>
    %432 = vector.extract_strided_slice %408 {offsets = [0, 352], sizes = [16, 32], strides = [1, 1]} : vector<16x384xf32> to vector<16x32xf32>
    %433 = vector.shape_cast %429 : vector<16x32xf32> to vector<1x16x32xf32>
    %434 = vector.shape_cast %430 : vector<16x32xf32> to vector<1x16x32xf32>
    %435 = vector.shape_cast %431 : vector<16x32xf32> to vector<1x16x32xf32>
    %436 = vector.shape_cast %432 : vector<16x32xf32> to vector<1x16x32xf32>
    %437 = tpu.concatenate %433, %434, %435, %436 in 0 : vector<1x16x32xf32>, vector<1x16x32xf32>, vector<1x16x32xf32>, vector<1x16x32xf32> -> vector<4x16x32xf32>
    %438 = vector.shape_cast %437 : vector<4x16x32xf32> to vector<8x8x32xf32>
    "tpu.trace_start"() <{level = 10 : i32, message = "bqd,bkd->bqk"}> : () -> ()
    %cst_128 = arith.constant dense<0.000000e+00> : vector<8x8x8xf32>
    %439 = tpu.matmul %418, %428, %cst_128 {dimension_numbers = #tpu.dot_dimension_numbers<[2], [2], [1], [1], [0, 0, 0, 1, 1, 1], [0], [0]>} : vector<8x8x32xf32>, vector<8x8x32xf32>, vector<8x8x8xf32> -> vector<8x8x8xf32>
    "tpu.trace_stop"() : () -> ()
    %cst_129 = arith.constant 0.176776692 : f32
    %440 = vector.broadcast %cst_129 : f32 to vector<8x8x8xf32>
    %441 = arith.mulf %439, %440 : vector<8x8x8xf32>
    %cst_130 = arith.constant dense<0xFF800000> : vector<8x8xf32>
    %442 = vector.multi_reduction <maximumf>, %441, %cst_130 [2] : vector<8x8x8xf32> to vector<8x8xf32>
    %443 = vector.shape_cast %442 : vector<8x8xf32> to vector<8x8x1xf32>
    %444 = vector.broadcast %443 : vector<8x8x1xf32> to vector<8x8x8xf32>
    %445 = arith.subf %441, %444 : vector<8x8x8xf32>
    %446 = math.exp %445 : vector<8x8x8xf32>
    %cst_131 = arith.constant dense<0.000000e+00> : vector<8x8xf32>
    %447 = vector.multi_reduction <add>, %446, %cst_131 [2] : vector<8x8x8xf32> to vector<8x8xf32>
    %448 = vector.shape_cast %447 : vector<8x8xf32> to vector<8x8x1xf32>
    %449 = vector.broadcast %448 : vector<8x8x1xf32> to vector<8x8x8xf32>
    %450 = arith.divf %446, %449 : vector<8x8x8xf32>
    "tpu.trace_start"() <{level = 10 : i32, message = "bqk,bkd->bqd"}> : () -> ()
    %cst_132 = arith.constant dense<0.000000e+00> : vector<8x8x32xf32>
    %451 = tpu.matmul %450, %438, %cst_132 {dimension_numbers = #tpu.dot_dimension_numbers<[2], [1], [1], [2], [0, 0, 0, 1, 1, 2], [0], [0]>} : vector<8x8x8xf32>, vector<8x8x32xf32>, vector<8x8x32xf32> -> vector<8x8x32xf32>
    "tpu.trace_stop"() : () -> ()
    %452 = vector.shape_cast %451 : vector<8x8x32xf32> to vector<4x2x8x32xf32>
    %453 = vector.extract_strided_slice %452 {offsets = [0, 0, 0, 0], sizes = [1, 2, 8, 32], strides = [1, 1, 1, 1]} : vector<4x2x8x32xf32> to vector<1x2x8x32xf32>
    %454 = vector.shape_cast %453 : vector<1x2x8x32xf32> to vector<2x8x32xf32>
    %455 = vector.extract_strided_slice %452 {offsets = [1, 0, 0, 0], sizes = [1, 2, 8, 32], strides = [1, 1, 1, 1]} : vector<4x2x8x32xf32> to vector<1x2x8x32xf32>
    %456 = vector.shape_cast %455 : vector<1x2x8x32xf32> to vector<2x8x32xf32>
    %457 = vector.extract_strided_slice %452 {offsets = [2, 0, 0, 0], sizes = [1, 2, 8, 32], strides = [1, 1, 1, 1]} : vector<4x2x8x32xf32> to vector<1x2x8x32xf32>
    %458 = vector.shape_cast %457 : vector<1x2x8x32xf32> to vector<2x8x32xf32>
    %459 = vector.extract_strided_slice %452 {offsets = [3, 0, 0, 0], sizes = [1, 2, 8, 32], strides = [1, 1, 1, 1]} : vector<4x2x8x32xf32> to vector<1x2x8x32xf32>
    %460 = vector.shape_cast %459 : vector<1x2x8x32xf32> to vector<2x8x32xf32>
    %461 = tpu.concatenate %454, %456, %458, %460 in 2 : vector<2x8x32xf32>, vector<2x8x32xf32>, vector<2x8x32xf32>, vector<2x8x32xf32> -> vector<2x8x128xf32>
    %462 = vector.shape_cast %461 : vector<2x8x128xf32> to vector<16x128xf32>
    %c1168 = arith.constant 1168 : index
    %c0_133 = arith.constant 0 : index
    %463 = vector.load %arg3[%c1168, %c0_133] : memref<3784x128xf32, #tpu.memory_space<vmem>>, vector<128x128xf32>
    %cst_134 = arith.constant dense<0.000000e+00> : vector<16x128xf32>
    %464 = tpu.matmul %462, %463, %cst_134 {dimension_numbers = #tpu.dot_dimension_numbers<[1], [0], [0], [1], [0, 0, 1, 1], [], []>} : vector<16x128xf32>, vector<128x128xf32>, vector<16x128xf32> -> vector<16x128xf32>
    %c1296 = arith.constant 1296 : index
    %c0_135 = arith.constant 0 : index
    %465 = vector.load %arg3[%c1296, %c0_135] : memref<3784x128xf32, #tpu.memory_space<vmem>>, vector<1x128xf32>
    %466 = vector.broadcast %465 : vector<1x128xf32> to vector<16x128xf32>
    %467 = arith.addf %464, %466 : vector<16x128xf32>
    %468 = vector.shape_cast %467 : vector<16x128xf32> to vector<2x8x128xf32>
    %469 = arith.addf %378, %468 : vector<2x8x128xf32>
    %c1304 = arith.constant 1304 : index
    %c0_136 = arith.constant 0 : index
    %470 = vector.load %arg3[%c1304, %c0_136] : memref<3784x128xf32, #tpu.memory_space<vmem>>, vector<32x128xf32>
    %cst_137 = arith.constant dense<0.000000e+00> : vector<2x128xf32>
    %471 = tpu.matmul %42, %470, %cst_137 {dimension_numbers = #tpu.dot_dimension_numbers<[1], [0], [0], [1], [0, 0, 1, 1], [], []>} : vector<2x32xf32>, vector<32x128xf32>, vector<2x128xf32> -> vector<2x128xf32>
    %c1336 = arith.constant 1336 : index
    %c0_138 = arith.constant 0 : index
    %472 = vector.load %arg3[%c1336, %c0_138] : memref<3784x128xf32, #tpu.memory_space<vmem>>, vector<1x128xf32>
    %473 = vector.broadcast %472 : vector<1x128xf32> to vector<2x128xf32>
    %474 = arith.addf %471, %473 : vector<2x128xf32>
    %475 = vector.shape_cast %474 : vector<2x128xf32> to vector<2x1x128xf32>
    %476 = vector.broadcast %475 : vector<2x1x128xf32> to vector<2x8x128xf32>
    %477 = arith.addf %469, %476 : vector<2x8x128xf32>
    %cst_139 = arith.constant dense<0.000000e+00> : vector<2x8xf32>
    %478 = vector.multi_reduction <add>, %477, %cst_139 [2] : vector<2x8x128xf32> to vector<2x8xf32>
    %479 = vector.shape_cast %478 : vector<2x8xf32> to vector<2x8x1xf32>
    %cst_140 = arith.constant 1.280000e+02 : f32
    %480 = vector.broadcast %cst_140 : f32 to vector<2x8x1xf32>
    %481 = arith.divf %479, %480 : vector<2x8x1xf32>
    %482 = vector.broadcast %481 : vector<2x8x1xf32> to vector<2x8x128xf32>
    %483 = arith.subf %477, %482 : vector<2x8x128xf32>
    %484 = arith.mulf %483, %483 : vector<2x8x128xf32>
    %cst_141 = arith.constant dense<0.000000e+00> : vector<2x8xf32>
    %485 = vector.multi_reduction <add>, %484, %cst_141 [2] : vector<2x8x128xf32> to vector<2x8xf32>
    %486 = vector.shape_cast %485 : vector<2x8xf32> to vector<2x8x1xf32>
    %cst_142 = arith.constant 1.280000e+02 : f32
    %487 = vector.broadcast %cst_142 : f32 to vector<2x8x1xf32>
    %488 = arith.divf %486, %487 : vector<2x8x1xf32>
    %cst_143 = arith.constant 9.99999974E-6 : f32
    %489 = vector.broadcast %cst_143 : f32 to vector<2x8x1xf32>
    %490 = arith.addf %488, %489 : vector<2x8x1xf32>
    %491 = math.rsqrt %490 : vector<2x8x1xf32>
    %492 = vector.broadcast %491 : vector<2x8x1xf32> to vector<2x8x128xf32>
    %493 = arith.mulf %483, %492 : vector<2x8x128xf32>
    %c1152 = arith.constant 1152 : index
    %c0_144 = arith.constant 0 : index
    %494 = vector.load %arg3[%c1152, %c0_144] : memref<3784x128xf32, #tpu.memory_space<vmem>>, vector<1x128xf32>
    %495 = vector.shape_cast %494 : vector<1x128xf32> to vector<1x1x128xf32>
    %496 = vector.broadcast %495 : vector<1x1x128xf32> to vector<2x8x128xf32>
    %497 = arith.mulf %493, %496 : vector<2x8x128xf32>
    %c1160 = arith.constant 1160 : index
    %c0_145 = arith.constant 0 : index
    %498 = vector.load %arg3[%c1160, %c0_145] : memref<3784x128xf32, #tpu.memory_space<vmem>>, vector<1x128xf32>
    %499 = vector.shape_cast %498 : vector<1x128xf32> to vector<1x1x128xf32>
    %500 = vector.broadcast %499 : vector<1x1x128xf32> to vector<2x8x128xf32>
    %501 = arith.addf %497, %500 : vector<2x8x128xf32>
    %502 = vector.shape_cast %501 : vector<2x8x128xf32> to vector<16x128xf32>
    %c280_146 = arith.constant 280 : index
    %c0_147 = arith.constant 0 : index
    %503 = vector.load %arg4[%c280_146, %c0_147] : memref<832x512xf32, #tpu.memory_space<vmem>>, vector<128x512xf32>
    %cst_148 = arith.constant dense<0.000000e+00> : vector<16x512xf32>
    %504 = tpu.matmul %502, %503, %cst_148 {dimension_numbers = #tpu.dot_dimension_numbers<[1], [0], [0], [1], [0, 0, 1, 1], [], []>} : vector<16x128xf32>, vector<128x512xf32>, vector<16x512xf32> -> vector<16x512xf32>
    %c408_149 = arith.constant 408 : index
    %c0_150 = arith.constant 0 : index
    %505 = vector.load %arg4[%c408_149, %c0_150] : memref<832x512xf32, #tpu.memory_space<vmem>>, vector<1x512xf32>
    %506 = vector.broadcast %505 : vector<1x512xf32> to vector<16x512xf32>
    %507 = arith.addf %504, %506 : vector<16x512xf32>
    %508 = arith.mulf %507, %507 : vector<16x512xf32>
    %509 = arith.mulf %507, %508 : vector<16x512xf32>
    %cst_151 = arith.constant 4.471500e-02 : f32
    %510 = vector.broadcast %cst_151 : f32 to vector<16x512xf32>
    %511 = arith.mulf %510, %509 : vector<16x512xf32>
    %512 = arith.addf %507, %511 : vector<16x512xf32>
    %cst_152 = arith.constant 0.797884583 : f32
    %513 = vector.broadcast %cst_152 : f32 to vector<16x512xf32>
    %514 = arith.mulf %513, %512 : vector<16x512xf32>
    %515 = math.tanh %514 : vector<16x512xf32>
    %cst_153 = arith.constant 1.000000e+00 : f32
    %516 = vector.broadcast %cst_153 : f32 to vector<16x512xf32>
    %517 = arith.addf %516, %515 : vector<16x512xf32>
    %cst_154 = arith.constant 5.000000e-01 : f32
    %518 = vector.broadcast %cst_154 : f32 to vector<16x512xf32>
    %519 = arith.mulf %518, %517 : vector<16x512xf32>
    %520 = arith.mulf %507, %519 : vector<16x512xf32>
    %c1344 = arith.constant 1344 : index
    %c0_155 = arith.constant 0 : index
    %521 = vector.load %arg3[%c1344, %c0_155] : memref<3784x128xf32, #tpu.memory_space<vmem>>, vector<512x128xf32>
    %cst_156 = arith.constant dense<0.000000e+00> : vector<16x128xf32>
    %522 = tpu.matmul %520, %521, %cst_156 {dimension_numbers = #tpu.dot_dimension_numbers<[1], [0], [0], [1], [0, 0, 1, 1], [], []>} : vector<16x512xf32>, vector<512x128xf32>, vector<16x128xf32> -> vector<16x128xf32>
    %c1856 = arith.constant 1856 : index
    %c0_157 = arith.constant 0 : index
    %523 = vector.load %arg3[%c1856, %c0_157] : memref<3784x128xf32, #tpu.memory_space<vmem>>, vector<1x128xf32>
    %524 = vector.broadcast %523 : vector<1x128xf32> to vector<16x128xf32>
    %525 = arith.addf %522, %524 : vector<16x128xf32>
    %526 = vector.shape_cast %525 : vector<16x128xf32> to vector<2x8x128xf32>
    %527 = arith.addf %477, %526 : vector<2x8x128xf32>
    %cst_158 = arith.constant dense<0.000000e+00> : vector<2x8xf32>
    %528 = vector.multi_reduction <add>, %527, %cst_158 [2] : vector<2x8x128xf32> to vector<2x8xf32>
    %529 = vector.shape_cast %528 : vector<2x8xf32> to vector<2x8x1xf32>
    %cst_159 = arith.constant 1.280000e+02 : f32
    %530 = vector.broadcast %cst_159 : f32 to vector<2x8x1xf32>
    %531 = arith.divf %529, %530 : vector<2x8x1xf32>
    %532 = vector.broadcast %531 : vector<2x8x1xf32> to vector<2x8x128xf32>
    %533 = arith.subf %527, %532 : vector<2x8x128xf32>
    %534 = arith.mulf %533, %533 : vector<2x8x128xf32>
    %cst_160 = arith.constant dense<0.000000e+00> : vector<2x8xf32>
    %535 = vector.multi_reduction <add>, %534, %cst_160 [2] : vector<2x8x128xf32> to vector<2x8xf32>
    %536 = vector.shape_cast %535 : vector<2x8xf32> to vector<2x8x1xf32>
    %cst_161 = arith.constant 1.280000e+02 : f32
    %537 = vector.broadcast %cst_161 : f32 to vector<2x8x1xf32>
    %538 = arith.divf %536, %537 : vector<2x8x1xf32>
    %cst_162 = arith.constant 9.99999974E-6 : f32
    %539 = vector.broadcast %cst_162 : f32 to vector<2x8x1xf32>
    %540 = arith.addf %538, %539 : vector<2x8x1xf32>
    %541 = math.rsqrt %540 : vector<2x8x1xf32>
    %542 = vector.broadcast %541 : vector<2x8x1xf32> to vector<2x8x128xf32>
    %543 = arith.mulf %533, %542 : vector<2x8x128xf32>
    %c1864 = arith.constant 1864 : index
    %c0_163 = arith.constant 0 : index
    %544 = vector.load %arg3[%c1864, %c0_163] : memref<3784x128xf32, #tpu.memory_space<vmem>>, vector<1x128xf32>
    %545 = vector.shape_cast %544 : vector<1x128xf32> to vector<1x1x128xf32>
    %546 = vector.broadcast %545 : vector<1x1x128xf32> to vector<2x8x128xf32>
    %547 = arith.mulf %543, %546 : vector<2x8x128xf32>
    %c1872 = arith.constant 1872 : index
    %c0_164 = arith.constant 0 : index
    %548 = vector.load %arg3[%c1872, %c0_164] : memref<3784x128xf32, #tpu.memory_space<vmem>>, vector<1x128xf32>
    %549 = vector.shape_cast %548 : vector<1x128xf32> to vector<1x1x128xf32>
    %550 = vector.broadcast %549 : vector<1x1x128xf32> to vector<2x8x128xf32>
    %551 = arith.addf %547, %550 : vector<2x8x128xf32>
    %552 = vector.shape_cast %551 : vector<2x8x128xf32> to vector<16x128xf32>
    %c416 = arith.constant 416 : index
    %c0_165 = arith.constant 0 : index
    %553 = vector.load %arg4[%c416, %c0_165] : memref<832x512xf32, #tpu.memory_space<vmem>>, vector<128x384xf32>
    %cst_166 = arith.constant dense<0.000000e+00> : vector<16x384xf32>
    %554 = tpu.matmul %552, %553, %cst_166 {dimension_numbers = #tpu.dot_dimension_numbers<[1], [0], [0], [1], [0, 0, 1, 1], [], []>} : vector<16x128xf32>, vector<128x384xf32>, vector<16x384xf32> -> vector<16x384xf32>
    %c544 = arith.constant 544 : index
    %c0_167 = arith.constant 0 : index
    %555 = vector.load %arg4[%c544, %c0_167] : memref<832x512xf32, #tpu.memory_space<vmem>>, vector<1x384xf32>
    %556 = vector.broadcast %555 : vector<1x384xf32> to vector<16x384xf32>
    %557 = arith.addf %554, %556 : vector<16x384xf32>
    %558 = vector.extract_strided_slice %557 {offsets = [0, 0], sizes = [16, 32], strides = [1, 1]} : vector<16x384xf32> to vector<16x32xf32>
    %559 = vector.extract_strided_slice %557 {offsets = [0, 32], sizes = [16, 32], strides = [1, 1]} : vector<16x384xf32> to vector<16x32xf32>
    %560 = vector.extract_strided_slice %557 {offsets = [0, 64], sizes = [16, 32], strides = [1, 1]} : vector<16x384xf32> to vector<16x32xf32>
    %561 = vector.extract_strided_slice %557 {offsets = [0, 96], sizes = [16, 32], strides = [1, 1]} : vector<16x384xf32> to vector<16x32xf32>
    %562 = vector.shape_cast %558 : vector<16x32xf32> to vector<1x16x32xf32>
    %563 = vector.shape_cast %559 : vector<16x32xf32> to vector<1x16x32xf32>
    %564 = vector.shape_cast %560 : vector<16x32xf32> to vector<1x16x32xf32>
    %565 = vector.shape_cast %561 : vector<16x32xf32> to vector<1x16x32xf32>
    %566 = tpu.concatenate %562, %563, %564, %565 in 0 : vector<1x16x32xf32>, vector<1x16x32xf32>, vector<1x16x32xf32>, vector<1x16x32xf32> -> vector<4x16x32xf32>
    %567 = vector.shape_cast %566 : vector<4x16x32xf32> to vector<8x8x32xf32>
    %568 = vector.extract_strided_slice %557 {offsets = [0, 128], sizes = [16, 32], strides = [1, 1]} : vector<16x384xf32> to vector<16x32xf32>
    %569 = vector.extract_strided_slice %557 {offsets = [0, 160], sizes = [16, 32], strides = [1, 1]} : vector<16x384xf32> to vector<16x32xf32>
    %570 = vector.extract_strided_slice %557 {offsets = [0, 192], sizes = [16, 32], strides = [1, 1]} : vector<16x384xf32> to vector<16x32xf32>
    %571 = vector.extract_strided_slice %557 {offsets = [0, 224], sizes = [16, 32], strides = [1, 1]} : vector<16x384xf32> to vector<16x32xf32>
    %572 = vector.shape_cast %568 : vector<16x32xf32> to vector<1x16x32xf32>
    %573 = vector.shape_cast %569 : vector<16x32xf32> to vector<1x16x32xf32>
    %574 = vector.shape_cast %570 : vector<16x32xf32> to vector<1x16x32xf32>
    %575 = vector.shape_cast %571 : vector<16x32xf32> to vector<1x16x32xf32>
    %576 = tpu.concatenate %572, %573, %574, %575 in 0 : vector<1x16x32xf32>, vector<1x16x32xf32>, vector<1x16x32xf32>, vector<1x16x32xf32> -> vector<4x16x32xf32>
    %577 = vector.shape_cast %576 : vector<4x16x32xf32> to vector<8x8x32xf32>
    %578 = vector.extract_strided_slice %557 {offsets = [0, 256], sizes = [16, 32], strides = [1, 1]} : vector<16x384xf32> to vector<16x32xf32>
    %579 = vector.extract_strided_slice %557 {offsets = [0, 288], sizes = [16, 32], strides = [1, 1]} : vector<16x384xf32> to vector<16x32xf32>
    %580 = vector.extract_strided_slice %557 {offsets = [0, 320], sizes = [16, 32], strides = [1, 1]} : vector<16x384xf32> to vector<16x32xf32>
    %581 = vector.extract_strided_slice %557 {offsets = [0, 352], sizes = [16, 32], strides = [1, 1]} : vector<16x384xf32> to vector<16x32xf32>
    %582 = vector.shape_cast %578 : vector<16x32xf32> to vector<1x16x32xf32>
    %583 = vector.shape_cast %579 : vector<16x32xf32> to vector<1x16x32xf32>
    %584 = vector.shape_cast %580 : vector<16x32xf32> to vector<1x16x32xf32>
    %585 = vector.shape_cast %581 : vector<16x32xf32> to vector<1x16x32xf32>
    %586 = tpu.concatenate %582, %583, %584, %585 in 0 : vector<1x16x32xf32>, vector<1x16x32xf32>, vector<1x16x32xf32>, vector<1x16x32xf32> -> vector<4x16x32xf32>
    %587 = vector.shape_cast %586 : vector<4x16x32xf32> to vector<8x8x32xf32>
    "tpu.trace_start"() <{level = 10 : i32, message = "bqd,bkd->bqk"}> : () -> ()
    %cst_168 = arith.constant dense<0.000000e+00> : vector<8x8x8xf32>
    %588 = tpu.matmul %567, %577, %cst_168 {dimension_numbers = #tpu.dot_dimension_numbers<[2], [2], [1], [1], [0, 0, 0, 1, 1, 1], [0], [0]>} : vector<8x8x32xf32>, vector<8x8x32xf32>, vector<8x8x8xf32> -> vector<8x8x8xf32>
    "tpu.trace_stop"() : () -> ()
    %cst_169 = arith.constant 0.176776692 : f32
    %589 = vector.broadcast %cst_169 : f32 to vector<8x8x8xf32>
    %590 = arith.mulf %588, %589 : vector<8x8x8xf32>
    %cst_170 = arith.constant dense<0xFF800000> : vector<8x8xf32>
    %591 = vector.multi_reduction <maximumf>, %590, %cst_170 [2] : vector<8x8x8xf32> to vector<8x8xf32>
    %592 = vector.shape_cast %591 : vector<8x8xf32> to vector<8x8x1xf32>
    %593 = vector.broadcast %592 : vector<8x8x1xf32> to vector<8x8x8xf32>
    %594 = arith.subf %590, %593 : vector<8x8x8xf32>
    %595 = math.exp %594 : vector<8x8x8xf32>
    %cst_171 = arith.constant dense<0.000000e+00> : vector<8x8xf32>
    %596 = vector.multi_reduction <add>, %595, %cst_171 [2] : vector<8x8x8xf32> to vector<8x8xf32>
    %597 = vector.shape_cast %596 : vector<8x8xf32> to vector<8x8x1xf32>
    %598 = vector.broadcast %597 : vector<8x8x1xf32> to vector<8x8x8xf32>
    %599 = arith.divf %595, %598 : vector<8x8x8xf32>
    "tpu.trace_start"() <{level = 10 : i32, message = "bqk,bkd->bqd"}> : () -> ()
    %cst_172 = arith.constant dense<0.000000e+00> : vector<8x8x32xf32>
    %600 = tpu.matmul %599, %587, %cst_172 {dimension_numbers = #tpu.dot_dimension_numbers<[2], [1], [1], [2], [0, 0, 0, 1, 1, 2], [0], [0]>} : vector<8x8x8xf32>, vector<8x8x32xf32>, vector<8x8x32xf32> -> vector<8x8x32xf32>
    "tpu.trace_stop"() : () -> ()
    %601 = vector.shape_cast %600 : vector<8x8x32xf32> to vector<4x2x8x32xf32>
    %602 = vector.extract_strided_slice %601 {offsets = [0, 0, 0, 0], sizes = [1, 2, 8, 32], strides = [1, 1, 1, 1]} : vector<4x2x8x32xf32> to vector<1x2x8x32xf32>
    %603 = vector.shape_cast %602 : vector<1x2x8x32xf32> to vector<2x8x32xf32>
    %604 = vector.extract_strided_slice %601 {offsets = [1, 0, 0, 0], sizes = [1, 2, 8, 32], strides = [1, 1, 1, 1]} : vector<4x2x8x32xf32> to vector<1x2x8x32xf32>
    %605 = vector.shape_cast %604 : vector<1x2x8x32xf32> to vector<2x8x32xf32>
    %606 = vector.extract_strided_slice %601 {offsets = [2, 0, 0, 0], sizes = [1, 2, 8, 32], strides = [1, 1, 1, 1]} : vector<4x2x8x32xf32> to vector<1x2x8x32xf32>
    %607 = vector.shape_cast %606 : vector<1x2x8x32xf32> to vector<2x8x32xf32>
    %608 = vector.extract_strided_slice %601 {offsets = [3, 0, 0, 0], sizes = [1, 2, 8, 32], strides = [1, 1, 1, 1]} : vector<4x2x8x32xf32> to vector<1x2x8x32xf32>
    %609 = vector.shape_cast %608 : vector<1x2x8x32xf32> to vector<2x8x32xf32>
    %610 = tpu.concatenate %603, %605, %607, %609 in 2 : vector<2x8x32xf32>, vector<2x8x32xf32>, vector<2x8x32xf32>, vector<2x8x32xf32> -> vector<2x8x128xf32>
    %611 = vector.shape_cast %610 : vector<2x8x128xf32> to vector<16x128xf32>
    %c1896 = arith.constant 1896 : index
    %c0_173 = arith.constant 0 : index
    %612 = vector.load %arg3[%c1896, %c0_173] : memref<3784x128xf32, #tpu.memory_space<vmem>>, vector<128x128xf32>
    %cst_174 = arith.constant dense<0.000000e+00> : vector<16x128xf32>
    %613 = tpu.matmul %611, %612, %cst_174 {dimension_numbers = #tpu.dot_dimension_numbers<[1], [0], [0], [1], [0, 0, 1, 1], [], []>} : vector<16x128xf32>, vector<128x128xf32>, vector<16x128xf32> -> vector<16x128xf32>
    %c2024 = arith.constant 2024 : index
    %c0_175 = arith.constant 0 : index
    %614 = vector.load %arg3[%c2024, %c0_175] : memref<3784x128xf32, #tpu.memory_space<vmem>>, vector<1x128xf32>
    %615 = vector.broadcast %614 : vector<1x128xf32> to vector<16x128xf32>
    %616 = arith.addf %613, %615 : vector<16x128xf32>
    %617 = vector.shape_cast %616 : vector<16x128xf32> to vector<2x8x128xf32>
    %618 = arith.addf %527, %617 : vector<2x8x128xf32>
    %c2032 = arith.constant 2032 : index
    %c0_176 = arith.constant 0 : index
    %619 = vector.load %arg3[%c2032, %c0_176] : memref<3784x128xf32, #tpu.memory_space<vmem>>, vector<32x128xf32>
    %cst_177 = arith.constant dense<0.000000e+00> : vector<2x128xf32>
    %620 = tpu.matmul %42, %619, %cst_177 {dimension_numbers = #tpu.dot_dimension_numbers<[1], [0], [0], [1], [0, 0, 1, 1], [], []>} : vector<2x32xf32>, vector<32x128xf32>, vector<2x128xf32> -> vector<2x128xf32>
    %c2064 = arith.constant 2064 : index
    %c0_178 = arith.constant 0 : index
    %621 = vector.load %arg3[%c2064, %c0_178] : memref<3784x128xf32, #tpu.memory_space<vmem>>, vector<1x128xf32>
    %622 = vector.broadcast %621 : vector<1x128xf32> to vector<2x128xf32>
    %623 = arith.addf %620, %622 : vector<2x128xf32>
    %624 = vector.shape_cast %623 : vector<2x128xf32> to vector<2x1x128xf32>
    %625 = vector.broadcast %624 : vector<2x1x128xf32> to vector<2x8x128xf32>
    %626 = arith.addf %618, %625 : vector<2x8x128xf32>
    %cst_179 = arith.constant dense<0.000000e+00> : vector<2x8xf32>
    %627 = vector.multi_reduction <add>, %626, %cst_179 [2] : vector<2x8x128xf32> to vector<2x8xf32>
    %628 = vector.shape_cast %627 : vector<2x8xf32> to vector<2x8x1xf32>
    %cst_180 = arith.constant 1.280000e+02 : f32
    %629 = vector.broadcast %cst_180 : f32 to vector<2x8x1xf32>
    %630 = arith.divf %628, %629 : vector<2x8x1xf32>
    %631 = vector.broadcast %630 : vector<2x8x1xf32> to vector<2x8x128xf32>
    %632 = arith.subf %626, %631 : vector<2x8x128xf32>
    %633 = arith.mulf %632, %632 : vector<2x8x128xf32>
    %cst_181 = arith.constant dense<0.000000e+00> : vector<2x8xf32>
    %634 = vector.multi_reduction <add>, %633, %cst_181 [2] : vector<2x8x128xf32> to vector<2x8xf32>
    %635 = vector.shape_cast %634 : vector<2x8xf32> to vector<2x8x1xf32>
    %cst_182 = arith.constant 1.280000e+02 : f32
    %636 = vector.broadcast %cst_182 : f32 to vector<2x8x1xf32>
    %637 = arith.divf %635, %636 : vector<2x8x1xf32>
    %cst_183 = arith.constant 9.99999974E-6 : f32
    %638 = vector.broadcast %cst_183 : f32 to vector<2x8x1xf32>
    %639 = arith.addf %637, %638 : vector<2x8x1xf32>
    %640 = math.rsqrt %639 : vector<2x8x1xf32>
    %641 = vector.broadcast %640 : vector<2x8x1xf32> to vector<2x8x128xf32>
    %642 = arith.mulf %632, %641 : vector<2x8x128xf32>
    %c1880 = arith.constant 1880 : index
    %c0_184 = arith.constant 0 : index
    %643 = vector.load %arg3[%c1880, %c0_184] : memref<3784x128xf32, #tpu.memory_space<vmem>>, vector<1x128xf32>
    %644 = vector.shape_cast %643 : vector<1x128xf32> to vector<1x1x128xf32>
    %645 = vector.broadcast %644 : vector<1x1x128xf32> to vector<2x8x128xf32>
    %646 = arith.mulf %642, %645 : vector<2x8x128xf32>
    %c1888 = arith.constant 1888 : index
    %c0_185 = arith.constant 0 : index
    %647 = vector.load %arg3[%c1888, %c0_185] : memref<3784x128xf32, #tpu.memory_space<vmem>>, vector<1x128xf32>
    %648 = vector.shape_cast %647 : vector<1x128xf32> to vector<1x1x128xf32>
    %649 = vector.broadcast %648 : vector<1x1x128xf32> to vector<2x8x128xf32>
    %650 = arith.addf %646, %649 : vector<2x8x128xf32>
    %651 = vector.shape_cast %650 : vector<2x8x128xf32> to vector<16x128xf32>
    %c552 = arith.constant 552 : index
    %c0_186 = arith.constant 0 : index
    %652 = vector.load %arg4[%c552, %c0_186] : memref<832x512xf32, #tpu.memory_space<vmem>>, vector<128x512xf32>
    %cst_187 = arith.constant dense<0.000000e+00> : vector<16x512xf32>
    %653 = tpu.matmul %651, %652, %cst_187 {dimension_numbers = #tpu.dot_dimension_numbers<[1], [0], [0], [1], [0, 0, 1, 1], [], []>} : vector<16x128xf32>, vector<128x512xf32>, vector<16x512xf32> -> vector<16x512xf32>
    %c680 = arith.constant 680 : index
    %c0_188 = arith.constant 0 : index
    %654 = vector.load %arg4[%c680, %c0_188] : memref<832x512xf32, #tpu.memory_space<vmem>>, vector<1x512xf32>
    %655 = vector.broadcast %654 : vector<1x512xf32> to vector<16x512xf32>
    %656 = arith.addf %653, %655 : vector<16x512xf32>
    %657 = arith.mulf %656, %656 : vector<16x512xf32>
    %658 = arith.mulf %656, %657 : vector<16x512xf32>
    %cst_189 = arith.constant 4.471500e-02 : f32
    %659 = vector.broadcast %cst_189 : f32 to vector<16x512xf32>
    %660 = arith.mulf %659, %658 : vector<16x512xf32>
    %661 = arith.addf %656, %660 : vector<16x512xf32>
    %cst_190 = arith.constant 0.797884583 : f32
    %662 = vector.broadcast %cst_190 : f32 to vector<16x512xf32>
    %663 = arith.mulf %662, %661 : vector<16x512xf32>
    %664 = math.tanh %663 : vector<16x512xf32>
    %cst_191 = arith.constant 1.000000e+00 : f32
    %665 = vector.broadcast %cst_191 : f32 to vector<16x512xf32>
    %666 = arith.addf %665, %664 : vector<16x512xf32>
    %cst_192 = arith.constant 5.000000e-01 : f32
    %667 = vector.broadcast %cst_192 : f32 to vector<16x512xf32>
    %668 = arith.mulf %667, %666 : vector<16x512xf32>
    %669 = arith.mulf %656, %668 : vector<16x512xf32>
    %c2072 = arith.constant 2072 : index
    %c0_193 = arith.constant 0 : index
    %670 = vector.load %arg3[%c2072, %c0_193] : memref<3784x128xf32, #tpu.memory_space<vmem>>, vector<512x128xf32>
    %cst_194 = arith.constant dense<0.000000e+00> : vector<16x128xf32>
    %671 = tpu.matmul %669, %670, %cst_194 {dimension_numbers = #tpu.dot_dimension_numbers<[1], [0], [0], [1], [0, 0, 1, 1], [], []>} : vector<16x512xf32>, vector<512x128xf32>, vector<16x128xf32> -> vector<16x128xf32>
    %c2584 = arith.constant 2584 : index
    %c0_195 = arith.constant 0 : index
    %672 = vector.load %arg3[%c2584, %c0_195] : memref<3784x128xf32, #tpu.memory_space<vmem>>, vector<1x128xf32>
    %673 = vector.broadcast %672 : vector<1x128xf32> to vector<16x128xf32>
    %674 = arith.addf %671, %673 : vector<16x128xf32>
    %675 = vector.shape_cast %674 : vector<16x128xf32> to vector<2x8x128xf32>
    %676 = arith.addf %626, %675 : vector<2x8x128xf32>
    %cst_196 = arith.constant dense<0.000000e+00> : vector<2x8xf32>
    %677 = vector.multi_reduction <add>, %676, %cst_196 [2] : vector<2x8x128xf32> to vector<2x8xf32>
    %678 = vector.shape_cast %677 : vector<2x8xf32> to vector<2x8x1xf32>
    %cst_197 = arith.constant 1.280000e+02 : f32
    %679 = vector.broadcast %cst_197 : f32 to vector<2x8x1xf32>
    %680 = arith.divf %678, %679 : vector<2x8x1xf32>
    %681 = vector.broadcast %680 : vector<2x8x1xf32> to vector<2x8x128xf32>
    %682 = arith.subf %676, %681 : vector<2x8x128xf32>
    %683 = arith.mulf %682, %682 : vector<2x8x128xf32>
    %cst_198 = arith.constant dense<0.000000e+00> : vector<2x8xf32>
    %684 = vector.multi_reduction <add>, %683, %cst_198 [2] : vector<2x8x128xf32> to vector<2x8xf32>
    %685 = vector.shape_cast %684 : vector<2x8xf32> to vector<2x8x1xf32>
    %cst_199 = arith.constant 1.280000e+02 : f32
    %686 = vector.broadcast %cst_199 : f32 to vector<2x8x1xf32>
    %687 = arith.divf %685, %686 : vector<2x8x1xf32>
    %cst_200 = arith.constant 9.99999974E-6 : f32
    %688 = vector.broadcast %cst_200 : f32 to vector<2x8x1xf32>
    %689 = arith.addf %687, %688 : vector<2x8x1xf32>
    %690 = math.rsqrt %689 : vector<2x8x1xf32>
    %691 = vector.broadcast %690 : vector<2x8x1xf32> to vector<2x8x128xf32>
    %692 = arith.mulf %682, %691 : vector<2x8x128xf32>
    %c2592 = arith.constant 2592 : index
    %c0_201 = arith.constant 0 : index
    %693 = vector.load %arg3[%c2592, %c0_201] : memref<3784x128xf32, #tpu.memory_space<vmem>>, vector<1x128xf32>
    %694 = vector.shape_cast %693 : vector<1x128xf32> to vector<1x1x128xf32>
    %695 = vector.broadcast %694 : vector<1x1x128xf32> to vector<2x8x128xf32>
    %696 = arith.mulf %692, %695 : vector<2x8x128xf32>
    %c2600 = arith.constant 2600 : index
    %c0_202 = arith.constant 0 : index
    %697 = vector.load %arg3[%c2600, %c0_202] : memref<3784x128xf32, #tpu.memory_space<vmem>>, vector<1x128xf32>
    %698 = vector.shape_cast %697 : vector<1x128xf32> to vector<1x1x128xf32>
    %699 = vector.broadcast %698 : vector<1x1x128xf32> to vector<2x8x128xf32>
    %700 = arith.addf %696, %699 : vector<2x8x128xf32>
    %701 = vector.shape_cast %700 : vector<2x8x128xf32> to vector<16x128xf32>
    %c2608 = arith.constant 2608 : index
    %c0_203 = arith.constant 0 : index
    %702 = vector.load %arg3[%c2608, %c0_203] : memref<3784x128xf32, #tpu.memory_space<vmem>>, vector<128x64xf32>
    %cst_204 = arith.constant dense<0.000000e+00> : vector<16x64xf32>
    %703 = tpu.matmul %701, %702, %cst_204 {dimension_numbers = #tpu.dot_dimension_numbers<[1], [0], [0], [1], [0, 0, 1, 1], [], []>} : vector<16x128xf32>, vector<128x64xf32>, vector<16x64xf32> -> vector<16x64xf32>
    %c2736 = arith.constant 2736 : index
    %c0_205 = arith.constant 0 : index
    %704 = vector.load %arg3[%c2736, %c0_205] : memref<3784x128xf32, #tpu.memory_space<vmem>>, vector<1x64xf32>
    %705 = vector.broadcast %704 : vector<1x64xf32> to vector<16x64xf32>
    %706 = arith.addf %703, %705 : vector<16x64xf32>
    %707 = vector.shape_cast %706 : vector<16x64xf32> to vector<2x8x64xf32>
    %708 = arith.addf %707, %347 : vector<2x8x64xf32>
    %cst_206 = arith.constant dense<0.000000e+00> : vector<2x8xf32>
    %709 = vector.multi_reduction <add>, %708, %cst_206 [2] : vector<2x8x64xf32> to vector<2x8xf32>
    %710 = vector.shape_cast %709 : vector<2x8xf32> to vector<2x8x1xf32>
    %cst_207 = arith.constant 6.400000e+01 : f32
    %711 = vector.broadcast %cst_207 : f32 to vector<2x8x1xf32>
    %712 = arith.divf %710, %711 : vector<2x8x1xf32>
    %713 = vector.broadcast %712 : vector<2x8x1xf32> to vector<2x8x64xf32>
    %714 = arith.subf %708, %713 : vector<2x8x64xf32>
    %715 = arith.mulf %714, %714 : vector<2x8x64xf32>
    %cst_208 = arith.constant dense<0.000000e+00> : vector<2x8xf32>
    %716 = vector.multi_reduction <add>, %715, %cst_208 [2] : vector<2x8x64xf32> to vector<2x8xf32>
    %717 = vector.shape_cast %716 : vector<2x8xf32> to vector<2x8x1xf32>
    %cst_209 = arith.constant 6.400000e+01 : f32
    %718 = vector.broadcast %cst_209 : f32 to vector<2x8x1xf32>
    %719 = arith.divf %717, %718 : vector<2x8x1xf32>
    %cst_210 = arith.constant 9.99999974E-6 : f32
    %720 = vector.broadcast %cst_210 : f32 to vector<2x8x1xf32>
    %721 = arith.addf %719, %720 : vector<2x8x1xf32>
    %722 = math.rsqrt %721 : vector<2x8x1xf32>
    %723 = vector.broadcast %722 : vector<2x8x1xf32> to vector<2x8x64xf32>
    %724 = arith.mulf %714, %723 : vector<2x8x64xf32>
    %c2744 = arith.constant 2744 : index
    %c0_211 = arith.constant 0 : index
    %725 = vector.load %arg3[%c2744, %c0_211] : memref<3784x128xf32, #tpu.memory_space<vmem>>, vector<1x64xf32>
    %726 = vector.shape_cast %725 : vector<1x64xf32> to vector<1x1x64xf32>
    %727 = vector.broadcast %726 : vector<1x1x64xf32> to vector<2x8x64xf32>
    %728 = arith.mulf %724, %727 : vector<2x8x64xf32>
    %c2752 = arith.constant 2752 : index
    %c0_212 = arith.constant 0 : index
    %729 = vector.load %arg3[%c2752, %c0_212] : memref<3784x128xf32, #tpu.memory_space<vmem>>, vector<1x64xf32>
    %730 = vector.shape_cast %729 : vector<1x64xf32> to vector<1x1x64xf32>
    %731 = vector.broadcast %730 : vector<1x1x64xf32> to vector<2x8x64xf32>
    %732 = arith.addf %728, %731 : vector<2x8x64xf32>
    %733 = vector.shape_cast %732 : vector<2x8x64xf32> to vector<16x64xf32>
    %c688 = arith.constant 688 : index
    %c0_213 = arith.constant 0 : index
    %734 = vector.load %arg4[%c688, %c0_213] : memref<832x512xf32, #tpu.memory_space<vmem>>, vector<64x192xf32>
    %cst_214 = arith.constant dense<0.000000e+00> : vector<16x192xf32>
    %735 = tpu.matmul %733, %734, %cst_214 {dimension_numbers = #tpu.dot_dimension_numbers<[1], [0], [0], [1], [0, 0, 1, 1], [], []>} : vector<16x64xf32>, vector<64x192xf32>, vector<16x192xf32> -> vector<16x192xf32>
    %c752 = arith.constant 752 : index
    %c0_215 = arith.constant 0 : index
    %736 = vector.load %arg4[%c752, %c0_215] : memref<832x512xf32, #tpu.memory_space<vmem>>, vector<1x192xf32>
    %737 = vector.broadcast %736 : vector<1x192xf32> to vector<16x192xf32>
    %738 = arith.addf %735, %737 : vector<16x192xf32>
    %739 = vector.extract_strided_slice %738 {offsets = [0, 0], sizes = [16, 32], strides = [1, 1]} : vector<16x192xf32> to vector<16x32xf32>
    %740 = vector.extract_strided_slice %738 {offsets = [0, 32], sizes = [16, 32], strides = [1, 1]} : vector<16x192xf32> to vector<16x32xf32>
    %741 = vector.shape_cast %739 : vector<16x32xf32> to vector<1x16x32xf32>
    %742 = vector.shape_cast %740 : vector<16x32xf32> to vector<1x16x32xf32>
    %743 = tpu.concatenate %741, %742 in 0 : vector<1x16x32xf32>, vector<1x16x32xf32> -> vector<2x16x32xf32>
    %744 = vector.shape_cast %743 : vector<2x16x32xf32> to vector<4x8x32xf32>
    %745 = vector.extract_strided_slice %738 {offsets = [0, 64], sizes = [16, 32], strides = [1, 1]} : vector<16x192xf32> to vector<16x32xf32>
    %746 = vector.extract_strided_slice %738 {offsets = [0, 96], sizes = [16, 32], strides = [1, 1]} : vector<16x192xf32> to vector<16x32xf32>
    %747 = vector.shape_cast %745 : vector<16x32xf32> to vector<1x16x32xf32>
    %748 = vector.shape_cast %746 : vector<16x32xf32> to vector<1x16x32xf32>
    %749 = tpu.concatenate %747, %748 in 0 : vector<1x16x32xf32>, vector<1x16x32xf32> -> vector<2x16x32xf32>
    %750 = vector.shape_cast %749 : vector<2x16x32xf32> to vector<4x8x32xf32>
    %751 = vector.extract_strided_slice %738 {offsets = [0, 128], sizes = [16, 32], strides = [1, 1]} : vector<16x192xf32> to vector<16x32xf32>
    %752 = vector.extract_strided_slice %738 {offsets = [0, 160], sizes = [16, 32], strides = [1, 1]} : vector<16x192xf32> to vector<16x32xf32>
    %753 = vector.shape_cast %751 : vector<16x32xf32> to vector<1x16x32xf32>
    %754 = vector.shape_cast %752 : vector<16x32xf32> to vector<1x16x32xf32>
    %755 = tpu.concatenate %753, %754 in 0 : vector<1x16x32xf32>, vector<1x16x32xf32> -> vector<2x16x32xf32>
    %756 = vector.shape_cast %755 : vector<2x16x32xf32> to vector<4x8x32xf32>
    "tpu.trace_start"() <{level = 10 : i32, message = "bqd,bkd->bqk"}> : () -> ()
    %cst_216 = arith.constant dense<0.000000e+00> : vector<4x8x8xf32>
    %757 = tpu.matmul %744, %750, %cst_216 {dimension_numbers = #tpu.dot_dimension_numbers<[2], [2], [1], [1], [0, 0, 0, 1, 1, 1], [0], [0]>} : vector<4x8x32xf32>, vector<4x8x32xf32>, vector<4x8x8xf32> -> vector<4x8x8xf32>
    "tpu.trace_stop"() : () -> ()
    %cst_217 = arith.constant 0.176776692 : f32
    %758 = vector.broadcast %cst_217 : f32 to vector<4x8x8xf32>
    %759 = arith.mulf %757, %758 : vector<4x8x8xf32>
    %cst_218 = arith.constant dense<0xFF800000> : vector<4x8xf32>
    %760 = vector.multi_reduction <maximumf>, %759, %cst_218 [2] : vector<4x8x8xf32> to vector<4x8xf32>
    %761 = vector.shape_cast %760 : vector<4x8xf32> to vector<4x8x1xf32>
    %762 = vector.broadcast %761 : vector<4x8x1xf32> to vector<4x8x8xf32>
    %763 = arith.subf %759, %762 : vector<4x8x8xf32>
    %764 = math.exp %763 : vector<4x8x8xf32>
    %cst_219 = arith.constant dense<0.000000e+00> : vector<4x8xf32>
    %765 = vector.multi_reduction <add>, %764, %cst_219 [2] : vector<4x8x8xf32> to vector<4x8xf32>
    %766 = vector.shape_cast %765 : vector<4x8xf32> to vector<4x8x1xf32>
    %767 = vector.broadcast %766 : vector<4x8x1xf32> to vector<4x8x8xf32>
    %768 = arith.divf %764, %767 : vector<4x8x8xf32>
    "tpu.trace_start"() <{level = 10 : i32, message = "bqk,bkd->bqd"}> : () -> ()
    %cst_220 = arith.constant dense<0.000000e+00> : vector<4x8x32xf32>
    %769 = tpu.matmul %768, %756, %cst_220 {dimension_numbers = #tpu.dot_dimension_numbers<[2], [1], [1], [2], [0, 0, 0, 1, 1, 2], [0], [0]>} : vector<4x8x8xf32>, vector<4x8x32xf32>, vector<4x8x32xf32> -> vector<4x8x32xf32>
    "tpu.trace_stop"() : () -> ()
    %770 = vector.shape_cast %769 : vector<4x8x32xf32> to vector<2x2x8x32xf32>
    %771 = vector.extract_strided_slice %770 {offsets = [0, 0, 0, 0], sizes = [1, 2, 8, 32], strides = [1, 1, 1, 1]} : vector<2x2x8x32xf32> to vector<1x2x8x32xf32>
    %772 = vector.shape_cast %771 : vector<1x2x8x32xf32> to vector<2x8x32xf32>
    %773 = vector.extract_strided_slice %770 {offsets = [1, 0, 0, 0], sizes = [1, 2, 8, 32], strides = [1, 1, 1, 1]} : vector<2x2x8x32xf32> to vector<1x2x8x32xf32>
    %774 = vector.shape_cast %773 : vector<1x2x8x32xf32> to vector<2x8x32xf32>
    %775 = tpu.concatenate %772, %774 in 2 : vector<2x8x32xf32>, vector<2x8x32xf32> -> vector<2x8x64xf32>
    %776 = vector.shape_cast %775 : vector<2x8x64xf32> to vector<16x64xf32>
    %c2776 = arith.constant 2776 : index
    %c0_221 = arith.constant 0 : index
    %777 = vector.load %arg3[%c2776, %c0_221] : memref<3784x128xf32, #tpu.memory_space<vmem>>, vector<64x64xf32>
    %cst_222 = arith.constant dense<0.000000e+00> : vector<16x64xf32>
    %778 = tpu.matmul %776, %777, %cst_222 {dimension_numbers = #tpu.dot_dimension_numbers<[1], [0], [0], [1], [0, 0, 1, 1], [], []>} : vector<16x64xf32>, vector<64x64xf32>, vector<16x64xf32> -> vector<16x64xf32>
    %c2840 = arith.constant 2840 : index
    %c0_223 = arith.constant 0 : index
    %779 = vector.load %arg3[%c2840, %c0_223] : memref<3784x128xf32, #tpu.memory_space<vmem>>, vector<1x64xf32>
    %780 = vector.broadcast %779 : vector<1x64xf32> to vector<16x64xf32>
    %781 = arith.addf %778, %780 : vector<16x64xf32>
    %782 = vector.shape_cast %781 : vector<16x64xf32> to vector<2x8x64xf32>
    %783 = arith.addf %708, %782 : vector<2x8x64xf32>
    %c2848 = arith.constant 2848 : index
    %c0_224 = arith.constant 0 : index
    %784 = vector.load %arg3[%c2848, %c0_224] : memref<3784x128xf32, #tpu.memory_space<vmem>>, vector<32x64xf32>
    %cst_225 = arith.constant dense<0.000000e+00> : vector<2x64xf32>
    %785 = tpu.matmul %42, %784, %cst_225 {dimension_numbers = #tpu.dot_dimension_numbers<[1], [0], [0], [1], [0, 0, 1, 1], [], []>} : vector<2x32xf32>, vector<32x64xf32>, vector<2x64xf32> -> vector<2x64xf32>
    %c2880 = arith.constant 2880 : index
    %c0_226 = arith.constant 0 : index
    %786 = vector.load %arg3[%c2880, %c0_226] : memref<3784x128xf32, #tpu.memory_space<vmem>>, vector<1x64xf32>
    %787 = vector.broadcast %786 : vector<1x64xf32> to vector<2x64xf32>
    %788 = arith.addf %785, %787 : vector<2x64xf32>
    %789 = vector.shape_cast %788 : vector<2x64xf32> to vector<2x1x64xf32>
    %790 = vector.broadcast %789 : vector<2x1x64xf32> to vector<2x8x64xf32>
    %791 = arith.addf %783, %790 : vector<2x8x64xf32>
    %cst_227 = arith.constant dense<0.000000e+00> : vector<2x8xf32>
    %792 = vector.multi_reduction <add>, %791, %cst_227 [2] : vector<2x8x64xf32> to vector<2x8xf32>
    %793 = vector.shape_cast %792 : vector<2x8xf32> to vector<2x8x1xf32>
    %cst_228 = arith.constant 6.400000e+01 : f32
    %794 = vector.broadcast %cst_228 : f32 to vector<2x8x1xf32>
    %795 = arith.divf %793, %794 : vector<2x8x1xf32>
    %796 = vector.broadcast %795 : vector<2x8x1xf32> to vector<2x8x64xf32>
    %797 = arith.subf %791, %796 : vector<2x8x64xf32>
    %798 = arith.mulf %797, %797 : vector<2x8x64xf32>
    %cst_229 = arith.constant dense<0.000000e+00> : vector<2x8xf32>
    %799 = vector.multi_reduction <add>, %798, %cst_229 [2] : vector<2x8x64xf32> to vector<2x8xf32>
    %800 = vector.shape_cast %799 : vector<2x8xf32> to vector<2x8x1xf32>
    %cst_230 = arith.constant 6.400000e+01 : f32
    %801 = vector.broadcast %cst_230 : f32 to vector<2x8x1xf32>
    %802 = arith.divf %800, %801 : vector<2x8x1xf32>
    %cst_231 = arith.constant 9.99999974E-6 : f32
    %803 = vector.broadcast %cst_231 : f32 to vector<2x8x1xf32>
    %804 = arith.addf %802, %803 : vector<2x8x1xf32>
    %805 = math.rsqrt %804 : vector<2x8x1xf32>
    %806 = vector.broadcast %805 : vector<2x8x1xf32> to vector<2x8x64xf32>
    %807 = arith.mulf %797, %806 : vector<2x8x64xf32>
    %c2760 = arith.constant 2760 : index
    %c0_232 = arith.constant 0 : index
    %808 = vector.load %arg3[%c2760, %c0_232] : memref<3784x128xf32, #tpu.memory_space<vmem>>, vector<1x64xf32>
    %809 = vector.shape_cast %808 : vector<1x64xf32> to vector<1x1x64xf32>
    %810 = vector.broadcast %809 : vector<1x1x64xf32> to vector<2x8x64xf32>
    %811 = arith.mulf %807, %810 : vector<2x8x64xf32>
    %c2768 = arith.constant 2768 : index
    %c0_233 = arith.constant 0 : index
    %812 = vector.load %arg3[%c2768, %c0_233] : memref<3784x128xf32, #tpu.memory_space<vmem>>, vector<1x64xf32>
    %813 = vector.shape_cast %812 : vector<1x64xf32> to vector<1x1x64xf32>
    %814 = vector.broadcast %813 : vector<1x1x64xf32> to vector<2x8x64xf32>
    %815 = arith.addf %811, %814 : vector<2x8x64xf32>
    %816 = vector.shape_cast %815 : vector<2x8x64xf32> to vector<16x64xf32>
    %c760 = arith.constant 760 : index
    %c0_234 = arith.constant 0 : index
    %817 = vector.load %arg4[%c760, %c0_234] : memref<832x512xf32, #tpu.memory_space<vmem>>, vector<64x256xf32>
    %cst_235 = arith.constant dense<0.000000e+00> : vector<16x256xf32>
    %818 = tpu.matmul %816, %817, %cst_235 {dimension_numbers = #tpu.dot_dimension_numbers<[1], [0], [0], [1], [0, 0, 1, 1], [], []>} : vector<16x64xf32>, vector<64x256xf32>, vector<16x256xf32> -> vector<16x256xf32>
    %c824 = arith.constant 824 : index
    %c0_236 = arith.constant 0 : index
    %819 = vector.load %arg4[%c824, %c0_236] : memref<832x512xf32, #tpu.memory_space<vmem>>, vector<1x256xf32>
    %820 = vector.broadcast %819 : vector<1x256xf32> to vector<16x256xf32>
    %821 = arith.addf %818, %820 : vector<16x256xf32>
    %822 = arith.mulf %821, %821 : vector<16x256xf32>
    %823 = arith.mulf %821, %822 : vector<16x256xf32>
    %cst_237 = arith.constant 4.471500e-02 : f32
    %824 = vector.broadcast %cst_237 : f32 to vector<16x256xf32>
    %825 = arith.mulf %824, %823 : vector<16x256xf32>
    %826 = arith.addf %821, %825 : vector<16x256xf32>
    %cst_238 = arith.constant 0.797884583 : f32
    %827 = vector.broadcast %cst_238 : f32 to vector<16x256xf32>
    %828 = arith.mulf %827, %826 : vector<16x256xf32>
    %829 = math.tanh %828 : vector<16x256xf32>
    %cst_239 = arith.constant 1.000000e+00 : f32
    %830 = vector.broadcast %cst_239 : f32 to vector<16x256xf32>
    %831 = arith.addf %830, %829 : vector<16x256xf32>
    %cst_240 = arith.constant 5.000000e-01 : f32
    %832 = vector.broadcast %cst_240 : f32 to vector<16x256xf32>
    %833 = arith.mulf %832, %831 : vector<16x256xf32>
    %834 = arith.mulf %821, %833 : vector<16x256xf32>
    %c2888 = arith.constant 2888 : index
    %c0_241 = arith.constant 0 : index
    %835 = vector.load %arg3[%c2888, %c0_241] : memref<3784x128xf32, #tpu.memory_space<vmem>>, vector<256x64xf32>
    %cst_242 = arith.constant dense<0.000000e+00> : vector<16x64xf32>
    %836 = tpu.matmul %834, %835, %cst_242 {dimension_numbers = #tpu.dot_dimension_numbers<[1], [0], [0], [1], [0, 0, 1, 1], [], []>} : vector<16x256xf32>, vector<256x64xf32>, vector<16x64xf32> -> vector<16x64xf32>
    %c3144 = arith.constant 3144 : index
    %c0_243 = arith.constant 0 : index
    %837 = vector.load %arg3[%c3144, %c0_243] : memref<3784x128xf32, #tpu.memory_space<vmem>>, vector<1x64xf32>
    %838 = vector.broadcast %837 : vector<1x64xf32> to vector<16x64xf32>
    %839 = arith.addf %836, %838 : vector<16x64xf32>
    %840 = vector.shape_cast %839 : vector<16x64xf32> to vector<2x8x64xf32>
    %841 = arith.addf %791, %840 : vector<2x8x64xf32>
    %c3568 = arith.constant 3568 : index
    %c0_244 = arith.constant 0 : index
    %842 = vector.load %arg3[%c3568, %c0_244] : memref<3784x128xf32, #tpu.memory_space<vmem>>, vector<16x64xf32>
    %cst_245 = arith.constant dense<0.000000e+00> : vector<2x64xf32>
    %843 = tpu.matmul %43, %842, %cst_245 {dimension_numbers = #tpu.dot_dimension_numbers<[1], [0], [0], [1], [0, 0, 1, 1], [], []>} : vector<2x16xf32>, vector<16x64xf32>, vector<2x64xf32> -> vector<2x64xf32>
    %c3584 = arith.constant 3584 : index
    %c0_246 = arith.constant 0 : index
    %844 = vector.load %arg3[%c3584, %c0_246] : memref<3784x128xf32, #tpu.memory_space<vmem>>, vector<1x64xf32>
    %845 = vector.broadcast %844 : vector<1x64xf32> to vector<2x64xf32>
    %846 = arith.addf %843, %845 : vector<2x64xf32>
    %c3592 = arith.constant 3592 : index
    %c0_247 = arith.constant 0 : index
    %847 = vector.load %arg3[%c3592, %c0_247] : memref<3784x128xf32, #tpu.memory_space<vmem>>, vector<64x64xf32>
    %cst_248 = arith.constant dense<0.000000e+00> : vector<2x64xf32>
    %848 = tpu.matmul %846, %847, %cst_248 {dimension_numbers = #tpu.dot_dimension_numbers<[1], [0], [0], [1], [0, 0, 1, 1], [], []>} : vector<2x64xf32>, vector<64x64xf32>, vector<2x64xf32> -> vector<2x64xf32>
    %c3656 = arith.constant 3656 : index
    %c0_249 = arith.constant 0 : index
    %849 = vector.load %arg3[%c3656, %c0_249] : memref<3784x128xf32, #tpu.memory_space<vmem>>, vector<1x64xf32>
    %850 = vector.broadcast %849 : vector<1x64xf32> to vector<2x64xf32>
    %851 = arith.addf %848, %850 : vector<2x64xf32>
    %852 = vector.shape_cast %851 : vector<2x64xf32> to vector<2x1x64xf32>
    %853 = vector.broadcast %852 : vector<2x1x64xf32> to vector<2x8x64xf32>
    %854 = arith.addf %841, %853 : vector<2x8x64xf32>
    %cst_250 = arith.constant dense<0.000000e+00> : vector<2x8xf32>
    %855 = vector.multi_reduction <add>, %854, %cst_250 [2] : vector<2x8x64xf32> to vector<2x8xf32>
    %856 = vector.shape_cast %855 : vector<2x8xf32> to vector<2x8x1xf32>
    %cst_251 = arith.constant 6.400000e+01 : f32
    %857 = vector.broadcast %cst_251 : f32 to vector<2x8x1xf32>
    %858 = arith.divf %856, %857 : vector<2x8x1xf32>
    %859 = vector.broadcast %858 : vector<2x8x1xf32> to vector<2x8x64xf32>
    %860 = arith.subf %854, %859 : vector<2x8x64xf32>
    %861 = arith.mulf %860, %860 : vector<2x8x64xf32>
    %cst_252 = arith.constant dense<0.000000e+00> : vector<2x8xf32>
    %862 = vector.multi_reduction <add>, %861, %cst_252 [2] : vector<2x8x64xf32> to vector<2x8xf32>
    %863 = vector.shape_cast %862 : vector<2x8xf32> to vector<2x8x1xf32>
    %cst_253 = arith.constant 6.400000e+01 : f32
    %864 = vector.broadcast %cst_253 : f32 to vector<2x8x1xf32>
    %865 = arith.divf %863, %864 : vector<2x8x1xf32>
    %cst_254 = arith.constant 9.99999974E-6 : f32
    %866 = vector.broadcast %cst_254 : f32 to vector<2x8x1xf32>
    %867 = arith.addf %865, %866 : vector<2x8x1xf32>
    %868 = math.rsqrt %867 : vector<2x8x1xf32>
    %869 = vector.broadcast %868 : vector<2x8x1xf32> to vector<2x8x64xf32>
    %870 = arith.mulf %860, %869 : vector<2x8x64xf32>
    %c3152 = arith.constant 3152 : index
    %c0_255 = arith.constant 0 : index
    %871 = vector.load %arg3[%c3152, %c0_255] : memref<3784x128xf32, #tpu.memory_space<vmem>>, vector<1x64xf32>
    %872 = vector.shape_cast %871 : vector<1x64xf32> to vector<1x1x64xf32>
    %873 = vector.broadcast %872 : vector<1x1x64xf32> to vector<2x8x64xf32>
    %874 = arith.mulf %870, %873 : vector<2x8x64xf32>
    %c3160 = arith.constant 3160 : index
    %c0_256 = arith.constant 0 : index
    %875 = vector.load %arg3[%c3160, %c0_256] : memref<3784x128xf32, #tpu.memory_space<vmem>>, vector<1x64xf32>
    %876 = vector.shape_cast %875 : vector<1x64xf32> to vector<1x1x64xf32>
    %877 = vector.broadcast %876 : vector<1x1x64xf32> to vector<2x8x64xf32>
    %878 = arith.addf %874, %877 : vector<2x8x64xf32>
    %879 = vector.shape_cast %878 : vector<2x8x64xf32> to vector<16x64xf32>
    %c3168 = arith.constant 3168 : index
    %c0_257 = arith.constant 0 : index
    %880 = vector.load %arg3[%c3168, %c0_257] : memref<3784x128xf32, #tpu.memory_space<vmem>>, vector<64x32xf32>
    %cst_258 = arith.constant dense<0.000000e+00> : vector<16x32xf32>
    %881 = tpu.matmul %879, %880, %cst_258 {dimension_numbers = #tpu.dot_dimension_numbers<[1], [0], [0], [1], [0, 0, 1, 1], [], []>} : vector<16x64xf32>, vector<64x32xf32>, vector<16x32xf32> -> vector<16x32xf32>
    %c3232 = arith.constant 3232 : index
    %c0_259 = arith.constant 0 : index
    %882 = vector.load %arg3[%c3232, %c0_259] : memref<3784x128xf32, #tpu.memory_space<vmem>>, vector<1x32xf32>
    %883 = vector.broadcast %882 : vector<1x32xf32> to vector<16x32xf32>
    %884 = arith.addf %881, %883 : vector<16x32xf32>
    %885 = vector.shape_cast %884 : vector<16x32xf32> to vector<2x8x32xf32>
    %886 = arith.addf %885, %183 : vector<2x8x32xf32>
    %cst_260 = arith.constant dense<0.000000e+00> : vector<2x8xf32>
    %887 = vector.multi_reduction <add>, %886, %cst_260 [2] : vector<2x8x32xf32> to vector<2x8xf32>
    %888 = vector.shape_cast %887 : vector<2x8xf32> to vector<2x8x1xf32>
    %cst_261 = arith.constant 3.200000e+01 : f32
    %889 = vector.broadcast %cst_261 : f32 to vector<2x8x1xf32>
    %890 = arith.divf %888, %889 : vector<2x8x1xf32>
    %891 = vector.broadcast %890 : vector<2x8x1xf32> to vector<2x8x32xf32>
    %892 = arith.subf %886, %891 : vector<2x8x32xf32>
    %893 = arith.mulf %892, %892 : vector<2x8x32xf32>
    %cst_262 = arith.constant dense<0.000000e+00> : vector<2x8xf32>
    %894 = vector.multi_reduction <add>, %893, %cst_262 [2] : vector<2x8x32xf32> to vector<2x8xf32>
    %895 = vector.shape_cast %894 : vector<2x8xf32> to vector<2x8x1xf32>
    %cst_263 = arith.constant 3.200000e+01 : f32
    %896 = vector.broadcast %cst_263 : f32 to vector<2x8x1xf32>
    %897 = arith.divf %895, %896 : vector<2x8x1xf32>
    %cst_264 = arith.constant 9.99999974E-6 : f32
    %898 = vector.broadcast %cst_264 : f32 to vector<2x8x1xf32>
    %899 = arith.addf %897, %898 : vector<2x8x1xf32>
    %900 = math.rsqrt %899 : vector<2x8x1xf32>
    %901 = vector.broadcast %900 : vector<2x8x1xf32> to vector<2x8x32xf32>
    %902 = arith.mulf %892, %901 : vector<2x8x32xf32>
    %c3240 = arith.constant 3240 : index
    %c0_265 = arith.constant 0 : index
    %903 = vector.load %arg3[%c3240, %c0_265] : memref<3784x128xf32, #tpu.memory_space<vmem>>, vector<1x32xf32>
    %904 = vector.shape_cast %903 : vector<1x32xf32> to vector<1x1x32xf32>
    %905 = vector.broadcast %904 : vector<1x1x32xf32> to vector<2x8x32xf32>
    %906 = arith.mulf %902, %905 : vector<2x8x32xf32>
    %c3248 = arith.constant 3248 : index
    %c0_266 = arith.constant 0 : index
    %907 = vector.load %arg3[%c3248, %c0_266] : memref<3784x128xf32, #tpu.memory_space<vmem>>, vector<1x32xf32>
    %908 = vector.shape_cast %907 : vector<1x32xf32> to vector<1x1x32xf32>
    %909 = vector.broadcast %908 : vector<1x1x32xf32> to vector<2x8x32xf32>
    %910 = arith.addf %906, %909 : vector<2x8x32xf32>
    %911 = vector.shape_cast %910 : vector<2x8x32xf32> to vector<16x32xf32>
    %c3272 = arith.constant 3272 : index
    %c0_267 = arith.constant 0 : index
    %912 = vector.load %arg3[%c3272, %c0_267] : memref<3784x128xf32, #tpu.memory_space<vmem>>, vector<32x96xf32>
    %cst_268 = arith.constant dense<0.000000e+00> : vector<16x96xf32>
    %913 = tpu.matmul %911, %912, %cst_268 {dimension_numbers = #tpu.dot_dimension_numbers<[1], [0], [0], [1], [0, 0, 1, 1], [], []>} : vector<16x32xf32>, vector<32x96xf32>, vector<16x96xf32> -> vector<16x96xf32>
    %c3304 = arith.constant 3304 : index
    %c0_269 = arith.constant 0 : index
    %914 = vector.load %arg3[%c3304, %c0_269] : memref<3784x128xf32, #tpu.memory_space<vmem>>, vector<1x96xf32>
    %915 = vector.broadcast %914 : vector<1x96xf32> to vector<16x96xf32>
    %916 = arith.addf %913, %915 : vector<16x96xf32>
    %917 = vector.extract_strided_slice %916 {offsets = [0, 0], sizes = [16, 16], strides = [1, 1]} : vector<16x96xf32> to vector<16x16xf32>
    %918 = vector.extract_strided_slice %916 {offsets = [0, 16], sizes = [16, 16], strides = [1, 1]} : vector<16x96xf32> to vector<16x16xf32>
    %919 = vector.shape_cast %917 : vector<16x16xf32> to vector<1x16x16xf32>
    %920 = vector.shape_cast %918 : vector<16x16xf32> to vector<1x16x16xf32>
    %921 = tpu.concatenate %919, %920 in 0 : vector<1x16x16xf32>, vector<1x16x16xf32> -> vector<2x16x16xf32>
    %922 = vector.shape_cast %921 : vector<2x16x16xf32> to vector<4x8x16xf32>
    %923 = vector.extract_strided_slice %916 {offsets = [0, 32], sizes = [16, 16], strides = [1, 1]} : vector<16x96xf32> to vector<16x16xf32>
    %924 = vector.extract_strided_slice %916 {offsets = [0, 48], sizes = [16, 16], strides = [1, 1]} : vector<16x96xf32> to vector<16x16xf32>
    %925 = vector.shape_cast %923 : vector<16x16xf32> to vector<1x16x16xf32>
    %926 = vector.shape_cast %924 : vector<16x16xf32> to vector<1x16x16xf32>
    %927 = tpu.concatenate %925, %926 in 0 : vector<1x16x16xf32>, vector<1x16x16xf32> -> vector<2x16x16xf32>
    %928 = vector.shape_cast %927 : vector<2x16x16xf32> to vector<4x8x16xf32>
    %929 = vector.extract_strided_slice %916 {offsets = [0, 64], sizes = [16, 16], strides = [1, 1]} : vector<16x96xf32> to vector<16x16xf32>
    %930 = vector.extract_strided_slice %916 {offsets = [0, 80], sizes = [16, 16], strides = [1, 1]} : vector<16x96xf32> to vector<16x16xf32>
    %931 = vector.shape_cast %929 : vector<16x16xf32> to vector<1x16x16xf32>
    %932 = vector.shape_cast %930 : vector<16x16xf32> to vector<1x16x16xf32>
    %933 = tpu.concatenate %931, %932 in 0 : vector<1x16x16xf32>, vector<1x16x16xf32> -> vector<2x16x16xf32>
    %934 = vector.shape_cast %933 : vector<2x16x16xf32> to vector<4x8x16xf32>
    "tpu.trace_start"() <{level = 10 : i32, message = "bqd,bkd->bqk"}> : () -> ()
    %cst_270 = arith.constant dense<0.000000e+00> : vector<4x8x8xf32>
    %935 = tpu.matmul %922, %928, %cst_270 {dimension_numbers = #tpu.dot_dimension_numbers<[2], [2], [1], [1], [0, 0, 0, 1, 1, 1], [0], [0]>} : vector<4x8x16xf32>, vector<4x8x16xf32>, vector<4x8x8xf32> -> vector<4x8x8xf32>
    "tpu.trace_stop"() : () -> ()
    %cst_271 = arith.constant 2.500000e-01 : f32
    %936 = vector.broadcast %cst_271 : f32 to vector<4x8x8xf32>
    %937 = arith.mulf %935, %936 : vector<4x8x8xf32>
    %cst_272 = arith.constant dense<0xFF800000> : vector<4x8xf32>
    %938 = vector.multi_reduction <maximumf>, %937, %cst_272 [2] : vector<4x8x8xf32> to vector<4x8xf32>
    %939 = vector.shape_cast %938 : vector<4x8xf32> to vector<4x8x1xf32>
    %940 = vector.broadcast %939 : vector<4x8x1xf32> to vector<4x8x8xf32>
    %941 = arith.subf %937, %940 : vector<4x8x8xf32>
    %942 = math.exp %941 : vector<4x8x8xf32>
    %cst_273 = arith.constant dense<0.000000e+00> : vector<4x8xf32>
    %943 = vector.multi_reduction <add>, %942, %cst_273 [2] : vector<4x8x8xf32> to vector<4x8xf32>
    %944 = vector.shape_cast %943 : vector<4x8xf32> to vector<4x8x1xf32>
    %945 = vector.broadcast %944 : vector<4x8x1xf32> to vector<4x8x8xf32>
    %946 = arith.divf %942, %945 : vector<4x8x8xf32>
    "tpu.trace_start"() <{level = 10 : i32, message = "bqk,bkd->bqd"}> : () -> ()
    %cst_274 = arith.constant dense<0.000000e+00> : vector<4x8x16xf32>
    %947 = tpu.matmul %946, %934, %cst_274 {dimension_numbers = #tpu.dot_dimension_numbers<[2], [1], [1], [2], [0, 0, 0, 1, 1, 2], [0], [0]>} : vector<4x8x8xf32>, vector<4x8x16xf32>, vector<4x8x16xf32> -> vector<4x8x16xf32>
    "tpu.trace_stop"() : () -> ()
    %948 = vector.shape_cast %947 : vector<4x8x16xf32> to vector<2x2x8x16xf32>
    %949 = vector.extract_strided_slice %948 {offsets = [0, 0, 0, 0], sizes = [1, 2, 8, 16], strides = [1, 1, 1, 1]} : vector<2x2x8x16xf32> to vector<1x2x8x16xf32>
    %950 = vector.shape_cast %949 : vector<1x2x8x16xf32> to vector<2x8x16xf32>
    %951 = vector.extract_strided_slice %948 {offsets = [1, 0, 0, 0], sizes = [1, 2, 8, 16], strides = [1, 1, 1, 1]} : vector<2x2x8x16xf32> to vector<1x2x8x16xf32>
    %952 = vector.shape_cast %951 : vector<1x2x8x16xf32> to vector<2x8x16xf32>
    %953 = tpu.concatenate %950, %952 in 2 : vector<2x8x16xf32>, vector<2x8x16xf32> -> vector<2x8x32xf32>
    %954 = vector.shape_cast %953 : vector<2x8x32xf32> to vector<16x32xf32>
    %c3312 = arith.constant 3312 : index
    %c0_275 = arith.constant 0 : index
    %955 = vector.load %arg3[%c3312, %c0_275] : memref<3784x128xf32, #tpu.memory_space<vmem>>, vector<32x32xf32>
    %cst_276 = arith.constant dense<0.000000e+00> : vector<16x32xf32>
    %956 = tpu.matmul %954, %955, %cst_276 {dimension_numbers = #tpu.dot_dimension_numbers<[1], [0], [0], [1], [0, 0, 1, 1], [], []>} : vector<16x32xf32>, vector<32x32xf32>, vector<16x32xf32> -> vector<16x32xf32>
    %c3344 = arith.constant 3344 : index
    %c0_277 = arith.constant 0 : index
    %957 = vector.load %arg3[%c3344, %c0_277] : memref<3784x128xf32, #tpu.memory_space<vmem>>, vector<1x32xf32>
    %958 = vector.broadcast %957 : vector<1x32xf32> to vector<16x32xf32>
    %959 = arith.addf %956, %958 : vector<16x32xf32>
    %960 = vector.shape_cast %959 : vector<16x32xf32> to vector<2x8x32xf32>
    %961 = arith.addf %886, %960 : vector<2x8x32xf32>
    %c3352 = arith.constant 3352 : index
    %c0_278 = arith.constant 0 : index
    %962 = vector.load %arg3[%c3352, %c0_278] : memref<3784x128xf32, #tpu.memory_space<vmem>>, vector<32x32xf32>
    %cst_279 = arith.constant dense<0.000000e+00> : vector<2x32xf32>
    %963 = tpu.matmul %42, %962, %cst_279 {dimension_numbers = #tpu.dot_dimension_numbers<[1], [0], [0], [1], [0, 0, 1, 1], [], []>} : vector<2x32xf32>, vector<32x32xf32>, vector<2x32xf32> -> vector<2x32xf32>
    %c3384 = arith.constant 3384 : index
    %c0_280 = arith.constant 0 : index
    %964 = vector.load %arg3[%c3384, %c0_280] : memref<3784x128xf32, #tpu.memory_space<vmem>>, vector<1x32xf32>
    %965 = vector.broadcast %964 : vector<1x32xf32> to vector<2x32xf32>
    %966 = arith.addf %963, %965 : vector<2x32xf32>
    %967 = vector.shape_cast %966 : vector<2x32xf32> to vector<2x1x32xf32>
    %968 = vector.broadcast %967 : vector<2x1x32xf32> to vector<2x8x32xf32>
    %969 = arith.addf %961, %968 : vector<2x8x32xf32>
    %cst_281 = arith.constant dense<0.000000e+00> : vector<2x8xf32>
    %970 = vector.multi_reduction <add>, %969, %cst_281 [2] : vector<2x8x32xf32> to vector<2x8xf32>
    %971 = vector.shape_cast %970 : vector<2x8xf32> to vector<2x8x1xf32>
    %cst_282 = arith.constant 3.200000e+01 : f32
    %972 = vector.broadcast %cst_282 : f32 to vector<2x8x1xf32>
    %973 = arith.divf %971, %972 : vector<2x8x1xf32>
    %974 = vector.broadcast %973 : vector<2x8x1xf32> to vector<2x8x32xf32>
    %975 = arith.subf %969, %974 : vector<2x8x32xf32>
    %976 = arith.mulf %975, %975 : vector<2x8x32xf32>
    %cst_283 = arith.constant dense<0.000000e+00> : vector<2x8xf32>
    %977 = vector.multi_reduction <add>, %976, %cst_283 [2] : vector<2x8x32xf32> to vector<2x8xf32>
    %978 = vector.shape_cast %977 : vector<2x8xf32> to vector<2x8x1xf32>
    %cst_284 = arith.constant 3.200000e+01 : f32
    %979 = vector.broadcast %cst_284 : f32 to vector<2x8x1xf32>
    %980 = arith.divf %978, %979 : vector<2x8x1xf32>
    %cst_285 = arith.constant 9.99999974E-6 : f32
    %981 = vector.broadcast %cst_285 : f32 to vector<2x8x1xf32>
    %982 = arith.addf %980, %981 : vector<2x8x1xf32>
    %983 = math.rsqrt %982 : vector<2x8x1xf32>
    %984 = vector.broadcast %983 : vector<2x8x1xf32> to vector<2x8x32xf32>
    %985 = arith.mulf %975, %984 : vector<2x8x32xf32>
    %c3256 = arith.constant 3256 : index
    %c0_286 = arith.constant 0 : index
    %986 = vector.load %arg3[%c3256, %c0_286] : memref<3784x128xf32, #tpu.memory_space<vmem>>, vector<1x32xf32>
    %987 = vector.shape_cast %986 : vector<1x32xf32> to vector<1x1x32xf32>
    %988 = vector.broadcast %987 : vector<1x1x32xf32> to vector<2x8x32xf32>
    %989 = arith.mulf %985, %988 : vector<2x8x32xf32>
    %c3264 = arith.constant 3264 : index
    %c0_287 = arith.constant 0 : index
    %990 = vector.load %arg3[%c3264, %c0_287] : memref<3784x128xf32, #tpu.memory_space<vmem>>, vector<1x32xf32>
    %991 = vector.shape_cast %990 : vector<1x32xf32> to vector<1x1x32xf32>
    %992 = vector.broadcast %991 : vector<1x1x32xf32> to vector<2x8x32xf32>
    %993 = arith.addf %989, %992 : vector<2x8x32xf32>
    %994 = vector.shape_cast %993 : vector<2x8x32xf32> to vector<16x32xf32>
    %c3392 = arith.constant 3392 : index
    %c0_288 = arith.constant 0 : index
    %995 = vector.load %arg3[%c3392, %c0_288] : memref<3784x128xf32, #tpu.memory_space<vmem>>, vector<32x128xf32>
    %cst_289 = arith.constant dense<0.000000e+00> : vector<16x128xf32>
    %996 = tpu.matmul %994, %995, %cst_289 {dimension_numbers = #tpu.dot_dimension_numbers<[1], [0], [0], [1], [0, 0, 1, 1], [], []>} : vector<16x32xf32>, vector<32x128xf32>, vector<16x128xf32> -> vector<16x128xf32>
    %c3424 = arith.constant 3424 : index
    %c0_290 = arith.constant 0 : index
    %997 = vector.load %arg3[%c3424, %c0_290] : memref<3784x128xf32, #tpu.memory_space<vmem>>, vector<1x128xf32>
    %998 = vector.broadcast %997 : vector<1x128xf32> to vector<16x128xf32>
    %999 = arith.addf %996, %998 : vector<16x128xf32>
    %1000 = arith.mulf %999, %999 : vector<16x128xf32>
    %1001 = arith.mulf %999, %1000 : vector<16x128xf32>
    %cst_291 = arith.constant 4.471500e-02 : f32
    %1002 = vector.broadcast %cst_291 : f32 to vector<16x128xf32>
    %1003 = arith.mulf %1002, %1001 : vector<16x128xf32>
    %1004 = arith.addf %999, %1003 : vector<16x128xf32>
    %cst_292 = arith.constant 0.797884583 : f32
    %1005 = vector.broadcast %cst_292 : f32 to vector<16x128xf32>
    %1006 = arith.mulf %1005, %1004 : vector<16x128xf32>
    %1007 = math.tanh %1006 : vector<16x128xf32>
    %cst_293 = arith.constant 1.000000e+00 : f32
    %1008 = vector.broadcast %cst_293 : f32 to vector<16x128xf32>
    %1009 = arith.addf %1008, %1007 : vector<16x128xf32>
    %cst_294 = arith.constant 5.000000e-01 : f32
    %1010 = vector.broadcast %cst_294 : f32 to vector<16x128xf32>
    %1011 = arith.mulf %1010, %1009 : vector<16x128xf32>
    %1012 = arith.mulf %999, %1011 : vector<16x128xf32>
    %c3432 = arith.constant 3432 : index
    %c0_295 = arith.constant 0 : index
    %1013 = vector.load %arg3[%c3432, %c0_295] : memref<3784x128xf32, #tpu.memory_space<vmem>>, vector<128x32xf32>
    %cst_296 = arith.constant dense<0.000000e+00> : vector<16x32xf32>
    %1014 = tpu.matmul %1012, %1013, %cst_296 {dimension_numbers = #tpu.dot_dimension_numbers<[1], [0], [0], [1], [0, 0, 1, 1], [], []>} : vector<16x128xf32>, vector<128x32xf32>, vector<16x32xf32> -> vector<16x32xf32>
    %c3560 = arith.constant 3560 : index
    %c0_297 = arith.constant 0 : index
    %1015 = vector.load %arg3[%c3560, %c0_297] : memref<3784x128xf32, #tpu.memory_space<vmem>>, vector<1x32xf32>
    %1016 = vector.broadcast %1015 : vector<1x32xf32> to vector<16x32xf32>
    %1017 = arith.addf %1014, %1016 : vector<16x32xf32>
    %1018 = vector.shape_cast %1017 : vector<16x32xf32> to vector<2x8x32xf32>
    %1019 = arith.addf %969, %1018 : vector<2x8x32xf32>
    %c3664 = arith.constant 3664 : index
    %c0_298 = arith.constant 0 : index
    %1020 = vector.load %arg3[%c3664, %c0_298] : memref<3784x128xf32, #tpu.memory_space<vmem>>, vector<16x32xf32>
    %cst_299 = arith.constant dense<0.000000e+00> : vector<2x32xf32>
    %1021 = tpu.matmul %43, %1020, %cst_299 {dimension_numbers = #tpu.dot_dimension_numbers<[1], [0], [0], [1], [0, 0, 1, 1], [], []>} : vector<2x16xf32>, vector<16x32xf32>, vector<2x32xf32> -> vector<2x32xf32>
    %c3680 = arith.constant 3680 : index
    %c0_300 = arith.constant 0 : index
    %1022 = vector.load %arg3[%c3680, %c0_300] : memref<3784x128xf32, #tpu.memory_space<vmem>>, vector<1x32xf32>
    %1023 = vector.broadcast %1022 : vector<1x32xf32> to vector<2x32xf32>
    %1024 = arith.addf %1021, %1023 : vector<2x32xf32>
    %c3688 = arith.constant 3688 : index
    %c0_301 = arith.constant 0 : index
    %1025 = vector.load %arg3[%c3688, %c0_301] : memref<3784x128xf32, #tpu.memory_space<vmem>>, vector<32x32xf32>
    %cst_302 = arith.constant dense<0.000000e+00> : vector<2x32xf32>
    %1026 = tpu.matmul %1024, %1025, %cst_302 {dimension_numbers = #tpu.dot_dimension_numbers<[1], [0], [0], [1], [0, 0, 1, 1], [], []>} : vector<2x32xf32>, vector<32x32xf32>, vector<2x32xf32> -> vector<2x32xf32>
    %c3720 = arith.constant 3720 : index
    %c0_303 = arith.constant 0 : index
    %1027 = vector.load %arg3[%c3720, %c0_303] : memref<3784x128xf32, #tpu.memory_space<vmem>>, vector<1x32xf32>
    %1028 = vector.broadcast %1027 : vector<1x32xf32> to vector<2x32xf32>
    %1029 = arith.addf %1026, %1028 : vector<2x32xf32>
    %1030 = vector.shape_cast %1029 : vector<2x32xf32> to vector<2x1x32xf32>
    %1031 = vector.broadcast %1030 : vector<2x1x32xf32> to vector<2x8x32xf32>
    %1032 = arith.addf %1019, %1031 : vector<2x8x32xf32>
    %cst_304 = arith.constant dense<0.000000e+00> : vector<2x8xf32>
    %1033 = vector.multi_reduction <add>, %1032, %cst_304 [2] : vector<2x8x32xf32> to vector<2x8xf32>
    %1034 = vector.shape_cast %1033 : vector<2x8xf32> to vector<2x8x1xf32>
    %cst_305 = arith.constant 3.200000e+01 : f32
    %1035 = vector.broadcast %cst_305 : f32 to vector<2x8x1xf32>
    %1036 = arith.divf %1034, %1035 : vector<2x8x1xf32>
    %1037 = vector.broadcast %1036 : vector<2x8x1xf32> to vector<2x8x32xf32>
    %1038 = arith.subf %1032, %1037 : vector<2x8x32xf32>
    %1039 = arith.mulf %1038, %1038 : vector<2x8x32xf32>
    %cst_306 = arith.constant dense<0.000000e+00> : vector<2x8xf32>
    %1040 = vector.multi_reduction <add>, %1039, %cst_306 [2] : vector<2x8x32xf32> to vector<2x8xf32>
    %1041 = vector.shape_cast %1040 : vector<2x8xf32> to vector<2x8x1xf32>
    %cst_307 = arith.constant 3.200000e+01 : f32
    %1042 = vector.broadcast %cst_307 : f32 to vector<2x8x1xf32>
    %1043 = arith.divf %1041, %1042 : vector<2x8x1xf32>
    %cst_308 = arith.constant 9.99999974E-6 : f32
    %1044 = vector.broadcast %cst_308 : f32 to vector<2x8x1xf32>
    %1045 = arith.addf %1043, %1044 : vector<2x8x1xf32>
    %1046 = math.rsqrt %1045 : vector<2x8x1xf32>
    %1047 = vector.broadcast %1046 : vector<2x8x1xf32> to vector<2x8x32xf32>
    %1048 = arith.mulf %1038, %1047 : vector<2x8x32xf32>
    %c3728 = arith.constant 3728 : index
    %c0_309 = arith.constant 0 : index
    %1049 = vector.load %arg3[%c3728, %c0_309] : memref<3784x128xf32, #tpu.memory_space<vmem>>, vector<1x32xf32>
    %1050 = vector.shape_cast %1049 : vector<1x32xf32> to vector<1x1x32xf32>
    %1051 = vector.broadcast %1050 : vector<1x1x32xf32> to vector<2x8x32xf32>
    %1052 = arith.mulf %1048, %1051 : vector<2x8x32xf32>
    %c3736 = arith.constant 3736 : index
    %c0_310 = arith.constant 0 : index
    %1053 = vector.load %arg3[%c3736, %c0_310] : memref<3784x128xf32, #tpu.memory_space<vmem>>, vector<1x32xf32>
    %1054 = vector.shape_cast %1053 : vector<1x32xf32> to vector<1x1x32xf32>
    %1055 = vector.broadcast %1054 : vector<1x1x32xf32> to vector<2x8x32xf32>
    %1056 = arith.addf %1052, %1055 : vector<2x8x32xf32>
    %1057 = vector.shape_cast %1056 : vector<2x8x32xf32> to vector<16x32xf32>
    %c3744 = arith.constant 3744 : index
    %c0_311 = arith.constant 0 : index
    %1058 = vector.load %arg3[%c3744, %c0_311] : memref<3784x128xf32, #tpu.memory_space<vmem>>, vector<32x128xf32>
    %cst_312 = arith.constant dense<0.000000e+00> : vector<16x128xf32>
    %1059 = tpu.matmul %1057, %1058, %cst_312 {dimension_numbers = #tpu.dot_dimension_numbers<[1], [0], [0], [1], [0, 0, 1, 1], [], []>} : vector<16x32xf32>, vector<32x128xf32>, vector<16x128xf32> -> vector<16x128xf32>
    %c3776 = arith.constant 3776 : index
    %c0_313 = arith.constant 0 : index
    %1060 = vector.load %arg3[%c3776, %c0_313] : memref<3784x128xf32, #tpu.memory_space<vmem>>, vector<1x128xf32>
    %1061 = vector.broadcast %1060 : vector<1x128xf32> to vector<16x128xf32>
    %1062 = arith.addf %1059, %1061 : vector<16x128xf32>
    %1063 = vector.shape_cast %1062 : vector<16x128xf32> to vector<2x8x128xf32>
    %cst_314 = arith.constant dense<0.000000e+00> : vector<2x8xf32>
    %1064 = vector.multi_reduction <add>, %841, %cst_314 [2] : vector<2x8x64xf32> to vector<2x8xf32>
    %1065 = vector.shape_cast %1064 : vector<2x8xf32> to vector<2x8x1xf32>
    %cst_315 = arith.constant 6.400000e+01 : f32
    %1066 = vector.broadcast %cst_315 : f32 to vector<2x8x1xf32>
    %1067 = arith.divf %1065, %1066 : vector<2x8x1xf32>
    %1068 = vector.broadcast %1067 : vector<2x8x1xf32> to vector<2x8x64xf32>
    %1069 = arith.subf %841, %1068 : vector<2x8x64xf32>
    %1070 = arith.mulf %1069, %1069 : vector<2x8x64xf32>
    %cst_316 = arith.constant dense<0.000000e+00> : vector<2x8xf32>
    %1071 = vector.multi_reduction <add>, %1070, %cst_316 [2] : vector<2x8x64xf32> to vector<2x8xf32>
    %1072 = vector.shape_cast %1071 : vector<2x8xf32> to vector<2x8x1xf32>
    %cst_317 = arith.constant 6.400000e+01 : f32
    %1073 = vector.broadcast %cst_317 : f32 to vector<2x8x1xf32>
    %1074 = arith.divf %1072, %1073 : vector<2x8x1xf32>
    %cst_318 = arith.constant 9.99999974E-6 : f32
    %1075 = vector.broadcast %cst_318 : f32 to vector<2x8x1xf32>
    %1076 = arith.addf %1074, %1075 : vector<2x8x1xf32>
    %1077 = math.rsqrt %1076 : vector<2x8x1xf32>
    %1078 = vector.broadcast %1077 : vector<2x8x1xf32> to vector<2x8x64xf32>
    %1079 = arith.mulf %1069, %1078 : vector<2x8x64xf32>
    %c3152_319 = arith.constant 3152 : index
    %c0_320 = arith.constant 0 : index
    %1080 = vector.load %arg3[%c3152_319, %c0_320] : memref<3784x128xf32, #tpu.memory_space<vmem>>, vector<1x64xf32>
    %1081 = vector.shape_cast %1080 : vector<1x64xf32> to vector<1x1x64xf32>
    %1082 = vector.broadcast %1081 : vector<1x1x64xf32> to vector<2x8x64xf32>
    %1083 = arith.mulf %1079, %1082 : vector<2x8x64xf32>
    %c3160_321 = arith.constant 3160 : index
    %c0_322 = arith.constant 0 : index
    %1084 = vector.load %arg3[%c3160_321, %c0_322] : memref<3784x128xf32, #tpu.memory_space<vmem>>, vector<1x64xf32>
    %1085 = vector.shape_cast %1084 : vector<1x64xf32> to vector<1x1x64xf32>
    %1086 = vector.broadcast %1085 : vector<1x1x64xf32> to vector<2x8x64xf32>
    %1087 = arith.addf %1083, %1086 : vector<2x8x64xf32>
    %1088 = vector.shape_cast %1087 : vector<2x8x64xf32> to vector<16x64xf32>
    %c3168_323 = arith.constant 3168 : index
    %c0_324 = arith.constant 0 : index
    %1089 = vector.load %arg3[%c3168_323, %c0_324] : memref<3784x128xf32, #tpu.memory_space<vmem>>, vector<64x32xf32>
    %cst_325 = arith.constant dense<0.000000e+00> : vector<16x32xf32>
    %1090 = tpu.matmul %1088, %1089, %cst_325 {dimension_numbers = #tpu.dot_dimension_numbers<[1], [0], [0], [1], [0, 0, 1, 1], [], []>} : vector<16x64xf32>, vector<64x32xf32>, vector<16x32xf32> -> vector<16x32xf32>
    %c3232_326 = arith.constant 3232 : index
    %c0_327 = arith.constant 0 : index
    %1091 = vector.load %arg3[%c3232_326, %c0_327] : memref<3784x128xf32, #tpu.memory_space<vmem>>, vector<1x32xf32>
    %1092 = vector.broadcast %1091 : vector<1x32xf32> to vector<16x32xf32>
    %1093 = arith.addf %1090, %1092 : vector<16x32xf32>
    %1094 = vector.shape_cast %1093 : vector<16x32xf32> to vector<2x8x32xf32>
    %1095 = arith.addf %1094, %183 : vector<2x8x32xf32>
    %cst_328 = arith.constant dense<0.000000e+00> : vector<2x8xf32>
    %1096 = vector.multi_reduction <add>, %1095, %cst_328 [2] : vector<2x8x32xf32> to vector<2x8xf32>
    %1097 = vector.shape_cast %1096 : vector<2x8xf32> to vector<2x8x1xf32>
    %cst_329 = arith.constant 3.200000e+01 : f32
    %1098 = vector.broadcast %cst_329 : f32 to vector<2x8x1xf32>
    %1099 = arith.divf %1097, %1098 : vector<2x8x1xf32>
    %1100 = vector.broadcast %1099 : vector<2x8x1xf32> to vector<2x8x32xf32>
    %1101 = arith.subf %1095, %1100 : vector<2x8x32xf32>
    %1102 = arith.mulf %1101, %1101 : vector<2x8x32xf32>
    %cst_330 = arith.constant dense<0.000000e+00> : vector<2x8xf32>
    %1103 = vector.multi_reduction <add>, %1102, %cst_330 [2] : vector<2x8x32xf32> to vector<2x8xf32>
    %1104 = vector.shape_cast %1103 : vector<2x8xf32> to vector<2x8x1xf32>
    %cst_331 = arith.constant 3.200000e+01 : f32
    %1105 = vector.broadcast %cst_331 : f32 to vector<2x8x1xf32>
    %1106 = arith.divf %1104, %1105 : vector<2x8x1xf32>
    %cst_332 = arith.constant 9.99999974E-6 : f32
    %1107 = vector.broadcast %cst_332 : f32 to vector<2x8x1xf32>
    %1108 = arith.addf %1106, %1107 : vector<2x8x1xf32>
    %1109 = math.rsqrt %1108 : vector<2x8x1xf32>
    %1110 = vector.broadcast %1109 : vector<2x8x1xf32> to vector<2x8x32xf32>
    %1111 = arith.mulf %1101, %1110 : vector<2x8x32xf32>
    %c3240_333 = arith.constant 3240 : index
    %c0_334 = arith.constant 0 : index
    %1112 = vector.load %arg3[%c3240_333, %c0_334] : memref<3784x128xf32, #tpu.memory_space<vmem>>, vector<1x32xf32>
    %1113 = vector.shape_cast %1112 : vector<1x32xf32> to vector<1x1x32xf32>
    %1114 = vector.broadcast %1113 : vector<1x1x32xf32> to vector<2x8x32xf32>
    %1115 = arith.mulf %1111, %1114 : vector<2x8x32xf32>
    %c3248_335 = arith.constant 3248 : index
    %c0_336 = arith.constant 0 : index
    %1116 = vector.load %arg3[%c3248_335, %c0_336] : memref<3784x128xf32, #tpu.memory_space<vmem>>, vector<1x32xf32>
    %1117 = vector.shape_cast %1116 : vector<1x32xf32> to vector<1x1x32xf32>
    %1118 = vector.broadcast %1117 : vector<1x1x32xf32> to vector<2x8x32xf32>
    %1119 = arith.addf %1115, %1118 : vector<2x8x32xf32>
    %1120 = vector.shape_cast %1119 : vector<2x8x32xf32> to vector<16x32xf32>
    %c3272_337 = arith.constant 3272 : index
    %c0_338 = arith.constant 0 : index
    %1121 = vector.load %arg3[%c3272_337, %c0_338] : memref<3784x128xf32, #tpu.memory_space<vmem>>, vector<32x96xf32>
    %cst_339 = arith.constant dense<0.000000e+00> : vector<16x96xf32>
    %1122 = tpu.matmul %1120, %1121, %cst_339 {dimension_numbers = #tpu.dot_dimension_numbers<[1], [0], [0], [1], [0, 0, 1, 1], [], []>} : vector<16x32xf32>, vector<32x96xf32>, vector<16x96xf32> -> vector<16x96xf32>
    %c3304_340 = arith.constant 3304 : index
    %c0_341 = arith.constant 0 : index
    %1123 = vector.load %arg3[%c3304_340, %c0_341] : memref<3784x128xf32, #tpu.memory_space<vmem>>, vector<1x96xf32>
    %1124 = vector.broadcast %1123 : vector<1x96xf32> to vector<16x96xf32>
    %1125 = arith.addf %1122, %1124 : vector<16x96xf32>
    %1126 = vector.extract_strided_slice %1125 {offsets = [0, 0], sizes = [16, 16], strides = [1, 1]} : vector<16x96xf32> to vector<16x16xf32>
    %1127 = vector.extract_strided_slice %1125 {offsets = [0, 16], sizes = [16, 16], strides = [1, 1]} : vector<16x96xf32> to vector<16x16xf32>
    %1128 = vector.shape_cast %1126 : vector<16x16xf32> to vector<1x16x16xf32>
    %1129 = vector.shape_cast %1127 : vector<16x16xf32> to vector<1x16x16xf32>
    %1130 = tpu.concatenate %1128, %1129 in 0 : vector<1x16x16xf32>, vector<1x16x16xf32> -> vector<2x16x16xf32>
    %1131 = vector.shape_cast %1130 : vector<2x16x16xf32> to vector<4x8x16xf32>
    %1132 = vector.extract_strided_slice %1125 {offsets = [0, 32], sizes = [16, 16], strides = [1, 1]} : vector<16x96xf32> to vector<16x16xf32>
    %1133 = vector.extract_strided_slice %1125 {offsets = [0, 48], sizes = [16, 16], strides = [1, 1]} : vector<16x96xf32> to vector<16x16xf32>
    %1134 = vector.shape_cast %1132 : vector<16x16xf32> to vector<1x16x16xf32>
    %1135 = vector.shape_cast %1133 : vector<16x16xf32> to vector<1x16x16xf32>
    %1136 = tpu.concatenate %1134, %1135 in 0 : vector<1x16x16xf32>, vector<1x16x16xf32> -> vector<2x16x16xf32>
    %1137 = vector.shape_cast %1136 : vector<2x16x16xf32> to vector<4x8x16xf32>
    %1138 = vector.extract_strided_slice %1125 {offsets = [0, 64], sizes = [16, 16], strides = [1, 1]} : vector<16x96xf32> to vector<16x16xf32>
    %1139 = vector.extract_strided_slice %1125 {offsets = [0, 80], sizes = [16, 16], strides = [1, 1]} : vector<16x96xf32> to vector<16x16xf32>
    %1140 = vector.shape_cast %1138 : vector<16x16xf32> to vector<1x16x16xf32>
    %1141 = vector.shape_cast %1139 : vector<16x16xf32> to vector<1x16x16xf32>
    %1142 = tpu.concatenate %1140, %1141 in 0 : vector<1x16x16xf32>, vector<1x16x16xf32> -> vector<2x16x16xf32>
    %1143 = vector.shape_cast %1142 : vector<2x16x16xf32> to vector<4x8x16xf32>
    "tpu.trace_start"() <{level = 10 : i32, message = "bqd,bkd->bqk"}> : () -> ()
    %cst_342 = arith.constant dense<0.000000e+00> : vector<4x8x8xf32>
    %1144 = tpu.matmul %1131, %1137, %cst_342 {dimension_numbers = #tpu.dot_dimension_numbers<[2], [2], [1], [1], [0, 0, 0, 1, 1, 1], [0], [0]>} : vector<4x8x16xf32>, vector<4x8x16xf32>, vector<4x8x8xf32> -> vector<4x8x8xf32>
    "tpu.trace_stop"() : () -> ()
    %cst_343 = arith.constant 2.500000e-01 : f32
    %1145 = vector.broadcast %cst_343 : f32 to vector<4x8x8xf32>
    %1146 = arith.mulf %1144, %1145 : vector<4x8x8xf32>
    %cst_344 = arith.constant dense<0xFF800000> : vector<4x8xf32>
    %1147 = vector.multi_reduction <maximumf>, %1146, %cst_344 [2] : vector<4x8x8xf32> to vector<4x8xf32>
    %1148 = vector.shape_cast %1147 : vector<4x8xf32> to vector<4x8x1xf32>
    %1149 = vector.broadcast %1148 : vector<4x8x1xf32> to vector<4x8x8xf32>
    %1150 = arith.subf %1146, %1149 : vector<4x8x8xf32>
    %1151 = math.exp %1150 : vector<4x8x8xf32>
    %cst_345 = arith.constant dense<0.000000e+00> : vector<4x8xf32>
    %1152 = vector.multi_reduction <add>, %1151, %cst_345 [2] : vector<4x8x8xf32> to vector<4x8xf32>
    %1153 = vector.shape_cast %1152 : vector<4x8xf32> to vector<4x8x1xf32>
    %1154 = vector.broadcast %1153 : vector<4x8x1xf32> to vector<4x8x8xf32>
    %1155 = arith.divf %1151, %1154 : vector<4x8x8xf32>
    "tpu.trace_start"() <{level = 10 : i32, message = "bqk,bkd->bqd"}> : () -> ()
    %cst_346 = arith.constant dense<0.000000e+00> : vector<4x8x16xf32>
    %1156 = tpu.matmul %1155, %1143, %cst_346 {dimension_numbers = #tpu.dot_dimension_numbers<[2], [1], [1], [2], [0, 0, 0, 1, 1, 2], [0], [0]>} : vector<4x8x8xf32>, vector<4x8x16xf32>, vector<4x8x16xf32> -> vector<4x8x16xf32>
    "tpu.trace_stop"() : () -> ()
    %1157 = vector.shape_cast %1156 : vector<4x8x16xf32> to vector<2x2x8x16xf32>
    %1158 = vector.extract_strided_slice %1157 {offsets = [0, 0, 0, 0], sizes = [1, 2, 8, 16], strides = [1, 1, 1, 1]} : vector<2x2x8x16xf32> to vector<1x2x8x16xf32>
    %1159 = vector.shape_cast %1158 : vector<1x2x8x16xf32> to vector<2x8x16xf32>
    %1160 = vector.extract_strided_slice %1157 {offsets = [1, 0, 0, 0], sizes = [1, 2, 8, 16], strides = [1, 1, 1, 1]} : vector<2x2x8x16xf32> to vector<1x2x8x16xf32>
    %1161 = vector.shape_cast %1160 : vector<1x2x8x16xf32> to vector<2x8x16xf32>
    %1162 = tpu.concatenate %1159, %1161 in 2 : vector<2x8x16xf32>, vector<2x8x16xf32> -> vector<2x8x32xf32>
    %1163 = vector.shape_cast %1162 : vector<2x8x32xf32> to vector<16x32xf32>
    %c3312_347 = arith.constant 3312 : index
    %c0_348 = arith.constant 0 : index
    %1164 = vector.load %arg3[%c3312_347, %c0_348] : memref<3784x128xf32, #tpu.memory_space<vmem>>, vector<32x32xf32>
    %cst_349 = arith.constant dense<0.000000e+00> : vector<16x32xf32>
    %1165 = tpu.matmul %1163, %1164, %cst_349 {dimension_numbers = #tpu.dot_dimension_numbers<[1], [0], [0], [1], [0, 0, 1, 1], [], []>} : vector<16x32xf32>, vector<32x32xf32>, vector<16x32xf32> -> vector<16x32xf32>
    %c3344_350 = arith.constant 3344 : index
    %c0_351 = arith.constant 0 : index
    %1166 = vector.load %arg3[%c3344_350, %c0_351] : memref<3784x128xf32, #tpu.memory_space<vmem>>, vector<1x32xf32>
    %1167 = vector.broadcast %1166 : vector<1x32xf32> to vector<16x32xf32>
    %1168 = arith.addf %1165, %1167 : vector<16x32xf32>
    %1169 = vector.shape_cast %1168 : vector<16x32xf32> to vector<2x8x32xf32>
    %1170 = arith.addf %1095, %1169 : vector<2x8x32xf32>
    %c3352_352 = arith.constant 3352 : index
    %c0_353 = arith.constant 0 : index
    %1171 = vector.load %arg3[%c3352_352, %c0_353] : memref<3784x128xf32, #tpu.memory_space<vmem>>, vector<32x32xf32>
    %cst_354 = arith.constant dense<0.000000e+00> : vector<2x32xf32>
    %1172 = tpu.matmul %42, %1171, %cst_354 {dimension_numbers = #tpu.dot_dimension_numbers<[1], [0], [0], [1], [0, 0, 1, 1], [], []>} : vector<2x32xf32>, vector<32x32xf32>, vector<2x32xf32> -> vector<2x32xf32>
    %c3384_355 = arith.constant 3384 : index
    %c0_356 = arith.constant 0 : index
    %1173 = vector.load %arg3[%c3384_355, %c0_356] : memref<3784x128xf32, #tpu.memory_space<vmem>>, vector<1x32xf32>
    %1174 = vector.broadcast %1173 : vector<1x32xf32> to vector<2x32xf32>
    %1175 = arith.addf %1172, %1174 : vector<2x32xf32>
    %1176 = vector.shape_cast %1175 : vector<2x32xf32> to vector<2x1x32xf32>
    %1177 = vector.broadcast %1176 : vector<2x1x32xf32> to vector<2x8x32xf32>
    %1178 = arith.addf %1170, %1177 : vector<2x8x32xf32>
    %cst_357 = arith.constant dense<0.000000e+00> : vector<2x8xf32>
    %1179 = vector.multi_reduction <add>, %1178, %cst_357 [2] : vector<2x8x32xf32> to vector<2x8xf32>
    %1180 = vector.shape_cast %1179 : vector<2x8xf32> to vector<2x8x1xf32>
    %cst_358 = arith.constant 3.200000e+01 : f32
    %1181 = vector.broadcast %cst_358 : f32 to vector<2x8x1xf32>
    %1182 = arith.divf %1180, %1181 : vector<2x8x1xf32>
    %1183 = vector.broadcast %1182 : vector<2x8x1xf32> to vector<2x8x32xf32>
    %1184 = arith.subf %1178, %1183 : vector<2x8x32xf32>
    %1185 = arith.mulf %1184, %1184 : vector<2x8x32xf32>
    %cst_359 = arith.constant dense<0.000000e+00> : vector<2x8xf32>
    %1186 = vector.multi_reduction <add>, %1185, %cst_359 [2] : vector<2x8x32xf32> to vector<2x8xf32>
    %1187 = vector.shape_cast %1186 : vector<2x8xf32> to vector<2x8x1xf32>
    %cst_360 = arith.constant 3.200000e+01 : f32
    %1188 = vector.broadcast %cst_360 : f32 to vector<2x8x1xf32>
    %1189 = arith.divf %1187, %1188 : vector<2x8x1xf32>
    %cst_361 = arith.constant 9.99999974E-6 : f32
    %1190 = vector.broadcast %cst_361 : f32 to vector<2x8x1xf32>
    %1191 = arith.addf %1189, %1190 : vector<2x8x1xf32>
    %1192 = math.rsqrt %1191 : vector<2x8x1xf32>
    %1193 = vector.broadcast %1192 : vector<2x8x1xf32> to vector<2x8x32xf32>
    %1194 = arith.mulf %1184, %1193 : vector<2x8x32xf32>
    %c3256_362 = arith.constant 3256 : index
    %c0_363 = arith.constant 0 : index
    %1195 = vector.load %arg3[%c3256_362, %c0_363] : memref<3784x128xf32, #tpu.memory_space<vmem>>, vector<1x32xf32>
    %1196 = vector.shape_cast %1195 : vector<1x32xf32> to vector<1x1x32xf32>
    %1197 = vector.broadcast %1196 : vector<1x1x32xf32> to vector<2x8x32xf32>
    %1198 = arith.mulf %1194, %1197 : vector<2x8x32xf32>
    %c3264_364 = arith.constant 3264 : index
    %c0_365 = arith.constant 0 : index
    %1199 = vector.load %arg3[%c3264_364, %c0_365] : memref<3784x128xf32, #tpu.memory_space<vmem>>, vector<1x32xf32>
    %1200 = vector.shape_cast %1199 : vector<1x32xf32> to vector<1x1x32xf32>
    %1201 = vector.broadcast %1200 : vector<1x1x32xf32> to vector<2x8x32xf32>
    %1202 = arith.addf %1198, %1201 : vector<2x8x32xf32>
    %1203 = vector.shape_cast %1202 : vector<2x8x32xf32> to vector<16x32xf32>
    %c3392_366 = arith.constant 3392 : index
    %c0_367 = arith.constant 0 : index
    %1204 = vector.load %arg3[%c3392_366, %c0_367] : memref<3784x128xf32, #tpu.memory_space<vmem>>, vector<32x128xf32>
    %cst_368 = arith.constant dense<0.000000e+00> : vector<16x128xf32>
    %1205 = tpu.matmul %1203, %1204, %cst_368 {dimension_numbers = #tpu.dot_dimension_numbers<[1], [0], [0], [1], [0, 0, 1, 1], [], []>} : vector<16x32xf32>, vector<32x128xf32>, vector<16x128xf32> -> vector<16x128xf32>
    %c3424_369 = arith.constant 3424 : index
    %c0_370 = arith.constant 0 : index
    %1206 = vector.load %arg3[%c3424_369, %c0_370] : memref<3784x128xf32, #tpu.memory_space<vmem>>, vector<1x128xf32>
    %1207 = vector.broadcast %1206 : vector<1x128xf32> to vector<16x128xf32>
    %1208 = arith.addf %1205, %1207 : vector<16x128xf32>
    %1209 = arith.mulf %1208, %1208 : vector<16x128xf32>
    %1210 = arith.mulf %1208, %1209 : vector<16x128xf32>
    %cst_371 = arith.constant 4.471500e-02 : f32
    %1211 = vector.broadcast %cst_371 : f32 to vector<16x128xf32>
    %1212 = arith.mulf %1211, %1210 : vector<16x128xf32>
    %1213 = arith.addf %1208, %1212 : vector<16x128xf32>
    %cst_372 = arith.constant 0.797884583 : f32
    %1214 = vector.broadcast %cst_372 : f32 to vector<16x128xf32>
    %1215 = arith.mulf %1214, %1213 : vector<16x128xf32>
    %1216 = math.tanh %1215 : vector<16x128xf32>
    %cst_373 = arith.constant 1.000000e+00 : f32
    %1217 = vector.broadcast %cst_373 : f32 to vector<16x128xf32>
    %1218 = arith.addf %1217, %1216 : vector<16x128xf32>
    %cst_374 = arith.constant 5.000000e-01 : f32
    %1219 = vector.broadcast %cst_374 : f32 to vector<16x128xf32>
    %1220 = arith.mulf %1219, %1218 : vector<16x128xf32>
    %1221 = arith.mulf %1208, %1220 : vector<16x128xf32>
    %c3432_375 = arith.constant 3432 : index
    %c0_376 = arith.constant 0 : index
    %1222 = vector.load %arg3[%c3432_375, %c0_376] : memref<3784x128xf32, #tpu.memory_space<vmem>>, vector<128x32xf32>
    %cst_377 = arith.constant dense<0.000000e+00> : vector<16x32xf32>
    %1223 = tpu.matmul %1221, %1222, %cst_377 {dimension_numbers = #tpu.dot_dimension_numbers<[1], [0], [0], [1], [0, 0, 1, 1], [], []>} : vector<16x128xf32>, vector<128x32xf32>, vector<16x32xf32> -> vector<16x32xf32>
    %c3560_378 = arith.constant 3560 : index
    %c0_379 = arith.constant 0 : index
    %1224 = vector.load %arg3[%c3560_378, %c0_379] : memref<3784x128xf32, #tpu.memory_space<vmem>>, vector<1x32xf32>
    %1225 = vector.broadcast %1224 : vector<1x32xf32> to vector<16x32xf32>
    %1226 = arith.addf %1223, %1225 : vector<16x32xf32>
    %1227 = vector.shape_cast %1226 : vector<16x32xf32> to vector<2x8x32xf32>
    %1228 = arith.addf %1178, %1227 : vector<2x8x32xf32>
    %cst_380 = arith.constant dense<0.000000e+00> : vector<2x8xf32>
    %1229 = vector.multi_reduction <add>, %1228, %cst_380 [2] : vector<2x8x32xf32> to vector<2x8xf32>
    %1230 = vector.shape_cast %1229 : vector<2x8xf32> to vector<2x8x1xf32>
    %cst_381 = arith.constant 3.200000e+01 : f32
    %1231 = vector.broadcast %cst_381 : f32 to vector<2x8x1xf32>
    %1232 = arith.divf %1230, %1231 : vector<2x8x1xf32>
    %1233 = vector.broadcast %1232 : vector<2x8x1xf32> to vector<2x8x32xf32>
    %1234 = arith.subf %1228, %1233 : vector<2x8x32xf32>
    %1235 = arith.mulf %1234, %1234 : vector<2x8x32xf32>
    %cst_382 = arith.constant dense<0.000000e+00> : vector<2x8xf32>
    %1236 = vector.multi_reduction <add>, %1235, %cst_382 [2] : vector<2x8x32xf32> to vector<2x8xf32>
    %1237 = vector.shape_cast %1236 : vector<2x8xf32> to vector<2x8x1xf32>
    %cst_383 = arith.constant 3.200000e+01 : f32
    %1238 = vector.broadcast %cst_383 : f32 to vector<2x8x1xf32>
    %1239 = arith.divf %1237, %1238 : vector<2x8x1xf32>
    %cst_384 = arith.constant 9.99999974E-6 : f32
    %1240 = vector.broadcast %cst_384 : f32 to vector<2x8x1xf32>
    %1241 = arith.addf %1239, %1240 : vector<2x8x1xf32>
    %1242 = math.rsqrt %1241 : vector<2x8x1xf32>
    %1243 = vector.broadcast %1242 : vector<2x8x1xf32> to vector<2x8x32xf32>
    %1244 = arith.mulf %1234, %1243 : vector<2x8x32xf32>
    %c3728_385 = arith.constant 3728 : index
    %c0_386 = arith.constant 0 : index
    %1245 = vector.load %arg3[%c3728_385, %c0_386] : memref<3784x128xf32, #tpu.memory_space<vmem>>, vector<1x32xf32>
    %1246 = vector.shape_cast %1245 : vector<1x32xf32> to vector<1x1x32xf32>
    %1247 = vector.broadcast %1246 : vector<1x1x32xf32> to vector<2x8x32xf32>
    %1248 = arith.mulf %1244, %1247 : vector<2x8x32xf32>
    %c3736_387 = arith.constant 3736 : index
    %c0_388 = arith.constant 0 : index
    %1249 = vector.load %arg3[%c3736_387, %c0_388] : memref<3784x128xf32, #tpu.memory_space<vmem>>, vector<1x32xf32>
    %1250 = vector.shape_cast %1249 : vector<1x32xf32> to vector<1x1x32xf32>
    %1251 = vector.broadcast %1250 : vector<1x1x32xf32> to vector<2x8x32xf32>
    %1252 = arith.addf %1248, %1251 : vector<2x8x32xf32>
    %1253 = vector.shape_cast %1252 : vector<2x8x32xf32> to vector<16x32xf32>
    %c3744_389 = arith.constant 3744 : index
    %c0_390 = arith.constant 0 : index
    %1254 = vector.load %arg3[%c3744_389, %c0_390] : memref<3784x128xf32, #tpu.memory_space<vmem>>, vector<32x128xf32>
    %cst_391 = arith.constant dense<0.000000e+00> : vector<16x128xf32>
    %1255 = tpu.matmul %1253, %1254, %cst_391 {dimension_numbers = #tpu.dot_dimension_numbers<[1], [0], [0], [1], [0, 0, 1, 1], [], []>} : vector<16x32xf32>, vector<32x128xf32>, vector<16x128xf32> -> vector<16x128xf32>
    %c3776_392 = arith.constant 3776 : index
    %c0_393 = arith.constant 0 : index
    %1256 = vector.load %arg3[%c3776_392, %c0_393] : memref<3784x128xf32, #tpu.memory_space<vmem>>, vector<1x128xf32>
    %1257 = vector.broadcast %1256 : vector<1x128xf32> to vector<16x128xf32>
    %1258 = arith.addf %1255, %1257 : vector<16x128xf32>
    %1259 = vector.shape_cast %1258 : vector<16x128xf32> to vector<2x8x128xf32>
    %1260 = arith.subf %1063, %1259 : vector<2x8x128xf32>
    %cst_394 = arith.constant 2.000000e+00 : f32
    %1261 = vector.broadcast %cst_394 : f32 to vector<2x8x128xf32>
    %1262 = arith.mulf %1261, %1260 : vector<2x8x128xf32>
    %1263 = arith.addf %1259, %1262 : vector<2x8x128xf32>
    %c0_395 = arith.constant 0 : index
    %c0_396 = arith.constant 0 : index
    %c0_397 = arith.constant 0 : index
    %1264 = vector.load %arg5[%c0_395, %c0_396, %c0_397] : memref<2x8x128xf32, #tpu.memory_space<vmem>>, vector<2x8x128xf32>
    tpu.vector_store %arg5[%c0_395, %c0_396, %c0_397], %1263 {strides = array<i32>} : memref<2x8x128xf32, #tpu.memory_space<vmem>>, vector<2x8x128xf32>,
    return
  }
}

</mosaic_0001>

<bundles_post_ra>
// kernel: run.1
= control target key start
LH: loop header
LB: loop body
LE: loop exit
PB: predicated region body
PF: predicated region fallthrough
CT: control target
= control target key end

     0   :  { %10 = vsyncpa [#allocation3], 0  ;;  %s9603_s0 = inlined_call_operand.hbm [shape: s32[2,8], index: 0, kind: input, shape index: {}]   ;;  %s9604_s1 = inlined_call_operand.vmem [shape: f32[2,1], index: 1, kind: input, shape index: {}]   ;;  %s9605_s2 = inlined_call_operand.hbm [shape: f32[2,16], index: 2, kind: input, shape index: {}]   ;;  %s9606_s3 = inlined_call_operand.hbm [shape: f32[3784,128], index: 3, kind: input, shape index: {}]   ;;  %s9607_s4 = inlined_call_operand.hbm [shape: f32[832,512], index: 4, kind: input, shape index: {}]   ;;  %s9608_s5 = inlined_call_operand.hbm [shape: f32[2,8,128], index: 5, kind: output, shape index: {}]  }
   0x1   :  { %11 = vsyncpa [#allocation6], 0 }
   0x2   :  { %12 = vsyncpa [#allocation9], 0  ;;  %s32_s20 = sshll.u32 %s9605_s2, 4  ;;  %s33_s20 = int_to_ptr.hbm [resolvable:$true] %s32_s20 }
   0x3   :  { %13 = vsyncpa [#allocation4], 0  ;;  %s8276_s21 = smov [#allocation5]   ;;  %s19_s25 = sshll.u32 %s9603_s0, 4  ;;  %s20_s25 = int_to_ptr.hbm [resolvable:$true] %s19_s25 }
   0x4   :  { %s34_s22 = sshll.u32 %s8276_s21, 4  ;;  %s8277_s26 = smov [#allocation2]   ;;  %s35_s22 = int_to_ptr.vmem [resolvable:$true] %s34_s22 }
   0x5   :  { %37 = dma.hbm_to_vmem [thread:$0]  %s33_s20, 32, %s35_s22, [#allocation6]  }
   0x6   :  { %s21_s27 = sshll.u32 %s8277_s26, 4  ;;  %s42_s30 = sshll.u32 %s9606_s3, 4  ;;  %s22_s27 = int_to_ptr.vmem [resolvable:$true] %s21_s27  ;;  %s43_s30 = int_to_ptr.hbm [resolvable:$true] %s42_s30 }
   0x7   :  { %24 = dma.hbm_to_vmem [thread:$0]  %s20_s25, 32, %s22_s27, [#allocation3]  }
   0x8   :  { %s8278_s2 = smov [#allocation7]   ;;  %s55_s9 = sshll.u32 %s9607_s4, 4  ;;  %s56_s9 = int_to_ptr.hbm [resolvable:$true] %s55_s9 }
   0x9   :  { %s44_s6 = sshll.u32 %s8278_s2, 4  ;;  %s8279_s10 = smov 128   ;;  %s45_s6 = int_to_ptr.vmem [resolvable:$true] %s44_s6 }
   0xa   :  { %s8280_s0 = smov 8   ;;  %s8281_s11 = smov [#allocation8]  }
   0xb   :  { %50 = dma.hbm_to_vmem [thread:$0]  %s43_s30, 60544, %s45_s6, [#allocation6], %s8279_s10, %s8279_s10, %s8280_s0  }
   0xc   :  { %s57_s12 = sshll.u32 %s8281_s11, 4  ;;  %s8282_s3 = smov 512   ;;  %s58_s12 = int_to_ptr.vmem [resolvable:$true] %s57_s12 }
   0xd   :  { %s8283_s13 = smov 32  }
   0xe   :  { %63 = dma.hbm_to_vmem [thread:$0]  %s56_s9, 53248, %s58_s12, [#allocation9], %s8282_s3, %s8282_s3, %s8283_s13  }
   0xf   :  { %8268 = dma.done.wait [#allocation3], 32  }
  0x10   :  { %8269 = vsyncadd [#allocation3], 4294967264 }
  0x11   :  { %8270 = dma.done.wait [#allocation6], 60576  }
  0x12   :  { %8271 = vsyncadd [#allocation6], 4294906720 }
  0x13   :  { %8272 = dma.done.wait [#allocation9], 53248  }
  0x14   :  { %8273 = vsyncadd [#allocation9], 4294914048  ;;  %v81_v0 = vlaneseq  ;;  %v8284_v1 = vmov 0   ;;  %v149_v3 = vld [vmem:[%s9604_s1] sm:$0x3]  ;;  %v117_v7 = vld [vmem:[#allocation7 + $0x70] sm:$0xff] }
  0x15   :  { %7737 = vset.pattern.permute.xlu1 %v8284_v1  ;;  %v80_v4 = vld [vmem:[#allocation2] sm:$0x3]  ;;  %v116_v8 = vld [vmem:[#allocation7 + $0x68] sm:$0xff]  ;;  %v115_v10 = vld [vmem:[#allocation7 + $0x60] sm:$0xff]  ;;  %v8285_v34 = vmov 1.0   ;;  %s8292_s1 = smov 16  }
  0x16   :  { %v85_v2 = vshrl.u32 %v81_v0, 7  ;;  %v118_v5 = vld [vmem:[#allocation7 + $0x78] sm:$0xff]  ;;  %152 = vperm.xlu1 %7737, %v149_v3   ;;  %v83_v6 = vperm.slane %v80_v4, 0  ;;  %v90_v9 = vperm.slane %v80_v4, 1  ;;  %v113_v12 = vld [vmem:[#allocation7 + $0x50] sm:$0xff]  ;;  %v112_v13 = vld [vmem:[#allocation7 + $0x48] sm:$0xff] }
  0x17   :  { %119 = vmatpush.msra.mxu0 %v118_v5  ;;  %v114_v11 = vld [vmem:[#allocation7 + $0x58] sm:$0xff]  ;;  %v111_v14 = vld [vmem:[#allocation7 + $0x40] sm:$0xff]  ;;  %v109_v16 = vld [vmem:[#allocation7 + $0x30] sm:$0xff]  ;;  %v82_v23 = vand.u32 127, %v81_v0  ;;  %v8286_v44 = vmov 2102212464  }
  0x18   :  { %7736 = vset.pattern.permute.xlu0 %v85_v2  ;;  %v110_v15 = vld [vmem:[#allocation7 + $0x38] sm:$0xff]  ;;  %v108_v17 = vld [vmem:[#allocation7 + $0x28] sm:$0xff]  ;;  %v107_v18 = vld [vmem:[#allocation7 + $0x20] sm:$0xff]  ;;  %v8287_v46 = vmov 920167782   ;;  %s8294_s15 = smov 112  }
  0x19   :  { %120 = vmatpush.msra.mxu0 %v117_v7  ;;  %v106_v19 = vld [vmem:[#allocation7 + $0x18] sm:$0xff]  ;;  %v105_v20 = vld [vmem:[#allocation7 + $0x10] sm:$0xff]  ;;  %v104_v21 = vld [vmem:[#allocation7 + $0x8] sm:$0xff]  ;;  %v145_v24 = vcvt.s32.f32 %v82_v23  ;;  %v8288_v48 = vmov 683565275   ;;  %s8295_s16 = smov 96  }
  0x1a   :  { %v103_v22 = vld [vmem:[#allocation7] sm:$0xff]  ;;  %v8289_v50 = vmov 2475754826   ;;  %v8290_v52 = vmov 2131351028   ;;  %s8296_s17 = smov 64  }
  0x1b   :  { %121 = vmatpush.msra.mxu0 %v116_v8  ;;  %v146_v25 = vmul.f32 -0.5756463, %v145_v24  ;;  %v8291_v55 = vmov 1326507024   ;;  %s8299_s18 = smov [#allocation10]   ;;  %s7513_s22 = sshll.u32 %s9608_s5, 4  ;;  %s7514_s22 = int_to_ptr.hbm [resolvable:$true] %s7513_s22 }
  0x1c   :  { %s7511_s19 = sshll.u32 %s8299_s18, 4  ;;  %s7512_s19 = int_to_ptr.vmem [resolvable:$true] %s7511_s19 }
  0x1d   :  { %122 = vmatpush.msra.mxu0 %v115_v10  ;;  %v147_v26 = vmul.f32 1.442695, %v146_v25 }
  0x1f   :  { %123 = vmatpush.msra.mxu0 %v114_v11  ;;  %7847 = vpow2.f32 %v147_v26 }
  0x20   :  { %88 = vperm.xlu0 %7736, %v83_v6  }
  0x21   :  { %124 = vmatpush.msra.mxu0 %v113_v12 }
  0x23   :  { %125 = vmatpush.msra.mxu0 %v112_v13 }
  0x25   :  { %126 = vmatpush.msra.mxu0 %v111_v14  ;;  %v7848_v27 = vpop.eup %7847 }
  0x27   :  { %127 = vmatpush.msra.mxu0 %v110_v15 }
  0x28   :  { %95 = vperm.xlu0 %7736, %v90_v9  }
  0x29   :  { %128 = vmatpush.msra.mxu0 %v109_v16 }
  0x2b   :  { %129 = vmatpush.msra.mxu0 %v108_v17 }
  0x2d   :  { %130 = vmatpush.msra.mxu0 %v107_v18 }
  0x2f   :  { %131 = vmatpush.msra.mxu0 %v106_v19 }
  0x30   :  { %7763 = vset.pattern.permute.xlu0 %v8284_v1 }
  0x31   :  { %132 = vmatpush.msra.mxu0 %v105_v20 }
  0x33   :  { %133 = vmatpush.msra.mxu0 %v104_v21 }
  0x35   :  { %134 = vmatpush.msra.mxu0 %v103_v22 }
  0x88   :  { %v153_v28 = vpop.permute.xlu1 %152 }
  0x89   :  { %v8351_v29 = vmul.f32 %v7848_v27, %v153_v28 }
  0x8b   :  { %v159_v30 = vand.u32 2139095040, %v8351_v29  ;;  %v156_v33 = vand.u32 2147483647, %v8351_v29  ;;  %vm158_vm14 = vcmp.lt.s32.totalorder %v8351_v29, 0 }
  0x8d   :  { %v160_v32 = vshrl.u32 %v159_v30, 23  ;;  %v163_v37 = vand.u32 8388607, %v156_v33  ;;  %vm157_vm15 = vcmp.le.f32.partialorder %v156_v33, 0.7853982 }
  0x8f   :  { %v7532_v35 = vadd.s32 4294967169, %v160_v32  ;;  %v164_v41 = vor.u32 8388608, %v163_v37 }
  0x91   :  { %v166_v36 = vadd.s32 1, %v7532_v35  ;;  %v8359_v58 = vshll.u32 %v164_v41, 8 }
  0x92   :  { %v89_v31 = vpop.permute.xlu0 %88 }
  0x93   :  { %vm97_vm0 = vcmp.eq.s32.totalorder %v89_v31, %v82_v23  ;;  %vm167_vm1 = vcmp.gt.s32.totalorder %v166_v36, 0  ;;  %v205_v5 = vand.u32 65535, %v8359_v58  ;;  %v206_v9 = vshrl.u32 %v8359_v58, 16 }
  0x94   :  { %7530 = vmatmul.msk.f32.vlgmr.msra.gmra.mxu0 %vm97_vm0, %v8285_v34  ;;  %v168_v38 = vsel %vm167_vm1, %v166_v36, 0 }
  0x95   :  { %v170_v40 = vand.u32 31, %v168_v38  ;;  %v8357_v42 = vshrl.u32 %v168_v38, 5 }
  0x97   :  { %v171_v43 = vsub.s32 32, %v170_v40  ;;  %v182_v45 = vshll.u32 %v8286_v44, %v170_v40  ;;  %v185_v47 = vshll.u32 %v8287_v46, %v170_v40  ;;  %v173_v49 = vshll.u32 %v8288_v48, %v170_v40 }
  0x98   :  { %v176_v51 = vshll.u32 %v8289_v50, %v170_v40  ;;  %v179_v53 = vshll.u32 %v8290_v52, %v170_v40  ;;  %vm191_vm3 = vcmp.lt.s32.totalorder %v8357_v42, 4  ;;  %vm188_vm4 = vcmp.lt.s32.totalorder %v8357_v42, 1 }
  0x99   :  { %v183_v54 = vshrl.u32 %v8287_v46, %v171_v43  ;;  %v186_v56 = vshrl.u32 %v8291_v55, %v171_v43  ;;  %v174_v57 = vshrl.u32 %v8289_v50, %v171_v43  ;;  %v177_v59 = vshrl.u32 %v8290_v52, %v171_v43 }
  0x9a   :  { %v96_v39 = vpop.permute.xlu0 %95  ;;  %v180_v60 = vshrl.u32 %v8286_v44, %v171_v43  ;;  %vm190_vm5 = vcmp.lt.s32.totalorder %v8357_v42, 3  ;;  %vm189_vm6 = vcmp.lt.s32.totalorder %v8357_v42, 2  ;;  %v172_v17 = vshrl.u32 %v8288_v48, %v171_v43 }
  0x9b   :  { %vm98_vm2 = vcmp.eq.s32.totalorder %v96_v39, %v82_v23  ;;  %v184_v61 = vor.u32 %v183_v54, %v182_v45  ;;  %v187_v62 = vor.u32 %v186_v56, %v185_v47  ;;  %v175_v63 = vor.u32 %v174_v57, %v173_v49 }
  0x9c   :  { %7531 = vmatmul.msk.f32.gmra.mxu0 %vm98_vm2, %v8285_v34  ;;  %v178_v0 = vor.u32 %v177_v59, %v176_v51  ;;  %v181_v2 = vor.u32 %v180_v60, %v179_v53 }
  0x9d   :  { %v197_v3 = vsel %vm191_vm3, %v184_v61, 920167782  ;;  %v201_v4 = vsel %vm191_vm3, %v187_v62, 1326507024  ;;  %v192_v32 = vsel %vm188_vm4, %v172_v17, %v175_v63 }
  0x9e   :  { %v196_v6 = vsel %vm188_vm4, %v175_v63, %v178_v0  ;;  %v198_v7 = vsel %vm190_vm5, %v181_v2, %v197_v3  ;;  %v200_v8 = vsel %vm188_vm4, %v178_v0, %v181_v2  ;;  %v202_v11 = vsel %vm190_vm5, %v184_v61, %v201_v4 }
  0x9f   :  { %v199_v10 = vsel %vm189_vm6, %v196_v6, %v198_v7  ;;  %v203_v12 = vsel %vm189_vm6, %v200_v8, %v202_v11  ;;  %v193_v24 = vsel %vm191_vm3, %v181_v2, 2102212464 }
  0xa0   :  { %v229_v13 = vand.u32 65535, %v199_v10  ;;  %v230_v14 = vshrl.u32 %v199_v10, 16  ;;  %v207_v15 = vand.u32 65535, %v203_v12  ;;  %v208_v16 = vshrl.u32 %v203_v12, 16  ;;  %v554_v12 = vld [vmem:[#allocation7 + $0xf0] sm:$0xff] }
  0xa1   :  { %v194_v35 = vsel %vm190_vm5, %v178_v0, %v193_v24  ;;  %575 = vmatpush.msra.mxu3 %v554_v12 }
  0xa2   :  { %v231_v18 = vmul.u32 %v229_v13, %v205_v5  ;;  %v232_v19 = vmul.u32 %v230_v14, %v205_v5  ;;  %v233_v20 = vmul.u32 %v229_v13, %v206_v9  ;;  %v209_v21 = vmul.u32 %v207_v15, %v205_v5  ;;  %v553_v13 = vld [vmem:[#allocation7 + $0xe8] sm:$0xff] }
  0xa3   :  { %v210_v22 = vmul.u32 %v208_v16, %v205_v5  ;;  %v211_v23 = vmul.u32 %v207_v15, %v206_v9  ;;  %v234_v25 = vmul.u32 %v230_v14, %v206_v9  ;;  %v212_v28 = vmul.u32 %v208_v16, %v206_v9  ;;  %576 = vmatpush.msra.mxu3 %v553_v13 }
  0xa4   :  { %v235_v26 = vshll.u32 %v232_v19, 16  ;;  %v237_v27 = vshll.u32 %v233_v20, 16  ;;  %v236_v39 = vshrl.u32 %v232_v19, 16  ;;  %v238_v46 = vshrl.u32 %v233_v20, 16 }
  0xa5   :  { %v213_v30 = vshll.u32 %v210_v22, 16  ;;  %v215_v31 = vshll.u32 %v211_v23, 16  ;;  %v214_v41 = vshrl.u32 %v210_v22, 16  ;;  %v216_v48 = vshrl.u32 %v211_v23, 16 }
  0xa6   :  { %vm239_vm7 = vc.u32 %v231_v18, %v235_v26  ;;  %v241_v34 = vadd.s32 %v235_v26, %v231_v18  ;;  %v195_v50 = vsel %vm189_vm6, %v192_v32, %v194_v35  ;;  %vm299_vm6 = vweird.f32 %v8351_v29 }
  0xa7   :  { %vm217_vm8 = vc.u32 %v209_v21, %v213_v30  ;;  %v219_v36 = vadd.s32 %v213_v30, %v209_v21  ;;  %v240_v37 = vsel %vm239_vm7, 1, %v8284_v1  ;;  %v249_v56 = vmul.u32 %v8359_v58, %v195_v50 }
  0xa8   :  { %v218_v38 = vsel %vm217_vm8, 1, %v8284_v1  ;;  %v242_v40 = vadd.s32 %v240_v37, %v234_v25  ;;  %vm243_vm9 = vc.u32 %v241_v34, %v237_v27  ;;  %v245_v53 = vadd.s32 %v241_v34, %v237_v27 }
  0xa9   :  { %v220_v43 = vadd.s32 %v218_v38, %v212_v28  ;;  %vm221_vm10 = vc.u32 %v219_v36, %v215_v31  ;;  %v244_v44 = vsel %vm243_vm9, 1, %v8284_v1  ;;  %vm477_vm7 = vcmask 261120  }
  0xaa   :  { %v222_v45 = vsel %vm221_vm10, 1, %v8284_v1  ;;  %v246_v47 = vadd.s32 %v244_v44, %v242_v40  ;;  %vm469_vm8 = vcmask 130048  }
  0xab   :  { %v224_v49 = vadd.s32 %v222_v45, %v220_v43 }
  0xac   :  { %v247_v51 = vadd.s32 %v246_v47, %v236_v39 }
  0xad   :  { %v225_v52 = vadd.s32 %v224_v49, %v214_v41 }
  0xae   :  { %v248_v54 = vadd.s32 %v247_v51, %v238_v46 }
  0xaf   :  { %v226_v55 = vadd.s32 %v225_v52, %v216_v48 }
  0xb0   :  { %v252_v57 = vadd.s32 1, %v248_v54 }
  0xb1   :  { %vm251_vm11 = vc.u32 %v226_v55, %v245_v53  ;;  %v250_v4 = vadd.s32 %v245_v53, %v226_v55  ;;  %v552_v53 = vld [vmem:[#allocation7 + $0xe0] sm:$0xff] }
  0xb2   :  { %v253_v59 = vsel %vm251_vm11, %v252_v57, %v248_v54  ;;  %577 = vmatpush.msra.mxu3 %v552_v53  ;;  %v551_v54 = vld [vmem:[#allocation7 + $0xd8] sm:$0xff]  ;;  %v474_v55 = vld [vmem:[#allocation7 + $0xa0] sm:$0xff]  ;;  %v472_v57 = vld [vmem:[#allocation7 + $0x90] sm:$0xff] }
  0xb3   :  { %v254_v60 = vadd.s32 %v253_v59, %v249_v56  ;;  %v473_v56 = vld [vmem:[#allocation7 + $0x98] sm:$0xff]  ;;  %493 = vmatpush.msra.mxu1 %v474_v55  ;;  %v646_v53 = vld [vmem:[#allocation7 + $0x128] sm:$0xff]  ;;  %v645_v55 = vld [vmem:[#allocation7 + $0x120] sm:$0xff] }
  0xb4   :  { %578 = vmatpush.msra.mxu3 %v551_v54  ;;  %v7766_v54 = vld [vmem:[#allocation7 + $0xd0] ss:$0 sm:$0xff] }
  0xb5   :  { %v255_v61 = vadd.s32 536870912, %v254_v60  ;;  %494 = vmatpush.msra.mxu1 %v473_v56 }
  0xb7   :  { %v256_v1 = vshrl.u32 %v255_v61, 30  ;;  %495 = vmatpush.msra.mxu1 %v472_v57 }
  0xb9   :  { %v257_v62 = vshll.u32 %v256_v1, 30  ;;  %v280_v19 = vsub.s32 4, %v256_v1 }
  0xbb   :  { %v258_v63 = vsub.s32 %v254_v60, %v257_v62  ;;  %v281_v23 = vsel %vm158_vm14, %v280_v19, %v256_v1  ;;  %v471_v62 = vld [vmem:[#allocation7 + $0x88] sm:$0xff] }
  0xbc   :  { %v283_v26 = vsel %vm157_vm15, 0, %v281_v23  ;;  %496 = vmatpush.msra.mxu1 %v471_v62 }
  0xbd   :  { %vm259_vm12 = vcmp.lt.s32.totalorder %v258_v63, 0  ;;  %v260_v0 = vsub.s32 0, %v258_v63  ;;  %v300_v30 = vadd.s32 3, %v283_v26  ;;  %v455_v37 = vand.u32 3, %v283_v26 }
  0xbf   :  { %v261_v2 = vsel %vm259_vm12, %v260_v0, %v258_v63  ;;  %v301_v36 = vand.u32 3, %v300_v30  ;;  %vm460_vm1 = vcmp.eq.s32.totalorder %v455_v37, 2  ;;  %vm456_vm3 = vcmp.lt.s32.totalorder %v455_v37, 2  ;;  %v1044_v30 = vld [vmem:[#allocation7 + $0x180] sm:$0xff] }
  0xc0   :  { %v262_v42 = vclz %v261_v2  ;;  %vm457_vm4 = vcmp.eq.s32.totalorder %v455_v37, 0  ;;  %v7764_v2 = vld [vmem:[#allocation7 + $0xf8] ss:$0 sm:$0xff] }
  0xc1   :  { %vm306_vm0 = vcmp.eq.s32.totalorder %v301_v36, 2  ;;  %vm303_vm2 = vcmp.eq.s32.totalorder %v301_v36, 0  ;;  %vm302_vm5 = vcmp.lt.s32.totalorder %v301_v36, 2 }
  0xc2   :  { %v7533_v3 = vadd.s32 4294967294, %v262_v42 }
  0xc4   :  { %vm7534_vm13 = vcmp.lt.s32.totalorder %v7533_v3, 0 }
  0xc5   :  { %v265_v5 = vsel %vm7534_vm13, 0, %v7533_v3 }
  0xc6   :  { %v266_v6 = vsub.s32 32, %v265_v5  ;;  %v267_v7 = vshll.u32 %v258_v63, %v265_v5  ;;  %v270_v8 = vsub.s32 4294967266, %v265_v5 }
  0xc8   :  { %v268_v58 = vshrl.u32 %v250_v4, %v266_v6  ;;  %v271_v9 = vadd.s32 127, %v270_v8  ;;  %v524_v8 = vld [vmem:[#allocation7 + $0xc8] sm:$0xff] }
  0xc9   :  { %542 = vmatpush.msra.mxu2 %v524_v8 }
  0xca   :  { %v269_v10 = vor.u32 %v268_v58, %v267_v7  ;;  %v272_v11 = vshll.u32 %v271_v9, 23  ;;  %v523_v58 = vld [vmem:[#allocation7 + $0xc0] sm:$0xff]  ;;  %v7765_v9 = vld [vmem:[#allocation7 + $0xa8] ss:$0 sm:$0xff] }
  0xcb   :  { %543 = vmatpush.msra.mxu2 %v523_v58  ;;  %v7767_v58 = vld [vmem:[#allocation7 + $0x100] ss:$0 sm:$0xff] }
  0xcc   :  { %v273_v14 = vor.u32 4788187, %v272_v11  ;;  %v276_v15 = vcvt.s32.f32 %v269_v10  ;;  %v522_v10 = vld [vmem:[#allocation7 + $0xb8] sm:$0xff]  ;;  %v521_v11 = vld [vmem:[#allocation7 + $0xb0] sm:$0xff] }
  0xcd   :  { %544 = vmatpush.msra.mxu2 %v522_v10 }
  0xce   :  { %v274_v16 = vand.u32 2147483647, %v273_v14 }
  0xcf   :  { %545 = vmatpush.msra.mxu2 %v521_v11 }
  0xd0   :  { %v277_v17 = vmul.f32 %v276_v15, %v274_v16 }
  0xd2   :  { %v278_v18 = vxor.u32 2147483648, %v277_v17 }
  0xd4   :  { %v279_v20 = vsel %vm158_vm14, %v278_v18, %v277_v17  ;;  %v8293_v17 = vmov 32.0  }
  0xd5   :  { %v282_v21 = vsel %vm157_vm15, %v8351_v29, %v279_v20  ;;  %v142_v29 = vld [vmem:[#allocation7 + $0x80] sm:$0xff] }
  0xd6   :  { %v284_v22 = vmul.f32 %v282_v21, %v282_v21 }
  0xd8   :  { %v285_v24 = vmul.f32 -0.001358992, %v284_v22  ;;  %v292_v25 = vmul.f32 -0.00019511016, %v284_v22 }
  0xda   :  { %v286_v27 = vadd.f32 0.041655596, %v285_v24  ;;  %v293_v28 = vadd.f32 0.008332121, %v292_v25 }
  0xdc   :  { %v287_v31 = vmul.f32 %v286_v27, %v284_v22  ;;  %v294_v32 = vmul.f32 %v293_v28, %v284_v22  ;;  %v1045_v28 = vld [vmem:[#allocation7 + $0x188] sm:$0xff] }
  0xdd   :  { %1063 = vmatpush.msrb.mxu0 %v1045_v28 }
  0xde   :  { %v288_v34 = vadd.f32 -0.4999988, %v287_v31  ;;  %v295_v35 = vadd.f32 -0.16666654, %v294_v32 }
  0xdf   :  { %1064 = vmatpush.msrb.mxu0 %v1044_v30 }
  0xe0   :  { %v289_v33 = vmul.f32 %v288_v34, %v284_v22  ;;  %v296_v38 = vmul.f32 %v295_v35, %v284_v22 }
  0xe2   :  { %v290_v39 = vadd.f32 1.0, %v289_v33  ;;  %v297_v40 = vadd.f32 1.0, %v296_v38 }
  0xe4   :  { %v298_v41 = vmul.f32 %v297_v40, %v282_v21  ;;  %v307_v43 = vxor.u32 2147483648, %v290_v39 }
  0xe6   :  { %v304_v44 = vxor.u32 2147483648, %v298_v41  ;;  %v462_v45 = vsel %vm460_vm1, %v307_v43, %v298_v41  ;;  %v308_v46 = vsel %vm306_vm0, %v307_v43, %v298_v41 }
  0xe8   :  { %v459_v47 = vsel %vm457_vm4, %v290_v39, %v304_v44  ;;  %v305_v48 = vsel %vm303_vm2, %v290_v39, %v304_v44  ;;  %vm794_vm4 = vcmask 64512  }
  0xe9   :  { %v463_v49 = vsel %vm456_vm3, %v459_v47, %v462_v45  ;;  %v309_v50 = vsel %vm302_vm5, %v305_v48, %v308_v46 }
  0xea   :  { %v464_v51 = vsel %vm299_vm6, nan, %v463_v49  ;;  %v310_v52 = vsel %vm299_vm6, nan, %v309_v50  ;;  %v1043_v49 = vld [vmem:[#allocation7 + $0x178] sm:$0xff]  ;;  %v1042_v50 = vld [vmem:[#allocation7 + $0x170] sm:$0xff] }
  0xeb   :  { %466 = vrot.lane.b32.xlu1 %v464_v51, %s8292_s1  ;;  %1065 = vmatpush.msrb.mxu0 %v1043_v49  ;;  %v648_v51 = vld [vmem:[#allocation7 + $0x138] sm:$0xff] }
  0xec   :  { %669 = vmatpush.msrb.mxu2 %v648_v51 }
  0xed   :  { %1066 = vmatpush.msrb.mxu0 %v1042_v50 }
 0x111   :  { %v136_v59 = vpop.f32.mrf.mxu0 }
 0x112   :  { %v143_v60 = vadd.f32 %v142_v29, %v136_v59 }
 0x114   :  { %7541 = vmatmul.msk.f32.vlgmr.msra.gmra.mxu3 %vm477_vm7, %v143_v60 }
 0x119   :  { %v139_v61 = vpop.f32.mrf.mxu0 }
 0x11a   :  { %v144_v1 = vadd.f32 %v142_v29, %v139_v61 }
 0x11c   :  { %7542 = vmatmul.msk.f32.gmra.mxu3 %vm477_vm7, %v144_v1 }
 0x15d   :  { %v467_v63 = vpop.permute.xlu1 %466 }
 0x15e   :  { %v470_v0 = vsel %vm469_vm8, %v310_v52, %v467_v63  ;;  %v647_v52 = vld [vmem:[#allocation7 + $0x130] sm:$0xff] }
 0x15f   :  { %7538 = vmatmul.msk.f32.vlgmr.msra.gmra.mxu1 %vm477_vm7, %v470_v0  ;;  %670 = vmatpush.msrb.mxu2 %v647_v52 }
 0x161   :  { %671 = vmatpush.msrb.mxu2 %v646_v53 }
 0x163   :  { %672 = vmatpush.msrb.mxu2 %v645_v55 }
 0x197   :  { %v580_v42 = vpop.f32.mrf.mxu3 }
 0x198   :  { %v8406_v3 = vadd.f32 %v7764_v2, %v580_v42 }
 0x19a   :  { %v586_v4 = vsel %vm477_vm7, %v8406_v3, 0.0 }
 0x19b   :  { %587 = vadd.xlane.f32.xlu2 %v586_v4 }
 0x19f   :  { %v583_v5 = vpop.f32.mrf.mxu3 }
 0x1a0   :  { %v8410_v6 = vadd.f32 %v7764_v2, %v583_v5 }
 0x1a2   :  { %v589_v7 = vsel %vm477_vm7, %v8410_v6, 0.0 }
 0x1a3   :  { %590 = vadd.xlane.f32.xlu2 %v589_v7 }
 0x1dc   :  { %v498_v12 = vpop.f32.mrf.mxu1 }
 0x1dd   :  { %v499_v13 = vadd.f32 %v7765_v9, %v498_v12  ;;  %v7768_v12 = vld [vmem:[#allocation7 + $0x108] ss:$0 sm:$0xff] }
 0x1df   :  { %v7539_v14 = vmul.f32 -1.442695, %v499_v13 }
 0x1e1   :  { %7849 = vpow2.f32 %v7539_v14 }
 0x1e7   :  { %v7850_v15 = vpop.eup %7849 }
 0x1e8   :  { %v504_v16 = vadd.f32 1.0, %v7850_v15 }
 0x1ea   :  { %7851 = vrcp.f32 %v504_v16  ;;  %v516_v22 = vand.u32 2147483648, %v504_v16  ;;  %v514_v24 = vand.u32 2147483647, %v504_v16  ;;  %vm510_vm10 = vweird.f32 %v504_v16 }
 0x1eb   :  { %7853 = vrcp.f32 %v8293_v17 }
 0x1ec   :  { %v517_v27 = vor.u32 1.1754944e-38, %v516_v22  ;;  %vm515_vm12 = vcmp.eq.f32.partialorder %v514_v24, 8.507059e+37  ;;  %v7770_v22 = vld [vmem:[#allocation7 + $0x140] ss:$0 sm:$0xff] }
 0x1f0   :  { %v7852_v18 = vpop.eup %7851 }
 0x1f1   :  { %v506_v19 = vmul.f32 %v7852_v18, %v504_v16  ;;  %v7854_v20 = vpop.eup %7853  ;;  %vm511_vm9 = vweird.f32 %v7852_v18 }
 0x1f2   :  { %v593_v25 = vmul.f32 32.0, %v7854_v20  ;;  %vm512_vm11 = vmor %vm510_vm10, %vm511_vm9  ;;  %vm597_vm13 = vweird.f32 %v7854_v20 }
 0x1f3   :  { %v507_v21 = vsub.f32 1.0, %v506_v19 }
 0x1f4   :  { %v594_v34 = vsub.f32 1.0, %v593_v25 }
 0x1f5   :  { %v508_v23 = vmul.f32 %v7852_v18, %v507_v21 }
 0x1f6   :  { %v595_v36 = vmul.f32 %v7854_v20, %v594_v34 }
 0x1f7   :  { %v509_v26 = vadd.f32 %v7852_v18, %v508_v23 }
 0x1f8   :  { %v596_v37 = vadd.f32 %v7854_v20, %v595_v36 }
 0x1f9   :  { %v513_v31 = vsel %vm512_vm11, %v7852_v18, %v509_v26 }
 0x1fa   :  { %v518_v32 = vsel %vm515_vm12, %v517_v27, %v513_v31  ;;  %v8415_v33 = vsel %vm597_vm13, %v7854_v20, %v596_v37 }
 0x1fb   :  { %v520_v35 = vmul.f32 %v518_v32, %v499_v13 }
 0x1fd   :  { %7540 = vmatmul.msk.f32.vlgmr.msra.gmra.mxu2 %vm477_vm7, %v520_v35 }
 0x20e   :  { %v588_v38 = vpop.xlane.xlu2 %587 }
 0x20f   :  { %v599_v39 = vmul.f32 %v8415_v33, %v588_v38 }
 0x211   :  { %v601_v40 = vsub.f32 %v8406_v3, %v599_v39 }
 0x213   :  { %v603_v41 = vmul.f32 %v601_v40, %v601_v40 }
 0x215   :  { %v605_v43 = vsel %vm477_vm7, %v603_v41, 0.0 }
 0x216   :  { %606 = vadd.xlane.f32.xlu0 %v605_v43  ;;  %v591_v44 = vpop.xlane.xlu2 %590 }
 0x217   :  { %v600_v45 = vmul.f32 %v8415_v33, %v591_v44 }
 0x219   :  { %v602_v46 = vsub.f32 %v8410_v6, %v600_v45 }
 0x21b   :  { %v604_v47 = vmul.f32 %v602_v46, %v602_v46 }
 0x21d   :  { %v608_v48 = vsel %vm477_vm7, %v604_v47, 0.0 }
 0x21e   :  { %609 = vadd.xlane.f32.xlu1 %v608_v48 }
 0x280   :  { %v547_v56 = vpop.f32.mrf.mxu2 }
 0x281   :  { %v8423_v57 = vadd.f32 %v7766_v54, %v547_v56 }
 0x283   :  { %7559 = vmatmul.msk.f32.vlgmr.msrb.gmra.mxu0 %vm477_vm7, %v8423_v57 }
 0x289   :  { %v607_v29 = vpop.xlane.xlu0 %606 }
 0x28a   :  { %v611_v59 = vmul.f32 %v607_v29, %v8415_v33 }
 0x28c   :  { %v613_v60 = vadd.f32 1e-05, %v611_v59 }
 0x28e   :  { %7855 = vrsqrt.f32 %v613_v60  ;;  %vm621_vm15 = vweird.f32 %v613_v60 }
 0x291   :  { %v610_v61 = vpop.xlane.xlu1 %609 }
 0x292   :  { %v612_v1 = vmul.f32 %v610_v61, %v8415_v33 }
 0x294   :  { %v7856_v62 = vpop.eup %7855  ;;  %v614_v63 = vadd.f32 1e-05, %v612_v1 }
 0x295   :  { %v616_v0 = vmul.f32 %v7856_v62, %v613_v60  ;;  %vm622_vm14 = vweird.f32 %v7856_v62 }
 0x296   :  { %7857 = vrsqrt.f32 %v614_v63  ;;  %vm623_vm0 = vmor %vm621_vm15, %vm622_vm14  ;;  %vm631_vm2 = vweird.f32 %v614_v63 }
 0x297   :  { %v617_v2 = vmul.f32 %v7856_v62, %v616_v0 }
 0x299   :  { %v618_v42 = vmul.f32 0.5, %v617_v2 }
 0x29b   :  { %v619_v4 = vsub.f32 1.5, %v618_v42 }
 0x29c   :  { %v7858_v5 = vpop.eup %7857 }
 0x29d   :  { %v620_v7 = vmul.f32 %v7856_v62, %v619_v4  ;;  %v626_v8 = vmul.f32 %v7858_v5, %v614_v63  ;;  %vm632_vm1 = vweird.f32 %v7858_v5 }
 0x29e   :  { %vm633_vm3 = vmor %vm631_vm2, %vm632_vm1 }
 0x29f   :  { %v624_v9 = vsel %vm623_vm0, %v7856_v62, %v620_v7  ;;  %v627_v10 = vmul.f32 %v7858_v5, %v626_v8 }
 0x2a0   :  { %v635_v11 = vmul.f32 %v624_v9, %v601_v40 }
 0x2a1   :  { %v628_v13 = vmul.f32 0.5, %v627_v10 }
 0x2a2   :  { %v639_v14 = vmul.f32 %v7767_v58, %v635_v11 }
 0x2a3   :  { %v629_v15 = vsub.f32 1.5, %v628_v13 }
 0x2a4   :  { %v643_v16 = vadd.f32 %v7768_v12, %v639_v14 }
 0x2a5   :  { %v630_v17 = vmul.f32 %v7858_v5, %v629_v15 }
 0x2a6   :  { %7543 = vmatmul.msk.f32.vlgmr.msrb.gmra.mxu2 %vm477_vm7, %v643_v16 }
 0x2a7   :  { %v634_v18 = vsel %vm633_vm3, %v7858_v5, %v630_v17 }
 0x2a8   :  { %v636_v19 = vmul.f32 %v634_v18, %v602_v46 }
 0x2aa   :  { %v640_v20 = vmul.f32 %v7767_v58, %v636_v19 }
 0x2ac   :  { %v644_v21 = vadd.f32 %v7768_v12, %v640_v20 }
 0x2ae   :  { %7544 = vmatmul.msk.f32.gmra.mxu2 %vm477_vm7, %v644_v21 }
 0x329   :  { %v674_v23 = vpop.f32.mrf.mxu2 }
 0x32a   :  { %v675_v24 = vadd.f32 %v7770_v22, %v674_v23 }
 0x32c   :  { %682 = vrot.lane.b32.xlu2 %v675_v24, %s8294_s15 }
 0x331   :  { %v677_v25 = vpop.f32.mrf.mxu2 }
 0x332   :  { %v8432_v26 = vadd.f32 %v7770_v22, %v677_v25 }
 0x334   :  { %712 = vrot.lane.b32.xlu1 %v8432_v26, %s8295_s16  ;;  %684 = vrot.lane.b32.xlu2 %v8432_v26, %s8294_s15 }
 0x33c   :  { %686 = vrot.lane.b32.xlu2 %v675_v24, %s8295_s16 }
 0x386   :  { %v683_v27 = vpop.permute.xlu2 %682 }
 0x387   :  { %738 = vrot.lane.b32.xlu2 %v683_v27, %s8295_s16 }
 0x38e   :  { %v685_v28 = vpop.permute.xlu2 %684 }
 0x38f   :  { %764 = vrot.lane.b32.xlu0 %v685_v28, %s8295_s16  ;;  %v7738_v63 = vpack.i.bf16 %v685_v28, %v683_v27 }
 0x396   :  { %v687_v30 = vpop.permute.xlu2 %686 }
 0x397   :  { %7545 = vmatpush.xpose.msk.msra.mxu2 %vm469_vm8, %v687_v30 }
 0x39a   :  { %7546 = vmatmul.msk.f32.vlgmr.msra.gmra.mxu2 %vm469_vm8, %v675_v24 }
 0x3a6   :  { %v713_v31 = vpop.permute.xlu1 %712 }
 0x3a7   :  { %7547 = vmatpush.xpose.msk.msrb.mxu2 %vm469_vm8, %v713_v31 }
 0x3aa   :  { %7548 = vmatmul.msk.f32.vlgmr.msrb.gmra.mxu2 %vm469_vm8, %v8432_v26 }
 0x3e1   :  { %v739_v32 = vpop.permute.xlu2 %738 }
 0x3e2   :  { %7549 = vmatpush.xpose.msk.msrb.mxu3 %vm469_vm8, %v739_v32 }
 0x3e5   :  { %7550 = vmatmul.msk.f32.vlgmr.msrb.gmra.mxu3 %vm469_vm8, %v683_v27 }
 0x401   :  { %v765_v34 = vpop.permute.xlu0 %764 }
 0x402   :  { %7551 = vmatpush.xpose.msk.msrb.mxu1 %vm469_vm8, %v765_v34 }
 0x405   :  { %7552 = vmatmul.msk.f32.vlgmr.msrb.gmra.mxu1 %vm469_vm8, %v685_v28 }
 0x41d   :  { %v709_v35 = vpop.f32.mrf.mxu2 }
 0x41e   :  { %v790_v36 = vmul.f32 0.25, %v709_v35 }
 0x420   :  { %v795_v37 = vsel %vm794_vm4, %v790_v36, -inf }
 0x421   :  { %796 = vmax.xlane.f32.xlu2 %v795_v37 }
 0x42d   :  { %v735_v38 = vpop.f32.mrf.mxu2 }
 0x42e   :  { %v791_v39 = vmul.f32 0.25, %v735_v38 }
 0x430   :  { %v798_v40 = vsel %vm794_vm4, %v791_v39, -inf }
 0x431   :  { %799 = vmax.xlane.f32.xlu2 %v798_v40 }
 0x468   :  { %v761_v41 = vpop.f32.mrf.mxu3 }
 0x469   :  { %v792_v43 = vmul.f32 0.25, %v761_v41 }
 0x46b   :  { %v801_v44 = vsel %vm794_vm4, %v792_v43, -inf }
 0x46c   :  { %802 = vmax.xlane.f32.xlu0 %v801_v44 }
 0x482   :  { %v787_v45 = vpop.f32.mrf.mxu1 }
 0x483   :  { %v793_v46 = vmul.f32 0.25, %v787_v45 }
 0x485   :  { %v804_v47 = vsel %vm794_vm4, %v793_v46, -inf }
 0x486   :  { %805 = vmax.xlane.f32.xlu1 %v804_v47 }
 0x494   :  { %v797_v48 = vpop.xlane.xlu2 %796 }
 0x495   :  { %v807_v49 = vsub.f32 %v790_v36, %v797_v48 }
 0x497   :  { %v811_v50 = vmul.f32 1.442695, %v807_v49 }
 0x499   :  { %7859 = vpow2.f32 %v811_v50 }
 0x49f   :  { %v7860_v51 = vpop.eup %7859  ;;  %891 = vrot.lane.b32.xlu1 %v675_v24, %s8296_s17 }
 0x4a0   :  { %v819_v52 = vsel %vm794_vm4, %v7860_v51, 0.0 }
 0x4a1   :  { %820 = vadd.xlane.f32.xlu2 %v819_v52 }
 0x4a4   :  { %v800_v59 = vpop.xlane.xlu2 %799 }
 0x4a5   :  { %v808_v1 = vsub.f32 %v791_v39, %v800_v59 }
 0x4a7   :  { %v813_v0 = vmul.f32 1.442695, %v808_v1 }
 0x4df   :  { %v803_v53 = vpop.xlane.xlu0 %802 }
 0x4e0   :  { %v809_v54 = vsub.f32 %v792_v43, %v803_v53 }
 0x4e2   :  { %v815_v55 = vmul.f32 1.442695, %v809_v54 }
 0x4e4   :  { %7861 = vpow2.f32 %v815_v55 }
 0x4ea   :  { %v7862_v56 = vpop.eup %7861 }
 0x4eb   :  { %v825_v29 = vsel %vm794_vm4, %v7862_v56, 0.0 }
 0x4ec   :  { %826 = vadd.xlane.f32.xlu0 %v825_v29 }
 0x4f9   :  { %v806_v60 = vpop.xlane.xlu1 %805 }
 0x4fa   :  { %v810_v61 = vsub.f32 %v793_v46, %v806_v60 }
 0x4fc   :  { %v817_v62 = vmul.f32 1.442695, %v810_v61 }
 0x4fe   :  { %7863 = vpow2.f32 %v817_v62 }
 0x4ff   :  { %7865 = vpow2.f32 %v813_v0  ;;  %v1007_v0 = vld [vmem:[#allocation7 + $0x158] sm:$0xff] }
 0x500   :  { %7739 = vrot.lane.b32.xlu0 %v7738_v63, %s8296_s17  ;;  %v1008_v63 = vld [vmem:[#allocation7 + $0x160] sm:$0xff] }
 0x504   :  { %v8458_v2 = vpop.eup %7863 }
 0x505   :  { %v828_v42 = vsel %vm794_vm4, %v8458_v2, 0.0  ;;  %v8462_v4 = vpop.eup %7865 }
 0x506   :  { %829 = vadd.xlane.f32.xlu2 %v828_v42  ;;  %v822_v5 = vsel %vm794_vm4, %v8462_v4, 0.0 }
 0x50e   :  { %823 = vadd.xlane.f32.xlu2 %v822_v5 }
 0x511   :  { %v892_v7 = vpop.permute.xlu1 %891 }
 0x512   :  { %912 = vmatpush.msra.mxu2 %v892_v7  ;;  %v1005_v7 = vld [vmem:[#allocation7 + $0x148] sm:$0xff] }
 0x514   :  { %v821_v8 = vpop.xlane.xlu2 %820 }
 0x515   :  { %7867 = vrcp.f32 %v821_v8  ;;  %v842_v11 = vand.u32 2147483648, %v821_v8  ;;  %v840_v13 = vand.u32 2147483647, %v821_v8  ;;  %vm836_vm6 = vweird.f32 %v821_v8 }
 0x517   :  { %v843_v15 = vor.u32 1.1754944e-38, %v842_v11  ;;  %vm841_vm10 = vcmp.eq.f32.partialorder %v840_v13, 8.507059e+37  ;;  %v7769_v11 = vld [vmem:[#allocation7 + $0x190] ss:$0 sm:$0xff]  ;;  %v7771_v13 = vld [vmem:[#allocation7 + $0x168] ss:$0 sm:$0xff] }
 0x51b   :  { %v7868_v58 = vpop.eup %7867 }
 0x51c   :  { %v832_v9 = vmul.f32 %v7868_v58, %v821_v8  ;;  %vm837_vm5 = vweird.f32 %v7868_v58 }
 0x51d   :  { %vm838_vm9 = vmor %vm836_vm6, %vm837_vm5 }
 0x51e   :  { %v833_v10 = vsub.f32 1.0, %v832_v9 }
 0x520   :  { %v834_v12 = vmul.f32 %v7868_v58, %v833_v10 }
 0x522   :  { %v835_v14 = vadd.f32 %v7868_v58, %v834_v12  ;;  %v1068_v12 = vpop.f32.mrf.mxu0 }
 0x524   :  { %v839_v16 = vsel %vm838_vm9, %v7868_v58, %v835_v14  ;;  %v1069_v14 = vadd.f32 %v7769_v11, %v1068_v12  ;;  %v1196_v11 = vld [vmem:[#allocation7 + $0x220] sm:$0xff]  ;;  %v1195_v12 = vld [vmem:[#allocation7 + $0x218] sm:$0xff] }
 0x525   :  { %v844_v17 = vsel %vm841_vm10, %v843_v15, %v839_v16 }
 0x526   :  { %917 = vrot.lane.b32.xlu2 %v8432_v26, %s8296_s17  ;;  %v845_v18 = vmul.f32 %v7860_v51, %v844_v17  ;;  %v1073_v17 = vperm.slane %v1069_v14, 0 }
 0x528   :  { %7553 = vmatmul.msk.f32.vlgmr.msra.gmra.mxu2 %vm794_vm4, %v845_v18 }
 0x55f   :  { %v827_v19 = vpop.xlane.xlu0 %826 }
 0x560   :  { %7869 = vrcp.f32 %v827_v19  ;;  %v872_v24 = vand.u32 2147483648, %v827_v19  ;;  %v870_v25 = vand.u32 2147483647, %v827_v19  ;;  %vm866_vm12 = vweird.f32 %v827_v19 }
 0x562   :  { %v873_v30 = vor.u32 1.1754944e-38, %v872_v24  ;;  %vm871_vm14 = vcmp.eq.f32.partialorder %v870_v25, 8.507059e+37 }
 0x566   :  { %v7870_v20 = vpop.eup %7869 }
 0x567   :  { %v862_v21 = vmul.f32 %v7870_v20, %v827_v19  ;;  %vm867_vm11 = vweird.f32 %v7870_v20 }
 0x568   :  { %vm868_vm13 = vmor %vm866_vm12, %vm867_vm11 }
 0x569   :  { %v863_v22 = vsub.f32 1.0, %v862_v21  ;;  %v1072_v21 = vrot.slane %v1069_v14, 1  ;;  %v1193_v14 = vld [vmem:[#allocation7 + $0x208] sm:$0xff] }
 0x56b   :  { %v864_v23 = vmul.f32 %v7870_v20, %v863_v22  ;;  %v1074_v24 = vperm.slane %v1072_v21, 0  ;;  %v1187_v21 = vld [vmem:[#allocation7 + $0x1d8] sm:$0xff] }
 0x56d   :  { %v865_v27 = vadd.f32 %v7870_v20, %v864_v23 }
 0x56f   :  { %v869_v28 = vsel %vm868_vm13, %v7870_v20, %v865_v27 }
 0x570   :  { %v874_v31 = vsel %vm871_vm14, %v873_v30, %v869_v28 }
 0x571   :  { %v875_v35 = vmul.f32 %v7862_v56, %v874_v31 }
 0x572   :  { %v7740_v26 = vpop.permute.xlu0 %7739 }
 0x573   :  { %v7742_v32 = vunpack.i.h.bf16 %v7740_v26  ;;  %v7741_v34 = vunpack.i.l.bf16 %v7740_v26 }
 0x575   :  { %964 = vmatpush.msra.mxu1 %v7741_v34  ;;  %990 = vmatpush.msrb.mxu2 %v7742_v32 }
 0x576   :  { %7555 = vmatmul.msk.f32.vlgmr.msra.gmra.mxu1 %vm794_vm4, %v875_v35 }
 0x579   :  { %v830_v36 = vpop.xlane.xlu2 %829 }
 0x57a   :  { %7871 = vrcp.f32 %v830_v36  ;;  %v887_v41 = vand.u32 2147483648, %v830_v36  ;;  %v885_v44 = vand.u32 2147483647, %v830_v36  ;;  %vm881_vm0 = vweird.f32 %v830_v36 }
 0x57c   :  { %v888_v47 = vor.u32 1.1754944e-38, %v887_v41  ;;  %vm886_vm2 = vcmp.eq.f32.partialorder %v885_v44, 8.507059e+37  ;;  %v1131_v41 = vld [vmem:[#allocation7 + $0x198] sm:$0xff] }
 0x580   :  { %v7872_v37 = vpop.eup %7871 }
 0x581   :  { %v877_v38 = vmul.f32 %v7872_v37, %v830_v36  ;;  %v824_v39 = vpop.xlane.xlu2 %823  ;;  %vm882_vm15 = vweird.f32 %v7872_v37 }
 0x582   :  { %7873 = vrcp.f32 %v824_v39  ;;  %vm883_vm1 = vmor %vm881_vm0, %vm882_vm15  ;;  %v857_v54 = vand.u32 2147483648, %v824_v39  ;;  %v855_v56 = vand.u32 2147483647, %v824_v39  ;;  %vm851_vm5 = vweird.f32 %v824_v39 }
 0x583   :  { %v878_v40 = vsub.f32 1.0, %v877_v38  ;;  %v1134_v38 = vld [vmem:[#allocation7 + $0x1b0] sm:$0xff] }
 0x584   :  { %v858_v59 = vor.u32 1.1754944e-38, %v857_v54  ;;  %vm856_vm9 = vcmp.eq.f32.partialorder %v855_v56, 8.507059e+37  ;;  %1155 = vmatpush.msrb.mxu1 %v1134_v38 }
 0x585   :  { %v879_v43 = vmul.f32 %v7872_v37, %v878_v40  ;;  %v1132_v40 = vld [vmem:[#allocation7 + $0x1a0] sm:$0xff] }
 0x587   :  { %v880_v45 = vadd.f32 %v7872_v37, %v879_v43 }
 0x588   :  { %v7874_v46 = vpop.eup %7873 }
 0x589   :  { %v884_v48 = vsel %vm883_vm1, %v7872_v37, %v880_v45  ;;  %v847_v49 = vmul.f32 %v7874_v46, %v824_v39  ;;  %v918_v50 = vpop.permute.xlu2 %917  ;;  %vm852_vm3 = vweird.f32 %v7874_v46  ;;  %v1133_v39 = vld [vmem:[#allocation7 + $0x1a8] sm:$0xff] }
 0x58a   :  { %938 = vmatpush.msra.mxu3 %v918_v50  ;;  %v889_v51 = vsel %vm886_vm2, %v888_v47, %v884_v48  ;;  %vm853_vm6 = vmor %vm851_vm5, %vm852_vm3  ;;  %1156 = vmatpush.msrb.mxu1 %v1133_v39 }
 0x58b   :  { %v848_v52 = vsub.f32 1.0, %v847_v49  ;;  %v890_v53 = vmul.f32 %v8458_v2, %v889_v51  ;;  %v1006_v2 = vld [vmem:[#allocation7 + $0x150] sm:$0xff] }
 0x58c   :  { %1029 = vmatpush.msrb.mxu3 %v1008_v63  ;;  %1157 = vmatpush.msrb.mxu1 %v1132_v40 }
 0x58d   :  { %v849_v55 = vmul.f32 %v7874_v46, %v848_v52  ;;  %7556 = vmatmul.msk.f32.vlgmr.msrb.gmra.mxu2 %vm794_vm4, %v890_v53  ;;  %v7772_v52 = vld [vmem:[#allocation7 + $0x110] ss:$0 sm:$0xff] }
 0x58e   :  { %1030 = vmatpush.msrb.mxu3 %v1007_v0  ;;  %1158 = vmatpush.msrb.mxu1 %v1131_v41 }
 0x58f   :  { %v850_v29 = vadd.f32 %v7874_v46, %v849_v55  ;;  %v7773_v55 = vld [vmem:[#allocation7 + $0x118] ss:$0 sm:$0xff] }
 0x590   :  { %1031 = vmatpush.msrb.mxu3 %v1006_v2 }
 0x591   :  { %v854_v60 = vsel %vm853_vm6, %v7874_v46, %v850_v29  ;;  %v1199_v29 = vld [vmem:[#allocation7 + $0x238] sm:$0xff] }
 0x592   :  { %v859_v61 = vsel %vm856_vm9, %v858_v59, %v854_v60  ;;  %1032 = vmatpush.msrb.mxu3 %v1005_v7  ;;  %v1198_v59 = vld [vmem:[#allocation7 + $0x230] sm:$0xff]  ;;  %1202 = vmatpush.msra.mxu2 %v1199_v29  ;;  %vm1314_vm9 = vcmask 523264  }
 0x593   :  { %v860_v1 = vmul.f32 %v8462_v4, %v859_v61  ;;  %v1197_v61 = vld [vmem:[#allocation7 + $0x228] sm:$0xff] }
 0x594   :  { %1203 = vmatpush.msra.mxu2 %v1198_v59 }
 0x595   :  { %7554 = vmatmul.msk.f32.vlgmr.msra.gmra.mxu3 %vm794_vm4, %v860_v1 }
 0x596   :  { %1204 = vmatpush.msra.mxu2 %v1197_v61 }
 0x598   :  { %1205 = vmatpush.msra.mxu2 %v1196_v11 }
 0x59a   :  { %1206 = vmatpush.msra.mxu2 %v1195_v12 }
 0x5ab   :  { %v914_v42 = vpop.f32.mrf.mxu2 }
 0x5f3   :  { %v966_v62 = vpop.f32.mrf.mxu1 }
 0x5f4   :  { %997 = vrot.lane.b32.xlu0 %v966_v62, %s8292_s1 }
 0x610   :  { %v992_v5 = vpop.f32.mrf.mxu2 }
 0x611   :  { %999 = vrot.lane.b32.xlu1 %v992_v5, %s8292_s1 }
 0x618   :  { %v940_v58 = vpop.f32.mrf.mxu3 }
 0x666   :  { %v998_v8 = vpop.permute.xlu0 %997 }
 0x667   :  { %v1003_v4 = vsel %vm469_vm8, %v914_v42, %v998_v8 }
 0x668   :  { %7557 = vmatmul.msk.f32.vlgmr.msrb.gmra.mxu3 %vm477_vm7, %v1003_v4 }
 0x683   :  { %v1000_v9 = vpop.permute.xlu1 %999 }
 0x684   :  { %v1004_v10 = vsel %vm469_vm8, %v940_v58, %v1000_v9 }
 0x685   :  { %7558 = vmatmul.msk.f32.gmra.mxu3 %vm477_vm7, %v1004_v10 }
 0x6eb   :  { %v1034_v15 = vpop.f32.mrf.mxu3 }
 0x6ec   :  { %v1035_v16 = vadd.f32 %v7771_v13, %v1034_v15  ;;  %v1192_v15 = vld [vmem:[#allocation7 + $0x200] sm:$0xff] }
 0x6ee   :  { %v1040_v18 = vadd.f32 %v1035_v16, %v8406_v3  ;;  %v1191_v16 = vld [vmem:[#allocation7 + $0x1f8] sm:$0xff] }
 0x6f0   :  { %v8481_v19 = vadd.f32 %v1073_v17, %v1040_v18  ;;  %v1190_v17 = vld [vmem:[#allocation7 + $0x1f0] sm:$0xff]  ;;  %v1189_v18 = vld [vmem:[#allocation7 + $0x1e8] sm:$0xff] }
 0x6f2   :  { %v1079_v20 = vsel %vm477_vm7, %v8481_v19, 0.0 }
 0x6f3   :  { %1080 = vadd.xlane.f32.xlu0 %v1079_v20  ;;  %v1188_v20 = vld [vmem:[#allocation7 + $0x1e0] sm:$0xff] }
 0x708   :  { %v1037_v22 = vpop.f32.mrf.mxu3 }
 0x709   :  { %v1038_v23 = vadd.f32 %v7771_v13, %v1037_v22  ;;  %v1194_v13 = vld [vmem:[#allocation7 + $0x210] sm:$0xff] }
 0x70a   :  { %1207 = vmatpush.msra.mxu2 %v1194_v13  ;;  %v1186_v22 = vld [vmem:[#allocation7 + $0x1d0] sm:$0xff] }
 0x70b   :  { %v1041_v25 = vadd.f32 %v1038_v23, %v8410_v6  ;;  %v1185_v23 = vld [vmem:[#allocation7 + $0x1c8] sm:$0xff] }
 0x70c   :  { %1208 = vmatpush.msra.mxu2 %v1193_v14 }
 0x70d   :  { %v8486_v27 = vadd.f32 %v1074_v24, %v1041_v25  ;;  %v1184_v24 = vld [vmem:[#allocation7 + $0x1c0] sm:$0xff]  ;;  %v7774_v25 = vld [vmem:[#allocation7 + $0x1b8] ss:$0 sm:$0xff] }
 0x70e   :  { %1209 = vmatpush.msra.mxu2 %v1192_v15 }
 0x70f   :  { %v1082_v28 = vsel %vm477_vm7, %v8486_v27, 0.0 }
 0x710   :  { %1083 = vadd.xlane.f32.xlu1 %v1082_v28  ;;  %1210 = vmatpush.msra.mxu2 %v1191_v16 }
 0x712   :  { %1211 = vmatpush.msra.mxu2 %v1190_v17  ;;  %v7776_v17 = vld [vmem:[#allocation7 + $0x248] ss:$0 sm:$0xff] }
 0x714   :  { %1212 = vmatpush.msra.mxu2 %v1189_v18 }
 0x716   :  { %1213 = vmatpush.msra.mxu2 %v1188_v20 }
 0x718   :  { %1214 = vmatpush.msra.mxu2 %v1187_v21  ;;  %v7777_v21 = vld [vmem:[#allocation7 + $0x250] ss:$0 sm:$0xff] }
 0x71a   :  { %1215 = vmatpush.msra.mxu2 %v1186_v22 }
 0x71c   :  { %1216 = vmatpush.msra.mxu2 %v1185_v23 }
 0x71e   :  { %1217 = vmatpush.msra.mxu2 %v1184_v24 }
 0x766   :  { %v1081_v30 = vpop.xlane.xlu0 %1080 }
 0x767   :  { %v1085_v3 = vmul.f32 %v1081_v30, %v8415_v33 }
 0x769   :  { %v1087_v31 = vsub.f32 %v8481_v19, %v1085_v3 }
 0x76b   :  { %v1089_v26 = vmul.f32 %v1087_v31, %v1087_v31 }
 0x76d   :  { %v1091_v32 = vsel %vm477_vm7, %v1089_v26, 0.0 }
 0x76e   :  { %1092 = vadd.xlane.f32.xlu2 %v1091_v32 }
 0x783   :  { %v1084_v34 = vpop.xlane.xlu1 %1083 }
 0x784   :  { %v1086_v35 = vmul.f32 %v1084_v34, %v8415_v33 }
 0x786   :  { %v1088_v6 = vsub.f32 %v8486_v27, %v1086_v35 }
 0x788   :  { %v1090_v36 = vmul.f32 %v1088_v6, %v1088_v6 }
 0x78a   :  { %v1094_v37 = vsel %vm477_vm7, %v1090_v36, 0.0 }
 0x78b   :  { %1095 = vadd.xlane.f32.xlu0 %v1094_v37 }
 0x7e1   :  { %v1093_v43 = vpop.xlane.xlu2 %1092 }
 0x7e2   :  { %v1097_v44 = vmul.f32 %v1093_v43, %v8415_v33 }
 0x7e4   :  { %v1099_v45 = vadd.f32 1e-05, %v1097_v44 }
 0x7e6   :  { %7875 = vrsqrt.f32 %v1099_v45  ;;  %vm1107_vm11 = vweird.f32 %v1099_v45 }
 0x7ec   :  { %v7876_v46 = vpop.eup %7875 }
 0x7ed   :  { %v1102_v47 = vmul.f32 %v7876_v46, %v1099_v45  ;;  %vm1108_vm10 = vweird.f32 %v7876_v46 }
 0x7ee   :  { %vm1109_vm12 = vmor %vm1107_vm11, %vm1108_vm10 }
 0x7ef   :  { %v1103_v48 = vmul.f32 %v7876_v46, %v1102_v47 }
 0x7f1   :  { %v1104_v49 = vmul.f32 0.5, %v1103_v48 }
 0x7f3   :  { %v1105_v50 = vsub.f32 1.5, %v1104_v49 }
 0x7f5   :  { %v1106_v51 = vmul.f32 %v7876_v46, %v1105_v50  ;;  %v7775_v50 = vld [vmem:[#allocation7 + $0x240] ss:$0 sm:$0xff] }
 0x7f7   :  { %v1110_v53 = vsel %vm1109_vm12, %v7876_v46, %v1106_v51 }
 0x7f8   :  { %v1121_v54 = vmul.f32 %v1110_v53, %v1087_v31 }
 0x7fa   :  { %v1125_v56 = vmul.f32 %v7772_v52, %v1121_v54 }
 0x7fc   :  { %v1129_v60 = vadd.f32 %v7773_v55, %v1125_v56 }
 0x7fe   :  { %7560 = vmatmul.msk.f32.vlgmr.msrb.gmra.mxu1 %vm477_vm7, %v1129_v60  ;;  %v1096_v1 = vpop.xlane.xlu0 %1095 }
 0x7ff   :  { %v1098_v62 = vmul.f32 %v1096_v1, %v8415_v33 }
 0x801   :  { %v1100_v63 = vadd.f32 1e-05, %v1098_v62 }
 0x803   :  { %7877 = vrsqrt.f32 %v1100_v63  ;;  %vm1117_vm14 = vweird.f32 %v1100_v63 }
 0x809   :  { %v7878_v0 = vpop.eup %7877 }
 0x80a   :  { %v1112_v2 = vmul.f32 %v7878_v0, %v1100_v63  ;;  %vm1118_vm13 = vweird.f32 %v7878_v0 }
 0x80b   :  { %vm1119_vm15 = vmor %vm1117_vm14, %vm1118_vm13 }
 0x80c   :  { %v1113_v42 = vmul.f32 %v7878_v0, %v1112_v2 }
 0x80e   :  { %v1114_v5 = vmul.f32 0.5, %v1113_v42 }
 0x810   :  { %v1115_v7 = vsub.f32 1.5, %v1114_v5  ;;  %v1282_v5 = vld [vmem:[#allocation7 + $0x270] sm:$0xff] }
 0x811   :  { %1303 = vmatpush.msra.mxu0 %v1282_v5  ;;  %v1384_v5 = vld [vmem:[#allocation8 + $0xa0] sm:$0xff] }
 0x812   :  { %v1116_v8 = vmul.f32 %v7878_v0, %v1115_v7  ;;  %v1281_v7 = vld [vmem:[#allocation7 + $0x268] sm:$0xff] }
 0x813   :  { %1304 = vmatpush.msra.mxu0 %v1281_v7  ;;  %v1385_v7 = vld [vmem:[#allocation8 + $0xa8] sm:$0xff] }
 0x814   :  { %v1120_v4 = vsel %vm1119_vm15, %v7878_v0, %v1116_v8  ;;  %v1280_v8 = vld [vmem:[#allocation7 + $0x260] sm:$0xff] }
 0x815   :  { %v1122_v58 = vmul.f32 %v1120_v4, %v1088_v6  ;;  %v1279_v4 = vld [vmem:[#allocation7 + $0x258] sm:$0xff]  ;;  %1305 = vmatpush.msra.mxu0 %v1280_v8  ;;  %v1382_v8 = vld [vmem:[#allocation8 + $0x80] sm:$0xff] }
 0x817   :  { %v1126_v9 = vmul.f32 %v7772_v52, %v1122_v58  ;;  %1306 = vmatpush.msra.mxu0 %v1279_v4  ;;  %v1383_v4 = vld [vmem:[#allocation8 + $0x88] sm:$0xff] }
 0x819   :  { %v1130_v10 = vadd.f32 %v7773_v55, %v1126_v9 }
 0x81b   :  { %7561 = vmatmul.msk.f32.gmra.mxu1 %vm477_vm7, %v1130_v10 }
 0x87b   :  { %v1160_v28 = vpop.f32.mrf.mxu1 }
 0x87c   :  { %v1161_v30 = vadd.f32 %v7774_v25, %v1160_v28 }
 0x87e   :  { %v1166_v3 = vmul.f32 %v1161_v30, %v1161_v30 }
 0x880   :  { %v1168_v31 = vmul.f32 %v1166_v3, %v1161_v30 }
 0x882   :  { %v1170_v26 = vmul.f32 0.044715, %v1168_v31 }
 0x884   :  { %v1172_v32 = vadd.f32 %v1170_v26, %v1161_v30 }
 0x886   :  { %v1174_v34 = vmul.f32 0.7978846, %v1172_v32 }
 0x888   :  { %7879 = vtanh.f32 %v1174_v34 }
 0x88e   :  { %v7880_v35 = vpop.eup %7879 }
 0x88f   :  { %v1178_v6 = vadd.f32 1.0, %v7880_v35 }
 0x891   :  { %v1180_v36 = vmul.f32 0.5, %v1178_v6 }
 0x893   :  { %v1182_v37 = vmul.f32 %v1180_v36, %v1161_v30 }
 0x895   :  { %1218 = vmatmul.f32.vlgmr.msra.gmra.mxu2 %v1182_v37 }
 0x898   :  { %v1163_v38 = vpop.f32.mrf.mxu1 }
 0x899   :  { %v1164_v39 = vadd.f32 %v7774_v25, %v1163_v38  ;;  %v7778_v38 = vld [vmem:[#allocation7 + $0x278] ss:$0 sm:$0xff] }
 0x89b   :  { %v1167_v40 = vmul.f32 %v1164_v39, %v1164_v39 }
 0x89d   :  { %v1169_v41 = vmul.f32 %v1167_v40, %v1164_v39 }
 0x89f   :  { %v1171_v43 = vmul.f32 0.044715, %v1169_v41 }
 0x8a1   :  { %v1173_v44 = vadd.f32 %v1171_v43, %v1164_v39 }
 0x8a3   :  { %v1175_v45 = vmul.f32 0.7978846, %v1173_v44 }
 0x8a5   :  { %7881 = vtanh.f32 %v1175_v45 }
 0x8ab   :  { %v7882_v46 = vpop.eup %7881 }
 0x8ac   :  { %v1179_v47 = vadd.f32 1.0, %v7882_v46  ;;  %v8297_v46 = vmov 64.0  }
 0x8ae   :  { %v1181_v48 = vmul.f32 0.5, %v1179_v47 }
 0x8b0   :  { %v1183_v49 = vmul.f32 %v1181_v48, %v1164_v39 }
 0x8b2   :  { %1221 = vmatmul.f32.gmra.mxu2 %v1183_v49 }
 0x918   :  { %v1219_v51 = vpop.f32.mrf.mxu2 }
 0x919   :  { %v1220_v52 = vadd.f32 %v7775_v50, %v1219_v51 }
 0x91b   :  { %v8501_v53 = vadd.f32 %v1220_v52, %v8481_v19 }
 0x91d   :  { %v1227_v54 = vsel %vm477_vm7, %v8501_v53, 0.0 }
 0x91e   :  { %1228 = vadd.xlane.f32.xlu1 %v1227_v54 }
 0x935   :  { %v1222_v55 = vpop.f32.mrf.mxu2 }
 0x936   :  { %v1223_v56 = vadd.f32 %v7775_v50, %v1222_v55 }
 0x938   :  { %v8506_v29 = vadd.f32 %v1223_v56, %v8486_v27 }
 0x93a   :  { %v1230_v59 = vsel %vm477_vm7, %v8506_v29, 0.0 }
 0x93b   :  { %1231 = vadd.xlane.f32.xlu2 %v1230_v59 }
 0x991   :  { %v1229_v60 = vpop.xlane.xlu1 %1228 }
 0x992   :  { %v1233_v61 = vmul.f32 %v1229_v60, %v8415_v33 }
 0x994   :  { %v1235_v1 = vsub.f32 %v8501_v53, %v1233_v61 }
 0x996   :  { %v1237_v19 = vmul.f32 %v1235_v1, %v1235_v1 }
 0x998   :  { %v1239_v62 = vsel %vm477_vm7, %v1237_v19, 0.0 }
 0x999   :  { %1240 = vadd.xlane.f32.xlu0 %v1239_v62 }
 0x9ae   :  { %v1232_v63 = vpop.xlane.xlu2 %1231 }
 0x9af   :  { %v1234_v0 = vmul.f32 %v1232_v63, %v8415_v33 }
 0x9b1   :  { %v1236_v2 = vsub.f32 %v8506_v29, %v1234_v0  ;;  %v1388_v0 = vld [vmem:[#allocation8 + $0xe0] sm:$0xff] }
 0x9b2   :  { %1411 = vmatpush.msra.mxu3 %v1388_v0 }
 0x9b3   :  { %v1238_v27 = vmul.f32 %v1236_v2, %v1236_v2 }
 0x9b5   :  { %v1242_v42 = vsel %vm477_vm7, %v1238_v27, 0.0  ;;  %v1386_v27 = vld [vmem:[#allocation8 + $0xc0] sm:$0xff] }
 0x9b6   :  { %1243 = vadd.xlane.f32.xlu1 %v1242_v42  ;;  %v1387_v42 = vld [vmem:[#allocation8 + $0xc8] sm:$0xff]  ;;  %1412 = vmatpush.msra.mxu3 %v1386_v27 }
 0x9b8   :  { %1413 = vmatpush.msra.mxu3 %v1384_v5 }
 0x9ba   :  { %1414 = vmatpush.msra.mxu3 %v1382_v8 }
 0xa0c   :  { %v1241_v58 = vpop.xlane.xlu0 %1240 }
 0xa0d   :  { %v1245_v9 = vmul.f32 %v1241_v58, %v8415_v33  ;;  %v1380_v58 = vld [vmem:[#allocation8 + $0x60] sm:$0xff] }
 0xa0e   :  { %1415 = vmatpush.msra.mxu3 %v1380_v58 }
 0xa0f   :  { %v1247_v10 = vadd.f32 1e-05, %v1245_v9  ;;  %v1381_v9 = vld [vmem:[#allocation8 + $0x68] sm:$0xff] }
 0xa11   :  { %7883 = vrsqrt.f32 %v1247_v10  ;;  %vm1255_vm1 = vweird.f32 %v1247_v10 }
 0xa17   :  { %v7884_v11 = vpop.eup %7883 }
 0xa18   :  { %v1250_v12 = vmul.f32 %v7884_v11, %v1247_v10  ;;  %vm1256_vm0 = vweird.f32 %v7884_v11  ;;  %v1378_v10 = vld [vmem:[#allocation8 + $0x40] sm:$0xff] }
 0xa19   :  { %vm1257_vm2 = vmor %vm1255_vm1, %vm1256_vm0  ;;  %1416 = vmatpush.msra.mxu3 %v1378_v10 }
 0xa1a   :  { %v1251_v13 = vmul.f32 %v7884_v11, %v1250_v12  ;;  %v1376_v12 = vld [vmem:[#allocation8 + $0x20] sm:$0xff] }
 0xa1b   :  { %1417 = vmatpush.msra.mxu3 %v1376_v12 }
 0xa1c   :  { %v1252_v14 = vmul.f32 0.5, %v1251_v13  ;;  %v1377_v13 = vld [vmem:[#allocation8 + $0x28] sm:$0xff] }
 0xa1e   :  { %v1253_v15 = vsub.f32 1.5, %v1252_v14  ;;  %v1374_v14 = vld [vmem:[#allocation8] sm:$0xff] }
 0xa1f   :  { %1418 = vmatpush.msra.mxu3 %v1374_v14 }
 0xa20   :  { %v1254_v16 = vmul.f32 %v7884_v11, %v1253_v15  ;;  %v1375_v15 = vld [vmem:[#allocation8 + $0x8] sm:$0xff] }
 0xa22   :  { %v1258_v18 = vsel %vm1257_vm2, %v7884_v11, %v1254_v16  ;;  %v1379_v11 = vld [vmem:[#allocation8 + $0x48] sm:$0xff] }
 0xa23   :  { %v1269_v20 = vmul.f32 %v1258_v18, %v1235_v1 }
 0xa25   :  { %v1273_v22 = vmul.f32 %v7776_v17, %v1269_v20 }
 0xa27   :  { %v1277_v23 = vadd.f32 %v7777_v21, %v1273_v22 }
 0xa29   :  { %7562 = vmatmul.msk.f32.vlgmr.msra.gmra.mxu0 %vm477_vm7, %v1277_v23  ;;  %v1244_v24 = vpop.xlane.xlu1 %1243 }
 0xa2a   :  { %v1246_v25 = vmul.f32 %v1244_v24, %v8415_v33 }
 0xa2c   :  { %v1248_v28 = vadd.f32 1e-05, %v1246_v25 }
 0xa2e   :  { %7885 = vrsqrt.f32 %v1248_v28  ;;  %vm1265_vm5 = vweird.f32 %v1248_v28 }
 0xa2f   :  { %7887 = vrcp.f32 %v8297_v46 }
 0xa34   :  { %v7886_v30 = vpop.eup %7885 }
 0xa35   :  { %v1260_v3 = vmul.f32 %v7886_v30, %v1248_v28  ;;  %vm1266_vm3 = vweird.f32 %v7886_v30  ;;  %v7888_v47 = vpop.eup %7887  ;;  %v7779_v28 = vld [vmem:[#allocation7 + $0x280] ss:$0 sm:$0xff] }
 0xa36   :  { %vm1267_vm6 = vmor %vm1265_vm5, %vm1266_vm3  ;;  %v1322_v48 = vmul.f32 64.0, %v7888_v47  ;;  %vm1326_vm10 = vweird.f32 %v7888_v47 }
 0xa37   :  { %v1261_v31 = vmul.f32 %v7886_v30, %v1260_v3 }
 0xa38   :  { %v1323_v49 = vsub.f32 1.0, %v1322_v48 }
 0xa39   :  { %v1262_v26 = vmul.f32 0.5, %v1261_v31  ;;  %v7780_v31 = vld [vmem:[#allocation7 + $0x288] ss:$0 sm:$0xff] }
 0xa3a   :  { %v1324_v50 = vmul.f32 %v7888_v47, %v1323_v49  ;;  %v1391_v49 = vld [vmem:[#allocation8 + $0x100] ss:$8 sm:$0x3] }
 0xa3b   :  { %v1263_v32 = vsub.f32 1.5, %v1262_v26 }
 0xa3c   :  { %v1325_v51 = vadd.f32 %v7888_v47, %v1324_v50  ;;  %v1393_v50 = vperm.slane %v1391_v49, 0 }
 0xa3d   :  { %v1264_v34 = vmul.f32 %v7886_v30, %v1263_v32 }
 0xa3e   :  { %v8528_v52 = vsel %vm1326_vm10, %v7888_v47, %v1325_v51 }
 0xa3f   :  { %v1268_v35 = vsel %vm1267_vm6, %v7886_v30, %v1264_v34 }
 0xa40   :  { %v1270_v6 = vmul.f32 %v1268_v35, %v1236_v2  ;;  %v1389_v2 = vld [vmem:[#allocation8 + $0xe8] sm:$0xff] }
 0xa41   :  { %1434 = vmatpush.msra.mxu1 %v1389_v2  ;;  %v1394_v2 = vperm.slane %v1391_v49, 1 }
 0xa42   :  { %v1274_v36 = vmul.f32 %v7776_v17, %v1270_v6 }
 0xa43   :  { %1435 = vmatpush.msra.mxu1 %v1387_v42 }
 0xa44   :  { %v1278_v37 = vadd.f32 %v7777_v21, %v1274_v36 }
 0xa45   :  { %1436 = vmatpush.msra.mxu1 %v1385_v7 }
 0xa46   :  { %7563 = vmatmul.msk.f32.gmra.mxu0 %vm477_vm7, %v1278_v37 }
 0xa47   :  { %1437 = vmatpush.msra.mxu1 %v1383_v4 }
 0xa49   :  { %1438 = vmatpush.msra.mxu1 %v1381_v9 }
 0xa4b   :  { %1439 = vmatpush.msra.mxu1 %v1379_v11 }
 0xa4d   :  { %1440 = vmatpush.msra.mxu1 %v1377_v13 }
 0xa4f   :  { %1441 = vmatpush.msra.mxu1 %v1375_v15 }
 0xaa6   :  { %v1308_v39 = vpop.f32.mrf.mxu0 }
 0xaa7   :  { %v8520_v40 = vadd.f32 %v7778_v38, %v1308_v39 }
 0xaa9   :  { %v1315_v41 = vsel %vm1314_vm9, %v8520_v40, 0.0 }
 0xaaa   :  { %1316 = vadd.xlane.f32.xlu2 %v1315_v41 }
 0xac3   :  { %v1311_v43 = vpop.f32.mrf.mxu0 }
 0xac4   :  { %v8524_v44 = vadd.f32 %v7778_v38, %v1311_v43 }
 0xac6   :  { %v1318_v45 = vsel %vm1314_vm9, %v8524_v44, 0.0 }
 0xac7   :  { %1319 = vadd.xlane.f32.xlu0 %v1318_v45 }
 0xb1d   :  { %v1317_v54 = vpop.xlane.xlu2 %1316 }
 0xb1e   :  { %v1328_v55 = vmul.f32 %v8528_v52, %v1317_v54 }
 0xb20   :  { %v1330_v56 = vsub.f32 %v8520_v40, %v1328_v55 }
 0xb22   :  { %v1332_v59 = vmul.f32 %v1330_v56, %v1330_v56 }
 0xb24   :  { %v1334_v60 = vsel %vm1314_vm9, %v1332_v59, 0.0 }
 0xb25   :  { %1335 = vadd.xlane.f32.xlu1 %v1334_v60 }
 0xb3a   :  { %v1320_v61 = vpop.xlane.xlu0 %1319 }
 0xb3b   :  { %v1329_v1 = vmul.f32 %v8528_v52, %v1320_v61 }
 0xb3d   :  { %v8535_v19 = vsub.f32 %v8524_v44, %v1329_v1 }
 0xb3f   :  { %v1333_v62 = vmul.f32 %v8535_v19, %v8535_v19 }
 0xb41   :  { %v1337_v63 = vsel %vm1314_vm9, %v1333_v62, 0.0 }
 0xb42   :  { %1338 = vadd.xlane.f32.xlu2 %v1337_v63 }
 0xb98   :  { %v1336_v16 = vpop.xlane.xlu1 %1335 }
 0xb99   :  { %v1340_v17 = vmul.f32 %v1336_v16, %v8528_v52 }
 0xb9b   :  { %v1342_v18 = vadd.f32 1e-05, %v1340_v17 }
 0xb9d   :  { %7889 = vrsqrt.f32 %v1342_v18  ;;  %vm1350_vm12 = vweird.f32 %v1342_v18 }
 0xba3   :  { %v7890_v20 = vpop.eup %7889 }
 0xba4   :  { %v1345_v21 = vmul.f32 %v7890_v20, %v1342_v18  ;;  %vm1351_vm11 = vweird.f32 %v7890_v20 }
 0xba5   :  { %vm1352_vm13 = vmor %vm1350_vm12, %vm1351_vm11 }
 0xba6   :  { %v1346_v22 = vmul.f32 %v7890_v20, %v1345_v21 }
 0xba8   :  { %v1347_v23 = vmul.f32 0.5, %v1346_v22 }
 0xbaa   :  { %v1348_v24 = vsub.f32 1.5, %v1347_v23 }
 0xbac   :  { %v1349_v25 = vmul.f32 %v7890_v20, %v1348_v24 }
 0xbae   :  { %v1353_v30 = vsel %vm1352_vm13, %v7890_v20, %v1349_v25 }
 0xbaf   :  { %v1364_v3 = vmul.f32 %v1353_v30, %v1330_v56 }
 0xbb1   :  { %v1368_v26 = vmul.f32 %v7779_v28, %v1364_v3 }
 0xbb3   :  { %v1372_v32 = vadd.f32 %v7780_v31, %v1368_v26 }
 0xbb5   :  { %v1339_v34 = vpop.xlane.xlu2 %1338  ;;  %7564 = vmatmul.msk.f32.vlgmr.msra.gmra.mxu3 %vm1314_vm9, %v1372_v32  ;;  %7566 = vmatmul.msk.f32.vlgmr.msra.gmra.mxu1 %vm1314_vm9, %v1372_v32 }
 0xbb6   :  { %v1341_v35 = vmul.f32 %v1339_v34, %v8528_v52 }
 0xbb8   :  { %v1343_v6 = vadd.f32 1e-05, %v1341_v35 }
 0xbba   :  { %7891 = vrsqrt.f32 %v1343_v6  ;;  %vm1360_vm15 = vweird.f32 %v1343_v6 }
 0xbc0   :  { %v7892_v36 = vpop.eup %7891 }
 0xbc1   :  { %v1355_v37 = vmul.f32 %v7892_v36, %v1343_v6  ;;  %vm1361_vm14 = vweird.f32 %v7892_v36 }
 0xbc2   :  { %vm1362_vm0 = vmor %vm1360_vm15, %vm1361_vm14 }
 0xbc3   :  { %v1356_v38 = vmul.f32 %v7892_v36, %v1355_v37 }
 0xbc5   :  { %v1357_v39 = vmul.f32 0.5, %v1356_v38 }
 0xbc7   :  { %v1358_v41 = vsub.f32 1.5, %v1357_v39 }
 0xbc9   :  { %v1359_v43 = vmul.f32 %v7892_v36, %v1358_v41 }
 0xbcb   :  { %v1363_v45 = vsel %vm1362_vm0, %v7892_v36, %v1359_v43 }
 0xbcc   :  { %v1365_v46 = vmul.f32 %v1363_v45, %v8535_v19 }
 0xbce   :  { %v1369_v47 = vmul.f32 %v7779_v28, %v1365_v46 }
 0xbd0   :  { %v1373_v48 = vadd.f32 %v7780_v31, %v1369_v47 }
 0xbd2   :  { %7565 = vmatmul.msk.f32.gmra.mxu3 %vm1314_vm9, %v1373_v48  ;;  %7567 = vmatmul.msk.f32.gmra.mxu1 %vm1314_vm9, %v1373_v48 }
 0xc32   :  { %v1443_v1 = vpop.f32.mrf.mxu1 }
 0xc33   :  { %v1444_v5 = vadd.f32 %v1443_v1, %v1394_v2 }
 0xc38   :  { %v1420_v51 = vpop.f32.mrf.mxu3 }
 0xc39   :  { %v1421_v54 = vadd.f32 %v1420_v51, %v1393_v50 }
 0xc3b   :  { %1463 = vrot.lane.b32.xlu2 %v1421_v54, %s8296_s17  ;;  %1451 = vrot.lane.b32.xlu0 %v1421_v54, %s8295_s16 }
 0xc4f   :  { %v1446_v0 = vpop.f32.mrf.mxu1 }
 0xc50   :  { %v1447_v27 = vadd.f32 %v1446_v0, %v1394_v2 }
 0xc52   :  { %v7743_v8 = vpack.i.bf16 %v1447_v27, %v1444_v5 }
 0xc55   :  { %v1423_v55 = vpop.f32.mrf.mxu3 }
 0xc56   :  { %v1424_v56 = vadd.f32 %v1423_v55, %v1393_v50 }
 0xc58   :  { %1453 = vrot.lane.b32.xlu1 %v1424_v56, %s8295_s16 }
 0xc95   :  { %v1464_v59 = vpop.permute.xlu2 %1463 }
 0xc96   :  { %7568 = vmatpush.xpose.msk.msrb.mxu0 %vm477_vm7, %v1464_v59 }
 0xc99   :  { %7569 = vmatmul.msk.f32.vlgmr.msrb.gmra.mxu0 %vm477_vm7, %v1421_v54 }
 0xcad   :  { %v1452_v60 = vpop.permute.xlu0 %1451 }
 0xcae   :  { %1515 = vrot.lane.b32.xlu0 %v1452_v60, %s8296_s17 }
 0xcb6   :  { %1489 = vrot.lane.b32.xlu0 %v1424_v56, %s8296_s17 }
 0xcca   :  { %v1454_v61 = vpop.permute.xlu1 %1453 }
 0xccb   :  { %1541 = vrot.lane.b32.xlu1 %v1454_v61, %s8296_s17 }
 0xd16   :  { %v1486_v19 = vpop.f32.mrf.mxu0 }
 0xd17   :  { %v1567_v62 = vmul.f32 0.17677669, %v1486_v19 }
 0xd19   :  { %v1571_v63 = vsel %vm794_vm4, %v1567_v62, -inf }
 0xd1a   :  { %1572 = vmax.xlane.f32.xlu0 %v1571_v63 }
 0xd20   :  { %v1516_v42 = vpop.permute.xlu0 %1515 }
 0xd21   :  { %7572 = vmatpush.xpose.msk.msra.mxu0 %vm477_vm7, %v1516_v42 }
 0xd24   :  { %7573 = vmatmul.msk.f32.vlgmr.msra.gmra.mxu0 %vm477_vm7, %v1452_v60 }
 0xd25   :  { %1708 = vmatpush.msrb.mxu0 %v1447_v27 }
 0xd28   :  { %v1490_v7 = vpop.permute.xlu0 %1489 }
 0xd29   :  { %7570 = vmatpush.xpose.msk.msrb.mxu3 %vm477_vm7, %v1490_v7 }
 0xd2c   :  { %7571 = vmatmul.msk.f32.vlgmr.msrb.gmra.mxu3 %vm477_vm7, %v1424_v56 }
 0xd2d   :  { %1685 = vmatpush.msra.mxu3 %v1444_v5 }
 0xd2e   :  { %7744 = vrot.lane.b32.xlu0 %v7743_v8, %s8295_s16  ;;  %v1813_v8 = vld [vmem:[#allocation7 + $0x300] sm:$0xff] }
 0xd2f   :  { %1828 = vmatpush.msra.mxu0 %v1813_v8 }
 0xd3d   :  { %v1542_v4 = vpop.permute.xlu1 %1541 }
 0xd3e   :  { %7574 = vmatpush.xpose.msk.msrb.mxu1 %vm477_vm7, %v1542_v4  ;;  %v1812_v4 = vld [vmem:[#allocation7 + $0x2f8] sm:$0xff] }
 0xd3f   :  { %1829 = vmatpush.msra.mxu0 %v1812_v4 }
 0xd41   :  { %7575 = vmatmul.msk.f32.vlgmr.msrb.gmra.mxu1 %vm477_vm7, %v1454_v61 }
 0xd8d   :  { %v1573_v58 = vpop.xlane.xlu0 %1572 }
 0xd8e   :  { %v1583_v24 = vsub.f32 %v1567_v62, %v1573_v58 }
 0xd90   :  { %v1587_v28 = vmul.f32 1.442695, %v1583_v24 }
 0xda0   :  { %v7745_v9 = vpop.permute.xlu0 %7744 }
 0xda1   :  { %v7747_v10 = vunpack.i.h.bf16 %v7745_v9  ;;  %v7746_v11 = vunpack.i.l.bf16 %v7745_v9  ;;  %v1538_v12 = vpop.f32.mrf.mxu0  ;;  %v1811_v9 = vld [vmem:[#allocation7 + $0x2f0] sm:$0xff] }
 0xda2   :  { %v1569_v13 = vmul.f32 0.17677669, %v1538_v12  ;;  %1830 = vmatpush.msra.mxu0 %v1811_v9 }
 0xda3   :  { %1731 = vmatpush.msra.mxu1 %v7746_v11  ;;  %1754 = vmatpush.msrb.mxu2 %v7747_v10  ;;  %v1810_v11 = vld [vmem:[#allocation7 + $0x2e8] sm:$0xff] }
 0xda4   :  { %v1577_v14 = vsel %vm794_vm4, %v1569_v13, -inf  ;;  %1831 = vmatpush.msra.mxu0 %v1810_v11 }
 0xda5   :  { %1578 = vmax.xlane.f32.xlu2 %v1577_v14 }
 0xdaf   :  { %v1512_v15 = vpop.f32.mrf.mxu3 }
 0xdb0   :  { %v1568_v16 = vmul.f32 0.17677669, %v1512_v15 }
 0xdb2   :  { %v1574_v17 = vsel %vm794_vm4, %v1568_v16, -inf }
 0xdb3   :  { %1575 = vmax.xlane.f32.xlu2 %v1574_v17 }
 0xdbe   :  { %v1564_v18 = vpop.f32.mrf.mxu1 }
 0xdbf   :  { %v1570_v20 = vmul.f32 0.17677669, %v1564_v18 }
 0xdc1   :  { %v1580_v21 = vsel %vm794_vm4, %v1570_v20, -inf }
 0xdc2   :  { %1581 = vmax.xlane.f32.xlu1 %v1580_v21 }
 0xe18   :  { %v1579_v22 = vpop.xlane.xlu2 %1578 }
 0xe19   :  { %v1585_v23 = vsub.f32 %v1569_v13, %v1579_v22 }
 0xe1b   :  { %v1591_v25 = vmul.f32 1.442695, %v1585_v23 }
 0xe1d   :  { %7893 = vpow2.f32 %v1591_v25 }
 0xe1e   :  { %7895 = vpow2.f32 %v1587_v28 }
 0xe23   :  { %v7894_v30 = vpop.eup %7893 }
 0xe24   :  { %v1601_v3 = vsel %vm794_vm4, %v7894_v30, 0.0  ;;  %v7896_v31 = vpop.eup %7895 }
 0xe25   :  { %1602 = vadd.xlane.f32.xlu1 %v1601_v3  ;;  %v1595_v26 = vsel %vm794_vm4, %v7896_v31, 0.0 }
 0xe26   :  { %v1576_v32 = vpop.xlane.xlu2 %1575 }
 0xe27   :  { %v1584_v6 = vsub.f32 %v1568_v16, %v1576_v32 }
 0xe29   :  { %v1589_v37 = vmul.f32 1.442695, %v1584_v6 }
 0xe2d   :  { %1596 = vadd.xlane.f32.xlu1 %v1595_v26 }
 0xe35   :  { %v1582_v34 = vpop.xlane.xlu1 %1581 }
 0xe36   :  { %v1586_v35 = vsub.f32 %v1570_v20, %v1582_v34 }
 0xe38   :  { %v1593_v36 = vmul.f32 1.442695, %v1586_v35 }
 0xe3a   :  { %7897 = vpow2.f32 %v1593_v36 }
 0xe3b   :  { %7899 = vpow2.f32 %v1589_v37 }
 0xe40   :  { %v8568_v38 = vpop.eup %7897 }
 0xe41   :  { %v1604_v39 = vsel %vm794_vm4, %v8568_v38, 0.0  ;;  %v8572_v41 = vpop.eup %7899 }
 0xe42   :  { %1605 = vadd.xlane.f32.xlu2 %v1604_v39  ;;  %v1598_v43 = vsel %vm794_vm4, %v8572_v41, 0.0  ;;  %v1775_v39 = vld [vmem:[#allocation7 + $0x2d0] sm:$0xff] }
 0xe4a   :  { %1599 = vadd.xlane.f32.xlu2 %v1598_v43  ;;  %v1774_v43 = vld [vmem:[#allocation7 + $0x2c8] sm:$0xff] }
 0xe98   :  { %v1603_v45 = vpop.xlane.xlu1 %1602 }
 0xe99   :  { %7901 = vrcp.f32 %v1603_v45  ;;  %v1648_v50 = vand.u32 2147483648, %v1603_v45  ;;  %v1646_v54 = vand.u32 2147483647, %v1603_v45  ;;  %vm1642_vm2 = vweird.f32 %v1603_v45 }
 0xe9b   :  { %v1649_v59 = vor.u32 1.1754944e-38, %v1648_v50  ;;  %vm1647_vm5 = vcmp.eq.f32.partialorder %v1646_v54, 8.507059e+37 }
 0xe9f   :  { %v7902_v46 = vpop.eup %7901 }
 0xea0   :  { %v1638_v47 = vmul.f32 %v7902_v46, %v1603_v45  ;;  %v1597_v48 = vpop.xlane.xlu1 %1596  ;;  %vm1643_vm1 = vweird.f32 %v7902_v46  ;;  %v1773_v45 = vld [vmem:[#allocation7 + $0x2c0] sm:$0xff] }
 0xea1   :  { %7903 = vrcp.f32 %v1597_v48  ;;  %vm1644_vm3 = vmor %vm1642_vm2, %vm1643_vm1  ;;  %v1618_v63 = vand.u32 2147483648, %v1597_v48  ;;  %v1616_v2 = vand.u32 2147483647, %v1597_v48  ;;  %vm1612_vm10 = vweird.f32 %v1597_v48 }
 0xea2   :  { %v1639_v49 = vsub.f32 1.0, %v1638_v47  ;;  %v1771_v47 = vld [vmem:[#allocation7 + $0x2b0] sm:$0xff] }
 0xea3   :  { %v1619_v42 = vor.u32 1.1754944e-38, %v1618_v63  ;;  %vm1617_vm12 = vcmp.eq.f32.partialorder %v1616_v2, 8.507059e+37 }
 0xea4   :  { %v1640_v51 = vmul.f32 %v7902_v46, %v1639_v49  ;;  %v1769_v49 = vld [vmem:[#allocation7 + $0x2a0] sm:$0xff] }
 0xea6   :  { %v1641_v55 = vadd.f32 %v7902_v46, %v1640_v51 }
 0xea7   :  { %v7904_v56 = vpop.eup %7903 }
 0xea8   :  { %v1645_v60 = vsel %vm1644_vm3, %v7902_v46, %v1641_v55  ;;  %v1608_v61 = vmul.f32 %v7904_v56, %v1597_v48  ;;  %vm1613_vm6 = vweird.f32 %v7904_v56  ;;  %v1772_v46 = vld [vmem:[#allocation7 + $0x2b8] sm:$0xff] }
 0xea9   :  { %v1650_v1 = vsel %vm1647_vm5, %v1649_v59, %v1645_v60  ;;  %vm1614_vm11 = vmor %vm1612_vm10, %vm1613_vm6  ;;  %v7781_v60 = vld [vmem:[#allocation7 + $0x308] ss:$0 sm:$0xff] }
 0xeaa   :  { %v1609_v19 = vsub.f32 1.0, %v1608_v61  ;;  %v1651_v62 = vmul.f32 %v7894_v30, %v1650_v1  ;;  %v7782_v1 = vld [vmem:[#allocation7 + $0x2e0] ss:$0 sm:$0xff] }
 0xeac   :  { %v1610_v0 = vmul.f32 %v7904_v56, %v1609_v19  ;;  %7578 = vmatmul.msk.f32.vlgmr.msra.gmra.mxu1 %vm794_vm4, %v1651_v62 }
 0xeae   :  { %v1611_v27 = vadd.f32 %v7904_v56, %v1610_v0 }
 0xeb0   :  { %v1615_v5 = vsel %vm1614_vm11, %v7904_v56, %v1611_v27 }
 0xeb1   :  { %v1620_v7 = vsel %vm1617_vm12, %v1619_v42, %v1615_v5 }
 0xeb2   :  { %v1621_v58 = vmul.f32 %v7896_v31, %v1620_v7 }
 0xeb4   :  { %7576 = vmatmul.msk.f32.vlgmr.msra.gmra.mxu3 %vm794_vm4, %v1621_v58 }
 0xeb5   :  { %v1606_v10 = vpop.xlane.xlu2 %1605 }
 0xeb6   :  { %7905 = vrcp.f32 %v1606_v10  ;;  %v1663_v16 = vand.u32 2147483648, %v1606_v10  ;;  %v1661_v18 = vand.u32 2147483647, %v1606_v10  ;;  %vm1657_vm14 = vweird.f32 %v1606_v10 }
 0xeb8   :  { %v1664_v22 = vor.u32 1.1754944e-38, %v1663_v16  ;;  %vm1662_vm0 = vcmp.eq.f32.partialorder %v1661_v18, 8.507059e+37 }
 0xebc   :  { %v7906_v12 = vpop.eup %7905 }
 0xebd   :  { %v1653_v13 = vmul.f32 %v7906_v12, %v1606_v10  ;;  %v1600_v14 = vpop.xlane.xlu2 %1599  ;;  %vm1658_vm13 = vweird.f32 %v7906_v12 }
 0xebe   :  { %7907 = vrcp.f32 %v1600_v14  ;;  %vm1659_vm15 = vmor %vm1657_vm14, %vm1658_vm13  ;;  %v1633_v3 = vand.u32 2147483648, %v1600_v14  ;;  %v1631_v26 = vand.u32 2147483647, %v1600_v14  ;;  %vm1627_vm2 = vweird.f32 %v1600_v14 }
 0xebf   :  { %v1654_v15 = vsub.f32 1.0, %v1653_v13 }
 0xec0   :  { %v1634_v34 = vor.u32 1.1754944e-38, %v1633_v3  ;;  %vm1632_vm5 = vcmp.eq.f32.partialorder %v1631_v26, 8.507059e+37  ;;  %v1902_v3 = vld [vmem:[#allocation8 + $0x180] sm:$0xff] }
 0xec1   :  { %v1655_v17 = vmul.f32 %v7906_v12, %v1654_v15  ;;  %v1900_v26 = vld [vmem:[#allocation8 + $0x160] sm:$0xff] }
 0xec3   :  { %v1656_v20 = vadd.f32 %v7906_v12, %v1655_v17 }
 0xec4   :  { %v7908_v21 = vpop.eup %7907 }
 0xec5   :  { %v1660_v23 = vsel %vm1659_vm15, %v7906_v12, %v1656_v20  ;;  %v1623_v24 = vmul.f32 %v7908_v21, %v1600_v14  ;;  %vm1628_vm1 = vweird.f32 %v7908_v21  ;;  %v1910_v20 = vld [vmem:[#allocation8 + $0x200] sm:$0xff] }
 0xec6   :  { %v1665_v25 = vsel %vm1662_vm0, %v1664_v22, %v1660_v23  ;;  %vm1629_vm3 = vmor %vm1627_vm2, %vm1628_vm1  ;;  %1933 = vmatpush.msrb.mxu1 %v1910_v20  ;;  %v1908_v22 = vld [vmem:[#allocation8 + $0x1e0] sm:$0xff]  ;;  %v1909_v23 = vld [vmem:[#allocation8 + $0x1e8] sm:$0xff] }
 0xec7   :  { %v1624_v28 = vsub.f32 1.0, %v1623_v24  ;;  %v1666_v30 = vmul.f32 %v8568_v38, %v1665_v25  ;;  %v1776_v38 = vld [vmem:[#allocation7 + $0x2d8] sm:$0xff]  ;;  %v1906_v24 = vld [vmem:[#allocation8 + $0x1c0] sm:$0xff]  ;;  %v1907_v25 = vld [vmem:[#allocation8 + $0x1c8] sm:$0xff] }
 0xec8   :  { %1793 = vmatpush.msrb.mxu3 %v1776_v38  ;;  %1934 = vmatpush.msrb.mxu1 %v1908_v22  ;;  %v2014_v20 = vld [vmem:[#allocation7 + $0x348] sm:$0xff]  ;;  %v2013_v22 = vld [vmem:[#allocation7 + $0x340] sm:$0xff] }
 0xec9   :  { %v1625_v31 = vmul.f32 %v7908_v21, %v1624_v28  ;;  %7579 = vmatmul.msk.f32.vlgmr.msrb.gmra.mxu2 %vm794_vm4, %v1666_v30  ;;  %v1904_v28 = vld [vmem:[#allocation8 + $0x1a0] sm:$0xff]  ;;  %v1905_v30 = vld [vmem:[#allocation8 + $0x1a8] sm:$0xff] }
 0xeca   :  { %1794 = vmatpush.msrb.mxu3 %v1775_v39  ;;  %1935 = vmatpush.msrb.mxu1 %v1906_v24  ;;  %v2012_v24 = vld [vmem:[#allocation7 + $0x338] sm:$0xff] }
 0xecb   :  { %v1626_v32 = vadd.f32 %v7908_v21, %v1625_v31  ;;  %v1903_v31 = vld [vmem:[#allocation8 + $0x188] sm:$0xff] }
 0xecc   :  { %1795 = vmatpush.msrb.mxu3 %v1774_v43  ;;  %1936 = vmatpush.msrb.mxu1 %v1904_v28  ;;  %v2022_v43 = vld [vmem:[#allocation7 + $0x388] sm:$0xff]  ;;  %v2011_v28 = vld [vmem:[#allocation7 + $0x330] sm:$0xff] }
 0xecd   :  { %v1630_v35 = vsel %vm1629_vm3, %v7908_v21, %v1626_v32  ;;  %v1911_v21 = vld [vmem:[#allocation8 + $0x208] sm:$0xff] }
 0xece   :  { %v1635_v6 = vsel %vm1632_vm5, %v1634_v34, %v1630_v35  ;;  %1796 = vmatpush.msrb.mxu3 %v1773_v45  ;;  %1956 = vmatpush.msra.mxu2 %v1911_v21  ;;  %v1901_v32 = vld [vmem:[#allocation8 + $0x168] sm:$0xff]  ;;  %v1898_v34 = vld [vmem:[#allocation8 + $0x140] sm:$0xff]  ;;  %v2021_v45 = vld [vmem:[#allocation7 + $0x380] sm:$0xff] }
 0xecf   :  { %v1636_v36 = vmul.f32 %v8572_v41, %v1635_v6  ;;  %v1770_v41 = vld [vmem:[#allocation7 + $0x2a8] sm:$0xff]  ;;  %1937 = vmatpush.msrb.mxu1 %v1902_v3  ;;  %v1899_v35 = vld [vmem:[#allocation8 + $0x148] sm:$0xff]  ;;  %v2033_v21 = vld [vmem:[#allocation7 + $0x3e0] sm:$0xff] }
 0xed0   :  { %1797 = vmatpush.msrb.mxu3 %v1772_v46  ;;  %1957 = vmatpush.msra.mxu2 %v1909_v23  ;;  %v1896_v6 = vld [vmem:[#allocation8 + $0x120] sm:$0xff]  ;;  %v2020_v46 = vld [vmem:[#allocation7 + $0x378] sm:$0xff] }
 0xed1   :  { %7577 = vmatmul.msk.f32.vlgmr.msrb.gmra.mxu0 %vm794_vm4, %v1636_v36  ;;  %1938 = vmatpush.msrb.mxu1 %v1900_v26  ;;  %v1897_v36 = vld [vmem:[#allocation8 + $0x128] sm:$0xff]  ;;  %v2032_v23 = vld [vmem:[#allocation7 + $0x3d8] sm:$0xff]  ;;  %v2010_v3 = vld [vmem:[#allocation7 + $0x328] sm:$0xff] }
 0xed2   :  { %1798 = vmatpush.msrb.mxu3 %v1771_v47  ;;  %1958 = vmatpush.msra.mxu2 %v1907_v25  ;;  %v2031_v25 = vld [vmem:[#allocation7 + $0x3d0] sm:$0xff]  ;;  %v2009_v26 = vld [vmem:[#allocation7 + $0x320] sm:$0xff] }
 0xed3   :  { %1939 = vmatpush.msrb.mxu1 %v1898_v34  ;;  %2041 = vmatpush.msrb.mxu0 %v2022_v43  ;;  %v2008_v34 = vld [vmem:[#allocation7 + $0x318] sm:$0xff]  ;;  %v2023_v43 = vld [vmem:[#allocation7 + $0x390] sm:$0xff] }
 0xed4   :  { %1799 = vmatpush.msrb.mxu3 %v1770_v41  ;;  %1959 = vmatpush.msra.mxu2 %v1905_v30  ;;  %v2030_v30 = vld [vmem:[#allocation7 + $0x3c8] sm:$0xff] }
 0xed5   :  { %1940 = vmatpush.msrb.mxu1 %v1896_v6  ;;  %2042 = vmatpush.msrb.mxu0 %v2021_v45  ;;  %v2007_v6 = vld [vmem:[#allocation7 + $0x310] sm:$0xff] }
 0xed6   :  { %1800 = vmatpush.msrb.mxu3 %v1769_v49  ;;  %1960 = vmatpush.msra.mxu2 %v1903_v31  ;;  %v2029_v31 = vld [vmem:[#allocation7 + $0x3c0] sm:$0xff] }
 0xed7   :  { %2043 = vmatpush.msrb.mxu0 %v2020_v46 }
 0xed8   :  { %1961 = vmatpush.msra.mxu2 %v1901_v32  ;;  %v2028_v32 = vld [vmem:[#allocation7 + $0x3b8] sm:$0xff] }
 0xed9   :  { %7582 = vmatmul.msk.f32.vlgmr.msra.gmra.mxu0 %vm477_vm7, %v8423_v57 }
 0xeda   :  { %1962 = vmatpush.msra.mxu2 %v1899_v35  ;;  %v2027_v35 = vld [vmem:[#allocation7 + $0x3b0] sm:$0xff] }
 0xedc   :  { %1963 = vmatpush.msra.mxu2 %v1897_v36  ;;  %v2026_v36 = vld [vmem:[#allocation7 + $0x3a8] sm:$0xff] }
 0xf29   :  { %v1733_v37 = vpop.f32.mrf.mxu1 }
 0xf2a   :  { %1761 = vrot.lane.b32.xlu1 %v1733_v37, %s8283_s13 }
 0xf37   :  { %v1687_v50 = vpop.f32.mrf.mxu3 }
 0xf4c   :  { %v1756_v48 = vpop.f32.mrf.mxu2 }
 0xf4d   :  { %1763 = vrot.lane.b32.xlu2 %v1756_v48, %s8283_s13 }
 0xf4e   :  { %v1710_v55 = vpop.f32.mrf.mxu0 }
 0xf56   :  { %v1833_v61 = vpop.f32.mrf.mxu0 }
 0xf57   :  { %v1834_v19 = vadd.f32 %v7781_v60, %v1833_v61 }
 0xf59   :  { %v1838_v0 = vperm.slane %v1834_v19, 0  ;;  %v1837_v5 = vrot.slane %v1834_v19, 1 }
 0xf5b   :  { %v1839_v4 = vperm.slane %v1837_v5, 0 }
 0xf9c   :  { %v1762_v51 = vpop.permute.xlu1 %1761 }
 0xf9d   :  { %v1767_v54 = vsel %vm477_vm7, %v1687_v50, %v1762_v51 }
 0xf9e   :  { %7580 = vmatmul.msk.f32.vlgmr.msrb.gmra.mxu3 %vm1314_vm9, %v1767_v54 }
 0xfa7   :  { %v1764_v56 = vpop.permute.xlu2 %1763 }
 0xfa8   :  { %v1768_v59 = vsel %vm477_vm7, %v1710_v55, %v1764_v56 }
 0xfa9   :  { %7581 = vmatmul.msk.f32.gmra.mxu3 %vm1314_vm9, %v1768_v59  ;;  %v7783_v59 = vld [vmem:[#allocation7 + $0x290] ss:$0 sm:$0xff] }
0x1021   :  { %v1802_v62 = vpop.f32.mrf.mxu3 }
0x1022   :  { %v1803_v63 = vadd.f32 %v7782_v1, %v1802_v62  ;;  %v7784_v62 = vld [vmem:[#allocation7 + $0x298] ss:$0 sm:$0xff] }
0x1024   :  { %v1808_v2 = vadd.f32 %v1803_v63, %v8520_v40 }
0x1026   :  { %v8591_v27 = vadd.f32 %v1838_v0, %v1808_v2 }
0x1028   :  { %v1844_v42 = vsel %vm1314_vm9, %v8591_v27, 0.0 }
0x1029   :  { %1845 = vadd.xlane.f32.xlu0 %v1844_v42 }
0x102c   :  { %v1805_v7 = vpop.f32.mrf.mxu3 }
0x102d   :  { %v1806_v8 = vadd.f32 %v7782_v1, %v1805_v7 }
0x102f   :  { %v1809_v58 = vadd.f32 %v1806_v8, %v8524_v44 }
0x1031   :  { %v8596_v9 = vadd.f32 %v1839_v4, %v1809_v58 }
0x1033   :  { %v1847_v10 = vsel %vm1314_vm9, %v8596_v9, 0.0 }
0x1034   :  { %1848 = vadd.xlane.f32.xlu2 %v1847_v10 }
0x109c   :  { %v1846_v11 = vpop.xlane.xlu0 %1845 }
0x109d   :  { %v1850_v40 = vmul.f32 %v1846_v11, %v8528_v52  ;;  %v2019_v11 = vld [vmem:[#allocation7 + $0x370] sm:$0xff] }
0x109e   :  { %2044 = vmatpush.msrb.mxu0 %v2019_v11 }
0x109f   :  { %v8602_v12 = vsub.f32 %v8591_v27, %v1850_v40  ;;  %v2038_v40 = vld [vmem:[#allocation7 + $0x408] sm:$0xff] }
0x10a0   :  { %2064 = vmatpush.msra.mxu3 %v2038_v40 }
0x10a1   :  { %v1854_v13 = vmul.f32 %v8602_v12, %v8602_v12 }
0x10a3   :  { %v1856_v14 = vsel %vm1314_vm9, %v1854_v13, 0.0  ;;  %v2037_v13 = vld [vmem:[#allocation7 + $0x400] sm:$0xff] }
0x10a4   :  { %1857 = vadd.xlane.f32.xlu1 %v1856_v14  ;;  %2065 = vmatpush.msra.mxu3 %v2037_v13  ;;  %v2017_v14 = vld [vmem:[#allocation7 + $0x360] sm:$0xff] }
0x10a7   :  { %v1849_v15 = vpop.xlane.xlu2 %1848 }
0x10a8   :  { %v1851_v44 = vmul.f32 %v1849_v15, %v8528_v52  ;;  %v2036_v15 = vld [vmem:[#allocation7 + $0x3f8] sm:$0xff] }
0x10a9   :  { %2066 = vmatpush.msra.mxu3 %v2036_v15 }
0x10aa   :  { %v8609_v16 = vsub.f32 %v8596_v9, %v1851_v44  ;;  %v2016_v44 = vld [vmem:[#allocation7 + $0x358] sm:$0xff] }
0x10ac   :  { %v1855_v17 = vmul.f32 %v8609_v16, %v8609_v16 }
0x10ae   :  { %v1859_v18 = vsel %vm1314_vm9, %v1855_v17, 0.0  ;;  %v2015_v17 = vld [vmem:[#allocation7 + $0x350] sm:$0xff] }
0x10af   :  { %1860 = vadd.xlane.f32.xlu0 %v1859_v18  ;;  %v2034_v18 = vld [vmem:[#allocation7 + $0x3e8] sm:$0xff] }
0x1117   :  { %v1858_v37 = vpop.xlane.xlu1 %1857 }
0x1118   :  { %v1862_v38 = vmul.f32 %v1858_v37, %v8528_v52  ;;  %v1913_v37 = vld [vmem:[#allocation8 + $0x220] ss:$8 sm:$0x3] }
0x1119   :  { %v1915_v45 = vperm.slane %v1913_v37, 0 }
0x111a   :  { %v1864_v39 = vadd.f32 1e-05, %v1862_v38  ;;  %v2025_v38 = vld [vmem:[#allocation7 + $0x3a0] sm:$0xff] }
0x111c   :  { %7909 = vrsqrt.f32 %v1864_v39  ;;  %vm1872_vm10 = vweird.f32 %v1864_v39 }
0x1122   :  { %v7910_v47 = vpop.eup %7909  ;;  %v1861_v41 = vpop.xlane.xlu0 %1860 }
0x1123   :  { %v1867_v48 = vmul.f32 %v7910_v47, %v1864_v39  ;;  %v1863_v49 = vmul.f32 %v1861_v41, %v8528_v52  ;;  %vm1873_vm6 = vweird.f32 %v7910_v47  ;;  %v2024_v39 = vld [vmem:[#allocation7 + $0x398] sm:$0xff] }
0x1124   :  { %vm1874_vm11 = vmor %vm1872_vm10, %vm1873_vm6 }
0x1125   :  { %v1868_v50 = vmul.f32 %v7910_v47, %v1867_v48  ;;  %v1865_v51 = vadd.f32 1e-05, %v1863_v49  ;;  %v1916_v48 = vperm.slane %v1913_v37, 1 }
0x1127   :  { %v1869_v54 = vmul.f32 0.5, %v1868_v50  ;;  %7911 = vrsqrt.f32 %v1865_v51  ;;  %vm1882_vm13 = vweird.f32 %v1865_v51 }
0x1129   :  { %v1870_v55 = vsub.f32 1.5, %v1869_v54 }
0x112b   :  { %v1871_v56 = vmul.f32 %v7910_v47, %v1870_v55 }
0x112d   :  { %v7912_v60 = vpop.eup %7911  ;;  %v1875_v61 = vsel %vm1874_vm11, %v7910_v47, %v1871_v56 }
0x112e   :  { %v1886_v1 = vmul.f32 %v1875_v61, %v8602_v12  ;;  %v1877_v19 = vmul.f32 %v7912_v60, %v1865_v51  ;;  %vm1883_vm12 = vweird.f32 %v7912_v60  ;;  %v2018_v12 = vld [vmem:[#allocation7 + $0x368] sm:$0xff] }
0x112f   :  { %vm1884_vm14 = vmor %vm1882_vm13, %vm1883_vm12  ;;  %2045 = vmatpush.msrb.mxu0 %v2018_v12 }
0x1130   :  { %v1890_v63 = vmul.f32 %v7783_v59, %v1886_v1  ;;  %v1878_v0 = vmul.f32 %v7912_v60, %v1877_v19 }
0x1131   :  { %2046 = vmatpush.msrb.mxu0 %v2017_v14 }
0x1132   :  { %v1879_v2 = vmul.f32 0.5, %v1878_v0  ;;  %v1894_v42 = vadd.f32 %v7784_v62, %v1890_v63 }
0x1133   :  { %2047 = vmatpush.msrb.mxu0 %v2016_v44 }
0x1134   :  { %v1880_v5 = vsub.f32 1.5, %v1879_v2  ;;  %7583 = vmatmul.msk.f32.vlgmr.msrb.gmra.mxu1 %vm1314_vm9, %v1894_v42  ;;  %7585 = vmatmul.msk.f32.vlgmr.msra.gmra.mxu2 %vm1314_vm9, %v1894_v42 }
0x1135   :  { %2048 = vmatpush.msrb.mxu0 %v2015_v17 }
0x1136   :  { %v1881_v7 = vmul.f32 %v7912_v60, %v1880_v5 }
0x1137   :  { %2049 = vmatpush.msrb.mxu0 %v2014_v20 }
0x1138   :  { %v1885_v8 = vsel %vm1884_vm14, %v7912_v60, %v1881_v7 }
0x1139   :  { %v1887_v4 = vmul.f32 %v1885_v8, %v8609_v16  ;;  %v2035_v16 = vld [vmem:[#allocation7 + $0x3f0] sm:$0xff]  ;;  %2050 = vmatpush.msrb.mxu0 %v2013_v22 }
0x113a   :  { %2067 = vmatpush.msra.mxu3 %v2035_v16 }
0x113b   :  { %v1891_v58 = vmul.f32 %v7783_v59, %v1887_v4  ;;  %2051 = vmatpush.msrb.mxu0 %v2012_v24 }
0x113c   :  { %2068 = vmatpush.msra.mxu3 %v2034_v18 }
0x113d   :  { %v1895_v10 = vadd.f32 %v7784_v62, %v1891_v58  ;;  %2052 = vmatpush.msrb.mxu0 %v2011_v28 }
0x113e   :  { %2069 = vmatpush.msra.mxu3 %v2033_v21 }
0x113f   :  { %7584 = vmatmul.msk.f32.gmra.mxu1 %vm1314_vm9, %v1895_v10  ;;  %7586 = vmatmul.msk.f32.gmra.mxu2 %vm1314_vm9, %v1895_v10 }
0x1140   :  { %2070 = vmatpush.msra.mxu3 %v2032_v23  ;;  %2053 = vmatpush.msrb.mxu0 %v2010_v3 }
0x1142   :  { %2071 = vmatpush.msra.mxu3 %v2031_v25  ;;  %2054 = vmatpush.msrb.mxu0 %v2009_v26 }
0x1144   :  { %2072 = vmatpush.msra.mxu3 %v2030_v30  ;;  %2055 = vmatpush.msrb.mxu0 %v2008_v34 }
0x1146   :  { %2073 = vmatpush.msra.mxu3 %v2029_v31  ;;  %2056 = vmatpush.msrb.mxu0 %v2007_v6  ;;  %v7785_v31 = vld [vmem:[#allocation7 + $0x410] ss:$0 sm:$0xff] }
0x1148   :  { %2074 = vmatpush.msra.mxu3 %v2028_v32 }
0x114a   :  { %2075 = vmatpush.msra.mxu3 %v2027_v35 }
0x114c   :  { %2076 = vmatpush.msra.mxu3 %v2026_v36 }
0x114e   :  { %2077 = vmatpush.msra.mxu3 %v2025_v38 }
0x1150   :  { %2078 = vmatpush.msra.mxu3 %v2024_v39 }
0x1152   :  { %2079 = vmatpush.msra.mxu3 %v2023_v43 }
0x11b1   :  { %v1942_v46 = vpop.f32.mrf.mxu1 }
0x11b2   :  { %v1943_v47 = vadd.f32 %v1942_v46, %v1915_v45 }
0x11b4   :  { %v1971_v41 = vmul.f32 %v1943_v47, %v1943_v47 }
0x11b6   :  { %v1975_v49 = vmul.f32 %v1971_v41, %v1943_v47 }
0x11b7   :  { %v1965_v50 = vpop.f32.mrf.mxu2 }
0x11b8   :  { %v1979_v51 = vmul.f32 0.044715, %v1975_v49  ;;  %v1966_v54 = vadd.f32 %v1965_v50, %v1916_v48 }
0x11ba   :  { %v1983_v55 = vadd.f32 %v1979_v51, %v1943_v47  ;;  %v1972_v56 = vmul.f32 %v1966_v54, %v1966_v54 }
0x11bc   :  { %v1987_v59 = vmul.f32 0.7978846, %v1983_v55  ;;  %v1976_v60 = vmul.f32 %v1972_v56, %v1966_v54  ;;  %v1945_v61 = vpop.f32.mrf.mxu1  ;;  %v2148_v56 = vld [vmem:[#allocation7 + $0x460] sm:$0xff] }
0x11bd   :  { %v1946_v1 = vadd.f32 %v1945_v61, %v1915_v45  ;;  %2165 = vmatpush.msra.mxu1 %v2148_v56  ;;  %v2145_v61 = vld [vmem:[#allocation7 + $0x448] sm:$0xff] }
0x11be   :  { %7913 = vtanh.f32 %v1987_v59  ;;  %v1980_v19 = vmul.f32 0.044715, %v1976_v60  ;;  %v2147_v59 = vld [vmem:[#allocation7 + $0x458] sm:$0xff]  ;;  %v2146_v60 = vld [vmem:[#allocation7 + $0x450] sm:$0xff] }
0x11bf   :  { %v1973_v62 = vmul.f32 %v1946_v1, %v1946_v1  ;;  %2166 = vmatpush.msra.mxu1 %v2147_v59 }
0x11c0   :  { %v1984_v63 = vadd.f32 %v1980_v19, %v1966_v54  ;;  %v2143_v19 = vld [vmem:[#allocation7 + $0x438] sm:$0xff] }
0x11c1   :  { %v1977_v0 = vmul.f32 %v1973_v62, %v1946_v1  ;;  %2167 = vmatpush.msra.mxu1 %v2146_v60  ;;  %v2142_v62 = vld [vmem:[#allocation7 + $0x430] sm:$0xff] }
0x11c2   :  { %v1988_v2 = vmul.f32 0.7978846, %v1984_v63  ;;  %v1968_v42 = vpop.f32.mrf.mxu2  ;;  %v2141_v63 = vld [vmem:[#allocation7 + $0x428] sm:$0xff] }
0x11c3   :  { %v1969_v5 = vadd.f32 %v1968_v42, %v1916_v48  ;;  %v1981_v7 = vmul.f32 0.044715, %v1977_v0  ;;  %2168 = vmatpush.msra.mxu1 %v2145_v61 }
0x11c4   :  { %v7914_v8 = vpop.eup %7913  ;;  %7915 = vtanh.f32 %v1988_v2 }
0x11c5   :  { %v1974_v4 = vmul.f32 %v1969_v5, %v1969_v5  ;;  %v1995_v58 = vadd.f32 1.0, %v7914_v8  ;;  %v1985_v10 = vadd.f32 %v1981_v7, %v1946_v1 }
0x11c7   :  { %v1999_v11 = vmul.f32 0.5, %v1995_v58  ;;  %v1989_v40 = vmul.f32 0.7978846, %v1985_v10  ;;  %v1978_v12 = vmul.f32 %v1974_v4, %v1969_v5 }
0x11c9   :  { %v2003_v13 = vmul.f32 %v1999_v11, %v1943_v47  ;;  %7917 = vtanh.f32 %v1989_v40  ;;  %v1982_v14 = vmul.f32 0.044715, %v1978_v12 }
0x11ca   :  { %v7916_v15 = vpop.eup %7915 }
0x11cb   :  { %2057 = vmatmul.f32.vlgmr.msrb.gmra.mxu0 %v2003_v13  ;;  %v1996_v44 = vadd.f32 1.0, %v7916_v15  ;;  %v1986_v16 = vadd.f32 %v1982_v14, %v1969_v5  ;;  %v7786_v13 = vld [vmem:[#allocation7 + $0x418] ss:$0 sm:$0xff] }
0x11cd   :  { %v2000_v17 = vmul.f32 0.5, %v1996_v44  ;;  %v1990_v18 = vmul.f32 0.7978846, %v1986_v16 }
0x11cf   :  { %v7918_v20 = vpop.eup %7917  ;;  %v2004_v21 = vmul.f32 %v2000_v17, %v1966_v54  ;;  %7919 = vtanh.f32 %v1990_v18  ;;  %v7787_v17 = vld [vmem:[#allocation7 + $0x420] ss:$0 sm:$0xff] }
0x11d0   :  { %v1997_v22 = vadd.f32 1.0, %v7918_v20 }
0x11d1   :  { %2080 = vmatmul.f32.vlgmr.msra.gmra.mxu3 %v2004_v21 }
0x11d2   :  { %v2001_v23 = vmul.f32 0.5, %v1997_v22 }
0x11d4   :  { %v2005_v24 = vmul.f32 %v2001_v23, %v1946_v1  ;;  %v2144_v1 = vld [vmem:[#allocation7 + $0x440] sm:$0xff] }
0x11d5   :  { %v7920_v25 = vpop.eup %7919  ;;  %2169 = vmatpush.msra.mxu1 %v2144_v1 }
0x11d6   :  { %2060 = vmatmul.f32.gmra.mxu0 %v2005_v24  ;;  %v1998_v28 = vadd.f32 1.0, %v7920_v25 }
0x11d7   :  { %2170 = vmatpush.msra.mxu1 %v2143_v19  ;;  %v2274_v19 = vld [vmem:[#allocation8 + $0x3e0] sm:$0xff] }
0x11d8   :  { %v2002_v30 = vmul.f32 0.5, %v1998_v28 }
0x11d9   :  { %2171 = vmatpush.msra.mxu1 %v2142_v62  ;;  %v2275_v62 = vld [vmem:[#allocation8 + $0x3e8] sm:$0xff] }
0x11da   :  { %v2006_v3 = vmul.f32 %v2002_v30, %v1969_v5 }
0x11db   :  { %2172 = vmatpush.msra.mxu1 %v2141_v63  ;;  %v2276_v63 = vld [vmem:[#allocation8 + $0x3f0] sm:$0xff] }
0x11dc   :  { %2083 = vmatmul.f32.gmra.mxu3 %v2006_v3 }
0x1248   :  { %v2058_v26 = vpop.f32.mrf.mxu0 }
0x1249   :  { %v2059_v32 = vadd.f32 %v7785_v31, %v2058_v26 }
0x1253   :  { %v2061_v37 = vpop.f32.mrf.mxu0 }
0x1254   :  { %v2081_v34 = vpop.f32.mrf.mxu3  ;;  %v2062_v38 = vadd.f32 %v7785_v31, %v2061_v37  ;;  %v7788_v31 = vld [vmem:[#allocation7 + $0x468] ss:$0 sm:$0xff] }
0x1255   :  { %v2082_v35 = vadd.f32 %v2081_v34, %v2059_v32 }
0x1257   :  { %v8623_v6 = vadd.f32 %v2082_v35, %v8591_v27 }
0x1259   :  { %v2089_v36 = vsel %vm1314_vm9, %v8623_v6, 0.0 }
0x125a   :  { %2090 = vadd.xlane.f32.xlu0 %v2089_v36  ;;  %v8298_v36 = vmov 128.0  }
0x125f   :  { %v2084_v39 = vpop.f32.mrf.mxu3 }
0x1260   :  { %v2085_v43 = vadd.f32 %v2084_v39, %v2062_v38 }
0x1262   :  { %v8628_v45 = vadd.f32 %v2085_v43, %v8596_v9  ;;  %v2280_v43 = vld [vmem:[#allocation8 + $0x420] sm:$0xff] }
0x1263   :  { %2292 = vmatpush.msrb.mxu2 %v2280_v43  ;;  %v2240_v43 = vld [vmem:[#allocation8 + $0x270] sm:$0xff] }
0x1264   :  { %v2092_v46 = vsel %vm1314_vm9, %v8628_v45, 0.0 }
0x1265   :  { %2093 = vadd.xlane.f32.xlu0 %v2092_v46  ;;  %v2281_v46 = vld [vmem:[#allocation8 + $0x428] sm:$0xff] }
0x1266   :  { %2315 = vmatpush.msrb.mxu1 %v2281_v46  ;;  %v2235_v46 = vld [vmem:[#allocation8 + $0x240] sm:$0xff] }
0x12cd   :  { %v2091_v47 = vpop.xlane.xlu0 %2090 }
0x12ce   :  { %v2095_v41 = vmul.f32 %v2091_v47, %v8528_v52  ;;  %v2282_v47 = vld [vmem:[#allocation8 + $0x430] sm:$0xff] }
0x12cf   :  { %2338 = vmatpush.msra.mxu0 %v2282_v47  ;;  %v2236_v47 = vld [vmem:[#allocation8 + $0x248] sm:$0xff] }
0x12d0   :  { %v2097_v27 = vsub.f32 %v8623_v6, %v2095_v41  ;;  %v2277_v41 = vld [vmem:[#allocation8 + $0x400] sm:$0xff] }
0x12d1   :  { %2293 = vmatpush.msrb.mxu2 %v2277_v41  ;;  %v2237_v41 = vld [vmem:[#allocation8 + $0x250] sm:$0xff] }
0x12d2   :  { %v2099_v48 = vmul.f32 %v2097_v27, %v2097_v27 }
0x12d3   :  { %2294 = vmatpush.msrb.mxu2 %v2274_v19 }
0x12d4   :  { %v2101_v49 = vsel %vm1314_vm9, %v2099_v48, 0.0  ;;  %v2279_v48 = vld [vmem:[#allocation8 + $0x410] sm:$0xff] }
0x12d5   :  { %2102 = vadd.xlane.f32.xlu2 %v2101_v49  ;;  %2339 = vmatpush.msra.mxu0 %v2279_v48 }
0x12d7   :  { %2340 = vmatpush.msra.mxu0 %v2276_v63  ;;  %v7789_v63 = vld [vmem:[#allocation7 + $0x470] ss:$0 sm:$0xff] }
0x12d8   :  { %v2094_v50 = vpop.xlane.xlu0 %2093 }
0x12d9   :  { %v2096_v51 = vmul.f32 %v2094_v50, %v8528_v52 }
0x12db   :  { %v2098_v54 = vsub.f32 %v8628_v45, %v2096_v51 }
0x12dd   :  { %v2100_v9 = vmul.f32 %v2098_v54, %v2098_v54 }
0x12df   :  { %v2104_v55 = vsel %vm1314_vm9, %v2100_v9, 0.0 }
0x12e0   :  { %2105 = vadd.xlane.f32.xlu1 %v2104_v55 }
0x1348   :  { %v2103_v0 = vpop.xlane.xlu2 %2102 }
0x1349   :  { %v2107_v2 = vmul.f32 %v2103_v0, %v8528_v52  ;;  %v2271_v0 = vld [vmem:[#allocation8 + $0x3c0] sm:$0xff] }
0x134a   :  { %2295 = vmatpush.msrb.mxu2 %v2271_v0 }
0x134b   :  { %v2109_v42 = vadd.f32 1e-05, %v2107_v2  ;;  %v2272_v2 = vld [vmem:[#allocation8 + $0x3c8] sm:$0xff] }
0x134d   :  { %7921 = vrsqrt.f32 %v2109_v42  ;;  %vm2117_vm0 = vweird.f32 %v2109_v42 }
0x1353   :  { %v7922_v5 = vpop.eup %7921  ;;  %v2106_v7 = vpop.xlane.xlu1 %2105 }
0x1354   :  { %v2112_v8 = vmul.f32 %v7922_v5, %v2109_v42  ;;  %v2108_v4 = vmul.f32 %v2106_v7, %v8528_v52  ;;  %vm2118_vm15 = vweird.f32 %v7922_v5  ;;  %v2273_v42 = vld [vmem:[#allocation8 + $0x3d0] sm:$0xff]  ;;  %v2269_v7 = vld [vmem:[#allocation8 + $0x3a8] sm:$0xff] }
0x1355   :  { %vm2119_vm1 = vmor %vm2117_vm0, %vm2118_vm15  ;;  %2341 = vmatpush.msra.mxu0 %v2273_v42 }
0x1356   :  { %v2113_v58 = vmul.f32 %v7922_v5, %v2112_v8  ;;  %v2110_v10 = vadd.f32 1e-05, %v2108_v4  ;;  %v2270_v8 = vld [vmem:[#allocation8 + $0x3b0] sm:$0xff]  ;;  %v2265_v4 = vld [vmem:[#allocation8 + $0x380] sm:$0xff] }
0x1357   :  { %2342 = vmatpush.msra.mxu0 %v2270_v8 }
0x1358   :  { %v2114_v11 = vmul.f32 0.5, %v2113_v58  ;;  %7923 = vrsqrt.f32 %v2110_v10  ;;  %vm2127_vm3 = vweird.f32 %v2110_v10  ;;  %v2266_v58 = vld [vmem:[#allocation8 + $0x388] sm:$0xff] }
0x1359   :  { %7925 = vrcp.f32 %v8298_v36  ;;  %v2242_v36 = vld [vmem:[#allocation8 + $0x288] sm:$0xff] }
0x135a   :  { %v2115_v40 = vsub.f32 1.5, %v2114_v11  ;;  %v2262_v11 = vld [vmem:[#allocation8 + $0x360] sm:$0xff] }
0x135c   :  { %v2116_v12 = vmul.f32 %v7922_v5, %v2115_v40  ;;  %v2263_v40 = vld [vmem:[#allocation8 + $0x368] sm:$0xff] }
0x135e   :  { %v7924_v14 = vpop.eup %7923  ;;  %v2120_v15 = vsel %vm2119_vm1, %v7922_v5, %v2116_v12  ;;  %v2268_v5 = vld [vmem:[#allocation8 + $0x3a0] sm:$0xff]  ;;  %v2264_v12 = vld [vmem:[#allocation8 + $0x370] sm:$0xff] }
0x135f   :  { %v2131_v44 = vmul.f32 %v2120_v15, %v2097_v27  ;;  %v2122_v16 = vmul.f32 %v7924_v14, %v2110_v10  ;;  %vm2128_vm2 = vweird.f32 %v7924_v14  ;;  %v7926_v37 = vpop.eup %7925  ;;  %v2278_v27 = vld [vmem:[#allocation8 + $0x408] sm:$0xff]  ;;  %2296 = vmatpush.msrb.mxu2 %v2268_v5  ;;  %v2267_v10 = vld [vmem:[#allocation8 + $0x390] sm:$0xff] }
0x1360   :  { %vm2129_vm5 = vmor %vm2127_vm3, %vm2128_vm2  ;;  %v2185_v38 = vmul.f32 128.0, %v7926_v37  ;;  %2316 = vmatpush.msrb.mxu1 %v2278_v27  ;;  %vm2189_vm6 = vweird.f32 %v7926_v37  ;;  %2343 = vmatpush.msra.mxu0 %v2267_v10  ;;  %v2261_v15 = vld [vmem:[#allocation8 + $0x350] sm:$0xff] }
0x1361   :  { %v2135_v18 = vmul.f32 %v7786_v13, %v2131_v44  ;;  %v2123_v20 = vmul.f32 %v7924_v14, %v2122_v16  ;;  %2297 = vmatpush.msrb.mxu2 %v2265_v4  ;;  %v2256_v44 = vld [vmem:[#allocation8 + $0x320] sm:$0xff]  ;;  %v2257_v16 = vld [vmem:[#allocation8 + $0x328] sm:$0xff] }
0x1362   :  { %v2186_v39 = vsub.f32 1.0, %v2185_v38  ;;  %2317 = vmatpush.msrb.mxu1 %v2275_v62  ;;  %2344 = vmatpush.msra.mxu0 %v2264_v12  ;;  %v2238_v38 = vld [vmem:[#allocation8 + $0x260] sm:$0xff] }
0x1363   :  { %v2124_v21 = vmul.f32 0.5, %v2123_v20  ;;  %v2139_v22 = vadd.f32 %v7787_v17, %v2135_v18  ;;  %2298 = vmatpush.msrb.mxu2 %v2262_v11  ;;  %v2253_v18 = vld [vmem:[#allocation8 + $0x300] sm:$0xff]  ;;  %v2254_v20 = vld [vmem:[#allocation8 + $0x308] sm:$0xff] }
0x1364   :  { %v2187_v49 = vmul.f32 %v7926_v37, %v2186_v39  ;;  %2318 = vmatpush.msrb.mxu1 %v2272_v2  ;;  %2345 = vmatpush.msra.mxu0 %v2261_v15  ;;  %v2239_v39 = vld [vmem:[#allocation8 + $0x268] sm:$0xff] }
0x1365   :  { %v2125_v23 = vsub.f32 1.5, %v2124_v21  ;;  %7587 = vmatmul.msk.f32.vlgmr.msra.gmra.mxu1 %vm1314_vm9, %v2139_v22  ;;  %v2255_v21 = vld [vmem:[#allocation8 + $0x310] sm:$0xff]  ;;  %v2250_v22 = vld [vmem:[#allocation8 + $0x2e0] sm:$0xff] }
0x1366   :  { %v2188_v50 = vadd.f32 %v7926_v37, %v2187_v49  ;;  %2319 = vmatpush.msrb.mxu1 %v2269_v7  ;;  %v7790_v7 = vld [vmem:[#allocation7 + $0x478] ss:$0 sm:$0xff] }
0x1367   :  { %v2126_v24 = vmul.f32 %v7924_v14, %v2125_v23  ;;  %v2251_v23 = vld [vmem:[#allocation8 + $0x2e8] sm:$0xff] }
0x1368   :  { %v8648_v51 = vsel %vm2189_vm6, %v7926_v37, %v2188_v50  ;;  %2320 = vmatpush.msrb.mxu1 %v2266_v58  ;;  %v2243_v37 = vld [vmem:[#allocation8 + $0x290] sm:$0xff] }
0x1369   :  { %v2130_v25 = vsel %vm2129_vm5, %v7924_v14, %v2126_v24  ;;  %v2260_v14 = vld [vmem:[#allocation8 + $0x348] sm:$0xff]  ;;  %v2252_v24 = vld [vmem:[#allocation8 + $0x2f0] sm:$0xff] }
0x136a   :  { %v2132_v28 = vmul.f32 %v2130_v25, %v2098_v54  ;;  %2321 = vmatpush.msrb.mxu1 %v2263_v40  ;;  %v2247_v25 = vld [vmem:[#allocation8 + $0x2c0] sm:$0xff] }
0x136c   :  { %v2136_v30 = vmul.f32 %v7786_v13, %v2132_v28  ;;  %v2259_v13 = vld [vmem:[#allocation8 + $0x340] sm:$0xff]  ;;  %2322 = vmatpush.msrb.mxu1 %v2260_v14  ;;  %v2248_v28 = vld [vmem:[#allocation8 + $0x2c8] sm:$0xff] }
0x136d   :  { %2299 = vmatpush.msrb.mxu2 %v2259_v13 }
0x136e   :  { %v2140_v3 = vadd.f32 %v7787_v17, %v2136_v30  ;;  %v2258_v17 = vld [vmem:[#allocation8 + $0x330] sm:$0xff]  ;;  %2323 = vmatpush.msrb.mxu1 %v2257_v16 }
0x136f   :  { %2300 = vmatpush.msrb.mxu2 %v2256_v44  ;;  %2346 = vmatpush.msra.mxu0 %v2258_v17  ;;  %v2249_v30 = vld [vmem:[#allocation8 + $0x2d0] sm:$0xff] }
0x1370   :  { %7588 = vmatmul.msk.f32.gmra.mxu1 %vm1314_vm9, %v2140_v3  ;;  %v2244_v3 = vld [vmem:[#allocation8 + $0x2a0] sm:$0xff] }
0x1371   :  { %2301 = vmatpush.msrb.mxu2 %v2253_v18  ;;  %2324 = vmatpush.msrb.mxu1 %v2254_v20 }
0x1372   :  { %2347 = vmatpush.msra.mxu0 %v2255_v21 }
0x1373   :  { %2302 = vmatpush.msrb.mxu2 %v2250_v22  ;;  %2325 = vmatpush.msrb.mxu1 %v2251_v23 }
0x1374   :  { %2348 = vmatpush.msra.mxu0 %v2252_v24 }
0x1375   :  { %2303 = vmatpush.msrb.mxu2 %v2247_v25  ;;  %2326 = vmatpush.msrb.mxu1 %v2248_v28 }
0x1376   :  { %2349 = vmatpush.msra.mxu0 %v2249_v30 }
0x1377   :  { %2304 = vmatpush.msrb.mxu2 %v2244_v3 }
0x13e2   :  { %v2174_v26 = vpop.f32.mrf.mxu1 }
0x13e3   :  { %v8642_v32 = vadd.f32 %v7788_v31, %v2174_v26  ;;  %v2246_v26 = vld [vmem:[#allocation8 + $0x2b0] sm:$0xff] }
0x13e4   :  { %2350 = vmatpush.msra.mxu0 %v2246_v26 }
0x13e5   :  { %2180 = vadd.xlane.f32.xlu0 %v8642_v32 }
0x13e6   :  { %2351 = vmatpush.msra.mxu0 %v2243_v37 }
0x13e8   :  { %2352 = vmatpush.msra.mxu0 %v2240_v43 }
0x13ea   :  { %2353 = vmatpush.msra.mxu0 %v2237_v41 }
0x13ed   :  { %v2177_v34 = vpop.f32.mrf.mxu1 }
0x13ee   :  { %v8645_v35 = vadd.f32 %v7788_v31, %v2177_v34  ;;  %v2245_v31 = vld [vmem:[#allocation8 + $0x2a8] sm:$0xff]  ;;  %v2241_v34 = vld [vmem:[#allocation8 + $0x280] sm:$0xff] }
0x13ef   :  { %2327 = vmatpush.msrb.mxu1 %v2245_v31  ;;  %2305 = vmatpush.msrb.mxu2 %v2241_v34 }
0x13f0   :  { %2182 = vadd.xlane.f32.xlu2 %v8645_v35 }
0x13f1   :  { %2328 = vmatpush.msrb.mxu1 %v2242_v36  ;;  %2306 = vmatpush.msrb.mxu2 %v2238_v38 }
0x13f3   :  { %2329 = vmatpush.msrb.mxu1 %v2239_v39  ;;  %2307 = vmatpush.msrb.mxu2 %v2235_v46 }
0x13f5   :  { %2330 = vmatpush.msrb.mxu1 %v2236_v47 }
0x1458   :  { %v2181_v54 = vpop.xlane.xlu0 %2180 }
0x1459   :  { %v2191_v9 = vmul.f32 %v8648_v51, %v2181_v54 }
0x145b   :  { %v8652_v55 = vsub.f32 %v8642_v32, %v2191_v9 }
0x145d   :  { %v2195_v56 = vmul.f32 %v8652_v55, %v8652_v55 }
0x145f   :  { %2197 = vadd.xlane.f32.xlu1 %v2195_v56 }
0x1463   :  { %v2183_v59 = vpop.xlane.xlu2 %2182 }
0x1464   :  { %v2192_v60 = vmul.f32 %v8648_v51, %v2183_v59 }
0x1466   :  { %v8658_v61 = vsub.f32 %v8645_v35, %v2192_v60 }
0x1468   :  { %v2196_v1 = vmul.f32 %v8658_v61, %v8658_v61 }
0x146a   :  { %2199 = vadd.xlane.f32.xlu0 %v2196_v1 }
0x14d2   :  { %v2198_v27 = vpop.xlane.xlu1 %2197 }
0x14d3   :  { %v2201_v48 = vmul.f32 %v2198_v27, %v8648_v51 }
0x14d5   :  { %v2203_v49 = vadd.f32 1e-05, %v2201_v48 }
0x14d7   :  { %7927 = vrsqrt.f32 %v2203_v49  ;;  %vm2211_vm11 = vweird.f32 %v2203_v49 }
0x14dd   :  { %v7928_v50 = vpop.eup %7927  ;;  %v2200_v54 = vpop.xlane.xlu0 %2199 }
0x14de   :  { %v2206_v9 = vmul.f32 %v7928_v50, %v2203_v49  ;;  %v2202_v56 = vmul.f32 %v2200_v54, %v8648_v51  ;;  %vm2212_vm10 = vweird.f32 %v7928_v50 }
0x14df   :  { %vm2213_vm12 = vmor %vm2211_vm11, %vm2212_vm10 }
0x14e0   :  { %v2207_v59 = vmul.f32 %v7928_v50, %v2206_v9  ;;  %v2204_v60 = vadd.f32 1e-05, %v2202_v56 }
0x14e2   :  { %v2208_v1 = vmul.f32 0.5, %v2207_v59  ;;  %7929 = vrsqrt.f32 %v2204_v60  ;;  %vm2221_vm14 = vweird.f32 %v2204_v60 }
0x14e4   :  { %v2209_v19 = vsub.f32 1.5, %v2208_v1 }
0x14e6   :  { %v2210_v62 = vmul.f32 %v7928_v50, %v2209_v19 }
0x14e8   :  { %v7930_v0 = vpop.eup %7929  ;;  %v2214_v2 = vsel %vm2213_vm12, %v7928_v50, %v2210_v62 }
0x14e9   :  { %v2225_v42 = vmul.f32 %v2214_v2, %v8652_v55  ;;  %v2216_v5 = vmul.f32 %v7930_v0, %v2204_v60  ;;  %vm2222_vm13 = vweird.f32 %v7930_v0  ;;  %v2284_v55 = vld [vmem:[#allocation8 + $0x440] ss:$8 sm:$0x7] }
0x14ea   :  { %vm2223_vm15 = vmor %vm2221_vm14, %vm2222_vm13  ;;  %v2287_v44 = vperm.slane %v2284_v55, 1  ;;  %v2288_v16 = vperm.slane %v2284_v55, 2  ;;  %v2286_v22 = vperm.slane %v2284_v55, 0 }
0x14eb   :  { %v2217_v8 = vmul.f32 %v7930_v0, %v2216_v5  ;;  %v2229_v4 = vmul.f32 %v7789_v63, %v2225_v42 }
0x14ed   :  { %v2218_v58 = vmul.f32 0.5, %v2217_v8  ;;  %v2233_v10 = vadd.f32 %v7790_v7, %v2229_v4 }
0x14ef   :  { %v2219_v11 = vsub.f32 1.5, %v2218_v58  ;;  %2308 = vmatmul.f32.vlgmr.msrb.gmra.mxu2 %v2233_v10  ;;  %2331 = vmatmul.f32.vlgmr.msrb.gmra.mxu1 %v2233_v10 }
0x14f0   :  { %2354 = vmatmul.f32.vlgmr.msra.gmra.mxu0 %v2233_v10 }
0x14f1   :  { %v2220_v40 = vmul.f32 %v7930_v0, %v2219_v11 }
0x14f3   :  { %v2224_v12 = vsel %vm2223_vm15, %v7930_v0, %v2220_v40 }
0x14f4   :  { %v2226_v13 = vmul.f32 %v2224_v12, %v8658_v61 }
0x14f6   :  { %v2230_v14 = vmul.f32 %v7789_v63, %v2226_v13 }
0x14f8   :  { %v2234_v15 = vadd.f32 %v7790_v7, %v2230_v14 }
0x14fa   :  { %2311 = vmatmul.f32.gmra.mxu2 %v2234_v15  ;;  %2334 = vmatmul.f32.gmra.mxu1 %v2234_v15 }
0x14fb   :  { %2357 = vmatmul.f32.gmra.mxu0 %v2234_v15 }
0x156c   :  { %v2332_v17 = vpop.f32.mrf.mxu1 }
0x156d   :  { %v2333_v18 = vadd.f32 %v2332_v17, %v2287_v44  ;;  %v2355_v20 = vpop.f32.mrf.mxu0 }
0x156e   :  { %v8666_v21 = vadd.f32 %v2355_v20, %v2288_v16 }
0x156f   :  { %2377 = vrot.lane.b32.xlu2 %v2333_v18, %s8295_s16  ;;  %7589 = vmatpush.xpose.msk.msrb.mxu3 %vm477_vm7, %v2333_v18 }
0x1570   :  { %2819 = vmatpush.msrb.mxu0 %v8666_v21 }
0x1572   :  { %v2309_v61 = vpop.f32.mrf.mxu2 }
0x1573   :  { %v2310_v23 = vadd.f32 %v2309_v61, %v2286_v22 }
0x1575   :  { %2363 = vrot.lane.b32.xlu0 %v2310_v23, %s8295_s16  ;;  %7590 = vmatmul.msk.f32.vlgmr.msrb.gmra.mxu3 %vm477_vm7, %v2310_v23 }
0x1577   :  { %v2335_v24 = vpop.f32.mrf.mxu1 }
0x1578   :  { %v2336_v25 = vadd.f32 %v2335_v24, %v2287_v44  ;;  %v2358_v41 = vpop.f32.mrf.mxu0 }
0x1579   :  { %v8697_v48 = vadd.f32 %v2358_v41, %v2288_v16 }
0x157a   :  { %2379 = vrot.lane.b32.xlu1 %v2336_v25, %s8295_s16  ;;  %7591 = vmatpush.xpose.msk.msra.mxu2 %vm477_vm7, %v2336_v25 }
0x157d   :  { %2385 = vrot.lane.b32.xlu0 %v2333_v18, %s8283_s13  ;;  %v2312_v28 = vpop.f32.mrf.mxu2 }
0x157e   :  { %v2313_v30 = vadd.f32 %v2312_v28, %v2286_v22 }
0x1580   :  { %2365 = vrot.lane.b32.xlu2 %v2313_v30, %s8295_s16  ;;  %7592 = vmatmul.msk.f32.vlgmr.msra.gmra.mxu2 %vm477_vm7, %v2313_v30 }
0x1582   :  { %2371 = vrot.lane.b32.xlu1 %v2310_v23, %s8283_s13 }
0x1585   :  { %2367 = vrot.lane.b32.xlu0 %v2310_v23, %s8296_s17 }
0x1588   :  { %2381 = vrot.lane.b32.xlu2 %v2333_v18, %s8296_s17 }
0x158a   :  { %2387 = vrot.lane.b32.xlu1 %v2336_v25, %s8283_s13 }
0x158d   :  { %2383 = vrot.lane.b32.xlu0 %v2336_v25, %s8296_s17 }
0x1590   :  { %2373 = vrot.lane.b32.xlu2 %v2313_v30, %s8283_s13 }
0x1592   :  { %2369 = vrot.lane.b32.xlu1 %v2313_v30, %s8296_s17 }
0x1595   :  { %2391 = vrot.lane.b32.xlu0 %v8666_v21, %s8295_s16 }
0x15c9   :  { %v2378_v3 = vpop.permute.xlu2 %2377 }
0x15ca   :  { %7593 = vmatpush.xpose.msk.msra.mxu3 %vm477_vm7, %v2378_v3 }
0x15da   :  { %v2366_v31 = vpop.permute.xlu2 %2365 }
0x15e2   :  { %v2382_v26 = vpop.permute.xlu2 %2381 }
0x15e3   :  { %7597 = vmatpush.xpose.msk.msrb.mxu3 %vm477_vm7, %v2382_v26 }
0x15e7   :  { %v2364_v34 = vpop.permute.xlu0 %2363 }
0x15e8   :  { %7594 = vmatmul.msk.f32.vlgmr.msra.gmra.mxu3 %vm477_vm7, %v2364_v34 }
0x15ea   :  { %v2374_v49 = vpop.permute.xlu2 %2373 }
0x15ec   :  { %v2380_v36 = vpop.permute.xlu1 %2379 }
0x15ed   :  { %7595 = vmatpush.xpose.msk.msrb.mxu2 %vm477_vm7, %v2380_v36 }
0x15ef   :  { %v2386_v37 = vpop.permute.xlu0 %2385 }
0x15f0   :  { %7596 = vmatmul.msk.f32.vlgmr.msrb.gmra.mxu2 %vm477_vm7, %v2366_v31 }
0x15f1   :  { %7601 = vmatpush.xpose.msk.msra.mxu2 %vm477_vm7, %v2386_v37 }
0x15f4   :  { %v2372_v38 = vpop.permute.xlu1 %2371 }
0x15f7   :  { %v2368_v39 = vpop.permute.xlu0 %2367 }
0x15f8   :  { %v2430_v43 = vpop.f32.mrf.mxu3  ;;  %7598 = vmatmul.msk.f32.vlgmr.msrb.gmra.mxu3 %vm477_vm7, %v2368_v39  ;;  %7602 = vmatmul.msk.f32.vlgmr.msra.gmra.mxu2 %vm477_vm7, %v2372_v38 }
0x15f9   :  { %v2601_v46 = vmul.f32 0.17677669, %v2430_v43 }
0x15fb   :  { %v2609_v47 = vsel %vm794_vm4, %v2601_v46, -inf }
0x15fc   :  { %2610 = vmax.xlane.f32.xlu0 %v2609_v47  ;;  %v2388_v27 = vpop.permute.xlu1 %2387 }
0x15fd   :  { %7603 = vmatpush.xpose.msk.msra.mxu3 %vm477_vm7, %v2388_v27 }
0x15ff   :  { %v2384_v50 = vpop.permute.xlu0 %2383 }
0x1600   :  { %7599 = vmatpush.xpose.msk.msra.mxu1 %vm477_vm7, %v2384_v50  ;;  %7604 = vmatmul.msk.f32.vlgmr.msra.gmra.mxu3 %vm477_vm7, %v2374_v49 }
0x1603   :  { %v2454_v54 = vpop.f32.mrf.mxu2 }
0x1604   :  { %2842 = vmatpush.msrb.mxu1 %v8697_v48  ;;  %v2602_v9 = vmul.f32 0.17677669, %v2454_v54  ;;  %v2370_v56 = vpop.permute.xlu1 %2369 }
0x1605   :  { %7600 = vmatmul.msk.f32.vlgmr.msra.gmra.mxu1 %vm477_vm7, %v2370_v56 }
0x1606   :  { %v2612_v59 = vsel %vm794_vm4, %v2602_v9, -inf }
0x1607   :  { %2613 = vmax.xlane.f32.xlu1 %v2612_v59  ;;  %v2392_v60 = vpop.permute.xlu0 %2391 }
0x1608   :  { %2865 = vmatpush.msrb.mxu2 %v2392_v60 }
0x166b   :  { %v2478_v1 = vpop.f32.mrf.mxu3 }
0x166c   :  { %v2603_v19 = vmul.f32 0.17677669, %v2478_v1 }
0x166e   :  { %v2615_v62 = vsel %vm794_vm4, %v2603_v19, -inf }
0x166f   :  { %2616 = vmax.xlane.f32.xlu2 %v2615_v62  ;;  %v2611_v63 = vpop.xlane.xlu0 %2610 }
0x1670   :  { %v2633_v2 = vsub.f32 %v2601_v46, %v2611_v63 }
0x1672   :  { %v2641_v42 = vmul.f32 1.442695, %v2633_v2 }
0x1673   :  { %v2502_v0 = vpop.f32.mrf.mxu2 }
0x1674   :  { %7931 = vpow2.f32 %v2641_v42  ;;  %v2604_v55 = vmul.f32 0.17677669, %v2502_v0 }
0x1676   :  { %v2618_v16 = vsel %vm794_vm4, %v2604_v55, -inf }
0x167a   :  { %v8707_v40 = vpop.eup %7931  ;;  %v2614_v18 = vpop.xlane.xlu1 %2613 }
0x167b   :  { %v2526_v5 = vpop.f32.mrf.mxu3  ;;  %v2574_v7 = vpop.f32.mrf.mxu2  ;;  %v2657_v14 = vsel %vm794_vm4, %v8707_v40, 0.0  ;;  %v2634_v20 = vsub.f32 %v2602_v9, %v2614_v18 }
0x167c   :  { %v2605_v8 = vmul.f32 0.17677669, %v2526_v5  ;;  %v2607_v4 = vmul.f32 0.17677669, %v2574_v7 }
0x167d   :  { %v2643_v22 = vmul.f32 1.442695, %v2634_v20 }
0x167e   :  { %v2627_v58 = vsel %vm794_vm4, %v2607_v4, -inf  ;;  %v2621_v10 = vsel %vm794_vm4, %v2605_v8, -inf }
0x167f   :  { %2628 = vmax.xlane.f32.xlu1 %v2627_v58  ;;  %2622 = vmax.xlane.f32.xlu2 %v2621_v10  ;;  %7933 = vpow2.f32 %v2643_v22 }
0x1682   :  { %v2550_v11 = vpop.f32.mrf.mxu1 }
0x1683   :  { %v2606_v12 = vmul.f32 0.17677669, %v2550_v11  ;;  %v2598_v15 = vpop.f32.mrf.mxu3 }
0x1684   :  { %v2608_v44 = vmul.f32 0.17677669, %v2598_v15 }
0x1685   :  { %v2624_v13 = vsel %vm794_vm4, %v2606_v12, -inf  ;;  %v8718_v61 = vpop.eup %7933 }
0x1686   :  { %2625 = vmax.xlane.f32.xlu0 %v2624_v13  ;;  %v2630_v17 = vsel %vm794_vm4, %v2608_v44, -inf  ;;  %v2660_v23 = vsel %vm794_vm4, %v8718_v61, 0.0 }
0x1687   :  { %2658 = vadd.xlane.f32.xlu2 %v2657_v14 }
0x168e   :  { %2619 = vmax.xlane.f32.xlu0 %v2618_v16 }
0x168f   :  { %2631 = vmax.xlane.f32.xlu2 %v2630_v17 }
0x1698   :  { %2403 = vrot.lane.b32.xlu1 %v8666_v21, %s8283_s13 }
0x16a2   :  { %2397 = vrot.lane.b32.xlu0 %v8666_v21, %s8296_s17 }
0x16c2   :  { %2661 = vadd.xlane.f32.xlu1 %v2660_v23 }
0x16e2   :  { %v2617_v24 = vpop.xlane.xlu2 %2616 }
0x16e3   :  { %v2635_v25 = vsub.f32 %v2603_v19, %v2617_v24 }
0x16e5   :  { %v2645_v28 = vmul.f32 1.442695, %v2635_v25 }
0x16e7   :  { %7935 = vpow2.f32 %v2645_v28 }
0x16ed   :  { %v8722_v30 = vpop.eup %7935 }
0x16ee   :  { %v2663_v3 = vsel %vm794_vm4, %v8722_v30, 0.0 }
0x16ef   :  { %2664 = vadd.xlane.f32.xlu1 %v2663_v3 }
0x16f2   :  { %v2629_v21 = vpop.xlane.xlu1 %2628  ;;  %v2623_v31 = vpop.xlane.xlu2 %2622 }
0x16f3   :  { %v2639_v26 = vsub.f32 %v2607_v4, %v2629_v21  ;;  %v2637_v34 = vsub.f32 %v2605_v8, %v2623_v31 }
0x16f5   :  { %v2653_v36 = vmul.f32 1.442695, %v2639_v26  ;;  %v2649_v37 = vmul.f32 1.442695, %v2637_v34 }
0x16f7   :  { %7937 = vpow2.f32 %v2653_v36 }
0x16f8   :  { %7939 = vpow2.f32 %v2649_v37 }
0x16f9   :  { %v2626_v38 = vpop.xlane.xlu0 %2625 }
0x16fa   :  { %v2638_v39 = vsub.f32 %v2606_v12, %v2626_v38  ;;  %v2659_v43 = vpop.xlane.xlu2 %2658 }
0x16fb   :  { %7941 = vrcp.f32 %v2659_v43  ;;  %v2692_v63 = vand.u32 2147483648, %v2659_v43  ;;  %v2690_v42 = vand.u32 2147483647, %v2659_v43  ;;  %vm2686_vm1 = vweird.f32 %v2659_v43 }
0x16fc   :  { %v2651_v46 = vmul.f32 1.442695, %v2638_v39 }
0x16fd   :  { %v8726_v47 = vpop.eup %7937  ;;  %v2693_v8 = vor.u32 1.1754944e-38, %v2692_v63  ;;  %vm2691_vm3 = vcmp.eq.f32.partialorder %v2690_v42, 8.507059e+37 }
0x16fe   :  { %v8728_v41 = vpop.eup %7939  ;;  %7943 = vpow2.f32 %v2651_v46  ;;  %v2675_v27 = vsel %vm794_vm4, %v8726_v47, 0.0 }
0x16ff   :  { %v2669_v49 = vsel %vm794_vm4, %v8728_v41, 0.0  ;;  %2676 = vadd.xlane.f32.xlu0 %v2675_v27 }
0x1700   :  { %2670 = vadd.xlane.f32.xlu1 %v2669_v49 }
0x1701   :  { %v7942_v50 = vpop.eup %7941  ;;  %v2620_v54 = vpop.xlane.xlu0 %2619 }
0x1702   :  { %v2682_v9 = vmul.f32 %v7942_v50, %v2659_v43  ;;  %v2636_v56 = vsub.f32 %v2604_v55, %v2620_v54  ;;  %v2632_v59 = vpop.xlane.xlu2 %2631  ;;  %vm2687_vm0 = vweird.f32 %v7942_v50 }
0x1703   :  { %v2640_v62 = vsub.f32 %v2608_v44, %v2632_v59  ;;  %vm2688_vm2 = vmor %vm2686_vm1, %vm2687_vm0 }
0x1704   :  { %v8734_v60 = vpop.eup %7943  ;;  %v2683_v1 = vsub.f32 1.0, %v2682_v9  ;;  %v2647_v19 = vmul.f32 1.442695, %v2636_v56 }
0x1705   :  { %v2672_v0 = vsel %vm794_vm4, %v8734_v60, 0.0  ;;  %v2655_v7 = vmul.f32 1.442695, %v2640_v62 }
0x1706   :  { %v2684_v2 = vmul.f32 %v7942_v50, %v2683_v1  ;;  %7945 = vpow2.f32 %v2647_v19  ;;  %2673 = vadd.xlane.f32.xlu2 %v2672_v0 }
0x1707   :  { %7947 = vpow2.f32 %v2655_v7 }
0x1708   :  { %v2685_v5 = vadd.f32 %v7942_v50, %v2684_v2 }
0x170a   :  { %v2689_v4 = vsel %vm2688_vm2, %v7942_v50, %v2685_v5  ;;  %v2404_v58 = vpop.permute.xlu1 %2403 }
0x170b   :  { %2957 = vmatpush.msra.mxu2 %v2404_v58  ;;  %v2694_v10 = vsel %vm2691_vm3, %v2693_v8, %v2689_v4 }
0x170c   :  { %v8738_v11 = vpop.eup %7945  ;;  %v2695_v12 = vmul.f32 %v8707_v40, %v2694_v10 }
0x170d   :  { %v2666_v13 = vsel %vm794_vm4, %v8738_v11, 0.0  ;;  %v8744_v14 = vpop.eup %7947 }
0x170e   :  { %7605 = vmatmul.msk.f32.vlgmr.msrb.gmra.mxu0 %vm794_vm4, %v2695_v12  ;;  %2667 = vadd.xlane.f32.xlu2 %v2666_v13  ;;  %v2678_v55 = vsel %vm794_vm4, %v8744_v14, 0.0 }
0x1713   :  { %2405 = vrot.lane.b32.xlu0 %v8697_v48, %s8283_s13 }
0x1714   :  { %v2398_v15 = vpop.permute.xlu0 %2397 }
0x1715   :  { %2911 = vmatpush.msra.mxu0 %v2398_v15 }
0x1716   :  { %2679 = vadd.xlane.f32.xlu2 %v2678_v55 }
0x1719   :  { %2399 = vrot.lane.b32.xlu1 %v8697_v48, %s8296_s17 }
0x172e   :  { %2393 = vrot.lane.b32.xlu2 %v8697_v48, %s8295_s16 }
0x1735   :  { %v2662_v40 = vpop.xlane.xlu1 %2661 }
0x1736   :  { %7949 = vrcp.f32 %v2662_v40  ;;  %v2707_v18 = vand.u32 2147483648, %v2662_v40  ;;  %v2705_v22 = vand.u32 2147483647, %v2662_v40  ;;  %vm2701_vm6 = vweird.f32 %v2662_v40 }
0x1738   :  { %v2708_v24 = vor.u32 1.1754944e-38, %v2707_v18  ;;  %vm2706_vm11 = vcmp.eq.f32.partialorder %v2705_v22, 8.507059e+37 }
0x173c   :  { %v7950_v44 = vpop.eup %7949 }
0x173d   :  { %v2697_v16 = vmul.f32 %v7950_v44, %v2662_v40  ;;  %vm2702_vm5 = vweird.f32 %v7950_v44 }
0x173e   :  { %vm2703_vm10 = vmor %vm2701_vm6, %vm2702_vm5 }
0x173f   :  { %v2698_v17 = vsub.f32 1.0, %v2697_v16 }
0x1741   :  { %v2699_v20 = vmul.f32 %v7950_v44, %v2698_v17 }
0x1743   :  { %v2700_v23 = vadd.f32 %v7950_v44, %v2699_v20 }
0x1745   :  { %v2704_v25 = vsel %vm2703_vm10, %v7950_v44, %v2700_v23 }
0x1746   :  { %v2709_v28 = vsel %vm2706_vm11, %v2708_v24, %v2704_v25 }
0x1747   :  { %v2710_v3 = vmul.f32 %v8718_v61, %v2709_v28 }
0x1749   :  { %7606 = vmatmul.msk.f32.vlgmr.msrb.gmra.mxu1 %vm794_vm4, %v2710_v3 }
0x1762   :  { %v2665_v48 = vpop.xlane.xlu1 %2664 }
0x1763   :  { %7951 = vrcp.f32 %v2665_v48  ;;  %v2722_v36 = vand.u32 2147483648, %v2665_v48  ;;  %vm2716_vm13 = vweird.f32 %v2665_v48  ;;  %v2720_v38 = vand.u32 2147483647, %v2665_v48 }
0x1765   :  { %v2723_v46 = vor.u32 1.1754944e-38, %v2722_v36  ;;  %vm2721_vm15 = vcmp.eq.f32.partialorder %v2720_v38, 8.507059e+37  ;;  %v3061_v36 = vld [vmem:[#allocation7 + $0x528] sm:$0xff] }
0x1769   :  { %v7952_v21 = vpop.eup %7951 }
0x176a   :  { %v2712_v31 = vmul.f32 %v7952_v21, %v2665_v48  ;;  %vm2717_vm12 = vweird.f32 %v7952_v21 }
0x176b   :  { %vm2718_vm14 = vmor %vm2716_vm13, %vm2717_vm12 }
0x176c   :  { %v2713_v26 = vsub.f32 1.0, %v2712_v31 }
0x176e   :  { %v2714_v34 = vmul.f32 %v7952_v21, %v2713_v26 }
0x1770   :  { %v2715_v37 = vadd.f32 %v7952_v21, %v2714_v34 }
0x1772   :  { %v2719_v39 = vsel %vm2718_vm14, %v7952_v21, %v2715_v37  ;;  %v2677_v43 = vpop.xlane.xlu0 %2676 }
0x1773   :  { %v2671_v27 = vpop.xlane.xlu1 %2670  ;;  %7953 = vrcp.f32 %v2677_v43  ;;  %v2724_v61 = vsel %vm2721_vm15, %v2723_v46, %v2719_v39  ;;  %v2782_v62 = vand.u32 2147483648, %v2677_v43  ;;  %v2780_v2 = vand.u32 2147483647, %v2677_v43  ;;  %v3060_v39 = vld [vmem:[#allocation7 + $0x520] sm:$0xff] }
0x1774   :  { %7955 = vrcp.f32 %v2671_v27  ;;  %v2725_v49 = vmul.f32 %v8722_v30, %v2724_v61  ;;  %v2752_v63 = vand.u32 2147483648, %v2671_v27  ;;  %v2750_v5 = vand.u32 2147483647, %v2671_v27  ;;  %v3059_v61 = vld [vmem:[#allocation7 + $0x518] sm:$0xff] }
0x1775   :  { %vm2776_vm2 = vweird.f32 %v2677_v43  ;;  %vm2746_vm3 = vweird.f32 %v2671_v27  ;;  %v2783_v4 = vor.u32 1.1754944e-38, %v2782_v62  ;;  %vm2781_vm10 = vcmp.eq.f32.partialorder %v2780_v2, 8.507059e+37 }
0x1776   :  { %7607 = vmatmul.msk.f32.vlgmr.msrb.gmra.mxu2 %vm794_vm4, %v2725_v49  ;;  %v2753_v12 = vor.u32 1.1754944e-38, %v2752_v63  ;;  %vm2751_vm11 = vcmp.eq.f32.partialorder %v2750_v5, 8.507059e+37 }
0x1779   :  { %v7954_v50 = vpop.eup %7953  ;;  %v2674_v54 = vpop.xlane.xlu2 %2673 }
0x177a   :  { %v7956_v9 = vpop.eup %7955  ;;  %v2772_v56 = vmul.f32 %v7954_v50, %v2677_v43  ;;  %7957 = vrcp.f32 %v2674_v54  ;;  %vm2777_vm0 = vweird.f32 %v7954_v50  ;;  %v2767_v18 = vand.u32 2147483648, %v2674_v54 }
0x177b   :  { %v2742_v59 = vmul.f32 %v7956_v9, %v2671_v27  ;;  %vm2747_vm1 = vweird.f32 %v7956_v9  ;;  %vm2778_vm5 = vmor %vm2776_vm2, %vm2777_vm0  ;;  %v2765_v22 = vand.u32 2147483647, %v2674_v54  ;;  %vm2761_vm13 = vweird.f32 %v2674_v54 }
0x177c   :  { %v2773_v1 = vsub.f32 1.0, %v2772_v56  ;;  %vm2748_vm6 = vmor %vm2746_vm3, %vm2747_vm1  ;;  %v2768_v28 = vor.u32 1.1754944e-38, %v2767_v18  ;;  %v3023_v18 = vld [vmem:[#allocation7 + $0x4c8] sm:$0xff] }
0x177d   :  { %v2743_v19 = vsub.f32 1.0, %v2742_v59  ;;  %vm2766_vm15 = vcmp.eq.f32.partialorder %v2765_v22, 8.507059e+37  ;;  %v3021_v22 = vld [vmem:[#allocation7 + $0x4b8] sm:$0xff] }
0x177e   :  { %v2774_v0 = vmul.f32 %v7954_v50, %v2773_v1 }
0x177f   :  { %v2744_v42 = vmul.f32 %v7956_v9, %v2743_v19 }
0x1780   :  { %v7958_v7 = vpop.eup %7957  ;;  %v2775_v30 = vadd.f32 %v7954_v50, %v2774_v0 }
0x1781   :  { %v2745_v8 = vadd.f32 %v7956_v9, %v2744_v42  ;;  %v2757_v58 = vmul.f32 %v7958_v7, %v2674_v54  ;;  %v2668_v10 = vpop.xlane.xlu2 %2667  ;;  %vm2762_vm12 = vweird.f32 %v7958_v7 }
0x1782   :  { %v2779_v13 = vsel %vm2778_vm5, %v7954_v50, %v2775_v30  ;;  %7959 = vrcp.f32 %v2668_v10  ;;  %vm2763_vm14 = vmor %vm2761_vm13, %vm2762_vm12  ;;  %v2735_v38 = vand.u32 2147483647, %v2668_v10  ;;  %vm2731_vm1 = vweird.f32 %v2668_v10  ;;  %v3031_v30 = vld [vmem:[#allocation7 + $0x508] sm:$0xff] }
0x1783   :  { %v2749_v15 = vsel %vm2748_vm6, %v7956_v9, %v2745_v8  ;;  %v2758_v55 = vsub.f32 1.0, %v2757_v58  ;;  %v2784_v40 = vsel %vm2781_vm10, %v2783_v4, %v2779_v13  ;;  %v3030_v8 = vld [vmem:[#allocation7 + $0x500] sm:$0xff]  ;;  %3034 = vmatpush.msrb.mxu0 %v3031_v30  ;;  %v3029_v58 = vld [vmem:[#allocation7 + $0x4f8] sm:$0xff]  ;;  %v3027_v13 = vld [vmem:[#allocation7 + $0x4e8] sm:$0xff]  ;;  %vm3013_vm12 = vcmask 785408  }
0x1784   :  { %v2754_v44 = vsel %vm2751_vm11, %v2753_v12, %v2749_v15  ;;  %v2785_v16 = vmul.f32 %v8726_v47, %v2784_v40  ;;  %v3062_v47 = vld [vmem:[#allocation7 + $0x530] sm:$0xff]  ;;  %vm2736_vm3 = vcmp.eq.f32.partialorder %v2735_v38, 8.507059e+37  ;;  %v3026_v15 = vld [vmem:[#allocation7 + $0x4e0] sm:$0xff]  ;;  %v3025_v40 = vld [vmem:[#allocation7 + $0x4d8] sm:$0xff] }
0x1785   :  { %v2759_v17 = vmul.f32 %v7958_v7, %v2758_v55  ;;  %v2755_v20 = vmul.f32 %v8728_v41, %v2754_v44  ;;  %v2737_v41 = vand.u32 2147483648, %v2668_v10  ;;  %3035 = vmatpush.msrb.mxu0 %v3030_v8  ;;  %v3028_v12 = vld [vmem:[#allocation7 + $0x4f0] sm:$0xff]  ;;  %v3199_v8 = vld [vmem:[#allocation8 + $0x630] sm:$0xff] }
0x1786   :  { %7611 = vmatmul.msk.f32.vlgmr.msra.gmra.mxu2 %vm794_vm4, %v2785_v16 }
0x1787   :  { %v2760_v23 = vadd.f32 %v7958_v7, %v2759_v17  ;;  %7609 = vmatmul.msk.f32.vlgmr.msra.gmra.mxu0 %vm794_vm4, %v2755_v20  ;;  %v2738_v27 = vor.u32 1.1754944e-38, %v2737_v41  ;;  %v3024_v17 = vld [vmem:[#allocation7 + $0x4d0] sm:$0xff]  ;;  %v3022_v20 = vld [vmem:[#allocation7 + $0x4c0] sm:$0xff] }
0x1788   :  { %v7960_v24 = vpop.eup %7959  ;;  %3036 = vmatpush.msrb.mxu0 %v3029_v58 }
0x1789   :  { %v2764_v25 = vsel %vm2763_vm14, %v7958_v7, %v2760_v23  ;;  %v2727_v3 = vmul.f32 %v7960_v24, %v2668_v10  ;;  %v2680_v48 = vpop.xlane.xlu2 %2679  ;;  %vm2732_vm0 = vweird.f32 %v7960_v24  ;;  %v3020_v23 = vld [vmem:[#allocation7 + $0x4b0] sm:$0xff] }
0x178a   :  { %7961 = vrcp.f32 %v2680_v48  ;;  %v2769_v26 = vsel %vm2766_vm15, %v2768_v28, %v2764_v25  ;;  %vm2733_vm2 = vmor %vm2731_vm1, %vm2732_vm0  ;;  %v2797_v1 = vand.u32 2147483648, %v2680_v48  ;;  %v2795_v62 = vand.u32 2147483647, %v2680_v48  ;;  %3037 = vmatpush.msrb.mxu0 %v3028_v12  ;;  %v3018_v25 = vld [vmem:[#allocation7 + $0x4a0] sm:$0xff]  ;;  %v3017_v28 = vld [vmem:[#allocation7 + $0x498] sm:$0xff] }
0x178b   :  { %v2728_v21 = vsub.f32 1.0, %v2727_v3  ;;  %v2400_v31 = vpop.permute.xlu1 %2399  ;;  %v2770_v34 = vmul.f32 %v8734_v60, %v2769_v26  ;;  %v2406_v60 = vpop.permute.xlu0 %2405  ;;  %vm2791_vm6 = vweird.f32 %v2680_v48  ;;  %v3016_v3 = vld [vmem:[#allocation7 + $0x490] sm:$0xff] }
0x178c   :  { %2934 = vmatpush.msra.mxu1 %v2400_v31  ;;  %v2798_v0 = vor.u32 1.1754944e-38, %v2797_v1  ;;  %vm2796_vm11 = vcmp.eq.f32.partialorder %v2795_v62, 8.507059e+37  ;;  %v2821_v7 = vpop.f32.mrf.mxu0  ;;  %3038 = vmatpush.msrb.mxu0 %v3027_v13 }
0x178d   :  { %v2729_v37 = vmul.f32 %v7960_v24, %v2728_v21  ;;  %7610 = vmatmul.msk.f32.vlgmr.msra.gmra.mxu1 %vm794_vm4, %v2770_v34 }
0x178e   :  { %3077 = vmatpush.msrb.mxu1 %v3062_v47  ;;  %3039 = vmatpush.msrb.mxu0 %v3026_v15 }
0x178f   :  { %v2730_v43 = vadd.f32 %v7960_v24, %v2729_v37 }
0x1790   :  { %3078 = vmatpush.msrb.mxu1 %v3061_v36  ;;  %v7962_v46 = vpop.eup %7961  ;;  %3040 = vmatpush.msrb.mxu0 %v3025_v40  ;;  %v3194_v40 = vld [vmem:[#allocation8 + $0x608] sm:$0xff] }
0x1791   :  { %v2734_v49 = vsel %vm2733_vm2, %v7960_v24, %v2730_v43  ;;  %v2787_v50 = vmul.f32 %v7962_v46, %v2680_v48  ;;  %v2394_v54 = vpop.permute.xlu2 %2393  ;;  %vm2792_vm5 = vweird.f32 %v7962_v46  ;;  %v3019_v24 = vld [vmem:[#allocation7 + $0x4a8] sm:$0xff] }
0x1792   :  { %3079 = vmatpush.msrb.mxu1 %v3060_v39  ;;  %2888 = vmatpush.msrb.mxu3 %v2394_v54  ;;  %v2739_v9 = vsel %vm2736_vm3, %v2738_v27, %v2734_v49  ;;  %vm2793_vm10 = vmor %vm2791_vm6, %vm2792_vm5 }
0x1793   :  { %v2788_v56 = vsub.f32 1.0, %v2787_v50  ;;  %v2740_v59 = vmul.f32 %v8738_v11, %v2739_v9  ;;  %3041 = vmatpush.msrb.mxu0 %v3024_v17  ;;  %v3189_v17 = vld [vmem:[#allocation8 + $0x5e0] sm:$0xff] }
0x1794   :  { %2980 = vmatpush.msra.mxu3 %v2406_v60  ;;  %3080 = vmatpush.msrb.mxu1 %v3059_v61  ;;  %v7792_v61 = vld [vmem:[#allocation7 + $0x510] ss:$0 sm:$0xff] }
0x1795   :  { %v2789_v19 = vmul.f32 %v7962_v46, %v2788_v56  ;;  %7608 = vmatmul.msk.f32.vlgmr.msrb.gmra.mxu3 %vm794_vm4, %v2740_v59  ;;  %7613 = vmatmul.msk.f32.vlgmr.msrb.gmra.mxu1 %vm477_vm7, %v8423_v57 }
0x1796   :  { %3042 = vmatpush.msrb.mxu0 %v3023_v18  ;;  %v3190_v18 = vld [vmem:[#allocation8 + $0x5e8] sm:$0xff] }
0x1797   :  { %v2790_v63 = vadd.f32 %v7962_v46, %v2789_v19 }
0x1798   :  { %3043 = vmatpush.msrb.mxu0 %v3022_v20  ;;  %v3191_v20 = vld [vmem:[#allocation8 + $0x5f0] sm:$0xff] }
0x1799   :  { %v2794_v2 = vsel %vm2793_vm10, %v7962_v46, %v2790_v63  ;;  %v7791_v46 = vld [vmem:[#allocation7 + $0x538] ss:$0 sm:$0xff] }
0x179a   :  { %v2799_v42 = vsel %vm2796_vm11, %v2798_v0, %v2794_v2  ;;  %3044 = vmatpush.msrb.mxu0 %v3021_v22  ;;  %v3201_v2 = vld [vmem:[#allocation8 + $0x640] sm:$0xff]  ;;  %v3192_v22 = vld [vmem:[#allocation8 + $0x5f8] sm:$0xff] }
0x179b   :  { %v2800_v5 = vmul.f32 %v8744_v14, %v2799_v42  ;;  %v3202_v42 = vld [vmem:[#allocation8 + $0x648] sm:$0xff]  ;;  %3216 = vmatpush.msrb.mxu2 %v3201_v2  ;;  %v3159_v2 = vld [vmem:[#allocation8 + $0x4f0] sm:$0xff] }
0x179c   :  { %3045 = vmatpush.msrb.mxu0 %v3020_v23  ;;  %3239 = vmatpush.msrb.mxu3 %v3202_v42  ;;  %v3185_v23 = vld [vmem:[#allocation8 + $0x5c0] sm:$0xff]  ;;  %v3160_v42 = vld [vmem:[#allocation8 + $0x4f8] sm:$0xff] }
0x179d   :  { %7612 = vmatmul.msk.f32.vlgmr.msra.gmra.mxu3 %vm794_vm4, %v2800_v5  ;;  %v3203_v5 = vld [vmem:[#allocation8 + $0x650] sm:$0xff] }
0x179e   :  { %3046 = vmatpush.msrb.mxu0 %v3019_v24  ;;  %3262 = vmatpush.msra.mxu1 %v3203_v5  ;;  %v3186_v24 = vld [vmem:[#allocation8 + $0x5c8] sm:$0xff]  ;;  %v3153_v5 = vld [vmem:[#allocation8 + $0x4c0] sm:$0xff] }
0x17a0   :  { %3047 = vmatpush.msrb.mxu0 %v3018_v25  ;;  %3263 = vmatpush.msra.mxu1 %v3199_v8  ;;  %v3187_v25 = vld [vmem:[#allocation8 + $0x5d0] sm:$0xff]  ;;  %v3150_v8 = vld [vmem:[#allocation8 + $0x4a8] sm:$0xff] }
0x17a2   :  { %3048 = vmatpush.msrb.mxu0 %v3017_v28  ;;  %v3188_v28 = vld [vmem:[#allocation8 + $0x5d8] sm:$0xff] }
0x17a4   :  { %3049 = vmatpush.msrb.mxu0 %v3016_v3  ;;  %v3181_v3 = vld [vmem:[#allocation8 + $0x5a0] sm:$0xff] }
0x17c6   :  { %v2844_v4 = vpop.f32.mrf.mxu1 }
0x17f9   :  { %v2867_v11 = vpop.f32.mrf.mxu2 }
0x17fa   :  { %2987 = vrot.lane.b32.xlu0 %v2867_v11, %s8283_s13  ;;  %v3197_v11 = vld [vmem:[#allocation8 + $0x620] sm:$0xff] }
0x17fb   :  { %3217 = vmatpush.msrb.mxu2 %v3197_v11  ;;  %v3155_v11 = vld [vmem:[#allocation8 + $0x4d0] sm:$0xff] }
0x1804   :  { %v2913_v10 = vpop.f32.mrf.mxu0 }
0x1805   :  { %2995 = vrot.lane.b32.xlu1 %v2913_v10, %s8296_s17 }
0x1809   :  { %v2959_v14 = vpop.f32.mrf.mxu2 }
0x180a   :  { %3003 = vrot.lane.b32.xlu0 %v2959_v14, %s8295_s16  ;;  %v2936_v55 = vpop.f32.mrf.mxu1 }
0x180d   :  { %2997 = vrot.lane.b32.xlu1 %v2936_v55, %s8296_s17  ;;  %v3193_v55 = vld [vmem:[#allocation8 + $0x600] sm:$0xff] }
0x180e   :  { %3218 = vmatpush.msrb.mxu2 %v3193_v55  ;;  %v3141_v55 = vld [vmem:[#allocation8 + $0x460] sm:$0xff] }
0x1810   :  { %3219 = vmatpush.msrb.mxu2 %v3189_v17 }
0x1812   :  { %v3082_v27 = vpop.f32.mrf.mxu1  ;;  %3220 = vmatpush.msrb.mxu2 %v3185_v23 }
0x1813   :  { %v3083_v49 = vadd.f32 %v7791_v46, %v3082_v27  ;;  %v3170_v46 = vld [vmem:[#allocation8 + $0x548] sm:$0xff]  ;;  %v3171_v27 = vld [vmem:[#allocation8 + $0x550] sm:$0xff] }
0x1814   :  { %3221 = vmatpush.msrb.mxu2 %v3181_v3 }
0x1815   :  { %v3087_v60 = vperm.slane %v3083_v49, 0  ;;  %v3086_v59 = vrot.slane %v3083_v49, 1  ;;  %v3165_v49 = vld [vmem:[#allocation8 + $0x520] sm:$0xff] }
0x1817   :  { %v3088_v62 = vperm.slane %v3086_v59, 0  ;;  %v3162_v59 = vld [vmem:[#allocation8 + $0x508] sm:$0xff] }
0x1818   :  { %v2890_v44 = vpop.f32.mrf.mxu3 }
0x1819   :  { %2989 = vrot.lane.b32.xlu2 %v2890_v44, %s8283_s13  ;;  %v3195_v44 = vld [vmem:[#allocation8 + $0x610] sm:$0xff] }
0x181a   :  { %3264 = vmatpush.msra.mxu1 %v3195_v44  ;;  %v3143_v44 = vld [vmem:[#allocation8 + $0x470] sm:$0xff] }
0x181c   :  { %3265 = vmatpush.msra.mxu1 %v3191_v20 }
0x181e   :  { %3266 = vmatpush.msra.mxu1 %v3187_v25 }
0x1820   :  { %v2982_v16 = vpop.f32.mrf.mxu3 }
0x1821   :  { %3005 = vrot.lane.b32.xlu0 %v2982_v16, %s8295_s16  ;;  %v3196_v16 = vld [vmem:[#allocation8 + $0x618] sm:$0xff] }
0x186c   :  { %v2988_v48 = vpop.permute.xlu0 %2987 }
0x186d   :  { %v3009_v21 = vsel %vm477_vm7, %v2821_v7, %v2988_v48  ;;  %v3198_v7 = vld [vmem:[#allocation8 + $0x628] sm:$0xff] }
0x186e   :  { %3240 = vmatpush.msrb.mxu3 %v3198_v7  ;;  %v3182_v48 = vld [vmem:[#allocation8 + $0x5a8] sm:$0xff]  ;;  %v3156_v7 = vld [vmem:[#allocation8 + $0x4d8] sm:$0xff] }
0x1870   :  { %3241 = vmatpush.msrb.mxu3 %v3194_v40  ;;  %v3142_v40 = vld [vmem:[#allocation8 + $0x468] sm:$0xff] }
0x1872   :  { %3242 = vmatpush.msrb.mxu3 %v3190_v18 }
0x1873   :  { %v2990_v34 = vpop.permute.xlu2 %2989 }
0x1874   :  { %v3010_v37 = vsel %vm477_vm7, %v2844_v4, %v2990_v34  ;;  %v3200_v4 = vld [vmem:[#allocation8 + $0x638] sm:$0xff]  ;;  %3243 = vmatpush.msrb.mxu3 %v3186_v24 }
0x1875   :  { %v3180_v34 = vld [vmem:[#allocation8 + $0x598] sm:$0xff] }
0x1876   :  { %3244 = vmatpush.msrb.mxu3 %v3182_v48  ;;  %v7793_v48 = vld [vmem:[#allocation7 + $0x480] ss:$0 sm:$0xff] }
0x1877   :  { %v2996_v47 = vpop.permute.xlu1 %2995 }
0x1878   :  { %v3011_v31 = vsel %vm1314_vm9, %v3009_v21, %v2996_v47  ;;  %v3183_v47 = vld [vmem:[#allocation8 + $0x5b0] sm:$0xff]  ;;  %v3184_v21 = vld [vmem:[#allocation8 + $0x5b8] sm:$0xff] }
0x1879   :  { %3267 = vmatpush.msra.mxu1 %v3183_v47  ;;  %v3427_v47 = vld [vmem:[#allocation7 + $0x6b8] sm:$0xff] }
0x187c   :  { %v3004_v26 = vpop.permute.xlu0 %3003 }
0x187d   :  { %v3014_v41 = vsel %vm3013_vm12, %v3011_v31, %v3004_v26  ;;  %v3177_v31 = vld [vmem:[#allocation8 + $0x580] sm:$0xff]  ;;  %v3178_v26 = vld [vmem:[#allocation8 + $0x588] sm:$0xff] }
0x187e   :  { %3050 = vmatmul.f32.vlgmr.msrb.gmra.mxu0 %v3014_v41  ;;  %v3179_v41 = vld [vmem:[#allocation8 + $0x590] sm:$0xff]  ;;  %3222 = vmatpush.msrb.mxu2 %v3177_v31  ;;  %v3426_v31 = vld [vmem:[#allocation7 + $0x6b0] sm:$0xff] }
0x187f   :  { %v2998_v36 = vpop.permute.xlu1 %2997  ;;  %3245 = vmatpush.msrb.mxu3 %v3178_v26  ;;  %3268 = vmatpush.msra.mxu1 %v3179_v41  ;;  %v3442_v41 = vld [vmem:[#allocation7 + $0x730] sm:$0xff] }
0x1880   :  { %v3012_v38 = vsel %vm1314_vm9, %v3010_v37, %v2998_v36  ;;  %v3173_v36 = vld [vmem:[#allocation8 + $0x560] sm:$0xff]  ;;  %v3174_v37 = vld [vmem:[#allocation8 + $0x568] sm:$0xff] }
0x1881   :  { %3223 = vmatpush.msrb.mxu2 %v3173_v36  ;;  %3246 = vmatpush.msrb.mxu3 %v3174_v37  ;;  %v7794_v37 = vld [vmem:[#allocation7 + $0x488] ss:$0 sm:$0xff] }
0x1883   :  { %3247 = vmatpush.msrb.mxu3 %v3170_v46 }
0x1893   :  { %v3006_v39 = vpop.permute.xlu0 %3005 }
0x1894   :  { %v3015_v43 = vsel %vm3013_vm12, %v3012_v38, %v3006_v39  ;;  %v3175_v38 = vld [vmem:[#allocation8 + $0x570] sm:$0xff]  ;;  %v3176_v39 = vld [vmem:[#allocation8 + $0x578] sm:$0xff] }
0x1895   :  { %3053 = vmatmul.f32.gmra.mxu0 %v3015_v43  ;;  %3269 = vmatpush.msra.mxu1 %v3175_v38  ;;  %v3169_v43 = vld [vmem:[#allocation8 + $0x540] sm:$0xff] }
0x1896   :  { %3224 = vmatpush.msrb.mxu2 %v3169_v43  ;;  %v3425_v38 = vld [vmem:[#allocation7 + $0x6a8] sm:$0xff] }
0x1897   :  { %3270 = vmatpush.msra.mxu1 %v3171_v27 }
0x1898   :  { %3225 = vmatpush.msrb.mxu2 %v3165_v49 }
0x18fb   :  { %v3051_v50 = vpop.f32.mrf.mxu0 }
0x18fc   :  { %v3052_v54 = vadd.f32 %v7792_v61, %v3051_v50  ;;  %v3166_v50 = vld [vmem:[#allocation8 + $0x528] sm:$0xff] }
0x18fd   :  { %3248 = vmatpush.msrb.mxu3 %v3166_v50 }
0x18fe   :  { %v3057_v9 = vadd.f32 %v3052_v54, %v8642_v32  ;;  %v3204_v32 = vld [vmem:[#allocation8 + $0x658] sm:$0xff]  ;;  %v3167_v54 = vld [vmem:[#allocation8 + $0x530] sm:$0xff] }
0x18ff   :  { %3285 = vmatpush.msra.mxu0 %v3204_v32  ;;  %3271 = vmatpush.msra.mxu1 %v3167_v54  ;;  %v3154_v32 = vld [vmem:[#allocation8 + $0x4c8] sm:$0xff] }
0x1900   :  { %v8783_v56 = vadd.f32 %v3087_v60, %v3057_v9  ;;  %v3168_v60 = vld [vmem:[#allocation8 + $0x538] sm:$0xff]  ;;  %v3161_v9 = vld [vmem:[#allocation8 + $0x500] sm:$0xff]  ;;  %3249 = vmatpush.msrb.mxu3 %v3162_v59 }
0x1901   :  { %3286 = vmatpush.msra.mxu0 %v3200_v4  ;;  %3226 = vmatpush.msrb.mxu2 %v3161_v9  ;;  %v3151_v4 = vld [vmem:[#allocation8 + $0x4b0] sm:$0xff] }
0x1902   :  { %3093 = vadd.xlane.f32.xlu2 %v8783_v56 }
0x1903   :  { %3287 = vmatpush.msra.mxu0 %v3196_v16  ;;  %v3144_v16 = vld [vmem:[#allocation8 + $0x478] sm:$0xff] }
0x1905   :  { %3288 = vmatpush.msra.mxu0 %v3192_v22 }
0x1907   :  { %3289 = vmatpush.msra.mxu0 %v3188_v28 }
0x1909   :  { %3290 = vmatpush.msra.mxu0 %v3184_v21  ;;  %v3443_v21 = vld [vmem:[#allocation7 + $0x738] sm:$0xff] }
0x190b   :  { %3291 = vmatpush.msra.mxu0 %v3180_v34 }
0x190d   :  { %3292 = vmatpush.msra.mxu0 %v3176_v39  ;;  %v3441_v39 = vld [vmem:[#allocation7 + $0x728] sm:$0xff] }
0x1912   :  { %v3054_v1 = vpop.f32.mrf.mxu0 }
0x1913   :  { %v3055_v19 = vadd.f32 %v7792_v61, %v3054_v1  ;;  %v3172_v61 = vld [vmem:[#allocation8 + $0x558] sm:$0xff]  ;;  %v3163_v1 = vld [vmem:[#allocation8 + $0x510] sm:$0xff] }
0x1914   :  { %3293 = vmatpush.msra.mxu0 %v3172_v61  ;;  %3272 = vmatpush.msra.mxu1 %v3163_v1 }
0x1915   :  { %v3058_v63 = vadd.f32 %v3055_v19, %v8645_v35  ;;  %v3164_v19 = vld [vmem:[#allocation8 + $0x518] sm:$0xff] }
0x1916   :  { %3294 = vmatpush.msra.mxu0 %v3168_v60  ;;  %3273 = vmatpush.msra.mxu1 %v3159_v2  ;;  %v3411_v2 = vld [vmem:[#allocation7 + $0x638] sm:$0xff] }
0x1917   :  { %v8787_v0 = vadd.f32 %v3088_v62, %v3058_v63  ;;  %v3157_v62 = vld [vmem:[#allocation8 + $0x4e0] sm:$0xff]  ;;  %v3158_v63 = vld [vmem:[#allocation8 + $0x4e8] sm:$0xff] }
0x1918   :  { %3295 = vmatpush.msra.mxu0 %v3164_v19  ;;  %3227 = vmatpush.msrb.mxu2 %v3157_v62 }
0x1919   :  { %3095 = vadd.xlane.f32.xlu1 %v8787_v0  ;;  %3250 = vmatpush.msrb.mxu3 %v3158_v63  ;;  %v3395_v63 = vld [vmem:[#allocation7 + $0x5b8] sm:$0xff] }
0x191a   :  { %3296 = vmatpush.msra.mxu0 %v3160_v42  ;;  %3228 = vmatpush.msrb.mxu2 %v3153_v5  ;;  %v3424_v42 = vld [vmem:[#allocation7 + $0x6a0] sm:$0xff] }
0x191b   :  { %3251 = vmatpush.msrb.mxu3 %v3154_v32  ;;  %3274 = vmatpush.msra.mxu1 %v3155_v11  ;;  %v3440_v5 = vld [vmem:[#allocation7 + $0x720] sm:$0xff]  ;;  %v3394_v32 = vld [vmem:[#allocation7 + $0x5b0] sm:$0xff] }
0x191c   :  { %3297 = vmatpush.msra.mxu0 %v3156_v7  ;;  %v3410_v11 = vld [vmem:[#allocation7 + $0x630] sm:$0xff]  ;;  %v3423_v7 = vld [vmem:[#allocation7 + $0x698] sm:$0xff] }
0x191d   :  { %3252 = vmatpush.msrb.mxu3 %v3150_v8  ;;  %3275 = vmatpush.msra.mxu1 %v3151_v4  ;;  %v3409_v8 = vld [vmem:[#allocation7 + $0x628] sm:$0xff]  ;;  %v3422_v4 = vld [vmem:[#allocation7 + $0x690] sm:$0xff] }
0x1975   :  { %v3094_v30 = vpop.xlane.xlu2 %3093 }
0x1976   :  { %v3097_v58 = vmul.f32 %v3094_v30, %v8648_v51  ;;  %v3149_v30 = vld [vmem:[#allocation8 + $0x4a0] sm:$0xff] }
0x1977   :  { %3229 = vmatpush.msrb.mxu2 %v3149_v30  ;;  %v3393_v30 = vld [vmem:[#allocation7 + $0x5a8] sm:$0xff] }
0x1978   :  { %v8792_v35 = vsub.f32 %v8783_v56, %v3097_v58  ;;  %v3152_v58 = vld [vmem:[#allocation8 + $0x4b8] sm:$0xff] }
0x1979   :  { %3298 = vmatpush.msra.mxu0 %v3152_v58  ;;  %v3438_v58 = vld [vmem:[#allocation7 + $0x710] sm:$0xff] }
0x197a   :  { %v3101_v10 = vmul.f32 %v8792_v35, %v8792_v35 }
0x197c   :  { %3103 = vadd.xlane.f32.xlu0 %v3101_v10  ;;  %v3145_v10 = vld [vmem:[#allocation8 + $0x480] sm:$0xff] }
0x197d   :  { %3230 = vmatpush.msrb.mxu2 %v3145_v10  ;;  %v3392_v10 = vld [vmem:[#allocation7 + $0x5a0] sm:$0xff] }
0x197f   :  { %3231 = vmatpush.msrb.mxu2 %v3141_v55  ;;  %v3391_v55 = vld [vmem:[#allocation7 + $0x598] sm:$0xff] }
0x1981   :  { %3446 = vmatpush.msra.mxu2 %v3395_v63  ;;  %v3398_v63 = vld [vmem:[#allocation7 + $0x5d0] sm:$0xff] }
0x1983   :  { %3447 = vmatpush.msra.mxu2 %v3394_v32  ;;  %v3397_v32 = vld [vmem:[#allocation7 + $0x5c8] sm:$0xff] }
0x1985   :  { %3448 = vmatpush.msra.mxu2 %v3393_v30 }
0x1987   :  { %3449 = vmatpush.msra.mxu2 %v3392_v10 }
0x1989   :  { %3450 = vmatpush.msra.mxu2 %v3391_v55 }
0x198c   :  { %v3096_v12 = vpop.xlane.xlu1 %3095 }
0x198d   :  { %v3098_v13 = vmul.f32 %v3096_v12, %v8648_v51  ;;  %v3146_v12 = vld [vmem:[#allocation8 + $0x488] sm:$0xff] }
0x198e   :  { %3253 = vmatpush.msrb.mxu3 %v3146_v12  ;;  %v3408_v12 = vld [vmem:[#allocation7 + $0x620] sm:$0xff] }
0x198f   :  { %v8798_v14 = vsub.f32 %v8787_v0, %v3098_v13  ;;  %v3147_v13 = vld [vmem:[#allocation8 + $0x490] sm:$0xff] }
0x1990   :  { %3276 = vmatpush.msra.mxu1 %v3147_v13  ;;  %3254 = vmatpush.msrb.mxu3 %v3142_v40  ;;  %v3421_v13 = vld [vmem:[#allocation7 + $0x688] sm:$0xff]  ;;  %v3407_v40 = vld [vmem:[#allocation7 + $0x618] sm:$0xff] }
0x1991   :  { %v3102_v15 = vmul.f32 %v8798_v14, %v8798_v14 }
0x1992   :  { %3277 = vmatpush.msra.mxu1 %v3143_v44  ;;  %3469 = vmatpush.msra.mxu3 %v3411_v2  ;;  %v3420_v44 = vld [vmem:[#allocation7 + $0x680] sm:$0xff] }
0x1993   :  { %3105 = vadd.xlane.f32.xlu2 %v3102_v15  ;;  %v3148_v15 = vld [vmem:[#allocation8 + $0x498] sm:$0xff] }
0x1994   :  { %3299 = vmatpush.msra.mxu0 %v3148_v15  ;;  %3492 = vmatpush.msrb.mxu1 %v3427_v47  ;;  %v3437_v15 = vld [vmem:[#allocation7 + $0x708] sm:$0xff] }
0x1995   :  { %3470 = vmatpush.msra.mxu3 %v3410_v11  ;;  %v3417_v47 = vld [vmem:[#allocation7 + $0x668] sm:$0xff]  ;;  %v3380_v11 = vld [vmem:[#allocation7 + $0x540] sm:$0xff] }
0x1996   :  { %3300 = vmatpush.msra.mxu0 %v3144_v16  ;;  %3493 = vmatpush.msrb.mxu1 %v3426_v31  ;;  %v3436_v16 = vld [vmem:[#allocation7 + $0x700] sm:$0xff]  ;;  %v3387_v31 = vld [vmem:[#allocation7 + $0x578] sm:$0xff] }
0x1997   :  { %3471 = vmatpush.msra.mxu3 %v3409_v8 }
0x1998   :  { %3515 = vmatpush.msrb.mxu0 %v3443_v21  ;;  %3494 = vmatpush.msrb.mxu1 %v3425_v38  ;;  %v3433_v21 = vld [vmem:[#allocation7 + $0x6e8] sm:$0xff]  ;;  %v3415_v38 = vld [vmem:[#allocation7 + $0x658] sm:$0xff] }
0x1999   :  { %3472 = vmatpush.msra.mxu3 %v3408_v12 }
0x199a   :  { %3516 = vmatpush.msrb.mxu0 %v3442_v41  ;;  %3495 = vmatpush.msrb.mxu1 %v3424_v42  ;;  %v3416_v41 = vld [vmem:[#allocation7 + $0x660] sm:$0xff] }
0x199b   :  { %3473 = vmatpush.msra.mxu3 %v3407_v40 }
0x199c   :  { %3517 = vmatpush.msrb.mxu0 %v3441_v39  ;;  %3496 = vmatpush.msrb.mxu1 %v3423_v7  ;;  %v3431_v39 = vld [vmem:[#allocation7 + $0x6d8] sm:$0xff]  ;;  %v3396_v7 = vld [vmem:[#allocation7 + $0x5c0] sm:$0xff] }
0x199e   :  { %3518 = vmatpush.msrb.mxu0 %v3440_v5  ;;  %3497 = vmatpush.msrb.mxu1 %v3422_v4  ;;  %v3381_v5 = vld [vmem:[#allocation7 + $0x548] sm:$0xff] }
0x19a0   :  { %3498 = vmatpush.msrb.mxu1 %v3421_v13 }
0x19a2   :  { %3499 = vmatpush.msrb.mxu1 %v3420_v44 }
0x19ef   :  { %v3104_v17 = vpop.xlane.xlu0 %3103 }
0x19f0   :  { %v3107_v18 = vmul.f32 %v3104_v17, %v8648_v51  ;;  %v3390_v17 = vld [vmem:[#allocation7 + $0x590] sm:$0xff] }
0x19f1   :  { %3451 = vmatpush.msra.mxu2 %v3390_v17 }
0x19f2   :  { %v3109_v20 = vadd.f32 1e-05, %v3107_v18  ;;  %v3406_v18 = vld [vmem:[#allocation7 + $0x610] sm:$0xff] }
0x19f3   :  { %3474 = vmatpush.msra.mxu3 %v3406_v18 }
0x19f4   :  { %7963 = vrsqrt.f32 %v3109_v20  ;;  %vm3117_vm14 = vweird.f32 %v3109_v20 }
0x19fa   :  { %v7964_v22 = vpop.eup %7963 }
0x19fb   :  { %v3112_v23 = vmul.f32 %v7964_v22, %v3109_v20  ;;  %vm3118_vm13 = vweird.f32 %v7964_v22  ;;  %v3419_v20 = vld [vmem:[#allocation7 + $0x678] sm:$0xff] }
0x19fc   :  { %vm3119_vm15 = vmor %vm3117_vm14, %vm3118_vm13  ;;  %3500 = vmatpush.msrb.mxu1 %v3419_v20 }
0x19fd   :  { %v3113_v24 = vmul.f32 %v7964_v22, %v3112_v23  ;;  %v3389_v23 = vld [vmem:[#allocation7 + $0x588] sm:$0xff] }
0x19fe   :  { %3452 = vmatpush.msra.mxu2 %v3389_v23 }
0x19ff   :  { %v3114_v25 = vmul.f32 0.5, %v3113_v24  ;;  %v3405_v24 = vld [vmem:[#allocation7 + $0x608] sm:$0xff] }
0x1a00   :  { %3475 = vmatpush.msra.mxu3 %v3405_v24 }
0x1a01   :  { %v3115_v28 = vsub.f32 1.5, %v3114_v25  ;;  %v3418_v25 = vld [vmem:[#allocation7 + $0x670] sm:$0xff] }
0x1a02   :  { %3501 = vmatpush.msrb.mxu1 %v3418_v25 }
0x1a03   :  { %v3116_v3 = vmul.f32 %v7964_v22, %v3115_v28  ;;  %v3434_v28 = vld [vmem:[#allocation7 + $0x6f0] sm:$0xff] }
0x1a04   :  { %3502 = vmatpush.msrb.mxu1 %v3417_v47 }
0x1a05   :  { %v3120_v26 = vsel %vm3119_vm15, %v7964_v22, %v3116_v3  ;;  %v3435_v22 = vld [vmem:[#allocation7 + $0x6f8] sm:$0xff]  ;;  %v3388_v3 = vld [vmem:[#allocation7 + $0x580] sm:$0xff] }
0x1a06   :  { %v3131_v34 = vmul.f32 %v3120_v26, %v8792_v35  ;;  %v3106_v36 = vpop.xlane.xlu2 %3105  ;;  %3453 = vmatpush.msra.mxu2 %v3388_v3  ;;  %v3403_v26 = vld [vmem:[#allocation7 + $0x5f8] sm:$0xff]  ;;  %3503 = vmatpush.msrb.mxu1 %v3416_v41 }
0x1a07   :  { %v3108_v43 = vmul.f32 %v3106_v36, %v8648_v51  ;;  %v3386_v36 = vld [vmem:[#allocation7 + $0x570] sm:$0xff] }
0x1a08   :  { %v3135_v46 = vmul.f32 %v7793_v48, %v3131_v34  ;;  %3454 = vmatpush.msra.mxu2 %v3387_v31  ;;  %v3432_v34 = vld [vmem:[#allocation7 + $0x6e0] sm:$0xff]  ;;  %3504 = vmatpush.msrb.mxu1 %v3415_v38 }
0x1a09   :  { %v3110_v27 = vadd.f32 1e-05, %v3108_v43  ;;  %v3385_v43 = vld [vmem:[#allocation7 + $0x568] sm:$0xff] }
0x1a0a   :  { %v3139_v61 = vadd.f32 %v7794_v37, %v3135_v46  ;;  %3455 = vmatpush.msra.mxu2 %v3386_v36  ;;  %v3401_v46 = vld [vmem:[#allocation7 + $0x5e8] sm:$0xff] }
0x1a0b   :  { %7965 = vrsqrt.f32 %v3110_v27  ;;  %vm3127_vm1 = vweird.f32 %v3110_v27 }
0x1a0c   :  { %3232 = vmatmul.f32.vlgmr.msrb.gmra.mxu2 %v3139_v61  ;;  %3255 = vmatmul.f32.vlgmr.msrb.gmra.mxu3 %v3139_v61 }
0x1a0d   :  { %3278 = vmatmul.f32.vlgmr.msra.gmra.mxu1 %v3139_v61  ;;  %3301 = vmatmul.f32.vlgmr.msra.gmra.mxu0 %v3139_v61  ;;  %v3430_v61 = vld [vmem:[#allocation7 + $0x6d0] sm:$0xff] }
0x1a0e   :  { %3456 = vmatpush.msra.mxu2 %v3385_v43 }
0x1a11   :  { %v7966_v49 = vpop.eup %7965 }
0x1a12   :  { %v3122_v35 = vmul.f32 %v7966_v49, %v3110_v27  ;;  %vm3128_vm0 = vweird.f32 %v7966_v49  ;;  %v3414_v27 = vld [vmem:[#allocation7 + $0x650] sm:$0xff] }
0x1a13   :  { %vm3129_vm2 = vmor %vm3127_vm1, %vm3128_vm0  ;;  %3505 = vmatpush.msrb.mxu1 %v3414_v27 }
0x1a14   :  { %v3123_v50 = vmul.f32 %v7966_v49, %v3122_v35  ;;  %v3400_v35 = vld [vmem:[#allocation7 + $0x5e0] sm:$0xff] }
0x1a16   :  { %v3124_v54 = vmul.f32 0.5, %v3123_v50  ;;  %v3413_v50 = vld [vmem:[#allocation7 + $0x648] sm:$0xff] }
0x1a17   :  { %3506 = vmatpush.msrb.mxu1 %v3413_v50 }
0x1a18   :  { %v3125_v60 = vsub.f32 1.5, %v3124_v54  ;;  %v3429_v54 = vld [vmem:[#allocation7 + $0x6c8] sm:$0xff] }
0x1a1a   :  { %v3126_v9 = vmul.f32 %v7966_v49, %v3125_v60  ;;  %v3383_v60 = vld [vmem:[#allocation7 + $0x558] sm:$0xff] }
0x1a1c   :  { %v3130_v59 = vsel %vm3129_vm2, %v7966_v49, %v3126_v9  ;;  %v3384_v49 = vld [vmem:[#allocation7 + $0x560] sm:$0xff]  ;;  %v3399_v9 = vld [vmem:[#allocation7 + $0x5d8] sm:$0xff] }
0x1a1d   :  { %v3132_v1 = vmul.f32 %v3130_v59, %v8798_v14  ;;  %v3439_v14 = vld [vmem:[#allocation7 + $0x718] sm:$0xff]  ;;  %3457 = vmatpush.msra.mxu2 %v3384_v49  ;;  %v3412_v59 = vld [vmem:[#allocation7 + $0x640] sm:$0xff] }
0x1a1e   :  { %3519 = vmatpush.msrb.mxu0 %v3439_v14  ;;  %3507 = vmatpush.msrb.mxu1 %v3412_v59 }
0x1a1f   :  { %v3136_v19 = vmul.f32 %v7793_v48, %v3132_v1  ;;  %v3404_v48 = vld [vmem:[#allocation7 + $0x600] sm:$0xff]  ;;  %3458 = vmatpush.msra.mxu2 %v3383_v60 }
0x1a20   :  { %3520 = vmatpush.msrb.mxu0 %v3438_v58  ;;  %3476 = vmatpush.msra.mxu3 %v3404_v48  ;;  %v8806_v1 = vld [vmem:[#allocation8 + $0x660] ss:$8 sm:$0xf] }
0x1a21   :  { %v3140_v62 = vadd.f32 %v7794_v37, %v3136_v19  ;;  %v3402_v37 = vld [vmem:[#allocation7 + $0x5f0] sm:$0xff]  ;;  %v3428_v19 = vld [vmem:[#allocation7 + $0x6c0] sm:$0xff]  ;;  %v3210_v2 = vperm.slane %v8806_v1, 2  ;;  %v3211_v42 = vperm.slane %v8806_v1, 3  ;;  %v3208_v58 = vperm.slane %v8806_v1, 0 }
0x1a22   :  { %3521 = vmatpush.msrb.mxu0 %v3437_v15  ;;  %3477 = vmatpush.msra.mxu3 %v3403_v26  ;;  %v3209_v10 = vperm.slane %v8806_v1, 1 }
0x1a23   :  { %3235 = vmatmul.f32.gmra.mxu2 %v3140_v62  ;;  %3258 = vmatmul.f32.gmra.mxu3 %v3140_v62 }
0x1a24   :  { %3281 = vmatmul.f32.gmra.mxu1 %v3140_v62  ;;  %3304 = vmatmul.f32.gmra.mxu0 %v3140_v62  ;;  %v3382_v62 = vld [vmem:[#allocation7 + $0x550] sm:$0xff] }
0x1a25   :  { %3522 = vmatpush.msrb.mxu0 %v3436_v16  ;;  %3478 = vmatpush.msra.mxu3 %v3402_v37 }
0x1a26   :  { %3459 = vmatpush.msra.mxu2 %v3382_v62 }
0x1a27   :  { %3523 = vmatpush.msrb.mxu0 %v3435_v22  ;;  %3479 = vmatpush.msra.mxu3 %v3401_v46 }
0x1a28   :  { %3460 = vmatpush.msra.mxu2 %v3381_v5 }
0x1a29   :  { %3524 = vmatpush.msrb.mxu0 %v3434_v28  ;;  %3480 = vmatpush.msra.mxu3 %v3400_v35 }
0x1a2a   :  { %3461 = vmatpush.msra.mxu2 %v3380_v11 }
0x1a2b   :  { %3525 = vmatpush.msrb.mxu0 %v3433_v21  ;;  %3481 = vmatpush.msra.mxu3 %v3399_v9 }
0x1a2d   :  { %3526 = vmatpush.msrb.mxu0 %v3432_v34  ;;  %3482 = vmatpush.msra.mxu3 %v3398_v63 }
0x1a2f   :  { %3527 = vmatpush.msrb.mxu0 %v3431_v39  ;;  %3483 = vmatpush.msra.mxu3 %v3397_v32 }
0x1a31   :  { %3528 = vmatpush.msrb.mxu0 %v3430_v61  ;;  %3484 = vmatpush.msra.mxu3 %v3396_v7 }
0x1a33   :  { %3529 = vmatpush.msrb.mxu0 %v3429_v54 }
0x1a35   :  { %3530 = vmatpush.msrb.mxu0 %v3428_v19 }
0x1a8a   :  { %v3279_v14 = vpop.f32.mrf.mxu1  ;;  %v3302_v30 = vpop.f32.mrf.mxu0 }
0x1a8b   :  { %v3280_v8 = vadd.f32 %v3279_v14, %v3210_v2  ;;  %v3303_v4 = vadd.f32 %v3302_v30, %v3211_v42 }
0x1a8d   :  { %v3310_v12 = vmul.f32 %v3280_v8, %v3280_v8  ;;  %v3311_v13 = vmul.f32 %v3303_v4, %v3303_v4 }
0x1a8f   :  { %v3318_v15 = vmul.f32 %v3310_v12, %v3280_v8  ;;  %v3319_v55 = vmul.f32 %v3311_v13, %v3303_v4  ;;  %v3233_v40 = vpop.f32.mrf.mxu2  ;;  %v3256_v44 = vpop.f32.mrf.mxu3 }
0x1a90   :  { %v3234_v16 = vadd.f32 %v3233_v40, %v3208_v58  ;;  %v3257_v17 = vadd.f32 %v3256_v44, %v3209_v10 }
0x1a91   :  { %v3326_v18 = vmul.f32 0.044715, %v3318_v15  ;;  %v3327_v20 = vmul.f32 0.044715, %v3319_v55 }
0x1a92   :  { %v3308_v22 = vmul.f32 %v3234_v16, %v3234_v16  ;;  %v3309_v23 = vmul.f32 %v3257_v17, %v3257_v17 }
0x1a93   :  { %v3334_v24 = vadd.f32 %v3326_v18, %v3280_v8  ;;  %v3335_v25 = vadd.f32 %v3327_v20, %v3303_v4 }
0x1a94   :  { %v3316_v28 = vmul.f32 %v3308_v22, %v3234_v16  ;;  %v3317_v3 = vmul.f32 %v3309_v23, %v3257_v17 }
0x1a95   :  { %v3342_v48 = vmul.f32 0.7978846, %v3334_v24  ;;  %v3343_v47 = vmul.f32 0.7978846, %v3335_v25 }
0x1a96   :  { %v3324_v21 = vmul.f32 0.044715, %v3316_v28  ;;  %v3325_v31 = vmul.f32 0.044715, %v3317_v3 }
0x1a97   :  { %7967 = vtanh.f32 %v3342_v48 }
0x1a98   :  { %7969 = vtanh.f32 %v3343_v47  ;;  %v3332_v26 = vadd.f32 %v3324_v21, %v3234_v16  ;;  %v3333_v41 = vadd.f32 %v3325_v31, %v3257_v17 }
0x1a9a   :  { %v3340_v34 = vmul.f32 0.7978846, %v3332_v26  ;;  %v3341_v36 = vmul.f32 0.7978846, %v3333_v41 }
0x1a9c   :  { %7971 = vtanh.f32 %v3340_v34 }
0x1a9d   :  { %v7968_v37 = vpop.eup %7967  ;;  %7973 = vtanh.f32 %v3341_v36 }
0x1a9e   :  { %v7970_v38 = vpop.eup %7969  ;;  %v3358_v39 = vadd.f32 1.0, %v7968_v37 }
0x1a9f   :  { %v3359_v43 = vadd.f32 1.0, %v7970_v38 }
0x1aa0   :  { %v3366_v46 = vmul.f32 0.5, %v3358_v39 }
0x1aa1   :  { %v3282_v27 = vpop.f32.mrf.mxu1  ;;  %v3305_v61 = vpop.f32.mrf.mxu0  ;;  %v3367_v49 = vmul.f32 0.5, %v3359_v43 }
0x1aa2   :  { %v7972_v35 = vpop.eup %7971  ;;  %v3283_v50 = vadd.f32 %v3282_v27, %v3210_v2  ;;  %v3306_v54 = vadd.f32 %v3305_v61, %v3211_v42  ;;  %v3374_v60 = vmul.f32 %v3366_v46, %v3280_v8  ;;  %v7795_v61 = vld [vmem:[#allocation7 + $0x740] ss:$0 sm:$0xff] }
0x1aa3   :  { %v7974_v9 = vpop.eup %7973  ;;  %v3375_v59 = vmul.f32 %v3367_v49, %v3303_v4  ;;  %v3356_v1 = vadd.f32 1.0, %v7972_v35 }
0x1aa4   :  { %v3314_v19 = vmul.f32 %v3283_v50, %v3283_v50  ;;  %v3315_v62 = vmul.f32 %v3306_v54, %v3306_v54  ;;  %3508 = vmatmul.f32.vlgmr.msrb.gmra.mxu1 %v3374_v60  ;;  %v3357_v63 = vadd.f32 1.0, %v7974_v9 }
0x1aa5   :  { %3531 = vmatmul.f32.vlgmr.msrb.gmra.mxu0 %v3375_v59  ;;  %v3364_v5 = vmul.f32 0.5, %v3356_v1 }
0x1aa6   :  { %v3236_v32 = vpop.f32.mrf.mxu2  ;;  %v3259_v11 = vpop.f32.mrf.mxu3  ;;  %v3365_v7 = vmul.f32 0.5, %v3357_v63  ;;  %v3322_v14 = vmul.f32 %v3314_v19, %v3283_v50  ;;  %v3323_v30 = vmul.f32 %v3315_v62, %v3306_v54 }
0x1aa7   :  { %v3237_v12 = vadd.f32 %v3236_v32, %v3208_v58  ;;  %v3260_v13 = vadd.f32 %v3259_v11, %v3209_v10  ;;  %v3372_v15 = vmul.f32 %v3364_v5, %v3234_v16 }
0x1aa8   :  { %v3373_v2 = vmul.f32 %v3365_v7, %v3257_v17  ;;  %v3330_v42 = vmul.f32 0.044715, %v3322_v14  ;;  %v3331_v8 = vmul.f32 0.044715, %v3323_v30 }
0x1aa9   :  { %v3312_v55 = vmul.f32 %v3237_v12, %v3237_v12  ;;  %v3313_v4 = vmul.f32 %v3260_v13, %v3260_v13  ;;  %3462 = vmatmul.f32.vlgmr.msra.gmra.mxu2 %v3372_v15  ;;  %v3634_v15 = vld [vmem:[#allocation8 + $0x868] sm:$0xff] }
0x1aaa   :  { %3485 = vmatmul.f32.vlgmr.msra.gmra.mxu3 %v3373_v2  ;;  %v3338_v40 = vadd.f32 %v3330_v42, %v3283_v50  ;;  %v3339_v44 = vadd.f32 %v3331_v8, %v3306_v54  ;;  %v3635_v2 = vld [vmem:[#allocation8 + $0x870] sm:$0xff]  ;;  %v3631_v42 = vld [vmem:[#allocation8 + $0x848] sm:$0xff] }
0x1aab   :  { %v3320_v18 = vmul.f32 %v3312_v55, %v3237_v12  ;;  %v3321_v20 = vmul.f32 %v3313_v4, %v3260_v13  ;;  %3668 = vmatpush.msrb.mxu3 %v3634_v15  ;;  %v3632_v8 = vld [vmem:[#allocation8 + $0x850] sm:$0xff]  ;;  %3691 = vmatpush.msra.mxu1 %v3635_v2 }
0x1aac   :  { %v3346_v22 = vmul.f32 0.7978846, %v3338_v40  ;;  %v3347_v23 = vmul.f32 0.7978846, %v3339_v44  ;;  %v3590_v15 = vld [vmem:[#allocation8 + $0x690] sm:$0xff] }
0x1aad   :  { %v3328_v24 = vmul.f32 0.044715, %v3320_v18  ;;  %v3329_v25 = vmul.f32 0.044715, %v3321_v20  ;;  %3669 = vmatpush.msrb.mxu3 %v3631_v42  ;;  %3692 = vmatpush.msra.mxu1 %v3632_v8 }
0x1aae   :  { %7975 = vtanh.f32 %v3346_v22 }
0x1aaf   :  { %7977 = vtanh.f32 %v3347_v23  ;;  %v3336_v58 = vadd.f32 %v3328_v24, %v3237_v12  ;;  %v3337_v10 = vadd.f32 %v3329_v25, %v3260_v13  ;;  %v3627_v23 = vld [vmem:[#allocation8 + $0x820] sm:$0xff]  ;;  %v3628_v24 = vld [vmem:[#allocation8 + $0x828] sm:$0xff]  ;;  %v3629_v25 = vld [vmem:[#allocation8 + $0x830] sm:$0xff] }
0x1ab0   :  { %3670 = vmatpush.msrb.mxu3 %v3628_v24  ;;  %3693 = vmatpush.msra.mxu1 %v3629_v25 }
0x1ab1   :  { %v3344_v16 = vmul.f32 0.7978846, %v3336_v58  ;;  %v3345_v17 = vmul.f32 0.7978846, %v3337_v10  ;;  %v3624_v58 = vld [vmem:[#allocation8 + $0x800] sm:$0xff]  ;;  %v3625_v10 = vld [vmem:[#allocation8 + $0x808] sm:$0xff] }
0x1ab2   :  { %3671 = vmatpush.msrb.mxu3 %v3625_v10 }
0x1ab3   :  { %7979 = vtanh.f32 %v3344_v16  ;;  %v3626_v16 = vld [vmem:[#allocation8 + $0x810] sm:$0xff] }
0x1ab4   :  { %v7976_v28 = vpop.eup %7975  ;;  %7981 = vtanh.f32 %v3345_v17  ;;  %3694 = vmatpush.msra.mxu1 %v3626_v16  ;;  %v3621_v17 = vld [vmem:[#allocation8 + $0x7e0] sm:$0xff] }
0x1ab5   :  { %v7978_v3 = vpop.eup %7977  ;;  %v3362_v48 = vadd.f32 1.0, %v7976_v28  ;;  %v3622_v28 = vld [vmem:[#allocation8 + $0x7e8] sm:$0xff] }
0x1ab6   :  { %v3363_v47 = vadd.f32 1.0, %v7978_v3  ;;  %v3623_v3 = vld [vmem:[#allocation8 + $0x7f0] sm:$0xff]  ;;  %3672 = vmatpush.msrb.mxu3 %v3622_v28 }
0x1ab7   :  { %v3370_v21 = vmul.f32 0.5, %v3362_v48  ;;  %3695 = vmatpush.msra.mxu1 %v3623_v3  ;;  %v3618_v48 = vld [vmem:[#allocation8 + $0x7c0] sm:$0xff] }
0x1ab8   :  { %v3371_v31 = vmul.f32 0.5, %v3363_v47  ;;  %v3619_v47 = vld [vmem:[#allocation8 + $0x7c8] sm:$0xff] }
0x1ab9   :  { %v7980_v26 = vpop.eup %7979  ;;  %v3378_v41 = vmul.f32 %v3370_v21, %v3283_v50  ;;  %v3620_v21 = vld [vmem:[#allocation8 + $0x7d0] sm:$0xff]  ;;  %3673 = vmatpush.msrb.mxu3 %v3619_v47 }
0x1aba   :  { %v7982_v34 = vpop.eup %7981  ;;  %v3379_v36 = vmul.f32 %v3371_v31, %v3306_v54  ;;  %v3360_v37 = vadd.f32 1.0, %v7980_v26  ;;  %3696 = vmatpush.msra.mxu1 %v3620_v21  ;;  %v3615_v31 = vld [vmem:[#allocation8 + $0x7a0] sm:$0xff]  ;;  %v3616_v26 = vld [vmem:[#allocation8 + $0x7a8] sm:$0xff] }
0x1abb   :  { %3511 = vmatmul.f32.gmra.mxu1 %v3378_v41  ;;  %v3361_v38 = vadd.f32 1.0, %v7982_v34  ;;  %v3617_v41 = vld [vmem:[#allocation8 + $0x7b0] sm:$0xff]  ;;  %3674 = vmatpush.msrb.mxu3 %v3616_v26  ;;  %v3612_v34 = vld [vmem:[#allocation8 + $0x780] sm:$0xff] }
0x1abc   :  { %3534 = vmatmul.f32.gmra.mxu0 %v3379_v36  ;;  %v3368_v39 = vmul.f32 0.5, %v3360_v37  ;;  %3697 = vmatpush.msra.mxu1 %v3617_v41  ;;  %v3613_v36 = vld [vmem:[#allocation8 + $0x788] sm:$0xff]  ;;  %v3614_v37 = vld [vmem:[#allocation8 + $0x790] sm:$0xff] }
0x1abd   :  { %v3369_v43 = vmul.f32 0.5, %v3361_v38  ;;  %3675 = vmatpush.msrb.mxu3 %v3613_v36  ;;  %v3609_v38 = vld [vmem:[#allocation8 + $0x760] sm:$0xff] }
0x1abe   :  { %v3376_v46 = vmul.f32 %v3368_v39, %v3237_v12  ;;  %3698 = vmatpush.msra.mxu1 %v3614_v37  ;;  %v3610_v39 = vld [vmem:[#allocation8 + $0x768] sm:$0xff] }
0x1abf   :  { %v3377_v27 = vmul.f32 %v3369_v43, %v3260_v13  ;;  %v3633_v13 = vld [vmem:[#allocation8 + $0x860] sm:$0xff]  ;;  %v3611_v43 = vld [vmem:[#allocation8 + $0x770] sm:$0xff]  ;;  %3676 = vmatpush.msrb.mxu3 %v3610_v39 }
0x1ac0   :  { %3465 = vmatmul.f32.gmra.mxu2 %v3376_v46  ;;  %3699 = vmatpush.msra.mxu1 %v3611_v43  ;;  %v3606_v46 = vld [vmem:[#allocation8 + $0x740] sm:$0xff] }
0x1ac1   :  { %3488 = vmatmul.f32.gmra.mxu3 %v3377_v27  ;;  %3645 = vmatpush.msrb.mxu2 %v3633_v13  ;;  %v3607_v27 = vld [vmem:[#allocation8 + $0x748] sm:$0xff] }
0x1ac2   :  { %3677 = vmatpush.msrb.mxu3 %v3607_v27  ;;  %v3589_v13 = vld [vmem:[#allocation8 + $0x688] sm:$0xff] }
0x1ac3   :  { %v3637_v37 = vld [vmem:[#allocation8 + $0x880] ss:$8 sm:$0x7] }
0x1ac4   :  { %v3640_v39 = vperm.slane %v3637_v37, 1 }
0x1b21   :  { %v3509_v59 = vpop.f32.mrf.mxu1 }
0x1b22   :  { %v3532_v50 = vpop.f32.mrf.mxu0 }
0x1b2c   :  { %v3463_v49 = vpop.f32.mrf.mxu2 }
0x1b2d   :  { %v3464_v35 = vadd.f32 %v7795_v61, %v3463_v49  ;;  %v3486_v60 = vpop.f32.mrf.mxu3  ;;  %v3603_v49 = vld [vmem:[#allocation8 + $0x720] sm:$0xff] }
0x1b2f   :  { %v3487_v9 = vadd.f32 %v3486_v60, %v3464_v35  ;;  %v3604_v35 = vld [vmem:[#allocation8 + $0x728] sm:$0xff]  ;;  %v3605_v60 = vld [vmem:[#allocation8 + $0x730] sm:$0xff] }
0x1b30   :  { %3678 = vmatpush.msrb.mxu3 %v3604_v35 }
0x1b31   :  { %v3510_v1 = vadd.f32 %v3509_v59, %v3487_v9  ;;  %v3600_v9 = vld [vmem:[#allocation8 + $0x700] sm:$0xff]  ;;  %v3601_v59 = vld [vmem:[#allocation8 + $0x708] sm:$0xff] }
0x1b32   :  { %3679 = vmatpush.msrb.mxu3 %v3601_v59 }
0x1b33   :  { %v3533_v19 = vadd.f32 %v3532_v50, %v3510_v1  ;;  %v3602_v1 = vld [vmem:[#allocation8 + $0x710] sm:$0xff]  ;;  %v3597_v50 = vld [vmem:[#allocation8 + $0x6e0] sm:$0xff] }
0x1b35   :  { %v8813_v54 = vadd.f32 %v3533_v19, %v8783_v56  ;;  %v3630_v56 = vld [vmem:[#allocation8 + $0x840] sm:$0xff]  ;;  %v3598_v19 = vld [vmem:[#allocation8 + $0x6e8] sm:$0xff] }
0x1b36   :  { %3646 = vmatpush.msrb.mxu2 %v3630_v56  ;;  %3680 = vmatpush.msrb.mxu3 %v3598_v19 }
0x1b37   :  { %3540 = vadd.xlane.f32.xlu1 %v8813_v54 }
0x1b38   :  { %v3512_v11 = vpop.f32.mrf.mxu1  ;;  %3647 = vmatpush.msrb.mxu2 %v3627_v23 }
0x1b39   :  { %v3535_v14 = vpop.f32.mrf.mxu0 }
0x1b3a   :  { %3648 = vmatpush.msrb.mxu2 %v3624_v58  ;;  %v7797_v58 = vld [vmem:[#allocation7 + $0x750] ss:$0 sm:$0xff] }
0x1b3c   :  { %3649 = vmatpush.msrb.mxu2 %v3621_v17 }
0x1b3e   :  { %3650 = vmatpush.msrb.mxu2 %v3618_v48 }
0x1b40   :  { %3651 = vmatpush.msrb.mxu2 %v3615_v31 }
0x1b42   :  { %3652 = vmatpush.msrb.mxu2 %v3612_v34 }
0x1b43   :  { %v3466_v62 = vpop.f32.mrf.mxu2 }
0x1b44   :  { %v3467_v63 = vadd.f32 %v7795_v61, %v3466_v62  ;;  %v3489_v5 = vpop.f32.mrf.mxu3  ;;  %3653 = vmatpush.msrb.mxu2 %v3609_v38  ;;  %v3608_v61 = vld [vmem:[#allocation8 + $0x750] sm:$0xff]  ;;  %v3639_v38 = vperm.slane %v3637_v37, 0 }
0x1b45   :  { %3700 = vmatpush.msra.mxu1 %v3608_v61  ;;  %v3599_v62 = vld [vmem:[#allocation8 + $0x6f0] sm:$0xff] }
0x1b46   :  { %v3490_v32 = vadd.f32 %v3489_v5, %v3467_v63  ;;  %3654 = vmatpush.msrb.mxu2 %v3606_v46  ;;  %v3594_v63 = vld [vmem:[#allocation8 + $0x6c0] sm:$0xff]  ;;  %v3595_v5 = vld [vmem:[#allocation8 + $0x6c8] sm:$0xff] }
0x1b47   :  { %3701 = vmatpush.msra.mxu1 %v3605_v60  ;;  %3681 = vmatpush.msrb.mxu3 %v3595_v5 }
0x1b48   :  { %v3513_v7 = vadd.f32 %v3512_v11, %v3490_v32  ;;  %3655 = vmatpush.msrb.mxu2 %v3603_v49  ;;  %v3596_v32 = vld [vmem:[#allocation8 + $0x6d0] sm:$0xff]  ;;  %v3591_v11 = vld [vmem:[#allocation8 + $0x6a0] sm:$0xff] }
0x1b49   :  { %3702 = vmatpush.msra.mxu1 %v3602_v1 }
0x1b4a   :  { %v3536_v30 = vadd.f32 %v3535_v14, %v3513_v7  ;;  %3656 = vmatpush.msrb.mxu2 %v3600_v9  ;;  %v3592_v7 = vld [vmem:[#allocation8 + $0x6a8] sm:$0xff]  ;;  %v3593_v14 = vld [vmem:[#allocation8 + $0x6b0] sm:$0xff] }
0x1b4b   :  { %3703 = vmatpush.msra.mxu1 %v3599_v62  ;;  %3682 = vmatpush.msrb.mxu3 %v3592_v7 }
0x1b4c   :  { %v8817_v12 = vadd.f32 %v3536_v30, %v8787_v0  ;;  %3657 = vmatpush.msrb.mxu2 %v3597_v50  ;;  %v3588_v30 = vld [vmem:[#allocation8 + $0x680] sm:$0xff]  ;;  %v3641_v50 = vperm.slane %v3637_v37, 2 }
0x1b4d   :  { %3704 = vmatpush.msra.mxu1 %v3596_v32  ;;  %3683 = vmatpush.msrb.mxu3 %v3589_v13 }
0x1b4e   :  { %3542 = vadd.xlane.f32.xlu0 %v8817_v12  ;;  %3658 = vmatpush.msrb.mxu2 %v3594_v63 }
0x1b4f   :  { %3705 = vmatpush.msra.mxu1 %v3593_v14 }
0x1b50   :  { %3659 = vmatpush.msrb.mxu2 %v3591_v11 }
0x1b51   :  { %3706 = vmatpush.msra.mxu1 %v3590_v15 }
0x1b52   :  { %3660 = vmatpush.msrb.mxu2 %v3588_v30 }
0x1baa   :  { %v3541_v55 = vpop.xlane.xlu1 %3540 }
0x1bab   :  { %v3544_v4 = vmul.f32 %v3541_v55, %v8648_v51 }
0x1bad   :  { %v8822_v0 = vsub.f32 %v8813_v54, %v3544_v4 }
0x1baf   :  { %v3548_v40 = vmul.f32 %v8822_v0, %v8822_v0 }
0x1bb1   :  { %3550 = vadd.xlane.f32.xlu2 %v3548_v40 }
0x1bc1   :  { %v3543_v44 = vpop.xlane.xlu0 %3542 }
0x1bc2   :  { %v3545_v18 = vmul.f32 %v3543_v44, %v8648_v51 }
0x1bc4   :  { %v8828_v20 = vsub.f32 %v8817_v12, %v3545_v18 }
0x1bc6   :  { %v3549_v22 = vmul.f32 %v8828_v20, %v8828_v20 }
0x1bc8   :  { %3552 = vadd.xlane.f32.xlu1 %v3549_v22  ;;  %v7796_v22 = vld [vmem:[#allocation7 + $0x748] ss:$0 sm:$0xff] }
0x1c24   :  { %v3551_v2 = vpop.xlane.xlu2 %3550 }
0x1c25   :  { %v3554_v56 = vmul.f32 %v3551_v2, %v8648_v51 }
0x1c27   :  { %v3556_v42 = vadd.f32 1e-05, %v3554_v56 }
0x1c29   :  { %7983 = vrsqrt.f32 %v3556_v42  ;;  %vm3564_vm5 = vweird.f32 %v3556_v42 }
0x1c2f   :  { %v7984_v8 = vpop.eup %7983 }
0x1c30   :  { %v3559_v55 = vmul.f32 %v7984_v8, %v3556_v42  ;;  %vm3565_vm3 = vweird.f32 %v7984_v8 }
0x1c31   :  { %vm3566_vm6 = vmor %vm3564_vm5, %vm3565_vm3 }
0x1c32   :  { %v3560_v4 = vmul.f32 %v7984_v8, %v3559_v55 }
0x1c34   :  { %v3561_v40 = vmul.f32 0.5, %v3560_v4 }
0x1c36   :  { %v3562_v44 = vsub.f32 1.5, %v3561_v40 }
0x1c38   :  { %v3563_v18 = vmul.f32 %v7984_v8, %v3562_v44 }
0x1c3a   :  { %v3567_v23 = vsel %vm3566_vm6, %v7984_v8, %v3563_v18 }
0x1c3b   :  { %v3578_v24 = vmul.f32 %v3567_v23, %v8822_v0  ;;  %v3553_v25 = vpop.xlane.xlu1 %3552 }
0x1c3c   :  { %v3555_v10 = vmul.f32 %v3553_v25, %v8648_v51 }
0x1c3d   :  { %v3582_v16 = vmul.f32 %v7796_v22, %v3578_v24 }
0x1c3e   :  { %v3557_v17 = vadd.f32 1e-05, %v3555_v10 }
0x1c3f   :  { %v3586_v28 = vadd.f32 %v7797_v58, %v3582_v16 }
0x1c40   :  { %7985 = vrsqrt.f32 %v3557_v17  ;;  %vm3574_vm11 = vweird.f32 %v3557_v17 }
0x1c41   :  { %3661 = vmatmul.f32.vlgmr.msrb.gmra.mxu2 %v3586_v28  ;;  %3684 = vmatmul.f32.vlgmr.msrb.gmra.mxu3 %v3586_v28 }
0x1c42   :  { %3707 = vmatmul.f32.vlgmr.msra.gmra.mxu1 %v3586_v28 }
0x1c46   :  { %v7986_v3 = vpop.eup %7985 }
0x1c47   :  { %v3569_v48 = vmul.f32 %v7986_v3, %v3557_v17  ;;  %vm3575_vm10 = vweird.f32 %v7986_v3 }
0x1c48   :  { %vm3576_vm13 = vmor %vm3574_vm11, %vm3575_vm10 }
0x1c49   :  { %v3570_v47 = vmul.f32 %v7986_v3, %v3569_v48 }
0x1c4b   :  { %v3571_v21 = vmul.f32 0.5, %v3570_v47 }
0x1c4d   :  { %v3572_v31 = vsub.f32 1.5, %v3571_v21 }
0x1c4f   :  { %v3573_v26 = vmul.f32 %v7986_v3, %v3572_v31 }
0x1c51   :  { %v3577_v0 = vsel %vm3576_vm13, %v7986_v3, %v3573_v26 }
0x1c52   :  { %v3579_v41 = vmul.f32 %v3577_v0, %v8828_v20 }
0x1c54   :  { %v3583_v34 = vmul.f32 %v7796_v22, %v3579_v41 }
0x1c56   :  { %v3587_v36 = vadd.f32 %v7797_v58, %v3583_v34 }
0x1c58   :  { %3664 = vmatmul.f32.gmra.mxu2 %v3587_v36  ;;  %3687 = vmatmul.f32.gmra.mxu3 %v3587_v36 }
0x1c59   :  { %3710 = vmatmul.f32.gmra.mxu1 %v3587_v36 }
0x1cbf   :  { %v3708_v9 = vpop.f32.mrf.mxu1 }
0x1cc0   :  { %v8859_v11 = vadd.f32 %v3708_v9, %v3641_v50 }
0x1cc4   :  { %v3662_v43 = vpop.f32.mrf.mxu2  ;;  %v3685_v46 = vpop.f32.mrf.mxu3 }
0x1cc5   :  { %v3663_v27 = vadd.f32 %v3662_v43, %v3639_v38  ;;  %v3686_v61 = vadd.f32 %v3685_v46, %v3640_v39 }
0x1cc7   :  { %3738 = vrot.lane.b32.xlu1 %v3686_v61, %s8283_s13  ;;  %3730 = vrot.lane.b32.xlu0 %v3686_v61, %s8295_s16 }
0x1cc8   :  { %7614 = vmatpush.xpose.msk.msra.mxu0 %vm477_vm7, %v3686_v61  ;;  %3716 = vrot.lane.b32.xlu2 %v3663_v27, %s8295_s16 }
0x1ccb   :  { %7615 = vmatmul.msk.f32.vlgmr.msra.gmra.mxu0 %vm477_vm7, %v3663_v27 }
0x1ccf   :  { %3734 = vrot.lane.b32.xlu1 %v3686_v61, %s8296_s17  ;;  %3724 = vrot.lane.b32.xlu0 %v3663_v27, %s8283_s13 }
0x1cd6   :  { %v3711_v1 = vpop.f32.mrf.mxu1 }
0x1cd7   :  { %v8852_v19 = vadd.f32 %v3711_v1, %v3641_v50 }
0x1cdb   :  { %v3665_v20 = vpop.f32.mrf.mxu2  ;;  %v3688_v49 = vpop.f32.mrf.mxu3 }
0x1cdc   :  { %v3666_v35 = vadd.f32 %v3665_v20, %v3639_v38  ;;  %v3689_v60 = vadd.f32 %v3688_v49, %v3640_v39 }
0x1cde   :  { %3736 = vrot.lane.b32.xlu2 %v3689_v60, %s8296_s17  ;;  %7616 = vmatpush.xpose.msk.msra.mxu2 %vm477_vm7, %v3689_v60 }
0x1cdf   :  { %3718 = vrot.lane.b32.xlu1 %v3666_v35, %s8295_s16  ;;  %3722 = vrot.lane.b32.xlu0 %v3666_v35, %s8296_s17 }
0x1ce1   :  { %7617 = vmatmul.msk.f32.vlgmr.msra.gmra.mxu2 %vm477_vm7, %v3666_v35 }
0x1ce6   :  { %3732 = vrot.lane.b32.xlu2 %v3689_v60, %s8295_s16 }
0x1ce7   :  { %3720 = vrot.lane.b32.xlu0 %v3663_v27, %s8296_s17 }
0x1cee   :  { %3740 = vrot.lane.b32.xlu2 %v3689_v60, %s8283_s13 }
0x1cef   :  { %3726 = vrot.lane.b32.xlu0 %v3666_v35, %s8283_s13 }
0x1d22   :  { %v3717_v59 = vpop.permute.xlu2 %3716 }
0x1d38   :  { %v3737_v62 = vpop.permute.xlu2 %3736 }
0x1d39   :  { %v3731_v63 = vpop.permute.xlu0 %3730  ;;  %7624 = vmatpush.xpose.msk.msrb.mxu2 %vm477_vm7, %v3737_v62  ;;  %v3739_v5 = vpop.permute.xlu1 %3738 }
0x1d3a   :  { %7618 = vmatpush.xpose.msk.msra.mxu3 %vm477_vm7, %v3731_v63 }
0x1d3d   :  { %4195 = vmatpush.msra.mxu2 %v8852_v19  ;;  %7619 = vmatmul.msk.f32.vlgmr.msra.gmra.mxu3 %vm477_vm7, %v3717_v59 }
0x1d3e   :  { %7626 = vmatpush.xpose.msk.msrb.mxu3 %vm477_vm7, %v3739_v5 }
0x1d40   :  { %v3733_v32 = vpop.permute.xlu2 %3732 }
0x1d41   :  { %7620 = vmatpush.xpose.msk.msrb.mxu0 %vm477_vm7, %v3733_v32  ;;  %v3735_v7 = vpop.permute.xlu1 %3734  ;;  %v3725_v14 = vpop.permute.xlu0 %3724 }
0x1d42   :  { %7622 = vmatpush.xpose.msk.msrb.mxu1 %vm477_vm7, %v3735_v7 }
0x1d45   :  { %7627 = vmatmul.msk.f32.vlgmr.msrb.gmra.mxu3 %vm477_vm7, %v3725_v14 }
0x1d46   :  { %4172 = vmatpush.msra.mxu1 %v8859_v11 }
0x1d48   :  { %v3783_v30 = vpop.f32.mrf.mxu0  ;;  %v3741_v13 = vpop.permute.xlu2 %3740 }
0x1d49   :  { %v3954_v15 = vmul.f32 0.17677669, %v3783_v30  ;;  %7628 = vmatpush.xpose.msk.msra.mxu0 %vm477_vm7, %v3741_v13 }
0x1d4b   :  { %v3962_v2 = vsel %vm794_vm4, %v3954_v15, -inf }
0x1d4c   :  { %3963 = vmax.xlane.f32.xlu2 %v3962_v2 }
0x1d51   :  { %v3723_v56 = vpop.permute.xlu0 %3722  ;;  %v3719_v42 = vpop.permute.xlu1 %3718 }
0x1d52   :  { %7621 = vmatmul.msk.f32.vlgmr.msrb.gmra.mxu0 %vm477_vm7, %v3719_v42  ;;  %7625 = vmatmul.msk.f32.vlgmr.msrb.gmra.mxu2 %vm477_vm7, %v3723_v56 }
0x1d59   :  { %v3721_v8 = vpop.permute.xlu0 %3720 }
0x1d5a   :  { %7623 = vmatmul.msk.f32.vlgmr.msrb.gmra.mxu1 %vm477_vm7, %v3721_v8 }
0x1d61   :  { %v3727_v55 = vpop.permute.xlu0 %3726 }
0x1d62   :  { %7629 = vmatmul.msk.f32.vlgmr.msra.gmra.mxu0 %vm477_vm7, %v3727_v55 }
0x1d64   :  { %v3807_v4 = vpop.f32.mrf.mxu2 }
0x1d65   :  { %v3955_v40 = vmul.f32 0.17677669, %v3807_v4 }
0x1d67   :  { %v3965_v44 = vsel %vm794_vm4, %v3955_v40, -inf }
0x1d68   :  { %3966 = vmax.xlane.f32.xlu0 %v3965_v44 }
0x1dbf   :  { %v3964_v18 = vpop.xlane.xlu2 %3963 }
0x1dc0   :  { %v3986_v22 = vsub.f32 %v3954_v15, %v3964_v18  ;;  %v3831_v23 = vpop.f32.mrf.mxu3 }
0x1dc1   :  { %v3956_v24 = vmul.f32 0.17677669, %v3831_v23 }
0x1dc2   :  { %v3994_v25 = vmul.f32 1.442695, %v3986_v22 }
0x1dc3   :  { %v3968_v58 = vsel %vm794_vm4, %v3956_v24, -inf }
0x1dc4   :  { %7987 = vpow2.f32 %v3994_v25  ;;  %3969 = vmax.xlane.f32.xlu1 %v3968_v58 }
0x1dc8   :  { %v3927_v17 = vpop.f32.mrf.mxu3 }
0x1dc9   :  { %v3960_v28 = vmul.f32 0.17677669, %v3927_v17 }
0x1dca   :  { %v8873_v10 = vpop.eup %7987 }
0x1dcb   :  { %v4010_v16 = vsel %vm794_vm4, %v8873_v10, 0.0  ;;  %v3980_v21 = vsel %vm794_vm4, %v3960_v28, -inf }
0x1dcc   :  { %4011 = vadd.xlane.f32.xlu1 %v4010_v16 }
0x1dcf   :  { %v3855_v3 = vpop.f32.mrf.mxu0 }
0x1dd0   :  { %v3957_v48 = vmul.f32 0.17677669, %v3855_v3 }
0x1dd2   :  { %v3971_v47 = vsel %vm794_vm4, %v3957_v48, -inf }
0x1dd3   :  { %3972 = vmax.xlane.f32.xlu0 %v3971_v47 }
0x1dd4   :  { %3981 = vmax.xlane.f32.xlu1 %v3980_v21 }
0x1dd5   :  { %v3903_v31 = vpop.f32.mrf.mxu2 }
0x1dd6   :  { %v3959_v26 = vmul.f32 0.17677669, %v3903_v31 }
0x1dd7   :  { %v3879_v0 = vpop.f32.mrf.mxu1 }
0x1dd8   :  { %v3958_v41 = vmul.f32 0.17677669, %v3879_v0  ;;  %v3977_v37 = vsel %vm794_vm4, %v3959_v26, -inf }
0x1dda   :  { %v3974_v34 = vsel %vm794_vm4, %v3958_v41, -inf }
0x1ddb   :  { %3975 = vmax.xlane.f32.xlu2 %v3974_v34  ;;  %v3967_v36 = vpop.xlane.xlu0 %3966 }
0x1ddc   :  { %v3987_v38 = vsub.f32 %v3955_v40, %v3967_v36  ;;  %3978 = vmax.xlane.f32.xlu1 %v3977_v37 }
0x1dde   :  { %v3996_v39 = vmul.f32 1.442695, %v3987_v38 }
0x1ddf   :  { %v3951_v43 = vpop.f32.mrf.mxu0 }
0x1de0   :  { %v3961_v46 = vmul.f32 0.17677669, %v3951_v43  ;;  %7989 = vpow2.f32 %v3996_v39 }
0x1de2   :  { %v3983_v27 = vsel %vm794_vm4, %v3961_v46, -inf }
0x1de3   :  { %3984 = vmax.xlane.f32.xlu2 %v3983_v27 }
0x1de6   :  { %v8882_v61 = vpop.eup %7989 }
0x1de7   :  { %3756 = vrot.lane.b32.xlu0 %v8859_v11, %s8283_s13  ;;  %v4013_v20 = vsel %vm794_vm4, %v8882_v61, 0.0 }
0x1deb   :  { %4014 = vadd.xlane.f32.xlu2 %v4013_v20 }
0x1df5   :  { %3744 = vrot.lane.b32.xlu1 %v8859_v11, %s8295_s16 }
0x1e37   :  { %v3970_v49 = vpop.xlane.xlu1 %3969 }
0x1e38   :  { %v3988_v35 = vsub.f32 %v3956_v24, %v3970_v49 }
0x1e3a   :  { %v3998_v60 = vmul.f32 1.442695, %v3988_v35 }
0x1e3c   :  { %7991 = vpow2.f32 %v3998_v60 }
0x1e3f   :  { %v4012_v9 = vpop.xlane.xlu1 %4011 }
0x1e40   :  { %7993 = vrcp.f32 %v4012_v9  ;;  %v4045_v13 = vand.u32 2147483648, %v4012_v9  ;;  %v4043_v56 = vand.u32 2147483647, %v4012_v9  ;;  %vm4039_vm15 = vweird.f32 %v4012_v9 }
0x1e42   :  { %v8890_v59 = vpop.eup %7991  ;;  %v4046_v8 = vor.u32 1.1754944e-38, %v4045_v13  ;;  %vm4044_vm1 = vcmp.eq.f32.partialorder %v4043_v56, 8.507059e+37 }
0x1e43   :  { %v4016_v1 = vsel %vm794_vm4, %v8890_v59, 0.0 }
0x1e44   :  { %4017 = vadd.xlane.f32.xlu0 %v4016_v1 }
0x1e46   :  { %v7994_v50 = vpop.eup %7993  ;;  %v3973_v62 = vpop.xlane.xlu0 %3972 }
0x1e47   :  { %v4035_v63 = vmul.f32 %v7994_v50, %v4012_v9  ;;  %v3989_v5 = vsub.f32 %v3957_v48, %v3973_v62  ;;  %v3982_v32 = vpop.xlane.xlu1 %3981  ;;  %vm4040_vm14 = vweird.f32 %v7994_v50 }
0x1e48   :  { %v3992_v7 = vsub.f32 %v3960_v28, %v3982_v32  ;;  %vm4041_vm0 = vmor %vm4039_vm15, %vm4040_vm14 }
0x1e49   :  { %v4036_v14 = vsub.f32 1.0, %v4035_v63  ;;  %v4000_v30 = vmul.f32 1.442695, %v3989_v5 }
0x1e4a   :  { %v4006_v15 = vmul.f32 1.442695, %v3992_v7 }
0x1e4b   :  { %v4037_v2 = vmul.f32 %v7994_v50, %v4036_v14  ;;  %7995 = vpow2.f32 %v4000_v30 }
0x1e4c   :  { %7997 = vpow2.f32 %v4006_v15 }
0x1e4d   :  { %v4038_v42 = vadd.f32 %v7994_v50, %v4037_v2 }
0x1e4e   :  { %v3976_v55 = vpop.xlane.xlu2 %3975 }
0x1e4f   :  { %v4042_v4 = vsel %vm4041_vm0, %v7994_v50, %v4038_v42  ;;  %v3990_v40 = vsub.f32 %v3958_v41, %v3976_v55  ;;  %v3979_v44 = vpop.xlane.xlu1 %3978  ;;  %v7748_v50 = vpack.i.bf16 %v8852_v19, %v8859_v11 }
0x1e50   :  { %v4047_v18 = vsel %vm4044_vm1, %v4046_v8, %v4042_v4  ;;  %v3991_v22 = vsub.f32 %v3959_v26, %v3979_v44 }
0x1e51   :  { %v8894_v23 = vpop.eup %7995  ;;  %v4048_v24 = vmul.f32 %v8873_v10, %v4047_v18  ;;  %v4002_v25 = vmul.f32 1.442695, %v3990_v40 }
0x1e52   :  { %v8897_v58 = vpop.eup %7997  ;;  %v4004_v16 = vmul.f32 1.442695, %v3991_v22  ;;  %v4019_v17 = vsel %vm794_vm4, %v8894_v23, 0.0 }
0x1e53   :  { %7999 = vpow2.f32 %v4002_v25  ;;  %4020 = vadd.xlane.f32.xlu2 %v4019_v17  ;;  %7630 = vmatmul.msk.f32.vlgmr.msra.gmra.mxu1 %vm794_vm4, %v4048_v24  ;;  %v4028_v28 = vsel %vm794_vm4, %v8897_v58, 0.0 }
0x1e54   :  { %8001 = vpow2.f32 %v4004_v16  ;;  %4029 = vadd.xlane.f32.xlu0 %v4028_v28 }
0x1e56   :  { %v3985_v3 = vpop.xlane.xlu2 %3984 }
0x1e57   :  { %v3993_v48 = vsub.f32 %v3961_v46, %v3985_v3 }
0x1e59   :  { %v8904_v47 = vpop.eup %7999  ;;  %v4008_v10 = vmul.f32 1.442695, %v3993_v48  ;;  %v3757_v39 = vpop.permute.xlu0 %3756 }
0x1e5a   :  { %v8906_v21 = vpop.eup %8001  ;;  %v4022_v31 = vsel %vm794_vm4, %v8904_v47, 0.0 }
0x1e5b   :  { %8003 = vpow2.f32 %v4008_v10  ;;  %4023 = vadd.xlane.f32.xlu1 %v4022_v31  ;;  %v4025_v26 = vsel %vm794_vm4, %v8906_v21, 0.0 }
0x1e5c   :  { %4026 = vadd.xlane.f32.xlu0 %v4025_v26 }
0x1e5e   :  { %v4015_v0 = vpop.xlane.xlu2 %4014 }
0x1e5f   :  { %8005 = vrcp.f32 %v4015_v0  ;;  %v4060_v46 = vand.u32 2147483648, %v4015_v0  ;;  %v4058_v20 = vand.u32 2147483647, %v4015_v0  ;;  %vm4054_vm3 = vweird.f32 %v4015_v0 }
0x1e61   :  { %v8912_v41 = vpop.eup %8003  ;;  %v4061_v35 = vor.u32 1.1754944e-38, %v4060_v46  ;;  %vm4059_vm6 = vcmp.eq.f32.partialorder %v4058_v20, 8.507059e+37 }
0x1e62   :  { %v4031_v34 = vsel %vm794_vm4, %v8912_v41, 0.0 }
0x1e63   :  { %4032 = vadd.xlane.f32.xlu2 %v4031_v34 }
0x1e65   :  { %v8006_v36 = vpop.eup %8005 }
0x1e66   :  { %v4050_v37 = vmul.f32 %v8006_v36, %v4015_v0  ;;  %vm4055_vm2 = vweird.f32 %v8006_v36 }
0x1e67   :  { %v3745_v38 = vpop.permute.xlu1 %3744  ;;  %vm4056_vm5 = vmor %vm4054_vm3, %vm4055_vm2 }
0x1e68   :  { %v4051_v43 = vsub.f32 1.0, %v4050_v37  ;;  %4218 = vmatpush.msra.mxu3 %v3745_v38 }
0x1e6a   :  { %4310 = vmatpush.msrb.mxu3 %v3757_v39  ;;  %v4052_v27 = vmul.f32 %v8006_v36, %v4051_v43 }
0x1e6c   :  { %v4053_v49 = vadd.f32 %v8006_v36, %v4052_v27 }
0x1e6e   :  { %v4057_v60 = vsel %vm4056_vm5, %v8006_v36, %v4053_v49 }
0x1e6f   :  { %v4062_v9 = vsel %vm4059_vm6, %v4061_v35, %v4057_v60 }
0x1e70   :  { %v4063_v1 = vmul.f32 %v8882_v61, %v4062_v9  ;;  %3746 = vrot.lane.b32.xlu0 %v8852_v19, %s8295_s16  ;;  %v4373_v9 = vld [vmem:[#allocation7 + $0x790] sm:$0xff] }
0x1e72   :  { %7631 = vmatmul.msk.f32.vlgmr.msra.gmra.mxu2 %vm794_vm4, %v4063_v1 }
0x1e74   :  { %3758 = vrot.lane.b32.xlu1 %v8852_v19, %s8283_s13 }
0x1e7b   :  { %7749 = vrot.lane.b32.xlu2 %v7748_v50, %s8296_s17 }
0x1eb7   :  { %v4018_v62 = vpop.xlane.xlu0 %4017 }
0x1eb8   :  { %8007 = vrcp.f32 %v4018_v62  ;;  %v4075_v7 = vand.u32 2147483648, %v4018_v62  ;;  %v4073_v14 = vand.u32 2147483647, %v4018_v62  ;;  %vm4069_vm11 = vweird.f32 %v4018_v62 }
0x1eba   :  { %v4076_v13 = vor.u32 1.1754944e-38, %v4075_v7  ;;  %vm4074_vm14 = vcmp.eq.f32.partialorder %v4073_v14, 8.507059e+37 }
0x1ebe   :  { %v8008_v63 = vpop.eup %8007 }
0x1ebf   :  { %v4065_v5 = vmul.f32 %v8008_v63, %v4018_v62  ;;  %vm4070_vm10 = vweird.f32 %v8008_v63 }
0x1ec0   :  { %vm4071_vm13 = vmor %vm4069_vm11, %vm4070_vm10 }
0x1ec1   :  { %v4066_v32 = vsub.f32 1.0, %v4065_v5 }
0x1ec3   :  { %v4067_v61 = vmul.f32 %v8008_v63, %v4066_v32 }
0x1ec5   :  { %v4068_v30 = vadd.f32 %v8008_v63, %v4067_v61 }
0x1ec6   :  { %v4021_v15 = vpop.xlane.xlu2 %4020 }
0x1ec7   :  { %v4072_v2 = vsel %vm4071_vm13, %v8008_v63, %v4068_v30  ;;  %8009 = vrcp.f32 %v4021_v15  ;;  %v4030_v19 = vpop.xlane.xlu0 %4029  ;;  %vm4084_vm0 = vweird.f32 %v4021_v15  ;;  %v4088_v48 = vand.u32 2147483647, %v4021_v15 }
0x1ec8   :  { %v4077_v11 = vsel %vm4074_vm14, %v4076_v13, %v4072_v2  ;;  %8011 = vrcp.f32 %v4030_v19  ;;  %v4135_v24 = vand.u32 2147483648, %v4030_v19  ;;  %v4133_v16 = vand.u32 2147483647, %v4030_v19 }
0x1ec9   :  { %v4078_v56 = vmul.f32 %v8890_v59, %v4077_v11  ;;  %vm4129_vm1 = vweird.f32 %v4030_v19  ;;  %v4090_v10 = vand.u32 2147483648, %v4021_v15  ;;  %vm4089_vm13 = vcmp.eq.f32.partialorder %v4088_v48, 8.507059e+37 }
0x1eca   :  { %v4136_v31 = vor.u32 1.1754944e-38, %v4135_v24  ;;  %vm4134_vm5 = vcmp.eq.f32.partialorder %v4133_v16, 8.507059e+37  ;;  %v4412_v16 = vld [vmem:[#allocation7 + $0x7f8] sm:$0xff] }
0x1ecb   :  { %7632 = vmatmul.msk.f32.vlgmr.msra.gmra.mxu3 %vm794_vm4, %v4078_v56  ;;  %v4091_v62 = vor.u32 1.1754944e-38, %v4090_v10 }
0x1ecd   :  { %v8927_v42 = vpop.eup %8009 }
0x1ece   :  { %v8012_v8 = vpop.eup %8011  ;;  %v4080_v55 = vmul.f32 %v8927_v42, %v4021_v15  ;;  %v4024_v4 = vpop.xlane.xlu1 %4023  ;;  %vm4085_vm3 = vweird.f32 %v8927_v42 }
0x1ecf   :  { %v4125_v40 = vmul.f32 %v8012_v8, %v4030_v19  ;;  %8013 = vrcp.f32 %v4024_v4  ;;  %v4027_v44 = vpop.xlane.xlu0 %4026  ;;  %vm4130_vm15 = vweird.f32 %v8012_v8  ;;  %v4103_v46 = vand.u32 2147483647, %v4024_v4  ;;  %vm8940_vm10 = vmor %vm4084_vm0, %vm4085_vm3 }
0x1ed0   :  { %v4081_v18 = vsub.f32 1.0, %v4080_v55  ;;  %8015 = vrcp.f32 %v4027_v44  ;;  %vm4131_vm2 = vmor %vm4129_vm1, %vm4130_vm15  ;;  %v4105_v27 = vand.u32 2147483648, %v4024_v4  ;;  %v4118_v35 = vand.u32 2147483647, %v4027_v44  ;;  %v4174_v10 = vpop.f32.mrf.mxu1 }
0x1ed1   :  { %v4126_v22 = vsub.f32 1.0, %v4125_v40  ;;  %v4120_v60 = vand.u32 2147483648, %v4027_v44  ;;  %vm4099_vm14 = vweird.f32 %v4024_v4  ;;  %vm4114_vm1 = vweird.f32 %v4027_v44 }
0x1ed2   :  { %v4082_v59 = vmul.f32 %v8927_v42, %v4081_v18  ;;  %v4106_v63 = vor.u32 1.1754944e-38, %v4105_v27  ;;  %vm4104_vm0 = vcmp.eq.f32.partialorder %v4103_v46, 8.507059e+37  ;;  %vm4119_vm3 = vcmp.eq.f32.partialorder %v4118_v35, 8.507059e+37  ;;  %v4414_v18 = vld [vmem:[#allocation7 + $0x808] sm:$0xff]  ;;  %v4379_v46 = vld [vmem:[#allocation7 + $0x7c0] sm:$0xff]  ;;  %v4378_v27 = vld [vmem:[#allocation7 + $0x7b8] sm:$0xff] }
0x1ed3   :  { %v4127_v25 = vmul.f32 %v8012_v8, %v4126_v22  ;;  %v4121_v61 = vor.u32 1.1754944e-38, %v4120_v60  ;;  %v4375_v35 = vld [vmem:[#allocation7 + $0x7a0] sm:$0xff]  ;;  %v4374_v60 = vld [vmem:[#allocation7 + $0x798] sm:$0xff] }
0x1ed4   :  { %v4083_v37 = vadd.f32 %v8927_v42, %v4082_v59 }
0x1ed5   :  { %v8014_v17 = vpop.eup %8013  ;;  %v4128_v28 = vadd.f32 %v8012_v8, %v4127_v25 }
0x1ed6   :  { %v8016_v3 = vpop.eup %8015  ;;  %v4095_v26 = vmul.f32 %v8014_v17, %v4024_v4  ;;  %v8931_v0 = vpop.xlane.xlu2 %4032  ;;  %vm4100_vm6 = vweird.f32 %v8014_v17 }
0x1ed7   :  { %v4132_v34 = vsel %vm4131_vm2, %v8012_v8, %v4128_v28  ;;  %v4110_v36 = vmul.f32 %v8016_v3, %v4027_v44  ;;  %8017 = vrcp.f32 %v8931_v0  ;;  %vm4115_vm11 = vweird.f32 %v8016_v3  ;;  %vm4101_vm15 = vmor %vm4099_vm14, %vm4100_vm6  ;;  %v4411_v28 = vld [vmem:[#allocation7 + $0x7f0] sm:$0xff] }
0x1ed8   :  { %v4137_v38 = vsel %vm4134_vm5, %v4136_v31, %v4132_v34  ;;  %v4096_v39 = vsub.f32 1.0, %v4095_v26  ;;  %vm4116_vm2 = vmor %vm4114_vm1, %vm4115_vm11  ;;  %v4150_v40 = vand.u32 2147483648, %v8931_v0  ;;  %v4148_v24 = vand.u32 2147483647, %v8931_v0 }
0x1ed9   :  { %v4138_v43 = vmul.f32 %v8897_v58, %v4137_v38  ;;  %v4111_v20 = vsub.f32 1.0, %v4110_v36  ;;  %v4087_v58 = vsel %vm8940_vm10, %v8927_v42, %v4083_v37  ;;  %vm4144_vm6 = vweird.f32 %v8931_v0  ;;  %v4383_v37 = vld [vmem:[#allocation7 + $0x7e0] sm:$0xff]  ;;  %v4382_v38 = vld [vmem:[#allocation7 + $0x7d8] sm:$0xff] }
0x1eda   :  { %v4097_v49 = vmul.f32 %v8014_v17, %v4096_v39  ;;  %v4092_v30 = vsel %vm4089_vm13, %v4091_v62, %v4087_v58  ;;  %vm4149_vm11 = vcmp.eq.f32.partialorder %v4148_v24, 8.507059e+37  ;;  %v4381_v39 = vld [vmem:[#allocation7 + $0x7d0] sm:$0xff]  ;;  %v4371_v58 = vld [vmem:[#allocation7 + $0x780] sm:$0xff] }
0x1edb   :  { %v4112_v1 = vmul.f32 %v8016_v3, %v4111_v20  ;;  %7636 = vmatmul.msk.f32.vlgmr.msrb.gmra.mxu3 %vm794_vm4, %v4138_v43  ;;  %v4093_v4 = vmul.f32 %v8894_v23, %v4092_v30  ;;  %v4151_v23 = vor.u32 1.1754944e-38, %v4150_v40  ;;  %v4380_v43 = vld [vmem:[#allocation7 + $0x7c8] sm:$0xff]  ;;  %v4377_v20 = vld [vmem:[#allocation7 + $0x7b0] sm:$0xff] }
0x1edc   :  { %v4098_v50 = vadd.f32 %v8014_v17, %v4097_v49  ;;  %v4376_v49 = vld [vmem:[#allocation7 + $0x7a8] sm:$0xff]  ;;  %v4369_v62 = vld [vmem:[#allocation7 + $0x770] sm:$0xff] }
0x1edd   :  { %v4113_v5 = vadd.f32 %v8016_v3, %v4112_v1  ;;  %v8018_v32 = vpop.eup %8017  ;;  %v4372_v1 = vld [vmem:[#allocation7 + $0x788] sm:$0xff] }
0x1ede   :  { %v4102_v7 = vsel %vm4101_vm15, %v8014_v17, %v4098_v50  ;;  %v7750_v14 = vpop.permute.xlu2 %7749  ;;  %v4140_v2 = vmul.f32 %v8018_v32, %v8931_v0  ;;  %vm4145_vm5 = vweird.f32 %v8018_v32  ;;  %v4370_v50 = vld [vmem:[#allocation7 + $0x778] sm:$0xff] }
0x1edf   :  { %v4107_v13 = vsel %vm4104_vm0, %v4106_v63, %v4102_v7  ;;  %v4117_v15 = vsel %vm4116_vm2, %v8016_v3, %v4113_v5  ;;  %v7752_v56 = vunpack.i.h.bf16 %v7750_v14  ;;  %v7751_v42 = vunpack.i.l.bf16 %v7750_v14  ;;  %vm4146_vm10 = vmor %vm4144_vm6, %vm4145_vm5  ;;  %v4368_v63 = vld [vmem:[#allocation7 + $0x768] sm:$0xff] }
0x1ee0   :  { %v4108_v19 = vmul.f32 %v8904_v47, %v4107_v13  ;;  %v4122_v11 = vsel %vm4119_vm3, %v4121_v61, %v4117_v15  ;;  %v4141_v55 = vsub.f32 1.0, %v4140_v2  ;;  %v4413_v47 = vld [vmem:[#allocation7 + $0x800] sm:$0xff] }
0x1ee1   :  { %v4123_v8 = vmul.f32 %v8906_v21, %v4122_v11  ;;  %4264 = vmatpush.msrb.mxu1 %v7751_v42  ;;  %4287 = vmatpush.msrb.mxu2 %v7752_v56  ;;  %v7798_v42 = vld [vmem:[#allocation7 + $0x810] ss:$0 sm:$0xff] }
0x1ee2   :  { %v3747_v44 = vpop.permute.xlu0 %3746  ;;  %v4142_v22 = vmul.f32 %v8018_v32, %v4141_v55  ;;  %7634 = vmatmul.msk.f32.vlgmr.msrb.gmra.mxu1 %vm794_vm4, %v4108_v19  ;;  %v7799_v55 = vld [vmem:[#allocation7 + $0x7e8] ss:$0 sm:$0xff] }
0x1ee3   :  { %4241 = vmatpush.msrb.mxu0 %v3747_v44  ;;  %7635 = vmatmul.msk.f32.vlgmr.msrb.gmra.mxu2 %vm794_vm4, %v4123_v8 }
0x1ee4   :  { %7633 = vmatmul.msk.f32.vlgmr.msrb.gmra.mxu0 %vm794_vm4, %v4093_v4  ;;  %v4143_v21 = vadd.f32 %v8018_v32, %v4142_v22  ;;  %4429 = vmatpush.msra.mxu2 %v4414_v18 }
0x1ee5   :  { %4386 = vmatpush.msra.mxu1 %v4383_v37 }
0x1ee6   :  { %v3759_v25 = vpop.permute.xlu1 %3758  ;;  %v4147_v59 = vsel %vm4146_vm10, %v8018_v32, %v4143_v21  ;;  %4430 = vmatpush.msra.mxu2 %v4413_v47 }
0x1ee7   :  { %4333 = vmatpush.msra.mxu0 %v3759_v25  ;;  %v4152_v17 = vsel %vm4149_vm11, %v4151_v23, %v4147_v59  ;;  %4387 = vmatpush.msra.mxu1 %v4382_v38 }
0x1ee8   :  { %4431 = vmatpush.msra.mxu2 %v4412_v16  ;;  %v4153_v3 = vmul.f32 %v8912_v41, %v4152_v17  ;;  %v4553_v17 = vld [vmem:[#allocation8 + $0xa80] sm:$0xff] }
0x1ee9   :  { %4388 = vmatpush.msra.mxu1 %v4381_v39  ;;  %4568 = vmatpush.msra.mxu3 %v4553_v17  ;;  %v4511_v17 = vld [vmem:[#allocation8 + $0x930] sm:$0xff] }
0x1eea   :  { %4432 = vmatpush.msra.mxu2 %v4411_v28  ;;  %v4554_v28 = vld [vmem:[#allocation8 + $0xa88] sm:$0xff] }
0x1eeb   :  { %7638 = vmatmul.msk.f32.vlgmr.msra.gmra.mxu2 %vm477_vm7, %v8423_v57  ;;  %4389 = vmatpush.msra.mxu1 %v4380_v43  ;;  %v4545_v43 = vld [vmem:[#allocation8 + $0xa40] sm:$0xff] }
0x1eec   :  { %7637 = vmatmul.msk.f32.vlgmr.msra.gmra.mxu0 %vm794_vm4, %v4153_v3  ;;  %v4555_v3 = vld [vmem:[#allocation8 + $0xa90] sm:$0xff] }
0x1eed   :  { %4390 = vmatpush.msra.mxu1 %v4379_v46  ;;  %4591 = vmatpush.msrb.mxu0 %v4554_v28  ;;  %v4546_v46 = vld [vmem:[#allocation8 + $0xa48] sm:$0xff]  ;;  %v4512_v28 = vld [vmem:[#allocation8 + $0x938] sm:$0xff] }
0x1eee   :  { %4614 = vmatpush.msrb.mxu2 %v4555_v3  ;;  %v4505_v3 = vld [vmem:[#allocation8 + $0x900] sm:$0xff] }
0x1eef   :  { %4391 = vmatpush.msra.mxu1 %v4378_v27  ;;  %v4547_v27 = vld [vmem:[#allocation8 + $0xa50] sm:$0xff] }
0x1ef1   :  { %4392 = vmatpush.msra.mxu1 %v4377_v20  ;;  %v4548_v20 = vld [vmem:[#allocation8 + $0xa58] sm:$0xff] }
0x1ef3   :  { %4393 = vmatpush.msra.mxu1 %v4376_v49  ;;  %v4541_v49 = vld [vmem:[#allocation8 + $0xa20] sm:$0xff] }
0x1ef5   :  { %v4197_v26 = vpop.f32.mrf.mxu2  ;;  %4394 = vmatpush.msra.mxu1 %v4375_v35  ;;  %v4542_v35 = vld [vmem:[#allocation8 + $0xa28] sm:$0xff] }
0x1ef7   :  { %4395 = vmatpush.msra.mxu1 %v4374_v60  ;;  %v4543_v60 = vld [vmem:[#allocation8 + $0xa30] sm:$0xff] }
0x1ef9   :  { %4396 = vmatpush.msra.mxu1 %v4373_v9  ;;  %v4544_v9 = vld [vmem:[#allocation8 + $0xa38] sm:$0xff] }
0x1efb   :  { %4397 = vmatpush.msra.mxu1 %v4372_v1  ;;  %v4537_v1 = vld [vmem:[#allocation8 + $0xa00] sm:$0xff] }
0x1efd   :  { %4398 = vmatpush.msra.mxu1 %v4371_v58  ;;  %v4538_v58 = vld [vmem:[#allocation8 + $0xa08] sm:$0xff] }
0x1eff   :  { %4399 = vmatpush.msra.mxu1 %v4370_v50  ;;  %v4539_v50 = vld [vmem:[#allocation8 + $0xa10] sm:$0xff] }
0x1f01   :  { %4400 = vmatpush.msra.mxu1 %v4369_v62  ;;  %v4540_v62 = vld [vmem:[#allocation8 + $0xa18] sm:$0xff] }
0x1f03   :  { %4401 = vmatpush.msra.mxu1 %v4368_v63  ;;  %v4533_v63 = vld [vmem:[#allocation8 + $0x9e0] sm:$0xff] }
0x1f4e   :  { %v4220_v48 = vpop.f32.mrf.mxu3 }
0x1f4f   :  { %4340 = vrot.lane.b32.xlu2 %v4220_v48, %s8283_s13  ;;  %v4549_v48 = vld [vmem:[#allocation8 + $0xa60] sm:$0xff] }
0x1f50   :  { %4569 = vmatpush.msra.mxu3 %v4549_v48  ;;  %v4507_v48 = vld [vmem:[#allocation8 + $0x910] sm:$0xff] }
0x1f52   :  { %4570 = vmatpush.msra.mxu3 %v4545_v43  ;;  %v4493_v43 = vld [vmem:[#allocation8 + $0x8a0] sm:$0xff] }
0x1f54   :  { %4571 = vmatpush.msra.mxu3 %v4541_v49 }
0x1f56   :  { %4572 = vmatpush.msra.mxu3 %v4537_v1  ;;  %v4795_v1 = vld [vmem:[#allocation7 + $0xa10] sm:$0xff] }
0x1f58   :  { %4573 = vmatpush.msra.mxu3 %v4533_v63  ;;  %v4761_v63 = vld [vmem:[#allocation7 + $0x900] sm:$0xff] }
0x1f5e   :  { %v4312_v31 = vpop.f32.mrf.mxu3 }
0x1f5f   :  { %4356 = vrot.lane.b32.xlu1 %v4312_v31, %s8295_s16  ;;  %v4266_v0 = vpop.f32.mrf.mxu1  ;;  %v4551_v31 = vld [vmem:[#allocation8 + $0xa70] sm:$0xff] }
0x1f60   :  { %4348 = vrot.lane.b32.xlu0 %v4266_v0, %s8296_s17  ;;  %4615 = vmatpush.msrb.mxu2 %v4551_v31  ;;  %v4501_v31 = vld [vmem:[#allocation8 + $0x8e0] sm:$0xff] }
0x1f61   :  { %v4243_v34 = vpop.f32.mrf.mxu0 }
0x1f62   :  { %4342 = vrot.lane.b32.xlu2 %v4243_v34, %s8283_s13  ;;  %4616 = vmatpush.msrb.mxu2 %v4547_v27  ;;  %v4495_v27 = vld [vmem:[#allocation8 + $0x8b0] sm:$0xff] }
0x1f64   :  { %4617 = vmatpush.msrb.mxu2 %v4543_v60 }
0x1f66   :  { %v4289_v41 = vpop.f32.mrf.mxu2  ;;  %4618 = vmatpush.msrb.mxu2 %v4539_v50  ;;  %v4794_v50 = vld [vmem:[#allocation7 + $0xa08] sm:$0xff] }
0x1f68   :  { %4350 = vrot.lane.b32.xlu0 %v4289_v41, %s8296_s17 }
0x1f69   :  { %v4335_v36 = vpop.f32.mrf.mxu0 }
0x1f6a   :  { %4358 = vrot.lane.b32.xlu1 %v4335_v36, %s8295_s16 }
0x1f6e   :  { %v4434_v8 = vpop.f32.mrf.mxu2 }
0x1f6f   :  { %v4435_v4 = vadd.f32 %v7798_v42, %v4434_v8  ;;  %v4522_v42 = vld [vmem:[#allocation8 + $0x988] sm:$0xff]  ;;  %v4523_v8 = vld [vmem:[#allocation8 + $0x990] sm:$0xff] }
0x1f71   :  { %v4439_v18 = vperm.slane %v4435_v4, 0  ;;  %v4438_v47 = vrot.slane %v4435_v4, 1  ;;  %v4517_v4 = vld [vmem:[#allocation8 + $0x960] sm:$0xff] }
0x1f73   :  { %v4440_v25 = vperm.slane %v4438_v47, 0  ;;  %v4514_v47 = vld [vmem:[#allocation8 + $0x948] sm:$0xff] }
0x1fa9   :  { %v4341_v5 = vpop.permute.xlu2 %4340 }
0x1faa   :  { %v4362_v7 = vsel %vm477_vm7, %v4174_v10, %v4341_v5  ;;  %v4550_v10 = vld [vmem:[#allocation8 + $0xa68] sm:$0xff] }
0x1fab   :  { %4592 = vmatpush.msrb.mxu0 %v4550_v10  ;;  %v4534_v5 = vld [vmem:[#allocation8 + $0x9e8] sm:$0xff]  ;;  %v4508_v10 = vld [vmem:[#allocation8 + $0x918] sm:$0xff] }
0x1fad   :  { %4593 = vmatpush.msrb.mxu0 %v4546_v46  ;;  %v4494_v46 = vld [vmem:[#allocation8 + $0x8a8] sm:$0xff] }
0x1faf   :  { %4594 = vmatpush.msrb.mxu0 %v4542_v35 }
0x1fb1   :  { %4595 = vmatpush.msrb.mxu0 %v4538_v58  ;;  %v4762_v58 = vld [vmem:[#allocation7 + $0x908] sm:$0xff] }
0x1fb3   :  { %4596 = vmatpush.msrb.mxu0 %v4534_v5  ;;  %v4793_v5 = vld [vmem:[#allocation7 + $0xa00] sm:$0xff] }
0x1fbc   :  { %v4343_v13 = vpop.permute.xlu2 %4342 }
0x1fbd   :  { %v4363_v15 = vsel %vm477_vm7, %v4197_v26, %v4343_v13  ;;  %v4552_v26 = vld [vmem:[#allocation8 + $0xa78] sm:$0xff] }
0x1fbe   :  { %v4532_v13 = vld [vmem:[#allocation8 + $0x9d8] sm:$0xff] }
0x1fd1   :  { %v4357_v32 = vpop.permute.xlu1 %4356 }
0x1fd2   :  { %v4349_v61 = vpop.permute.xlu0 %4348 }
0x1fd3   :  { %v4364_v14 = vsel %vm1314_vm9, %v4362_v7, %v4349_v61  ;;  %v4536_v7 = vld [vmem:[#allocation8 + $0x9f8] sm:$0xff]  ;;  %v4529_v61 = vld [vmem:[#allocation8 + $0x9c0] sm:$0xff] }
0x1fd4   :  { %v4366_v30 = vsel %vm3013_vm12, %v4364_v14, %v4357_v32  ;;  %v4535_v32 = vld [vmem:[#allocation8 + $0x9f0] sm:$0xff]  ;;  %v4530_v14 = vld [vmem:[#allocation8 + $0x9c8] sm:$0xff]  ;;  %4574 = vmatpush.msra.mxu3 %v4529_v61 }
0x1fd5   :  { %4402 = vmatmul.f32.vlgmr.msra.gmra.mxu1 %v4366_v30  ;;  %4619 = vmatpush.msrb.mxu2 %v4535_v32  ;;  %v4531_v30 = vld [vmem:[#allocation8 + $0x9d0] sm:$0xff] }
0x1fd6   :  { %4597 = vmatpush.msrb.mxu0 %v4530_v14 }
0x1fd7   :  { %4620 = vmatpush.msrb.mxu2 %v4531_v30 }
0x1fda   :  { %v4351_v2 = vpop.permute.xlu0 %4350 }
0x1fdb   :  { %v4365_v19 = vsel %vm1314_vm9, %v4363_v15, %v4351_v2  ;;  %v4525_v15 = vld [vmem:[#allocation8 + $0x9a0] sm:$0xff]  ;;  %v4526_v2 = vld [vmem:[#allocation8 + $0x9a8] sm:$0xff] }
0x1fdc   :  { %v4359_v11 = vpop.permute.xlu1 %4358  ;;  %4575 = vmatpush.msra.mxu3 %v4525_v15  ;;  %4598 = vmatpush.msrb.mxu0 %v4526_v2 }
0x1fdd   :  { %v4367_v56 = vsel %vm3013_vm12, %v4365_v19, %v4359_v11  ;;  %v4527_v19 = vld [vmem:[#allocation8 + $0x9b0] sm:$0xff]  ;;  %v4528_v11 = vld [vmem:[#allocation8 + $0x9b8] sm:$0xff] }
0x1fde   :  { %4405 = vmatmul.f32.gmra.mxu1 %v4367_v56  ;;  %4621 = vmatpush.msrb.mxu2 %v4527_v19  ;;  %v4521_v56 = vld [vmem:[#allocation8 + $0x980] sm:$0xff] }
0x1fdf   :  { %4576 = vmatpush.msra.mxu3 %v4521_v56  ;;  %4599 = vmatpush.msrb.mxu0 %v4522_v42  ;;  %v7800_v56 = vld [vmem:[#allocation7 + $0x758] ss:$0 sm:$0xff] }
0x1fe0   :  { %4622 = vmatpush.msrb.mxu2 %v4523_v8 }
0x1fe1   :  { %4577 = vmatpush.msra.mxu3 %v4517_v4  ;;  %v7801_v4 = vld [vmem:[#allocation7 + $0x760] ss:$0 sm:$0xff] }
0x2052   :  { %v4403_v40 = vpop.f32.mrf.mxu1 }
0x2053   :  { %v4404_v44 = vadd.f32 %v7799_v55, %v4403_v40  ;;  %v4518_v40 = vld [vmem:[#allocation8 + $0x968] sm:$0xff] }
0x2054   :  { %4600 = vmatpush.msrb.mxu0 %v4518_v40 }
0x2055   :  { %v4409_v22 = vadd.f32 %v4404_v44, %v8813_v54  ;;  %v4556_v54 = vld [vmem:[#allocation8 + $0xa98] sm:$0xff]  ;;  %v4519_v44 = vld [vmem:[#allocation8 + $0x970] sm:$0xff] }
0x2056   :  { %4637 = vmatpush.msrb.mxu1 %v4556_v54  ;;  %4623 = vmatpush.msrb.mxu2 %v4519_v44  ;;  %v4506_v54 = vld [vmem:[#allocation8 + $0x908] sm:$0xff] }
0x2057   :  { %v8975_v24 = vadd.f32 %v4439_v18, %v4409_v22  ;;  %v4520_v18 = vld [vmem:[#allocation8 + $0x978] sm:$0xff]  ;;  %v4513_v22 = vld [vmem:[#allocation8 + $0x940] sm:$0xff]  ;;  %4601 = vmatpush.msrb.mxu0 %v4514_v47 }
0x2058   :  { %4638 = vmatpush.msrb.mxu1 %v4552_v26  ;;  %4578 = vmatpush.msra.mxu3 %v4513_v22  ;;  %v4502_v26 = vld [vmem:[#allocation8 + $0x8e8] sm:$0xff] }
0x2059   :  { %4445 = vadd.xlane.f32.xlu2 %v8975_v24 }
0x205a   :  { %4639 = vmatpush.msrb.mxu1 %v4548_v20  ;;  %v4496_v20 = vld [vmem:[#allocation8 + $0x8b8] sm:$0xff] }
0x205b   :  { %v4406_v21 = vpop.f32.mrf.mxu1 }
0x205c   :  { %v4407_v23 = vadd.f32 %v7799_v55, %v4406_v21  ;;  %4640 = vmatpush.msrb.mxu1 %v4544_v9  ;;  %v4524_v55 = vld [vmem:[#allocation8 + $0x998] sm:$0xff]  ;;  %v4515_v21 = vld [vmem:[#allocation8 + $0x950] sm:$0xff]  ;;  %v4763_v9 = vld [vmem:[#allocation7 + $0x910] sm:$0xff] }
0x205d   :  { %4624 = vmatpush.msrb.mxu2 %v4515_v21 }
0x205e   :  { %v4410_v16 = vadd.f32 %v4407_v23, %v8817_v12  ;;  %4641 = vmatpush.msrb.mxu1 %v4540_v62  ;;  %v4516_v23 = vld [vmem:[#allocation8 + $0x958] sm:$0xff] }
0x205f   :  { %4625 = vmatpush.msrb.mxu2 %v4511_v17  ;;  %v4760_v17 = vld [vmem:[#allocation7 + $0x8f8] sm:$0xff] }
0x2060   :  { %v8979_v59 = vadd.f32 %v4440_v25, %v4410_v16  ;;  %4642 = vmatpush.msrb.mxu1 %v4536_v7  ;;  %v4509_v25 = vld [vmem:[#allocation8 + $0x920] sm:$0xff]  ;;  %v4510_v16 = vld [vmem:[#allocation8 + $0x928] sm:$0xff] }
0x2061   :  { %4579 = vmatpush.msra.mxu3 %v4509_v25  ;;  %4602 = vmatpush.msrb.mxu0 %v4510_v16 }
0x2062   :  { %4447 = vadd.xlane.f32.xlu0 %v8979_v59  ;;  %4643 = vmatpush.msrb.mxu1 %v4532_v13 }
0x2063   :  { %4580 = vmatpush.msra.mxu3 %v4505_v3  ;;  %4603 = vmatpush.msrb.mxu0 %v4506_v54  ;;  %v4792_v3 = vld [vmem:[#allocation7 + $0x9f8] sm:$0xff]  ;;  %v4746_v54 = vld [vmem:[#allocation7 + $0x888] sm:$0xff] }
0x2064   :  { %4644 = vmatpush.msrb.mxu1 %v4528_v11  ;;  %4626 = vmatpush.msrb.mxu2 %v4507_v48  ;;  %v4759_v48 = vld [vmem:[#allocation7 + $0x8f0] sm:$0xff] }
0x2065   :  { %4581 = vmatpush.msra.mxu3 %v4501_v31  ;;  %4604 = vmatpush.msrb.mxu0 %v4502_v26  ;;  %v4745_v31 = vld [vmem:[#allocation7 + $0x880] sm:$0xff]  ;;  %v4758_v26 = vld [vmem:[#allocation7 + $0x8e8] sm:$0xff] }
0x2066   :  { %4645 = vmatpush.msrb.mxu1 %v4524_v55 }
0x2068   :  { %4646 = vmatpush.msrb.mxu1 %v4520_v18 }
0x206a   :  { %4647 = vmatpush.msrb.mxu1 %v4516_v23 }
0x206c   :  { %4648 = vmatpush.msrb.mxu1 %v4512_v28  ;;  %v4779_v28 = vld [vmem:[#allocation7 + $0x990] sm:$0xff] }
0x206e   :  { %4649 = vmatpush.msrb.mxu1 %v4508_v10  ;;  %v4778_v10 = vld [vmem:[#allocation7 + $0x988] sm:$0xff] }
0x20cc   :  { %v4446_v12 = vpop.xlane.xlu2 %4445 }
0x20cd   :  { %v4449_v0 = vmul.f32 %v4446_v12, %v8648_v51  ;;  %v4503_v12 = vld [vmem:[#allocation8 + $0x8f0] sm:$0xff] }
0x20ce   :  { %4627 = vmatpush.msrb.mxu2 %v4503_v12  ;;  %v4777_v12 = vld [vmem:[#allocation7 + $0x980] sm:$0xff] }
0x20cf   :  { %v8984_v34 = vsub.f32 %v8975_v24, %v4449_v0  ;;  %v4504_v0 = vld [vmem:[#allocation8 + $0x8f8] sm:$0xff] }
0x20d0   :  { %4650 = vmatpush.msrb.mxu1 %v4504_v0  ;;  %v4790_v0 = vld [vmem:[#allocation7 + $0x9e8] sm:$0xff] }
0x20d1   :  { %v4453_v41 = vmul.f32 %v8984_v34, %v8984_v34 }
0x20d3   :  { %4455 = vadd.xlane.f32.xlu1 %v4453_v41  ;;  %v4497_v41 = vld [vmem:[#allocation8 + $0x8c0] sm:$0xff] }
0x20d4   :  { %4582 = vmatpush.msra.mxu3 %v4497_v41  ;;  %v4744_v41 = vld [vmem:[#allocation7 + $0x878] sm:$0xff] }
0x20d5   :  { %v4448_v36 = vpop.xlane.xlu0 %4447 }
0x20d6   :  { %v4450_v37 = vmul.f32 %v4448_v36, %v8648_v51  ;;  %v4498_v36 = vld [vmem:[#allocation8 + $0x8c8] sm:$0xff]  ;;  %4583 = vmatpush.msra.mxu3 %v4493_v43 }
0x20d7   :  { %4605 = vmatpush.msrb.mxu0 %v4498_v36  ;;  %v4757_v36 = vld [vmem:[#allocation7 + $0x8e0] sm:$0xff]  ;;  %v4743_v43 = vld [vmem:[#allocation7 + $0x870] sm:$0xff] }
0x20d8   :  { %v8990_v38 = vsub.f32 %v8979_v59, %v4450_v37  ;;  %v4499_v37 = vld [vmem:[#allocation8 + $0x8d0] sm:$0xff] }
0x20d9   :  { %4628 = vmatpush.msrb.mxu2 %v4499_v37  ;;  %4606 = vmatpush.msrb.mxu0 %v4494_v46  ;;  %v4776_v37 = vld [vmem:[#allocation7 + $0x978] sm:$0xff] }
0x20da   :  { %v4454_v39 = vmul.f32 %v8990_v38, %v8990_v38  ;;  %v4756_v46 = vld [vmem:[#allocation7 + $0x8d8] sm:$0xff] }
0x20db   :  { %4629 = vmatpush.msrb.mxu2 %v4495_v27  ;;  %4821 = vmatpush.msra.mxu0 %v4763_v9  ;;  %v4775_v27 = vld [vmem:[#allocation7 + $0x970] sm:$0xff] }
0x20dc   :  { %4457 = vadd.xlane.f32.xlu2 %v4454_v39  ;;  %v4500_v39 = vld [vmem:[#allocation8 + $0x8d8] sm:$0xff]  ;;  %v4787_v9 = vld [vmem:[#allocation7 + $0x9d0] sm:$0xff] }
0x20dd   :  { %4651 = vmatpush.msrb.mxu1 %v4500_v39  ;;  %4822 = vmatpush.msra.mxu0 %v4762_v58  ;;  %v4789_v39 = vld [vmem:[#allocation7 + $0x9e0] sm:$0xff]  ;;  %v4754_v58 = vld [vmem:[#allocation7 + $0x8c8] sm:$0xff] }
0x20de   :  { %4844 = vmatpush.msra.mxu2 %v4779_v28 }
0x20df   :  { %4652 = vmatpush.msrb.mxu1 %v4496_v20  ;;  %4823 = vmatpush.msra.mxu0 %v4761_v63  ;;  %v4788_v20 = vld [vmem:[#allocation7 + $0x9d8] sm:$0xff] }
0x20e0   :  { %4845 = vmatpush.msra.mxu2 %v4778_v10  ;;  %v4740_v63 = vld [vmem:[#allocation7 + $0x858] sm:$0xff] }
0x20e1   :  { %4867 = vmatpush.msra.mxu1 %v4795_v1  ;;  %4824 = vmatpush.msra.mxu0 %v4760_v17  ;;  %v4741_v1 = vld [vmem:[#allocation7 + $0x860] sm:$0xff]  ;;  %v4764_v10 = vld [vmem:[#allocation7 + $0x918] sm:$0xff] }
0x20e2   :  { %4846 = vmatpush.msra.mxu2 %v4777_v12 }
0x20e3   :  { %4868 = vmatpush.msra.mxu1 %v4794_v50  ;;  %4825 = vmatpush.msra.mxu0 %v4759_v48  ;;  %v4773_v50 = vld [vmem:[#allocation7 + $0x960] sm:$0xff]  ;;  %v4732_v48 = vld [vmem:[#allocation7 + $0x818] sm:$0xff] }
0x20e4   :  { %4847 = vmatpush.msra.mxu2 %v4776_v37 }
0x20e5   :  { %4869 = vmatpush.msra.mxu1 %v4793_v5  ;;  %4826 = vmatpush.msra.mxu0 %v4758_v26  ;;  %v4753_v5 = vld [vmem:[#allocation7 + $0x8c0] sm:$0xff] }
0x20e6   :  { %4848 = vmatpush.msra.mxu2 %v4775_v27 }
0x20e7   :  { %4870 = vmatpush.msra.mxu1 %v4792_v3  ;;  %4827 = vmatpush.msra.mxu0 %v4757_v36  ;;  %v4733_v3 = vld [vmem:[#allocation7 + $0x820] sm:$0xff] }
0x20e9   :  { %4828 = vmatpush.msra.mxu0 %v4756_v46 }
0x2146   :  { %v4456_v49 = vpop.xlane.xlu1 %4455 }
0x2147   :  { %v4459_v35 = vmul.f32 %v4456_v49, %v8648_v51  ;;  %v4742_v49 = vld [vmem:[#allocation7 + $0x868] sm:$0xff] }
0x2149   :  { %v4461_v60 = vadd.f32 1e-05, %v4459_v35  ;;  %v4755_v35 = vld [vmem:[#allocation7 + $0x8d0] sm:$0xff] }
0x214a   :  { %4829 = vmatpush.msra.mxu0 %v4755_v35 }
0x214b   :  { %8019 = vrsqrt.f32 %v4461_v60  ;;  %vm4469_vm13 = vweird.f32 %v4461_v60 }
0x214c   :  { %4830 = vmatpush.msra.mxu0 %v4754_v58 }
0x214e   :  { %4831 = vmatpush.msra.mxu0 %v4753_v5 }
0x214f   :  { %v4458_v62 = vpop.xlane.xlu2 %4457 }
0x2150   :  { %v4460_v32 = vmul.f32 %v4458_v62, %v8648_v51  ;;  %v4786_v62 = vld [vmem:[#allocation7 + $0x9c8] sm:$0xff] }
0x2151   :  { %v8020_v7 = vpop.eup %8019 }
0x2152   :  { %v4462_v61 = vadd.f32 1e-05, %v4460_v32  ;;  %v4464_v14 = vmul.f32 %v8020_v7, %v4461_v60  ;;  %vm4470_vm12 = vweird.f32 %v8020_v7  ;;  %v4774_v60 = vld [vmem:[#allocation7 + $0x968] sm:$0xff]  ;;  %v4772_v32 = vld [vmem:[#allocation7 + $0x958] sm:$0xff] }
0x2153   :  { %vm4471_vm14 = vmor %vm4469_vm13, %vm4470_vm12  ;;  %4849 = vmatpush.msra.mxu2 %v4774_v60 }
0x2154   :  { %8021 = vrsqrt.f32 %v4462_v61  ;;  %v4465_v30 = vmul.f32 %v8020_v7, %v4464_v14  ;;  %vm4479_vm1 = vweird.f32 %v4462_v61  ;;  %v4752_v14 = vld [vmem:[#allocation7 + $0x8b8] sm:$0xff] }
0x2155   :  { %4850 = vmatpush.msra.mxu2 %v4773_v50  ;;  %4832 = vmatpush.msra.mxu0 %v4752_v14 }
0x2156   :  { %v4466_v13 = vmul.f32 0.5, %v4465_v30  ;;  %v4771_v30 = vld [vmem:[#allocation7 + $0x950] sm:$0xff] }
0x2157   :  { %4851 = vmatpush.msra.mxu2 %v4772_v32 }
0x2158   :  { %v4467_v15 = vsub.f32 1.5, %v4466_v13  ;;  %v4784_v13 = vld [vmem:[#allocation7 + $0x9b8] sm:$0xff] }
0x2159   :  { %4852 = vmatpush.msra.mxu2 %v4771_v30 }
0x215a   :  { %v8022_v2 = vpop.eup %8021  ;;  %v4468_v19 = vmul.f32 %v8020_v7, %v4467_v15  ;;  %v4738_v15 = vld [vmem:[#allocation7 + $0x848] sm:$0xff] }
0x215b   :  { %v4474_v11 = vmul.f32 %v8022_v2, %v4462_v61  ;;  %vm4480_vm15 = vweird.f32 %v8022_v2  ;;  %v4739_v61 = vld [vmem:[#allocation7 + $0x850] sm:$0xff] }
0x215c   :  { %v4472_v42 = vsel %vm4471_vm14, %v8020_v7, %v4468_v19  ;;  %vm4481_vm0 = vmor %vm4479_vm1, %vm4480_vm15  ;;  %v4785_v7 = vld [vmem:[#allocation7 + $0x9c0] sm:$0xff]  ;;  %v4770_v19 = vld [vmem:[#allocation7 + $0x948] sm:$0xff] }
0x215d   :  { %v4475_v8 = vmul.f32 %v8022_v2, %v4474_v11  ;;  %v4483_v55 = vmul.f32 %v4472_v42, %v8984_v34  ;;  %v4747_v34 = vld [vmem:[#allocation7 + $0x890] sm:$0xff]  ;;  %4853 = vmatpush.msra.mxu2 %v4770_v19  ;;  %v4750_v42 = vld [vmem:[#allocation7 + $0x8a8] sm:$0xff] }
0x215e   :  { %4798 = vmatpush.msrb.mxu3 %v4747_v34  ;;  %v4783_v11 = vld [vmem:[#allocation7 + $0x9b0] sm:$0xff]  ;;  %v4766_v34 = vld [vmem:[#allocation7 + $0x928] sm:$0xff] }
0x215f   :  { %v4476_v40 = vmul.f32 0.5, %v4475_v8  ;;  %v4487_v44 = vmul.f32 %v7800_v56, %v4483_v55  ;;  %v4769_v8 = vld [vmem:[#allocation7 + $0x940] sm:$0xff]  ;;  %v4782_v55 = vld [vmem:[#allocation7 + $0x9a8] sm:$0xff] }
0x2160   :  { %4799 = vmatpush.msrb.mxu3 %v4746_v54  ;;  %4854 = vmatpush.msra.mxu2 %v4769_v8  ;;  %v4765_v54 = vld [vmem:[#allocation7 + $0x920] sm:$0xff] }
0x2161   :  { %v4477_v18 = vsub.f32 1.5, %v4476_v40  ;;  %v4491_v22 = vadd.f32 %v7801_v4, %v4487_v44  ;;  %v4749_v40 = vld [vmem:[#allocation7 + $0x8a0] sm:$0xff]  ;;  %v4768_v44 = vld [vmem:[#allocation7 + $0x938] sm:$0xff] }
0x2162   :  { %4800 = vmatpush.msrb.mxu3 %v4745_v31  ;;  %4855 = vmatpush.msra.mxu2 %v4768_v44 }
0x2163   :  { %v4478_v47 = vmul.f32 %v8022_v2, %v4477_v18  ;;  %4584 = vmatmul.f32.vlgmr.msra.gmra.mxu3 %v4491_v22  ;;  %4607 = vmatmul.f32.vlgmr.msrb.gmra.mxu0 %v4491_v22  ;;  %v8998_v18 = vld [vmem:[#allocation8 + $0xaa0] ss:$8 sm:$0xf] }
0x2164   :  { %4630 = vmatmul.f32.vlgmr.msrb.gmra.mxu2 %v4491_v22  ;;  %4653 = vmatmul.f32.vlgmr.msrb.gmra.mxu1 %v4491_v22  ;;  %v4781_v22 = vld [vmem:[#allocation7 + $0x9a0] sm:$0xff]  ;;  %v4561_v17 = vperm.slane %v8998_v18, 1  ;;  %v4563_v28 = vperm.slane %v8998_v18, 3  ;;  %v4562_v37 = vperm.slane %v8998_v18, 2 }
0x2165   :  { %v4482_v21 = vsel %vm4481_vm0, %v8022_v2, %v4478_v47  ;;  %4801 = vmatpush.msrb.mxu3 %v4744_v41  ;;  %v4751_v2 = vld [vmem:[#allocation7 + $0x8b0] sm:$0xff]  ;;  %v4560_v41 = vperm.slane %v8998_v18, 0 }
0x2166   :  { %v4484_v23 = vmul.f32 %v4482_v21, %v8990_v38  ;;  %v4791_v38 = vld [vmem:[#allocation7 + $0x9f0] sm:$0xff]  ;;  %4833 = vmatpush.msra.mxu0 %v4751_v2  ;;  %v4748_v21 = vld [vmem:[#allocation7 + $0x898] sm:$0xff] }
0x2167   :  { %4871 = vmatpush.msra.mxu1 %v4791_v38  ;;  %4802 = vmatpush.msrb.mxu3 %v4743_v43  ;;  %v4735_v47 = vld [vmem:[#allocation7 + $0x830] sm:$0xff] }
0x2168   :  { %v4488_v25 = vmul.f32 %v7800_v56, %v4484_v23  ;;  %v4737_v56 = vld [vmem:[#allocation7 + $0x840] sm:$0xff]  ;;  %4834 = vmatpush.msra.mxu0 %v4750_v42  ;;  %v4767_v23 = vld [vmem:[#allocation7 + $0x930] sm:$0xff] }
0x2169   :  { %4872 = vmatpush.msra.mxu1 %v4790_v0  ;;  %4803 = vmatpush.msrb.mxu3 %v4742_v49 }
0x216a   :  { %v4492_v16 = vadd.f32 %v7801_v4, %v4488_v25  ;;  %v4736_v4 = vld [vmem:[#allocation7 + $0x838] sm:$0xff]  ;;  %4835 = vmatpush.msra.mxu0 %v4749_v40  ;;  %4856 = vmatpush.msra.mxu2 %v4767_v23 }
0x216b   :  { %4873 = vmatpush.msra.mxu1 %v4789_v39  ;;  %4804 = vmatpush.msrb.mxu3 %v4741_v1  ;;  %v4780_v25 = vld [vmem:[#allocation7 + $0x998] sm:$0xff] }
0x216c   :  { %4587 = vmatmul.f32.gmra.mxu3 %v4492_v16  ;;  %4610 = vmatmul.f32.gmra.mxu0 %v4492_v16 }
0x216d   :  { %4633 = vmatmul.f32.gmra.mxu2 %v4492_v16  ;;  %4656 = vmatmul.f32.gmra.mxu1 %v4492_v16  ;;  %v4734_v16 = vld [vmem:[#allocation7 + $0x828] sm:$0xff] }
0x216e   :  { %4874 = vmatpush.msra.mxu1 %v4788_v20  ;;  %4805 = vmatpush.msrb.mxu3 %v4740_v63 }
0x216f   :  { %4836 = vmatpush.msra.mxu0 %v4748_v21  ;;  %4857 = vmatpush.msra.mxu2 %v4766_v34 }
0x2170   :  { %4875 = vmatpush.msra.mxu1 %v4787_v9  ;;  %4806 = vmatpush.msrb.mxu3 %v4739_v61 }
0x2171   :  { %4858 = vmatpush.msra.mxu2 %v4765_v54 }
0x2172   :  { %4876 = vmatpush.msra.mxu1 %v4786_v62  ;;  %4807 = vmatpush.msrb.mxu3 %v4738_v15 }
0x2173   :  { %4859 = vmatpush.msra.mxu2 %v4764_v10 }
0x2174   :  { %4877 = vmatpush.msra.mxu1 %v4785_v7  ;;  %4808 = vmatpush.msrb.mxu3 %v4737_v56 }
0x2176   :  { %4878 = vmatpush.msra.mxu1 %v4784_v13  ;;  %4809 = vmatpush.msrb.mxu3 %v4736_v4 }
0x2178   :  { %4879 = vmatpush.msra.mxu1 %v4783_v11  ;;  %4810 = vmatpush.msrb.mxu3 %v4735_v47 }
0x217a   :  { %4880 = vmatpush.msra.mxu1 %v4782_v55  ;;  %4811 = vmatpush.msrb.mxu3 %v4734_v16 }
0x217c   :  { %4881 = vmatpush.msra.mxu1 %v4781_v22  ;;  %4812 = vmatpush.msrb.mxu3 %v4733_v3 }
0x217e   :  { %4882 = vmatpush.msra.mxu1 %v4780_v25  ;;  %4813 = vmatpush.msrb.mxu3 %v4732_v48 }
0x21e0   :  { %v4608_v38 = vpop.f32.mrf.mxu0 }
0x21e1   :  { %v9002_v31 = vadd.f32 %v4608_v38, %v4561_v17  ;;  %v4654_v26 = vpop.f32.mrf.mxu1 }
0x21e2   :  { %v9004_v12 = vadd.f32 %v4654_v26, %v4563_v28 }
0x21e3   :  { %v4661_v0 = vmul.f32 %v9002_v31, %v9002_v31 }
0x21e4   :  { %v4663_v36 = vmul.f32 %v9004_v12, %v9004_v12 }
0x21e5   :  { %v4669_v39 = vmul.f32 %v4661_v0, %v9002_v31 }
0x21e6   :  { %v4671_v43 = vmul.f32 %v4663_v36, %v9004_v12  ;;  %v4585_v46 = vpop.f32.mrf.mxu3 }
0x21e7   :  { %v4677_v27 = vmul.f32 0.044715, %v4669_v39  ;;  %v9014_v20 = vadd.f32 %v4585_v46, %v4560_v41  ;;  %v4631_v49 = vpop.f32.mrf.mxu2 }
0x21e8   :  { %v4679_v35 = vmul.f32 0.044715, %v4671_v43  ;;  %v9016_v60 = vadd.f32 %v4631_v49, %v4562_v37 }
0x21e9   :  { %v4611_v9 = vpop.f32.mrf.mxu0  ;;  %v4685_v1 = vadd.f32 %v4677_v27, %v9002_v31  ;;  %v4660_v58 = vmul.f32 %v9014_v20, %v9014_v20 }
0x21ea   :  { %v9021_v50 = vadd.f32 %v4611_v9, %v4561_v17  ;;  %v4657_v62 = vpop.f32.mrf.mxu1  ;;  %v4687_v63 = vadd.f32 %v4679_v35, %v9004_v12  ;;  %v4662_v5 = vmul.f32 %v9016_v60, %v9016_v60 }
0x21eb   :  { %v9026_v32 = vadd.f32 %v4657_v62, %v4563_v28  ;;  %v4693_v7 = vmul.f32 0.7978846, %v4685_v1  ;;  %v4668_v61 = vmul.f32 %v4660_v58, %v9014_v20 }
0x21ec   :  { %v4665_v14 = vmul.f32 %v9021_v50, %v9021_v50  ;;  %v4695_v30 = vmul.f32 0.7978846, %v4687_v63  ;;  %v4670_v13 = vmul.f32 %v4662_v5, %v9016_v60 }
0x21ed   :  { %v4667_v15 = vmul.f32 %v9026_v32, %v9026_v32  ;;  %8023 = vtanh.f32 %v4693_v7  ;;  %v4676_v2 = vmul.f32 0.044715, %v4668_v61 }
0x21ee   :  { %v4673_v19 = vmul.f32 %v4665_v14, %v9021_v50  ;;  %8025 = vtanh.f32 %v4695_v30  ;;  %v4678_v11 = vmul.f32 0.044715, %v4670_v13 }
0x21ef   :  { %v4675_v56 = vmul.f32 %v4667_v15, %v9026_v32  ;;  %v4588_v42 = vpop.f32.mrf.mxu3  ;;  %v4684_v8 = vadd.f32 %v4676_v2, %v9014_v20 }
0x21f0   :  { %v4681_v55 = vmul.f32 0.044715, %v4673_v19  ;;  %v9037_v4 = vadd.f32 %v4588_v42, %v4560_v41  ;;  %v4634_v40 = vpop.f32.mrf.mxu2  ;;  %v4686_v44 = vadd.f32 %v4678_v11, %v9016_v60 }
0x21f1   :  { %v4683_v18 = vmul.f32 0.044715, %v4675_v56  ;;  %v4635_v22 = vadd.f32 %v4634_v40, %v4562_v37  ;;  %v4692_v47 = vmul.f32 0.7978846, %v4684_v8 }
0x21f2   :  { %v4689_v21 = vadd.f32 %v4681_v55, %v9021_v50  ;;  %v4664_v23 = vmul.f32 %v9037_v4, %v9037_v4  ;;  %v4694_v25 = vmul.f32 0.7978846, %v4686_v44 }
0x21f3   :  { %v4691_v16 = vadd.f32 %v4683_v18, %v9026_v32  ;;  %v4666_v34 = vmul.f32 %v4635_v22, %v4635_v22  ;;  %v8024_v17 = vpop.eup %8023  ;;  %8027 = vtanh.f32 %v4692_v47 }
0x21f4   :  { %v4672_v28 = vmul.f32 %v4664_v23, %v9037_v4  ;;  %v4697_v3 = vmul.f32 0.7978846, %v4689_v21  ;;  %v8026_v54 = vpop.eup %8025  ;;  %v4709_v48 = vadd.f32 1.0, %v8024_v17  ;;  %8029 = vtanh.f32 %v4694_v25 }
0x21f5   :  { %v4674_v10 = vmul.f32 %v4666_v34, %v4635_v22  ;;  %v4699_v38 = vmul.f32 0.7978846, %v4691_v16  ;;  %v4711_v26 = vadd.f32 1.0, %v8026_v54 }
0x21f6   :  { %v4680_v0 = vmul.f32 0.044715, %v4672_v28  ;;  %8031 = vtanh.f32 %v4697_v3  ;;  %v4717_v41 = vmul.f32 0.5, %v4709_v48 }
0x21f7   :  { %v4682_v36 = vmul.f32 0.044715, %v4674_v10  ;;  %8033 = vtanh.f32 %v4699_v38  ;;  %v4719_v37 = vmul.f32 0.5, %v4711_v26  ;;  %v4955_v26 = vld [vmem:[#allocation7 + $0xaa8] sm:$0xff] }
0x21f8   :  { %v4688_v39 = vadd.f32 %v4680_v0, %v9037_v4  ;;  %v4725_v43 = vmul.f32 %v4717_v41, %v9002_v31  ;;  %v4954_v0 = vld [vmem:[#allocation7 + $0xaa0] sm:$0xff]  ;;  %4958 = vmatpush.msra.mxu3 %v4955_v26 }
0x21f9   :  { %v4690_v46 = vadd.f32 %v4682_v36, %v4635_v22  ;;  %v8028_v27 = vpop.eup %8027  ;;  %v4727_v49 = vmul.f32 %v4719_v37, %v9004_v12 }
0x21fa   :  { %v4696_v35 = vmul.f32 0.7978846, %v4688_v39  ;;  %v8030_v9 = vpop.eup %8029  ;;  %v4708_v1 = vadd.f32 1.0, %v8028_v27  ;;  %4837 = vmatmul.f32.vlgmr.msra.gmra.mxu0 %v4725_v43  ;;  %4959 = vmatpush.msra.mxu3 %v4954_v0 }
0x21fb   :  { %v4698_v58 = vmul.f32 0.7978846, %v4690_v46  ;;  %v4710_v63 = vadd.f32 1.0, %v8030_v9  ;;  %4883 = vmatmul.f32.vlgmr.msra.gmra.mxu1 %v4727_v49  ;;  %v4952_v49 = vld [vmem:[#allocation7 + $0xa90] sm:$0xff]  ;;  %v4950_v9 = vld [vmem:[#allocation7 + $0xa80] sm:$0xff] }
0x21fc   :  { %v8032_v62 = vpop.eup %8031  ;;  %8035 = vtanh.f32 %v4696_v35  ;;  %v4716_v7 = vmul.f32 0.5, %v4708_v1  ;;  %v4951_v35 = vld [vmem:[#allocation7 + $0xa88] sm:$0xff]  ;;  %v4949_v1 = vld [vmem:[#allocation7 + $0xa78] sm:$0xff] }
0x21fd   :  { %v8034_v5 = vpop.eup %8033  ;;  %v4713_v61 = vadd.f32 1.0, %v8032_v62  ;;  %8037 = vtanh.f32 %v4698_v58  ;;  %v4718_v14 = vmul.f32 0.5, %v4710_v63  ;;  %v4948_v58 = vld [vmem:[#allocation7 + $0xa70] sm:$0xff]  ;;  %v4947_v62 = vld [vmem:[#allocation7 + $0xa68] sm:$0xff]  ;;  %v4946_v63 = vld [vmem:[#allocation7 + $0xa60] sm:$0xff] }
0x21fe   :  { %v4715_v30 = vadd.f32 1.0, %v8034_v5  ;;  %v4724_v31 = vmul.f32 %v4716_v7, %v9014_v20  ;;  %v4945_v5 = vld [vmem:[#allocation7 + $0xa58] sm:$0xff]  ;;  %v4944_v7 = vld [vmem:[#allocation7 + $0xa50] sm:$0xff] }
0x21ff   :  { %v4721_v13 = vmul.f32 0.5, %v4713_v61  ;;  %v4726_v12 = vmul.f32 %v4718_v14, %v9016_v60  ;;  %v7802_v60 = vld [vmem:[#allocation7 + $0xa18] ss:$0 sm:$0xff]  ;;  %v4943_v61 = vld [vmem:[#allocation7 + $0xa48] sm:$0xff]  ;;  %v4942_v14 = vld [vmem:[#allocation7 + $0xa40] sm:$0xff] }
0x2200   :  { %v4723_v15 = vmul.f32 0.5, %v4715_v30  ;;  %4814 = vmatmul.f32.vlgmr.msrb.gmra.mxu3 %v4724_v31  ;;  %v4941_v30 = vld [vmem:[#allocation7 + $0xa38] sm:$0xff]  ;;  %v4940_v31 = vld [vmem:[#allocation7 + $0xa30] sm:$0xff] }
0x2201   :  { %v4729_v2 = vmul.f32 %v4721_v13, %v9021_v50  ;;  %4860 = vmatmul.f32.vlgmr.msra.gmra.mxu2 %v4726_v12 }
0x2202   :  { %v8036_v19 = vpop.eup %8035  ;;  %v4731_v11 = vmul.f32 %v4723_v15, %v9026_v32 }
0x2203   :  { %v8038_v56 = vpop.eup %8037  ;;  %4840 = vmatmul.f32.gmra.mxu0 %v4729_v2  ;;  %v4712_v42 = vadd.f32 1.0, %v8036_v19 }
0x2204   :  { %4886 = vmatmul.f32.gmra.mxu1 %v4731_v11  ;;  %v4714_v8 = vadd.f32 1.0, %v8038_v56 }
0x2205   :  { %v4720_v55 = vmul.f32 0.5, %v4712_v42 }
0x2206   :  { %v4722_v40 = vmul.f32 0.5, %v4714_v8 }
0x2207   :  { %v4728_v20 = vmul.f32 %v4720_v55, %v9037_v4 }
0x2208   :  { %v4730_v44 = vmul.f32 %v4722_v40, %v4635_v22 }
0x2209   :  { %4817 = vmatmul.f32.gmra.mxu3 %v4728_v20 }
0x220a   :  { %4863 = vmatmul.f32.gmra.mxu2 %v4730_v44 }
0x2277   :  { %v4838_v50 = vpop.f32.mrf.mxu0 }
0x2278   :  { %v4884_v32 = vpop.f32.mrf.mxu1 }
0x2280   :  { %v4841_v3 = vpop.f32.mrf.mxu0 }
0x2281   :  { %v4887_v48 = vpop.f32.mrf.mxu1 }
0x2283   :  { %v4815_v18 = vpop.f32.mrf.mxu3 }
0x2284   :  { %v4816_v47 = vadd.f32 %v7802_v60, %v4815_v18  ;;  %v4861_v23 = vpop.f32.mrf.mxu2  ;;  %v7803_v18 = vld [vmem:[#allocation7 + $0xa20] ss:$0 sm:$0xff] }
0x2286   :  { %v4839_v21 = vadd.f32 %v4838_v50, %v4816_v47 }
0x2288   :  { %v4862_v25 = vadd.f32 %v4861_v23, %v4839_v21  ;;  %v7804_v23 = vld [vmem:[#allocation7 + $0xa28] ss:$0 sm:$0xff] }
0x228a   :  { %v4885_v16 = vadd.f32 %v4884_v32, %v4862_v25 }
0x228c   :  { %v4818_v34 = vpop.f32.mrf.mxu3  ;;  %v4890_v28 = vadd.f32 %v4885_v16, %v8975_v24 }
0x228d   :  { %v4819_v17 = vadd.f32 %v7802_v60, %v4818_v34  ;;  %v4864_v4 = vpop.f32.mrf.mxu2 }
0x228e   :  { %4892 = vadd.xlane.f32.xlu0 %v4890_v28 }
0x228f   :  { %v4842_v54 = vadd.f32 %v4841_v3, %v4819_v17 }
0x2291   :  { %v4865_v22 = vadd.f32 %v4864_v4, %v4842_v54  ;;  %v7805_v4 = vld [vmem:[#allocation7 + $0xab0] ss:$0 sm:$0xff] }
0x2293   :  { %v4888_v10 = vadd.f32 %v4887_v48, %v4865_v22 }
0x2295   :  { %v4891_v38 = vadd.f32 %v4888_v10, %v8979_v59  ;;  %v4953_v59 = vld [vmem:[#allocation7 + $0xa98] sm:$0xff] }
0x2296   :  { %4960 = vmatpush.msra.mxu3 %v4953_v59 }
0x2297   :  { %4894 = vadd.xlane.f32.xlu1 %v4891_v38 }
0x2298   :  { %4961 = vmatpush.msra.mxu3 %v4952_v49 }
0x229a   :  { %4962 = vmatpush.msra.mxu3 %v4951_v35  ;;  %v5049_v35 = vld [vmem:[#allocation8 + $0xba0] sm:$0xff] }
0x229b   :  { %5072 = vmatpush.msrb.mxu0 %v5049_v35 }
0x229c   :  { %4963 = vmatpush.msra.mxu3 %v4950_v9  ;;  %v5050_v9 = vld [vmem:[#allocation8 + $0xba8] sm:$0xff] }
0x229d   :  { %5095 = vmatpush.msrb.mxu2 %v5050_v9 }
0x229e   :  { %4964 = vmatpush.msra.mxu3 %v4949_v1  ;;  %v5047_v1 = vld [vmem:[#allocation8 + $0xb80] sm:$0xff] }
0x229f   :  { %5073 = vmatpush.msrb.mxu0 %v5047_v1 }
0x22a0   :  { %4965 = vmatpush.msra.mxu3 %v4948_v58  ;;  %v5048_v58 = vld [vmem:[#allocation8 + $0xb88] sm:$0xff] }
0x22a1   :  { %5096 = vmatpush.msrb.mxu2 %v5048_v58 }
0x22a2   :  { %4966 = vmatpush.msra.mxu3 %v4947_v62  ;;  %v5045_v62 = vld [vmem:[#allocation8 + $0xb60] sm:$0xff] }
0x22a3   :  { %5074 = vmatpush.msrb.mxu0 %v5045_v62 }
0x22a4   :  { %4967 = vmatpush.msra.mxu3 %v4946_v63  ;;  %v5046_v63 = vld [vmem:[#allocation8 + $0xb68] sm:$0xff] }
0x22a5   :  { %5097 = vmatpush.msrb.mxu2 %v5046_v63 }
0x22a6   :  { %4968 = vmatpush.msra.mxu3 %v4945_v5  ;;  %v5043_v5 = vld [vmem:[#allocation8 + $0xb40] sm:$0xff] }
0x22a7   :  { %5075 = vmatpush.msrb.mxu0 %v5043_v5 }
0x22a8   :  { %4969 = vmatpush.msra.mxu3 %v4944_v7  ;;  %v5044_v7 = vld [vmem:[#allocation8 + $0xb48] sm:$0xff] }
0x22a9   :  { %5098 = vmatpush.msrb.mxu2 %v5044_v7 }
0x22aa   :  { %4970 = vmatpush.msra.mxu3 %v4943_v61  ;;  %v5041_v61 = vld [vmem:[#allocation8 + $0xb20] sm:$0xff] }
0x22ab   :  { %5076 = vmatpush.msrb.mxu0 %v5041_v61 }
0x22ac   :  { %4971 = vmatpush.msra.mxu3 %v4942_v14  ;;  %v5042_v14 = vld [vmem:[#allocation8 + $0xb28] sm:$0xff] }
0x22ad   :  { %5099 = vmatpush.msrb.mxu2 %v5042_v14 }
0x22ae   :  { %4972 = vmatpush.msra.mxu3 %v4941_v30  ;;  %v5039_v30 = vld [vmem:[#allocation8 + $0xb00] sm:$0xff] }
0x22af   :  { %5077 = vmatpush.msrb.mxu0 %v5039_v30 }
0x22b0   :  { %4973 = vmatpush.msra.mxu3 %v4940_v31  ;;  %v5040_v31 = vld [vmem:[#allocation8 + $0xb08] sm:$0xff] }
0x22b1   :  { %5100 = vmatpush.msrb.mxu2 %v5040_v31 }
0x2301   :  { %v4893_v41 = vpop.xlane.xlu0 %4892 }
0x2302   :  { %v4896_v36 = vmul.f32 %v4893_v41, %v8648_v51 }
0x2304   :  { %v4898_v37 = vsub.f32 %v4890_v28, %v4896_v36 }
0x2306   :  { %v4900_v39 = vmul.f32 %v4898_v37, %v4898_v37 }
0x2308   :  { %4902 = vadd.xlane.f32.xlu2 %v4900_v39 }
0x230a   :  { %v4895_v24 = vpop.xlane.xlu1 %4894 }
0x230b   :  { %v4897_v43 = vmul.f32 %v4895_v24, %v8648_v51 }
0x230d   :  { %v9057_v46 = vsub.f32 %v4891_v38, %v4897_v43 }
0x230f   :  { %v4901_v27 = vmul.f32 %v9057_v46, %v9057_v46 }
0x2311   :  { %4904 = vadd.xlane.f32.xlu0 %v4901_v27 }
0x237b   :  { %v4903_v13 = vpop.xlane.xlu2 %4902 }
0x237c   :  { %v4906_v12 = vmul.f32 %v4903_v13, %v8648_v51  ;;  %v5037_v13 = vld [vmem:[#allocation8 + $0xae0] sm:$0xff] }
0x237d   :  { %5078 = vmatpush.msrb.mxu0 %v5037_v13 }
0x237e   :  { %v4908_v15 = vadd.f32 1e-05, %v4906_v12  ;;  %v5038_v12 = vld [vmem:[#allocation8 + $0xae8] sm:$0xff] }
0x237f   :  { %5101 = vmatpush.msrb.mxu2 %v5038_v12 }
0x2380   :  { %8039 = vrsqrt.f32 %v4908_v15  ;;  %vm4916_vm3 = vweird.f32 %v4908_v15 }
0x2384   :  { %v4905_v2 = vpop.xlane.xlu0 %4904 }
0x2385   :  { %v4907_v19 = vmul.f32 %v4905_v2, %v8648_v51  ;;  %v5036_v2 = vld [vmem:[#allocation8 + $0xac8] sm:$0xff] }
0x2386   :  { %v8040_v11 = vpop.eup %8039  ;;  %5102 = vmatpush.msrb.mxu2 %v5036_v2 }
0x2387   :  { %v4909_v56 = vadd.f32 1e-05, %v4907_v19  ;;  %v4911_v42 = vmul.f32 %v8040_v11, %v4908_v15  ;;  %vm4917_vm2 = vweird.f32 %v8040_v11  ;;  %v5035_v15 = vld [vmem:[#allocation8 + $0xac0] sm:$0xff] }
0x2388   :  { %vm4918_vm5 = vmor %vm4916_vm3, %vm4917_vm2  ;;  %5079 = vmatpush.msrb.mxu0 %v5035_v15 }
0x2389   :  { %8041 = vrsqrt.f32 %v4909_v56  ;;  %v4912_v8 = vmul.f32 %v8040_v11, %v4911_v42  ;;  %vm4926_vm10 = vweird.f32 %v4909_v56 }
0x238b   :  { %v4913_v55 = vmul.f32 0.5, %v4912_v8 }
0x238d   :  { %v4914_v40 = vsub.f32 1.5, %v4913_v55 }
0x238f   :  { %v8042_v20 = vpop.eup %8041  ;;  %v4915_v44 = vmul.f32 %v8040_v11, %v4914_v40 }
0x2390   :  { %v4921_v60 = vmul.f32 %v8042_v20, %v4909_v56  ;;  %vm4927_vm6 = vweird.f32 %v8042_v20 }
0x2391   :  { %v4919_v47 = vsel %vm4918_vm5, %v8040_v11, %v4915_v44  ;;  %vm4928_vm11 = vmor %vm4926_vm10, %vm4927_vm6 }
0x2392   :  { %v4922_v50 = vmul.f32 %v8042_v20, %v4921_v60  ;;  %v4930_v21 = vmul.f32 %v4919_v47, %v4898_v37 }
0x2394   :  { %v4923_v25 = vmul.f32 0.5, %v4922_v50  ;;  %v4934_v51 = vmul.f32 %v7803_v18, %v4930_v21 }
0x2396   :  { %v4924_v32 = vsub.f32 1.5, %v4923_v25  ;;  %v4938_v16 = vadd.f32 %v7804_v23, %v4934_v51 }
0x2398   :  { %v4925_v34 = vmul.f32 %v8042_v20, %v4924_v32  ;;  %4974 = vmatmul.f32.vlgmr.msra.gmra.mxu3 %v4938_v16  ;;  %v7807_v32 = vld [vmem:[#allocation7 + $0xac0] ss:$0 sm:$0xff] }
0x239a   :  { %v4929_v17 = vsel %vm4928_vm11, %v8042_v20, %v4925_v34 }
0x239b   :  { %v4931_v28 = vmul.f32 %v4929_v17, %v9057_v46 }
0x239d   :  { %v4935_v3 = vmul.f32 %v7803_v18, %v4931_v28 }
0x239f   :  { %v4939_v54 = vadd.f32 %v7804_v23, %v4935_v3  ;;  %v7806_v23 = vld [vmem:[#allocation7 + $0xab8] ss:$0 sm:$0xff] }
0x23a1   :  { %4977 = vmatmul.f32.gmra.mxu3 %v4939_v54 }
0x241b   :  { %v4975_v22 = vpop.f32.mrf.mxu3 }
0x241c   :  { %v4976_v48 = vadd.f32 %v7805_v4, %v4975_v22 }
0x241e   :  { %v9065_v10 = vadd.f32 %v4976_v48, %v8623_v6 }
0x2420   :  { %v4983_v38 = vsel %vm1314_vm9, %v9065_v10, 0.0 }
0x2421   :  { %4984 = vadd.xlane.f32.xlu1 %v4983_v38 }
0x2424   :  { %v4978_v26 = vpop.f32.mrf.mxu3 }
0x2425   :  { %v4979_v0 = vadd.f32 %v7805_v4, %v4978_v26  ;;  %v5052_v26 = vld [vmem:[#allocation8 + $0xbc0] ss:$8 sm:$0x3] }
0x2427   :  { %v9070_v41 = vadd.f32 %v4979_v0, %v8628_v45  ;;  %v5054_v0 = vperm.slane %v5052_v26, 0 }
0x2429   :  { %v4986_v36 = vsel %vm1314_vm9, %v9070_v41, 0.0 }
0x242a   :  { %4987 = vadd.xlane.f32.xlu2 %v4986_v36 }
0x2494   :  { %v4985_v37 = vpop.xlane.xlu1 %4984 }
0x2495   :  { %v4989_v39 = vmul.f32 %v4985_v37, %v8528_v52 }
0x2497   :  { %v9076_v24 = vsub.f32 %v9065_v10, %v4989_v39  ;;  %v5055_v39 = vperm.slane %v5052_v26, 1 }
0x2499   :  { %v4993_v6 = vmul.f32 %v9076_v24, %v9076_v24 }
0x249b   :  { %v4995_v43 = vsel %vm1314_vm9, %v4993_v6, 0.0 }
0x249c   :  { %4996 = vadd.xlane.f32.xlu0 %v4995_v43 }
0x249d   :  { %v4988_v46 = vpop.xlane.xlu2 %4987 }
0x249e   :  { %v4990_v45 = vmul.f32 %v4988_v46, %v8528_v52 }
0x24a0   :  { %v9083_v27 = vsub.f32 %v9070_v41, %v4990_v45 }
0x24a2   :  { %v4994_v59 = vmul.f32 %v9083_v27, %v9083_v27 }
0x24a4   :  { %v4998_v49 = vsel %vm1314_vm9, %v4994_v59, 0.0 }
0x24a5   :  { %4999 = vadd.xlane.f32.xlu1 %v4998_v49 }
0x250f   :  { %v4997_v19 = vpop.xlane.xlu0 %4996 }
0x2510   :  { %v5001_v11 = vmul.f32 %v4997_v19, %v8528_v52 }
0x2512   :  { %v5003_v56 = vadd.f32 1e-05, %v5001_v11 }
0x2514   :  { %8043 = vrsqrt.f32 %v5003_v56  ;;  %vm5011_vm13 = vweird.f32 %v5003_v56 }
0x2518   :  { %v5000_v42 = vpop.xlane.xlu1 %4999 }
0x2519   :  { %v5002_v8 = vmul.f32 %v5000_v42, %v8528_v52 }
0x251a   :  { %v8044_v55 = vpop.eup %8043 }
0x251b   :  { %v5004_v40 = vadd.f32 1e-05, %v5002_v8  ;;  %v5006_v20 = vmul.f32 %v8044_v55, %v5003_v56  ;;  %vm5012_vm12 = vweird.f32 %v8044_v55 }
0x251c   :  { %vm5013_vm14 = vmor %vm5011_vm13, %vm5012_vm12 }
0x251d   :  { %8045 = vrsqrt.f32 %v5004_v40  ;;  %v5007_v44 = vmul.f32 %v8044_v55, %v5006_v20  ;;  %vm5021_vm1 = vweird.f32 %v5004_v40 }
0x251f   :  { %v5008_v60 = vmul.f32 0.5, %v5007_v44 }
0x2521   :  { %v5009_v18 = vsub.f32 1.5, %v5008_v60 }
0x2523   :  { %v8046_v47 = vpop.eup %8045  ;;  %v5010_v50 = vmul.f32 %v8044_v55, %v5009_v18 }
0x2524   :  { %v5016_v21 = vmul.f32 %v8046_v47, %v5004_v40  ;;  %vm5022_vm15 = vweird.f32 %v8046_v47 }
0x2525   :  { %v5014_v25 = vsel %vm5013_vm14, %v8044_v55, %v5010_v50  ;;  %vm5023_vm0 = vmor %vm5021_vm1, %vm5022_vm15 }
0x2526   :  { %v5017_v51 = vmul.f32 %v8046_v47, %v5016_v21  ;;  %v5025_v16 = vmul.f32 %v5014_v25, %v9076_v24 }
0x2528   :  { %v5018_v34 = vmul.f32 0.5, %v5017_v51  ;;  %v5029_v17 = vmul.f32 %v7806_v23, %v5025_v16 }
0x252a   :  { %v5019_v28 = vsub.f32 1.5, %v5018_v34  ;;  %v5033_v3 = vadd.f32 %v7807_v32, %v5029_v17 }
0x252c   :  { %v5020_v54 = vmul.f32 %v8046_v47, %v5019_v28  ;;  %7639 = vmatmul.msk.f32.vlgmr.msrb.gmra.mxu0 %vm1314_vm9, %v5033_v3  ;;  %7641 = vmatmul.msk.f32.vlgmr.msrb.gmra.mxu2 %vm1314_vm9, %v5033_v3 }
0x252e   :  { %v5024_v4 = vsel %vm5023_vm0, %v8046_v47, %v5020_v54 }
0x252f   :  { %v5026_v22 = vmul.f32 %v5024_v4, %v9083_v27 }
0x2531   :  { %v5030_v48 = vmul.f32 %v7806_v23, %v5026_v22  ;;  %v5474_v22 = vld [vmem:[#allocation7 + $0xb38] sm:$0xff] }
0x2533   :  { %v5034_v38 = vadd.f32 %v7807_v32, %v5030_v48  ;;  %v5473_v48 = vld [vmem:[#allocation7 + $0xb30] sm:$0xff] }
0x2535   :  { %7640 = vmatmul.msk.f32.gmra.mxu0 %vm1314_vm9, %v5034_v38  ;;  %7642 = vmatmul.msk.f32.gmra.mxu2 %vm1314_vm9, %v5034_v38 }
0x25a9   :  { %v5081_v36 = vpop.f32.mrf.mxu0 }
0x25aa   :  { %v5082_v37 = vadd.f32 %v5081_v36, %v5054_v0  ;;  %v5472_v36 = vld [vmem:[#allocation7 + $0xb28] sm:$0xff] }
0x25ac   :  { %5124 = vrot.lane.b32.xlu1 %v5082_v37, %s8296_s17  ;;  %5112 = vrot.lane.b32.xlu2 %v5082_v37, %s8295_s16 }
0x25af   :  { %v5104_v24 = vpop.f32.mrf.mxu2 }
0x25b0   :  { %v5105_v6 = vadd.f32 %v5104_v24, %v5055_v39  ;;  %v5471_v24 = vld [vmem:[#allocation7 + $0xb20] sm:$0xff] }
0x25b2   :  { %v5084_v43 = vpop.f32.mrf.mxu0 }
0x25b3   :  { %v5085_v46 = vadd.f32 %v5084_v43, %v5054_v0 }
0x25b5   :  { %5114 = vrot.lane.b32.xlu0 %v5085_v46, %s8295_s16  ;;  %5150 = vrot.lane.b32.xlu1 %v5085_v46, %s8296_s17 }
0x25b8   :  { %v5107_v45 = vpop.f32.mrf.mxu2 }
0x25b9   :  { %v5108_v27 = vadd.f32 %v5107_v45, %v5055_v39 }
0x25bb   :  { %5369 = vmatpush.msrb.mxu3 %v5108_v27  ;;  %v7753_v19 = vpack.i.bf16 %v5108_v27, %v5105_v6 }
0x25bd   :  { %5489 = vmatpush.msra.mxu3 %v5474_v22  ;;  %v5434_v22 = vld [vmem:[#allocation7 + $0xaf8] sm:$0xff] }
0x25bf   :  { %5490 = vmatpush.msra.mxu3 %v5473_v48  ;;  %v5433_v48 = vld [vmem:[#allocation7 + $0xaf0] sm:$0xff] }
0x25c1   :  { %5491 = vmatpush.msra.mxu3 %v5472_v36 }
0x25c3   :  { %5492 = vmatpush.msra.mxu3 %v5471_v24 }
0x2606   :  { %v5113_v59 = vpop.permute.xlu2 %5112 }
0x2607   :  { %5176 = vrot.lane.b32.xlu0 %v5113_v59, %s8296_s17 }
0x261e   :  { %v5125_v49 = vpop.permute.xlu1 %5124 }
0x261f   :  { %7643 = vmatpush.xpose.msk.msra.mxu0 %vm477_vm7, %v5125_v49 }
0x2622   :  { %7644 = vmatmul.msk.f32.vlgmr.msra.gmra.mxu0 %vm477_vm7, %v5082_v37 }
0x2627   :  { %v5115_v35 = vpop.permute.xlu0 %5114  ;;  %v5151_v9 = vpop.permute.xlu1 %5150 }
0x2628   :  { %7645 = vmatpush.xpose.msk.msra.mxu2 %vm477_vm7, %v5151_v9  ;;  %5202 = vrot.lane.b32.xlu2 %v5115_v35, %s8296_s17 }
0x262b   :  { %7646 = vmatmul.msk.f32.vlgmr.msra.gmra.mxu2 %vm477_vm7, %v5085_v46 }
0x262c   :  { %5346 = vmatpush.msrb.mxu2 %v5105_v6 }
0x2679   :  { %v5177_v1 = vpop.permute.xlu0 %5176 }
0x267a   :  { %7647 = vmatpush.xpose.msk.msrb.mxu0 %vm477_vm7, %v5177_v1 }
0x267d   :  { %7648 = vmatmul.msk.f32.vlgmr.msrb.gmra.mxu0 %vm477_vm7, %v5113_v59 }
0x2682   :  { %v5203_v58 = vpop.permute.xlu2 %5202 }
0x2683   :  { %7649 = vmatpush.xpose.msk.msrb.mxu1 %vm477_vm7, %v5203_v58 }
0x2686   :  { %7650 = vmatmul.msk.f32.vlgmr.msrb.gmra.mxu1 %vm477_vm7, %v5115_v35 }
0x269f   :  { %v5147_v62 = vpop.f32.mrf.mxu0 }
0x26a0   :  { %v5228_v63 = vmul.f32 0.17677669, %v5147_v62 }
0x26a2   :  { %v5232_v5 = vsel %vm794_vm4, %v5228_v63, -inf }
0x26a3   :  { %5233 = vmax.xlane.f32.xlu1 %v5232_v5 }
0x26ae   :  { %v5173_v30 = vpop.f32.mrf.mxu2 }
0x26af   :  { %v5229_v31 = vmul.f32 0.17677669, %v5173_v30 }
0x26b1   :  { %v5235_v15 = vsel %vm794_vm4, %v5229_v31, -inf }
0x26fa   :  { %v5199_v7 = vpop.f32.mrf.mxu0 }
0x26fb   :  { %v5230_v61 = vmul.f32 0.17677669, %v5199_v7 }
0x26fd   :  { %v5238_v14 = vsel %vm794_vm4, %v5230_v61, -inf }
0x26fe   :  { %5239 = vmax.xlane.f32.xlu0 %v5238_v14 }
0x2703   :  { %v5225_v13 = vpop.f32.mrf.mxu1 }
0x2704   :  { %v5231_v12 = vmul.f32 0.17677669, %v5225_v13 }
0x2706   :  { %v5241_v2 = vsel %vm794_vm4, %v5231_v12, -inf  ;;  %5236 = vmax.xlane.f32.xlu0 %v5235_v15 }
0x2707   :  { %5242 = vmax.xlane.f32.xlu2 %v5241_v2 }
0x2716   :  { %v5234_v11 = vpop.xlane.xlu1 %5233 }
0x2717   :  { %v5244_v8 = vsub.f32 %v5228_v63, %v5234_v11 }
0x2719   :  { %v5248_v40 = vmul.f32 1.442695, %v5244_v8 }
0x271a   :  { %7754 = vrot.lane.b32.xlu0 %v7753_v19, %s8295_s16 }
0x2771   :  { %v5240_v56 = vpop.xlane.xlu0 %5239 }
0x2772   :  { %v5246_v42 = vsub.f32 %v5230_v61, %v5240_v56 }
0x2774   :  { %v5252_v55 = vmul.f32 1.442695, %v5246_v42 }
0x2776   :  { %8047 = vpow2.f32 %v5252_v55 }
0x2777   :  { %8049 = vpow2.f32 %v5248_v40 }
0x2779   :  { %v5237_v60 = vpop.xlane.xlu0 %5236 }
0x277a   :  { %v5243_v20 = vpop.xlane.xlu2 %5242  ;;  %v5245_v21 = vsub.f32 %v5229_v31, %v5237_v60 }
0x277b   :  { %v5247_v44 = vsub.f32 %v5231_v12, %v5243_v20 }
0x277c   :  { %v8048_v18 = vpop.eup %8047  ;;  %v5250_v25 = vmul.f32 1.442695, %v5245_v21 }
0x277d   :  { %v5254_v47 = vmul.f32 1.442695, %v5247_v44  ;;  %v5262_v50 = vsel %vm794_vm4, %v8048_v18, 0.0  ;;  %v9116_v23 = vpop.eup %8049 }
0x277e   :  { %5263 = vadd.xlane.f32.xlu2 %v5262_v50  ;;  %v5256_v32 = vsel %vm794_vm4, %v9116_v23, 0.0 }
0x277f   :  { %8051 = vpow2.f32 %v5254_v47 }
0x2780   :  { %8053 = vpow2.f32 %v5250_v25 }
0x2785   :  { %v9118_v51 = vpop.eup %8051 }
0x2786   :  { %5257 = vadd.xlane.f32.xlu2 %v5256_v32  ;;  %v5265_v16 = vsel %vm794_vm4, %v9118_v51, 0.0  ;;  %v9124_v34 = vpop.eup %8053 }
0x2787   :  { %5266 = vadd.xlane.f32.xlu1 %v5265_v16  ;;  %v5259_v54 = vsel %vm794_vm4, %v9124_v34, 0.0 }
0x278c   :  { %v7755_v17 = vpop.permute.xlu0 %7754 }
0x278d   :  { %v7757_v28 = vunpack.i.h.bf16 %v7755_v17  ;;  %v7756_v3 = vunpack.i.l.bf16 %v7755_v17 }
0x278f   :  { %5392 = vmatpush.msra.mxu0 %v7756_v3  ;;  %5415 = vmatpush.msra.mxu1 %v7757_v28  ;;  %v5437_v28 = vld [vmem:[#allocation7 + $0xb10] sm:$0xff]  ;;  %v5436_v3 = vld [vmem:[#allocation7 + $0xb08] sm:$0xff] }
0x2790   :  { %5260 = vadd.xlane.f32.xlu1 %v5259_v54  ;;  %5454 = vmatpush.msra.mxu2 %v5437_v28  ;;  %v5435_v54 = vld [vmem:[#allocation7 + $0xb00] sm:$0xff] }
0x2792   :  { %5455 = vmatpush.msra.mxu2 %v5436_v3 }
0x2794   :  { %5456 = vmatpush.msra.mxu2 %v5435_v54 }
0x2796   :  { %5457 = vmatpush.msra.mxu2 %v5434_v22 }
0x2798   :  { %5458 = vmatpush.msra.mxu2 %v5433_v48 }
0x27f1   :  { %v5264_v4 = vpop.xlane.xlu2 %5263 }
0x27f2   :  { %8055 = vrcp.f32 %v5264_v4  ;;  %v5309_v6 = vand.u32 2147483648, %v5264_v4  ;;  %v5307_v46 = vand.u32 2147483647, %v5264_v4  ;;  %vm5303_vm3 = vweird.f32 %v5264_v4 }
0x27f4   :  { %v5310_v59 = vor.u32 1.1754944e-38, %v5309_v6  ;;  %vm5308_vm6 = vcmp.eq.f32.partialorder %v5307_v46, 8.507059e+37 }
0x27f8   :  { %v8056_v38 = vpop.eup %8055 }
0x27f9   :  { %v5299_v26 = vmul.f32 %v8056_v38, %v5264_v4  ;;  %v5258_v0 = vpop.xlane.xlu2 %5257  ;;  %vm5304_vm2 = vweird.f32 %v8056_v38 }
0x27fa   :  { %8057 = vrcp.f32 %v5258_v0  ;;  %v5267_v37 = vpop.xlane.xlu1 %5266  ;;  %vm5305_vm5 = vmor %vm5303_vm3, %vm5304_vm2  ;;  %v5279_v7 = vand.u32 2147483648, %v5258_v0  ;;  %v5277_v30 = vand.u32 2147483647, %v5258_v0  ;;  %vm5273_vm12 = vweird.f32 %v5258_v0 }
0x27fb   :  { %v5300_v39 = vsub.f32 1.0, %v5299_v26  ;;  %8059 = vrcp.f32 %v5267_v37  ;;  %v5324_v31 = vand.u32 2147483648, %v5267_v37  ;;  %v5322_v12 = vand.u32 2147483647, %v5267_v37  ;;  %v5430_v26 = vld [vmem:[#allocation7 + $0xad8] sm:$0xff] }
0x27fc   :  { %v5280_v2 = vor.u32 1.1754944e-38, %v5279_v7  ;;  %vm5318_vm14 = vweird.f32 %v5267_v37  ;;  %vm5278_vm15 = vcmp.eq.f32.partialorder %v5277_v30, 8.507059e+37 }
0x27fd   :  { %v5301_v43 = vmul.f32 %v8056_v38, %v5300_v39  ;;  %v5325_v56 = vor.u32 1.1754944e-38, %v5324_v31  ;;  %vm5323_vm0 = vcmp.eq.f32.partialorder %v5322_v12, 8.507059e+37 }
0x27ff   :  { %v5302_v45 = vadd.f32 %v8056_v38, %v5301_v43  ;;  %v7808_v43 = vld [vmem:[#allocation7 + $0xb40] ss:$0 sm:$0xff] }
0x2800   :  { %v8058_v27 = vpop.eup %8057 }
0x2801   :  { %v8060_v49 = vpop.eup %8059  ;;  %v5306_v35 = vsel %vm5305_vm5, %v8056_v38, %v5302_v45  ;;  %v5269_v9 = vmul.f32 %v8058_v27, %v5258_v0  ;;  %vm5274_vm10 = vweird.f32 %v8058_v27  ;;  %v5431_v38 = vld [vmem:[#allocation7 + $0xae0] sm:$0xff]  ;;  %v7809_v45 = vld [vmem:[#allocation7 + $0xb18] ss:$0 sm:$0xff] }
0x2802   :  { %v5311_v1 = vsel %vm5308_vm6, %v5310_v59, %v5306_v35  ;;  %v5314_v58 = vmul.f32 %v8060_v49, %v5267_v37  ;;  %vm5319_vm11 = vweird.f32 %v8060_v49  ;;  %vm5275_vm13 = vmor %vm5273_vm12, %vm5274_vm10 }
0x2803   :  { %v5312_v62 = vmul.f32 %v8048_v18, %v5311_v1  ;;  %v5270_v63 = vsub.f32 1.0, %v5269_v9  ;;  %v5261_v5 = vpop.xlane.xlu1 %5260  ;;  %vm5320_vm1 = vmor %vm5318_vm14, %vm5319_vm11 }
0x2804   :  { %v5315_v61 = vsub.f32 1.0, %v5314_v58  ;;  %8061 = vrcp.f32 %v5261_v5  ;;  %v5294_v47 = vand.u32 2147483648, %v5261_v5  ;;  %v5292_v21 = vand.u32 2147483647, %v5261_v5 }
0x2805   :  { %v5271_v14 = vmul.f32 %v8058_v27, %v5270_v63  ;;  %7653 = vmatmul.msk.f32.vlgmr.msra.gmra.mxu0 %vm794_vm4, %v5312_v62  ;;  %vm5288_vm3 = vweird.f32 %v5261_v5 }
0x2806   :  { %v5316_v13 = vmul.f32 %v8060_v49, %v5315_v61  ;;  %v5295_v32 = vor.u32 1.1754944e-38, %v5294_v47  ;;  %vm5293_vm6 = vcmp.eq.f32.partialorder %v5292_v21, 8.507059e+37  ;;  %v5563_v47 = vld [vmem:[#allocation8 + $0xc40] sm:$0xff] }
0x2807   :  { %v5272_v15 = vadd.f32 %v8058_v27, %v5271_v14  ;;  %v5561_v21 = vld [vmem:[#allocation8 + $0xc20] sm:$0xff] }
0x2808   :  { %v5317_v19 = vadd.f32 %v8060_v49, %v5316_v13 }
0x2809   :  { %v5276_v11 = vsel %vm5275_vm13, %v8058_v27, %v5272_v15 }
0x280a   :  { %v8062_v42 = vpop.eup %8061  ;;  %v5281_v8 = vsel %vm5278_vm15, %v5280_v2, %v5276_v11  ;;  %v5321_v55 = vsel %vm5320_vm1, %v8060_v49, %v5317_v19 }
0x280b   :  { %v5282_v40 = vmul.f32 %v9116_v23, %v5281_v8  ;;  %v5326_v20 = vsel %vm5323_vm0, %v5325_v56, %v5321_v55  ;;  %v5284_v44 = vmul.f32 %v8062_v42, %v5261_v5  ;;  %vm5289_vm2 = vweird.f32 %v8062_v42  ;;  %v5572_v8 = vld [vmem:[#allocation8 + $0xcc8] sm:$0xff]  ;;  %v5569_v55 = vld [vmem:[#allocation8 + $0xca0] sm:$0xff] }
0x280c   :  { %v5327_v60 = vmul.f32 %v9118_v51, %v5326_v20  ;;  %vm5290_vm5 = vmor %vm5288_vm3, %vm5289_vm2  ;;  %5617 = vmatpush.msrb.mxu1 %v5572_v8  ;;  %v5567_v20 = vld [vmem:[#allocation8 + $0xc80] sm:$0xff]  ;;  %v5678_v8 = vld [vmem:[#allocation7 + $0xb98] sm:$0xff] }
0x280d   :  { %v5285_v18 = vsub.f32 1.0, %v5284_v44  ;;  %7651 = vmatmul.msk.f32.vlgmr.msrb.gmra.mxu2 %vm794_vm4, %v5282_v40  ;;  %v5570_v40 = vld [vmem:[#allocation8 + $0xca8] sm:$0xff] }
0x280e   :  { %7654 = vmatmul.msk.f32.vlgmr.msra.gmra.mxu1 %vm794_vm4, %v5327_v60  ;;  %v5568_v44 = vld [vmem:[#allocation8 + $0xc88] sm:$0xff]  ;;  %v5565_v60 = vld [vmem:[#allocation8 + $0xc60] sm:$0xff] }
0x280f   :  { %v5286_v50 = vmul.f32 %v8062_v42, %v5285_v18  ;;  %5618 = vmatpush.msrb.mxu1 %v5570_v40  ;;  %v5566_v18 = vld [vmem:[#allocation8 + $0xc68] sm:$0xff] }
0x2810   :  { %v5693_v40 = vld [vmem:[#allocation7 + $0xc10] sm:$0xff] }
0x2811   :  { %v5287_v25 = vadd.f32 %v8062_v42, %v5286_v50  ;;  %5619 = vmatpush.msrb.mxu1 %v5568_v44  ;;  %v5564_v50 = vld [vmem:[#allocation8 + $0xc48] sm:$0xff]  ;;  %v5692_v44 = vld [vmem:[#allocation7 + $0xc08] sm:$0xff] }
0x2813   :  { %v5291_v16 = vsel %vm5290_vm5, %v8062_v42, %v5287_v25  ;;  %v5571_v42 = vld [vmem:[#allocation8 + $0xcc0] sm:$0xff]  ;;  %5620 = vmatpush.msrb.mxu1 %v5566_v18  ;;  %v5562_v25 = vld [vmem:[#allocation8 + $0xc28] sm:$0xff]  ;;  %v5691_v18 = vld [vmem:[#allocation7 + $0xc00] sm:$0xff] }
0x2814   :  { %v5296_v23 = vsel %vm5293_vm6, %v5295_v32, %v5291_v16  ;;  %5594 = vmatpush.msrb.mxu0 %v5571_v42  ;;  %v5559_v32 = vld [vmem:[#allocation8 + $0xc00] sm:$0xff]  ;;  %v5560_v16 = vld [vmem:[#allocation8 + $0xc08] sm:$0xff]  ;;  %v5695_v42 = vld [vmem:[#allocation7 + $0xc20] sm:$0xff] }
0x2815   :  { %v5297_v17 = vmul.f32 %v9124_v34, %v5296_v23  ;;  %v5432_v34 = vld [vmem:[#allocation7 + $0xae8] sm:$0xff]  ;;  %5621 = vmatpush.msrb.mxu1 %v5564_v50  ;;  %v5690_v50 = vld [vmem:[#allocation7 + $0xbf8] sm:$0xff] }
0x2816   :  { %5459 = vmatpush.msra.mxu2 %v5432_v34  ;;  %5595 = vmatpush.msrb.mxu0 %v5569_v55  ;;  %v5557_v23 = vld [vmem:[#allocation8 + $0xbe0] sm:$0xff]  ;;  %v5694_v55 = vld [vmem:[#allocation7 + $0xc18] sm:$0xff] }
0x2817   :  { %7652 = vmatmul.msk.f32.vlgmr.msrb.gmra.mxu3 %vm794_vm4, %v5297_v17  ;;  %5622 = vmatpush.msrb.mxu1 %v5562_v25  ;;  %v5558_v17 = vld [vmem:[#allocation8 + $0xbe8] sm:$0xff] }
0x2818   :  { %5460 = vmatpush.msra.mxu2 %v5431_v38  ;;  %5596 = vmatpush.msrb.mxu0 %v5567_v20  ;;  %v5676_v20 = vld [vmem:[#allocation7 + $0xb88] sm:$0xff]  ;;  %v5689_v25 = vld [vmem:[#allocation7 + $0xbf0] sm:$0xff] }
0x2819   :  { %5623 = vmatpush.msrb.mxu1 %v5560_v16  ;;  %v5688_v16 = vld [vmem:[#allocation7 + $0xbe8] sm:$0xff] }
0x281a   :  { %5461 = vmatpush.msra.mxu2 %v5430_v26  ;;  %5597 = vmatpush.msrb.mxu0 %v5565_v60  ;;  %v7810_v26 = vld [vmem:[#allocation7 + $0xac8] ss:$0 sm:$0xff]  ;;  %v5675_v60 = vld [vmem:[#allocation7 + $0xb80] sm:$0xff] }
0x281b   :  { %5624 = vmatpush.msrb.mxu1 %v5558_v17  ;;  %v5687_v17 = vld [vmem:[#allocation7 + $0xbe0] sm:$0xff] }
0x281c   :  { %5598 = vmatpush.msrb.mxu0 %v5563_v47  ;;  %v5674_v47 = vld [vmem:[#allocation7 + $0xb78] sm:$0xff] }
0x281e   :  { %5599 = vmatpush.msrb.mxu0 %v5561_v21  ;;  %v5673_v21 = vld [vmem:[#allocation7 + $0xb70] sm:$0xff] }
0x281f   :  { %7657 = vmatmul.msk.f32.vlgmr.msra.gmra.mxu3 %vm477_vm7, %v8423_v57 }
0x2820   :  { %5600 = vmatpush.msrb.mxu0 %v5559_v32  ;;  %v5672_v32 = vld [vmem:[#allocation7 + $0xb68] sm:$0xff] }
0x2822   :  { %5601 = vmatpush.msrb.mxu0 %v5557_v23  ;;  %v5671_v23 = vld [vmem:[#allocation7 + $0xb60] sm:$0xff] }
0x2882   :  { %v5394_v51 = vpop.f32.mrf.mxu0 }
0x2883   :  { %5422 = vrot.lane.b32.xlu2 %v5394_v51, %s8283_s13 }
0x288b   :  { %v5417_v4 = vpop.f32.mrf.mxu1 }
0x288c   :  { %5424 = vrot.lane.b32.xlu1 %v5417_v4, %s8283_s13 }
0x2890   :  { %v5348_v0 = vpop.f32.mrf.mxu2 }
0x289a   :  { %v5371_v39 = vpop.f32.mrf.mxu3 }
0x28a2   :  { %v5494_v46 = vpop.f32.mrf.mxu3 }
0x28a3   :  { %v5495_v27 = vadd.f32 %v7808_v43, %v5494_v46  ;;  %v5750_v43 = vld [vmem:[#allocation7 + $0xdf0] sm:$0xff] }
0x28a5   :  { %v5499_v35 = vperm.slane %v5495_v27, 0  ;;  %v5498_v62 = vrot.slane %v5495_v27, 1 }
0x28a7   :  { %v5500_v7 = vperm.slane %v5498_v62, 0  ;;  %v5697_v62 = vld [vmem:[#allocation7 + $0xc30] sm:$0xff] }
0x28dd   :  { %v5423_v36 = vpop.permute.xlu2 %5422 }
0x28de   :  { %v5428_v37 = vsel %vm477_vm7, %v5348_v0, %v5423_v36  ;;  %v7811_v36 = vld [vmem:[#allocation7 + $0xad0] ss:$0 sm:$0xff] }
0x28df   :  { %7655 = vmatmul.msk.f32.vlgmr.msra.gmra.mxu2 %vm1314_vm9, %v5428_v37 }
0x28fe   :  { %v5425_v24 = vpop.permute.xlu1 %5424 }
0x28ff   :  { %v5429_v6 = vsel %vm477_vm7, %v5371_v39, %v5425_v24 }
0x2900   :  { %7656 = vmatmul.msk.f32.gmra.mxu2 %vm1314_vm9, %v5429_v6  ;;  %v5751_v6 = vld [vmem:[#allocation7 + $0xdf8] sm:$0xff] }
0x2901   :  { %5771 = vmatpush.msra.mxu0 %v5751_v6 }
0x2903   :  { %5772 = vmatpush.msra.mxu0 %v5750_v43 }
0x2962   :  { %v5463_v59 = vpop.f32.mrf.mxu2 }
0x2963   :  { %v5464_v49 = vadd.f32 %v7809_v45, %v5463_v59  ;;  %v5683_v59 = vld [vmem:[#allocation7 + $0xbc0] sm:$0xff] }
0x2964   :  { %5702 = vmatpush.msrb.mxu3 %v5683_v59  ;;  %v5781_v59 = vld [vmem:[#allocation7 + $0xe28] sm:$0xff] }
0x2965   :  { %v5469_v9 = vadd.f32 %v5464_v49, %v9065_v10  ;;  %v5699_v49 = vld [vmem:[#allocation7 + $0xc40] sm:$0xff] }
0x2966   :  { %5725 = vmatpush.msrb.mxu2 %v5699_v49 }
0x2967   :  { %v9144_v1 = vadd.f32 %v5499_v35, %v5469_v9  ;;  %v5682_v35 = vld [vmem:[#allocation7 + $0xbb8] sm:$0xff] }
0x2968   :  { %v5698_v9 = vld [vmem:[#allocation7 + $0xc38] sm:$0xff]  ;;  %5703 = vmatpush.msrb.mxu3 %v5682_v35 }
0x2969   :  { %v5505_v58 = vsel %vm1314_vm9, %v9144_v1, 0.0  ;;  %5726 = vmatpush.msrb.mxu2 %v5698_v9  ;;  %v5780_v9 = vld [vmem:[#allocation7 + $0xe20] sm:$0xff] }
0x296a   :  { %5506 = vadd.xlane.f32.xlu0 %v5505_v58  ;;  %v5681_v58 = vld [vmem:[#allocation7 + $0xbb0] sm:$0xff] }
0x296b   :  { %5704 = vmatpush.msrb.mxu3 %v5681_v58  ;;  %5727 = vmatpush.msrb.mxu2 %v5697_v62 }
0x2983   :  { %v5466_v63 = vpop.f32.mrf.mxu2 }
0x2984   :  { %v5467_v5 = vadd.f32 %v7809_v45, %v5466_v63 }
0x2986   :  { %v5470_v61 = vadd.f32 %v5467_v5, %v9070_v41 }
0x2988   :  { %v9149_v14 = vadd.f32 %v5500_v7, %v5470_v61 }
0x298a   :  { %v5508_v30 = vsel %vm1314_vm9, %v9149_v14, 0.0 }
0x298b   :  { %5509 = vadd.xlane.f32.xlu2 %v5508_v30 }
0x29dd   :  { %v5507_v31 = vpop.xlane.xlu0 %5506 }
0x29de   :  { %v5511_v10 = vmul.f32 %v5507_v31, %v8528_v52 }
0x29e0   :  { %v5513_v13 = vsub.f32 %v9144_v1, %v5511_v10 }
0x29e2   :  { %v5515_v12 = vmul.f32 %v5513_v13, %v5513_v13 }
0x29e4   :  { %v5517_v15 = vsel %vm1314_vm9, %v5515_v12, 0.0 }
0x29e5   :  { %5518 = vadd.xlane.f32.xlu1 %v5517_v15 }
0x29fe   :  { %v5510_v2 = vpop.xlane.xlu2 %5509 }
0x29ff   :  { %v5512_v19 = vmul.f32 %v5510_v2, %v8528_v52  ;;  %v550_v2 = vld [vmem:[#allocation5] sm:$0x3] }
0x2a01   :  { %v9158_v41 = vsub.f32 %v9149_v14, %v5512_v19  ;;  %v5680_v19 = vld [vmem:[#allocation7 + $0xba8] sm:$0xff] }
0x2a02   :  { %5705 = vmatpush.msrb.mxu3 %v5680_v19 }
0x2a03   :  { %v5516_v11 = vmul.f32 %v9158_v41, %v9158_v41 }
0x2a05   :  { %v5520_v56 = vsel %vm1314_vm9, %v5516_v11, 0.0  ;;  %v5696_v11 = vld [vmem:[#allocation7 + $0xc28] sm:$0xff] }
0x2a06   :  { %5521 = vadd.xlane.f32.xlu0 %v5520_v56  ;;  %5728 = vmatpush.msrb.mxu2 %v5696_v11  ;;  %v5679_v56 = vld [vmem:[#allocation7 + $0xba0] sm:$0xff] }
0x2a07   :  { %5706 = vmatpush.msrb.mxu3 %v5679_v56 }
0x2a08   :  { %5729 = vmatpush.msrb.mxu2 %v5695_v42 }
0x2a09   :  { %5707 = vmatpush.msrb.mxu3 %v5678_v8 }
0x2a0a   :  { %5730 = vmatpush.msrb.mxu2 %v5694_v55 }
0x2a0c   :  { %5731 = vmatpush.msrb.mxu2 %v5693_v40 }
0x2a0e   :  { %5732 = vmatpush.msrb.mxu2 %v5692_v44 }
0x2a10   :  { %5733 = vmatpush.msrb.mxu2 %v5691_v18 }
0x2a12   :  { %5734 = vmatpush.msrb.mxu2 %v5690_v50 }
0x2a14   :  { %5735 = vmatpush.msrb.mxu2 %v5689_v25 }
0x2a16   :  { %5736 = vmatpush.msrb.mxu2 %v5688_v16 }
0x2a18   :  { %5737 = vmatpush.msrb.mxu2 %v5687_v17 }
0x2a58   :  { %v5519_v51 = vpop.xlane.xlu1 %5518 }
0x2a59   :  { %v5523_v28 = vmul.f32 %v5519_v51, %v8528_v52  ;;  %v5670_v51 = vld [vmem:[#allocation7 + $0xb58] sm:$0xff] }
0x2a5b   :  { %v5525_v3 = vadd.f32 1e-05, %v5523_v28  ;;  %v5686_v28 = vld [vmem:[#allocation7 + $0xbd8] sm:$0xff] }
0x2a5c   :  { %5738 = vmatpush.msrb.mxu2 %v5686_v28 }
0x2a5d   :  { %8063 = vrsqrt.f32 %v5525_v3  ;;  %vm5533_vm11 = vweird.f32 %v5525_v3 }
0x2a63   :  { %v8064_v54 = vpop.eup %8063 }
0x2a64   :  { %v5528_v4 = vmul.f32 %v8064_v54, %v5525_v3  ;;  %vm5534_vm10 = vweird.f32 %v8064_v54  ;;  %v5669_v3 = vld [vmem:[#allocation7 + $0xb50] sm:$0xff] }
0x2a65   :  { %vm5535_vm12 = vmor %vm5533_vm11, %vm5534_vm10 }
0x2a66   :  { %v5529_v22 = vmul.f32 %v8064_v54, %v5528_v4  ;;  %v5668_v4 = vld [vmem:[#allocation7 + $0xb48] sm:$0xff] }
0x2a68   :  { %v5530_v48 = vmul.f32 0.5, %v5529_v22  ;;  %v5684_v22 = vld [vmem:[#allocation7 + $0xbc8] sm:$0xff] }
0x2a6a   :  { %v5531_v34 = vsub.f32 1.5, %v5530_v48  ;;  %v5574_v48 = vld [vmem:[#allocation8 + $0xce0] ss:$8 sm:$0x3] }
0x2a6c   :  { %v5532_v38 = vmul.f32 %v8064_v54, %v5531_v34  ;;  %v5784_v34 = vld [vmem:[#allocation7 + $0xe40] sm:$0xff] }
0x2a6d   :  { %5798 = vmatpush.msra.mxu1 %v5784_v34  ;;  %v7813_v34 = vld [vmem:[#allocation7 + $0xc48] ss:$0 sm:$0xff] }
0x2a6e   :  { %v5536_v0 = vsel %vm5535_vm12, %v8064_v54, %v5532_v38  ;;  %v5685_v54 = vld [vmem:[#allocation7 + $0xbd0] sm:$0xff]  ;;  %v5783_v38 = vld [vmem:[#allocation7 + $0xe38] sm:$0xff] }
0x2a6f   :  { %v5547_v37 = vmul.f32 %v5536_v0, %v5513_v13  ;;  %5739 = vmatpush.msrb.mxu2 %v5685_v54  ;;  %v5577_v0 = vperm.slane %v5574_v48, 1  ;;  %5799 = vmatpush.msra.mxu1 %v5783_v38 }
0x2a71   :  { %v5551_v39 = vmul.f32 %v7810_v26, %v5547_v37  ;;  %5740 = vmatpush.msrb.mxu2 %v5684_v22 }
0x2a73   :  { %v5555_v24 = vadd.f32 %v7811_v36, %v5551_v39 }
0x2a75   :  { %7658 = vmatmul.msk.f32.vlgmr.msrb.gmra.mxu0 %vm1314_vm9, %v5555_v24  ;;  %7660 = vmatmul.msk.f32.vlgmr.msrb.gmra.mxu1 %vm1314_vm9, %v5555_v24 }
0x2a79   :  { %v5522_v46 = vpop.xlane.xlu0 %5521 }
0x2a7a   :  { %v5524_v45 = vmul.f32 %v5522_v46, %v8528_v52  ;;  %v5782_v46 = vld [vmem:[#allocation7 + $0xe30] sm:$0xff] }
0x2a7b   :  { %5800 = vmatpush.msra.mxu1 %v5782_v46 }
0x2a7c   :  { %v5526_v27 = vadd.f32 1e-05, %v5524_v45 }
0x2a7d   :  { %5801 = vmatpush.msra.mxu1 %v5781_v59 }
0x2a7e   :  { %8065 = vrsqrt.f32 %v5526_v27  ;;  %vm5543_vm14 = vweird.f32 %v5526_v27 }
0x2a7f   :  { %5802 = vmatpush.msra.mxu1 %v5780_v9 }
0x2a84   :  { %v8066_v63 = vpop.eup %8065 }
0x2a85   :  { %v5538_v5 = vmul.f32 %v8066_v63, %v5526_v27  ;;  %vm5544_vm13 = vweird.f32 %v8066_v63 }
0x2a86   :  { %vm5545_vm15 = vmor %vm5543_vm14, %vm5544_vm13 }
0x2a87   :  { %v5539_v7 = vmul.f32 %v8066_v63, %v5538_v5  ;;  %v5778_v5 = vld [vmem:[#allocation7 + $0xe10] sm:$0xff] }
0x2a89   :  { %v5540_v61 = vmul.f32 0.5, %v5539_v7 }
0x2a8b   :  { %v5541_v30 = vsub.f32 1.5, %v5540_v61 }
0x2a8d   :  { %v5542_v31 = vmul.f32 %v8066_v63, %v5541_v30  ;;  %v5777_v30 = vld [vmem:[#allocation7 + $0xe08] sm:$0xff] }
0x2a8f   :  { %v5546_v10 = vsel %vm5545_vm15, %v8066_v63, %v5542_v31  ;;  %v5779_v63 = vld [vmem:[#allocation7 + $0xe18] sm:$0xff] }
0x2a90   :  { %v5548_v13 = vmul.f32 %v5546_v10, %v9158_v41  ;;  %v5677_v41 = vld [vmem:[#allocation7 + $0xb90] sm:$0xff]  ;;  %5803 = vmatpush.msra.mxu1 %v5779_v63 }
0x2a91   :  { %5708 = vmatpush.msrb.mxu3 %v5677_v41 }
0x2a92   :  { %v5552_v12 = vmul.f32 %v7810_v26, %v5548_v13  ;;  %v5576_v26 = vperm.slane %v5574_v48, 0  ;;  %5804 = vmatpush.msra.mxu1 %v5778_v5 }
0x2a93   :  { %5709 = vmatpush.msrb.mxu3 %v5676_v20 }
0x2a94   :  { %v5556_v15 = vadd.f32 %v7811_v36, %v5552_v12  ;;  %5805 = vmatpush.msra.mxu1 %v5777_v30 }
0x2a95   :  { %5710 = vmatpush.msrb.mxu3 %v5675_v60  ;;  %v7812_v60 = vld [vmem:[#allocation7 + $0xe00] ss:$0 sm:$0xff] }
0x2a96   :  { %7659 = vmatmul.msk.f32.gmra.mxu0 %vm1314_vm9, %v5556_v15  ;;  %7661 = vmatmul.msk.f32.gmra.mxu1 %vm1314_vm9, %v5556_v15 }
0x2a97   :  { %5711 = vmatpush.msrb.mxu3 %v5674_v47 }
0x2a99   :  { %5712 = vmatpush.msrb.mxu3 %v5673_v21 }
0x2a9b   :  { %5713 = vmatpush.msrb.mxu3 %v5672_v32 }
0x2a9d   :  { %5714 = vmatpush.msrb.mxu3 %v5671_v23 }
0x2a9e   :  { %7662 = vmatmul.msk.f32.vlgmr.msra.gmra.mxu0 %vm469_vm8, %v550_v2 }
0x2a9f   :  { %5715 = vmatpush.msrb.mxu3 %v5670_v51 }
0x2aa1   :  { %5716 = vmatpush.msrb.mxu3 %v5669_v3 }
0x2aa3   :  { %5717 = vmatpush.msrb.mxu3 %v5668_v4 }
0x2af2   :  { %v5603_v36 = vpop.f32.mrf.mxu0  ;;  %v5626_v37 = vpop.f32.mrf.mxu1 }
0x2af3   :  { %v5604_v39 = vadd.f32 %v5603_v36, %v5576_v26  ;;  %v5627_v24 = vadd.f32 %v5626_v37, %v5577_v0 }
0x2af5   :  { %v5632_v6 = vmul.f32 %v5604_v39, %v5604_v39  ;;  %v5633_v43 = vmul.f32 %v5627_v24, %v5627_v24 }
0x2af7   :  { %v5636_v45 = vmul.f32 %v5632_v6, %v5604_v39  ;;  %v5637_v27 = vmul.f32 %v5633_v43, %v5627_v24 }
0x2af9   :  { %v5640_v49 = vmul.f32 0.044715, %v5636_v45  ;;  %v5641_v35 = vmul.f32 0.044715, %v5637_v27 }
0x2afb   :  { %v5644_v58 = vadd.f32 %v5640_v49, %v5604_v39  ;;  %v5645_v62 = vadd.f32 %v5641_v35, %v5627_v24 }
0x2afd   :  { %v5648_v7 = vmul.f32 0.7978846, %v5644_v58  ;;  %v5649_v61 = vmul.f32 0.7978846, %v5645_v62 }
0x2aff   :  { %8067 = vtanh.f32 %v5648_v7 }
0x2b00   :  { %8069 = vtanh.f32 %v5649_v61 }
0x2b05   :  { %v8068_v31 = vpop.eup %8067 }
0x2b06   :  { %v8070_v10 = vpop.eup %8069  ;;  %v5656_v13 = vadd.f32 1.0, %v8068_v31 }
0x2b07   :  { %v5657_v12 = vadd.f32 1.0, %v8070_v10 }
0x2b08   :  { %v5660_v15 = vmul.f32 0.5, %v5656_v13 }
0x2b09   :  { %v5661_v2 = vmul.f32 0.5, %v5657_v12 }
0x2b0a   :  { %v5664_v19 = vmul.f32 %v5660_v15, %v5604_v39 }
0x2b0b   :  { %v5665_v11 = vmul.f32 %v5661_v2, %v5627_v24  ;;  %v9186_v2 = vld [vmem:[#allocation7 + $0xc98] sm:$0xff] }
0x2b0c   :  { %5718 = vmatmul.f32.vlgmr.msrb.gmra.mxu3 %v5664_v19  ;;  %5894 = vmatpush.msrb.mxu0 %v9186_v2  ;;  %v9189_v19 = vld [vmem:[#allocation7 + $0xc90] sm:$0xff] }
0x2b0d   :  { %5741 = vmatmul.f32.vlgmr.msrb.gmra.mxu2 %v5665_v11  ;;  %v9192_v11 = vld [vmem:[#allocation7 + $0xc88] sm:$0xff] }
0x2b0e   :  { %5895 = vmatpush.msrb.mxu0 %v9189_v19 }
0x2b10   :  { %5896 = vmatpush.msrb.mxu0 %v9192_v11 }
0x2b13   :  { %v5606_v56 = vpop.f32.mrf.mxu0  ;;  %v5629_v42 = vpop.f32.mrf.mxu1 }
0x2b14   :  { %v5607_v8 = vadd.f32 %v5606_v56, %v5576_v26  ;;  %v5630_v55 = vadd.f32 %v5629_v42, %v5577_v0  ;;  %v7814_v0 = vld [vmem:[#allocation7 + $0xe48] ss:$0 sm:$0xff]  ;;  %v9195_v56 = vld [vmem:[#allocation7 + $0xc80] sm:$0xff]  ;;  %v9198_v42 = vld [vmem:[#allocation7 + $0xc78] sm:$0xff] }
0x2b15   :  { %5897 = vmatpush.msrb.mxu0 %v9195_v56 }
0x2b16   :  { %v5634_v41 = vmul.f32 %v5607_v8, %v5607_v8  ;;  %v5635_v40 = vmul.f32 %v5630_v55, %v5630_v55 }
0x2b17   :  { %5898 = vmatpush.msrb.mxu0 %v9198_v42 }
0x2b18   :  { %v5638_v20 = vmul.f32 %v5634_v41, %v5607_v8  ;;  %v5639_v44 = vmul.f32 %v5635_v40, %v5630_v55  ;;  %v9207_v41 = vld [vmem:[#allocation7 + $0xc60] sm:$0xff] }
0x2b1a   :  { %v5642_v18 = vmul.f32 0.044715, %v5638_v20  ;;  %v5643_v47 = vmul.f32 0.044715, %v5639_v44 }
0x2b1b   :  { %v5774_v50 = vpop.f32.mrf.mxu0 }
0x2b1c   :  { %v5646_v21 = vadd.f32 %v5642_v18, %v5607_v8  ;;  %v5647_v25 = vadd.f32 %v5643_v47, %v5630_v55  ;;  %v5775_v32 = vadd.f32 %v7812_v60, %v5774_v50 }
0x2b1e   :  { %7663 = vmatmul.msk.f32.vlgmr.msra.gmra.mxu1 %vm1314_vm9, %v5775_v32  ;;  %v5650_v16 = vmul.f32 0.7978846, %v5646_v21  ;;  %v5651_v23 = vmul.f32 0.7978846, %v5647_v25  ;;  %v7815_v32 = vld [vmem:[#allocation7 + $0xc50] ss:$0 sm:$0xff] }
0x2b20   :  { %8071 = vtanh.f32 %v5650_v16 }
0x2b21   :  { %8073 = vtanh.f32 %v5651_v23  ;;  %v7816_v23 = vld [vmem:[#allocation7 + $0xc58] ss:$0 sm:$0xff] }
0x2b26   :  { %v8072_v17 = vpop.eup %8071 }
0x2b27   :  { %v8074_v51 = vpop.eup %8073  ;;  %v5658_v28 = vadd.f32 1.0, %v8072_v17 }
0x2b28   :  { %v5659_v3 = vadd.f32 1.0, %v8074_v51 }
0x2b29   :  { %v5662_v54 = vmul.f32 0.5, %v5658_v28 }
0x2b2a   :  { %v5663_v4 = vmul.f32 0.5, %v5659_v3 }
0x2b2b   :  { %v5666_v22 = vmul.f32 %v5662_v54, %v5607_v8  ;;  %v9201_v8 = vld [vmem:[#allocation7 + $0xc70] sm:$0xff] }
0x2b2c   :  { %v5667_v48 = vmul.f32 %v5663_v4, %v5630_v55  ;;  %5899 = vmatpush.msrb.mxu0 %v9201_v8  ;;  %v9204_v55 = vld [vmem:[#allocation7 + $0xc68] sm:$0xff] }
0x2b2d   :  { %5721 = vmatmul.f32.gmra.mxu3 %v5666_v22 }
0x2b2e   :  { %5744 = vmatmul.f32.gmra.mxu2 %v5667_v48  ;;  %5900 = vmatpush.msrb.mxu0 %v9204_v55 }
0x2b30   :  { %5901 = vmatpush.msrb.mxu0 %v9207_v41 }
0x2b8f   :  { %v5719_v38 = vpop.f32.mrf.mxu3 }
0x2b90   :  { %v5720_v26 = vadd.f32 %v7813_v34, %v5719_v38  ;;  %v5742_v36 = vpop.f32.mrf.mxu2 }
0x2b92   :  { %v5743_v37 = vadd.f32 %v5742_v36, %v5720_v26 }
0x2b94   :  { %v9173_v6 = vadd.f32 %v5743_v37, %v9144_v1 }
0x2b9b   :  { %v5807_v39 = vpop.f32.mrf.mxu1 }
0x2b9c   :  { %v5808_v24 = vadd.f32 %v7814_v0, %v5807_v39 }
0x2b9e   :  { %v5812_v43 = vperm.slane %v5808_v24, 0  ;;  %v5811_v59 = vrot.slane %v5808_v24, 1 }
0x2ba0   :  { %v5816_v46 = vadd.f32 %v5812_v43, %v9173_v6  ;;  %v5813_v58 = vperm.slane %v5811_v59, 0  ;;  %v7817_v43 = vld [vmem:[#allocation7 + $0xca0] ss:$0 sm:$0xff] }
0x2ba2   :  { %v5818_v45 = vsel %vm1314_vm9, %v5816_v46, 0.0 }
0x2ba3   :  { %5819 = vadd.xlane.f32.xlu0 %v5818_v45 }
0x2bb0   :  { %v5722_v27 = vpop.f32.mrf.mxu3 }
0x2bb1   :  { %v5723_v49 = vadd.f32 %v7813_v34, %v5722_v27  ;;  %v5745_v35 = vpop.f32.mrf.mxu2 }
0x2bb3   :  { %v5746_v9 = vadd.f32 %v5745_v35, %v5723_v49 }
0x2bb5   :  { %v9178_v62 = vadd.f32 %v5746_v9, %v9149_v14 }
0x2bb7   :  { %v5817_v63 = vadd.f32 %v5813_v58, %v9178_v62 }
0x2bb9   :  { %v5821_v1 = vsel %vm1314_vm9, %v5817_v63, 0.0 }
0x2bba   :  { %5822 = vadd.xlane.f32.xlu2 %v5821_v1 }
0x2c16   :  { %v5820_v5 = vpop.xlane.xlu0 %5819 }
0x2c17   :  { %v5824_v7 = vmul.f32 %v5820_v5, %v8528_v52 }
0x2c19   :  { %v5826_v61 = vsub.f32 %v5816_v46, %v5824_v7 }
0x2c1b   :  { %v5828_v30 = vmul.f32 %v5826_v61, %v5826_v61 }
0x2c1d   :  { %v5830_v31 = vsel %vm1314_vm9, %v5828_v30, 0.0 }
0x2c1e   :  { %5831 = vadd.xlane.f32.xlu0 %v5830_v31 }
0x2c2d   :  { %v5823_v10 = vpop.xlane.xlu2 %5822 }
0x2c2e   :  { %v5825_v13 = vmul.f32 %v5823_v10, %v8528_v52 }
0x2c30   :  { %v5827_v12 = vsub.f32 %v5817_v63, %v5825_v13 }
0x2c32   :  { %v5829_v15 = vmul.f32 %v5827_v12, %v5827_v12 }
0x2c34   :  { %v5833_v14 = vsel %vm1314_vm9, %v5829_v15, 0.0  ;;  %v9230_v15 = vld [vmem:[#allocation7 + $0xce0] sm:$0xff] }
0x2c35   :  { %5834 = vadd.xlane.f32.xlu1 %v5833_v14  ;;  %5987 = vmatpush.msrb.mxu1 %v9230_v15  ;;  %v9233_v14 = vld [vmem:[#allocation7 + $0xcd8] sm:$0xff] }
0x2c37   :  { %5988 = vmatpush.msrb.mxu1 %v9233_v14 }
0x2c91   :  { %v5832_v40 = vpop.xlane.xlu0 %5831 }
0x2c92   :  { %v5836_v20 = vmul.f32 %v5832_v40, %v8528_v52  ;;  %v9236_v40 = vld [vmem:[#allocation7 + $0xcd0] sm:$0xff] }
0x2c93   :  { %5989 = vmatpush.msrb.mxu1 %v9236_v40 }
0x2c94   :  { %v5838_v44 = vadd.f32 1e-05, %v5836_v20  ;;  %v9239_v20 = vld [vmem:[#allocation7 + $0xcc8] sm:$0xff] }
0x2c95   :  { %5990 = vmatpush.msrb.mxu1 %v9239_v20 }
0x2c96   :  { %8075 = vrsqrt.f32 %v5838_v44  ;;  %vm5846_vm0 = vweird.f32 %v5838_v44 }
0x2c9c   :  { %v8076_v60 = vpop.eup %8075 }
0x2c9d   :  { %v5841_v18 = vmul.f32 %v8076_v60, %v5838_v44  ;;  %vm5847_vm1 = vweird.f32 %v8076_v60 }
0x2c9e   :  { %vm5848_vm2 = vmor %vm5846_vm0, %vm5847_vm1 }
0x2c9f   :  { %v5842_v47 = vmul.f32 %v8076_v60, %v5841_v18 }
0x2ca1   :  { %v5843_v50 = vmul.f32 0.5, %v5842_v47 }
0x2ca3   :  { %v5844_v21 = vsub.f32 1.5, %v5843_v50 }
0x2ca5   :  { %v5845_v25 = vmul.f32 %v8076_v60, %v5844_v21 }
0x2ca7   :  { %v5849_v16 = vsel %vm5848_vm2, %v8076_v60, %v5845_v25 }
0x2ca8   :  { %v5860_v17 = vmul.f32 %v5849_v16, %v5826_v61  ;;  %v5835_v51 = vpop.xlane.xlu1 %5834 }
0x2ca9   :  { %v5837_v28 = vmul.f32 %v5835_v51, %v8528_v52  ;;  %v7819_v51 = vld [vmem:[#allocation7 + $0xcb0] ss:$0 sm:$0xff] }
0x2caa   :  { %v5864_v3 = vmul.f32 %v7815_v32, %v5860_v17 }
0x2cab   :  { %v5839_v54 = vadd.f32 1e-05, %v5837_v28 }
0x2cac   :  { %v5868_v4 = vadd.f32 %v7816_v23, %v5864_v3 }
0x2cad   :  { %8077 = vrsqrt.f32 %v5839_v54  ;;  %vm5856_vm5 = vweird.f32 %v5839_v54 }
0x2cae   :  { %7664 = vmatmul.msk.f32.vlgmr.msrb.gmra.mxu0 %vm1314_vm9, %v5868_v4 }
0x2cb3   :  { %v8078_v22 = vpop.eup %8077 }
0x2cb4   :  { %v5851_v48 = vmul.f32 %v8078_v22, %v5839_v54  ;;  %vm5857_vm3 = vweird.f32 %v8078_v22 }
0x2cb5   :  { %vm5858_vm6 = vmor %vm5856_vm5, %vm5857_vm3 }
0x2cb6   :  { %v5852_v34 = vmul.f32 %v8078_v22, %v5851_v48 }
0x2cb8   :  { %v5853_v38 = vmul.f32 0.5, %v5852_v34 }
0x2cba   :  { %v5854_v26 = vsub.f32 1.5, %v5853_v38 }
0x2cbc   :  { %v5855_v0 = vmul.f32 %v8078_v22, %v5854_v26 }
0x2cbe   :  { %v5859_v36 = vsel %vm5858_vm6, %v8078_v22, %v5855_v0 }
0x2cbf   :  { %v5861_v37 = vmul.f32 %v5859_v36, %v5827_v12 }
0x2cc1   :  { %v5865_v39 = vmul.f32 %v7815_v32, %v5861_v37 }
0x2cc3   :  { %v5869_v24 = vadd.f32 %v7816_v23, %v5865_v39  ;;  %v7818_v23 = vld [vmem:[#allocation7 + $0xca8] ss:$0 sm:$0xff] }
0x2cc5   :  { %7665 = vmatmul.msk.f32.gmra.mxu0 %vm1314_vm9, %v5869_v24 }
0x2d2b   :  { %v5903_v46 = vpop.f32.mrf.mxu0 }
0x2d2c   :  { %v5904_v45 = vadd.f32 %v7817_v43, %v5903_v46 }
0x2d2e   :  { %v9215_v27 = vadd.f32 %v5904_v45, %v8501_v53  ;;  %v7820_v45 = vld [vmem:[#allocation7 + $0xce8] ss:$0 sm:$0xff] }
0x2d30   :  { %v5911_v59 = vsel %vm477_vm7, %v9215_v27, 0.0 }
0x2d31   :  { %5912 = vadd.xlane.f32.xlu2 %v5911_v59 }
0x2d42   :  { %v5906_v49 = vpop.f32.mrf.mxu0 }
0x2d43   :  { %v5907_v35 = vadd.f32 %v7817_v43, %v5906_v49 }
0x2d45   :  { %v9220_v9 = vadd.f32 %v5907_v35, %v8506_v29 }
0x2d47   :  { %v5914_v58 = vsel %vm477_vm7, %v9220_v9, 0.0 }
0x2d48   :  { %5915 = vadd.xlane.f32.xlu0 %v5914_v58 }
0x2da4   :  { %v5913_v63 = vpop.xlane.xlu2 %5912 }
0x2da5   :  { %v5917_v1 = vmul.f32 %v5913_v63, %v8415_v33 }
0x2da7   :  { %v5919_v5 = vsub.f32 %v9215_v27, %v5917_v1 }
0x2da9   :  { %v5921_v7 = vmul.f32 %v5919_v5, %v5919_v5 }
0x2dab   :  { %v5923_v61 = vsel %vm477_vm7, %v5921_v7, 0.0 }
0x2dac   :  { %5924 = vadd.xlane.f32.xlu1 %v5923_v61 }
0x2dbb   :  { %v5916_v30 = vpop.xlane.xlu0 %5915 }
0x2dbc   :  { %v5918_v31 = vmul.f32 %v5916_v30, %v8415_v33 }
0x2dbe   :  { %v5920_v10 = vsub.f32 %v9220_v9, %v5918_v31 }
0x2dc0   :  { %v5922_v13 = vmul.f32 %v5920_v10, %v5920_v10 }
0x2dc2   :  { %v5926_v12 = vsel %vm477_vm7, %v5922_v13, 0.0 }
0x2dc3   :  { %5927 = vadd.xlane.f32.xlu2 %v5926_v12 }
0x2e1f   :  { %v5925_v44 = vpop.xlane.xlu1 %5924 }
0x2e20   :  { %v5929_v60 = vmul.f32 %v5925_v44, %v8415_v33 }
0x2e22   :  { %v5931_v18 = vadd.f32 1e-05, %v5929_v60 }
0x2e24   :  { %8079 = vrsqrt.f32 %v5931_v18  ;;  %vm5939_vm11 = vweird.f32 %v5931_v18 }
0x2e2a   :  { %v8080_v47 = vpop.eup %8079 }
0x2e2b   :  { %v5934_v50 = vmul.f32 %v8080_v47, %v5931_v18  ;;  %vm5940_vm10 = vweird.f32 %v8080_v47 }
0x2e2c   :  { %vm5941_vm12 = vmor %vm5939_vm11, %vm5940_vm10 }
0x2e2d   :  { %v5935_v21 = vmul.f32 %v8080_v47, %v5934_v50 }
0x2e2f   :  { %v5936_v25 = vmul.f32 0.5, %v5935_v21 }
0x2e31   :  { %v5937_v32 = vsub.f32 1.5, %v5936_v25 }
0x2e33   :  { %v5938_v16 = vmul.f32 %v8080_v47, %v5937_v32 }
0x2e35   :  { %v5942_v17 = vsel %vm5941_vm12, %v8080_v47, %v5938_v16 }
0x2e36   :  { %v5953_v28 = vmul.f32 %v5942_v17, %v5919_v5  ;;  %v5928_v3 = vpop.xlane.xlu2 %5927 }
0x2e37   :  { %v5930_v54 = vmul.f32 %v5928_v3, %v8415_v33 }
0x2e38   :  { %v5957_v4 = vmul.f32 %v7818_v23, %v5953_v28 }
0x2e39   :  { %v5932_v22 = vadd.f32 1e-05, %v5930_v54 }
0x2e3a   :  { %v5961_v48 = vadd.f32 %v7819_v51, %v5957_v4 }
0x2e3b   :  { %8081 = vrsqrt.f32 %v5932_v22  ;;  %vm5949_vm14 = vweird.f32 %v5932_v22 }
0x2e3c   :  { %7666 = vmatmul.msk.f32.vlgmr.msrb.gmra.mxu1 %vm477_vm7, %v5961_v48 }
0x2e41   :  { %v8082_v34 = vpop.eup %8081 }
0x2e42   :  { %v5944_v38 = vmul.f32 %v8082_v34, %v5932_v22  ;;  %vm5950_vm13 = vweird.f32 %v8082_v34 }
0x2e43   :  { %vm5951_vm15 = vmor %vm5949_vm14, %vm5950_vm13 }
0x2e44   :  { %v5945_v26 = vmul.f32 %v8082_v34, %v5944_v38 }
0x2e46   :  { %v5946_v0 = vmul.f32 0.5, %v5945_v26 }
0x2e48   :  { %v5947_v36 = vsub.f32 1.5, %v5946_v0 }
0x2e4a   :  { %v5948_v37 = vmul.f32 %v8082_v34, %v5947_v36 }
0x2e4c   :  { %v5952_v39 = vsel %vm5951_vm15, %v8082_v34, %v5948_v37 }
0x2e4d   :  { %v5954_v24 = vmul.f32 %v5952_v39, %v5920_v10 }
0x2e4f   :  { %v5958_v43 = vmul.f32 %v7818_v23, %v5954_v24 }
0x2e51   :  { %v5962_v46 = vadd.f32 %v7819_v51, %v5958_v43 }
0x2e53   :  { %7667 = vmatmul.msk.f32.gmra.mxu1 %vm477_vm7, %v5962_v46 }
0x2eb9   :  { %v5992_v59 = vpop.f32.mrf.mxu1 }
0x2eba   :  { %v5993_v49 = vadd.f32 %v7820_v45, %v5992_v59 }
0x2ebc   :  { %6004 = vrot.lane.b32.xlu2 %v5993_v49, %s8295_s16  ;;  %6000 = vrot.lane.b32.xlu0 %v5993_v49, %s8294_s15 }
0x2ed0   :  { %v5995_v35 = vpop.f32.mrf.mxu1 }
0x2ed1   :  { %v9248_v58 = vadd.f32 %v7820_v45, %v5995_v35  ;;  %v6689_v35 = vsel %vm1314_vm9, %v9173_v6, 0.0 }
0x2ed3   :  { %6002 = vrot.lane.b32.xlu1 %v9248_v58, %s8294_s15 }
0x2f16   :  { %v6005_v63 = vpop.permute.xlu2 %6004 }
0x2f17   :  { %7668 = vmatpush.xpose.msk.msra.mxu3 %vm469_vm8, %v6005_v63 }
0x2f1a   :  { %7669 = vmatmul.msk.f32.vlgmr.msra.gmra.mxu3 %vm469_vm8, %v5993_v49 }
0x2f2e   :  { %v6001_v1 = vpop.permute.xlu0 %6000 }
0x2f2f   :  { %6056 = vrot.lane.b32.xlu0 %v6001_v1, %s8295_s16 }
0x2f37   :  { %6030 = vrot.lane.b32.xlu0 %v9248_v58, %s8295_s16 }
0x2f45   :  { %v6003_v5 = vpop.permute.xlu1 %6002 }
0x2f46   :  { %6082 = vrot.lane.b32.xlu1 %v6003_v5, %s8295_s16 }
0x2f9d   :  { %v6027_v7 = vpop.f32.mrf.mxu3 }
0x2f9e   :  { %v6108_v61 = vmul.f32 0.25, %v6027_v7 }
0x2fa0   :  { %v6112_v30 = vsel %vm794_vm4, %v6108_v61, -inf }
0x2fa1   :  { %v6057_v31 = vpop.permute.xlu0 %6056  ;;  %6113 = vmax.xlane.f32.xlu0 %v6112_v30 }
0x2fa2   :  { %7672 = vmatpush.xpose.msk.msra.mxu2 %vm469_vm8, %v6057_v31 }
0x2fa5   :  { %7673 = vmatmul.msk.f32.vlgmr.msra.gmra.mxu2 %vm469_vm8, %v6001_v1 }
0x2fa9   :  { %v6031_v10 = vpop.permute.xlu0 %6030 }
0x2faa   :  { %7670 = vmatpush.xpose.msk.msra.mxu1 %vm469_vm8, %v6031_v10 }
0x2fad   :  { %7671 = vmatmul.msk.f32.vlgmr.msra.gmra.mxu1 %vm469_vm8, %v9248_v58 }
0x2fb5   :  { %6260 = vrot.lane.b32.xlu0 %v6001_v1, %s8296_s17 }
0x2fb8   :  { %v6083_v13 = vpop.permute.xlu1 %6082 }
0x2fb9   :  { %7674 = vmatpush.xpose.msk.msrb.mxu3 %vm469_vm8, %v6083_v13 }
0x2fbc   :  { %7675 = vmatmul.msk.f32.vlgmr.msrb.gmra.mxu3 %vm469_vm8, %v6003_v5 }
0x2fbd   :  { %6208 = vrot.lane.b32.xlu0 %v5993_v49, %s8296_s17 }
0x3014   :  { %v6114_v12 = vpop.xlane.xlu0 %6113 }
0x3015   :  { %v6124_v34 = vsub.f32 %v6108_v61, %v6114_v12 }
0x3017   :  { %v6128_v26 = vmul.f32 1.442695, %v6124_v34 }
0x3027   :  { %v6261_v44 = vpop.permute.xlu0 %6260 }
0x3028   :  { %v6079_v60 = vpop.f32.mrf.mxu2  ;;  %6281 = vmatpush.msrb.mxu2 %v6261_v44 }
0x3029   :  { %v6110_v18 = vmul.f32 0.25, %v6079_v60 }
0x302a   :  { %v6053_v16 = vpop.f32.mrf.mxu1 }
0x302b   :  { %v6118_v47 = vsel %vm794_vm4, %v6110_v18, -inf  ;;  %v6109_v23 = vmul.f32 0.25, %v6053_v16 }
0x302c   :  { %6119 = vmax.xlane.f32.xlu2 %v6118_v47 }
0x302d   :  { %v6115_v17 = vsel %vm794_vm4, %v6109_v23, -inf }
0x302f   :  { %v6209_v50 = vpop.permute.xlu0 %6208 }
0x3030   :  { %6229 = vmatpush.msra.mxu0 %v6209_v50 }
0x303f   :  { %v6105_v21 = vpop.f32.mrf.mxu3 }
0x3040   :  { %v6111_v25 = vmul.f32 0.25, %v6105_v21 }
0x3042   :  { %v6121_v32 = vsel %vm794_vm4, %v6111_v25, -inf }
0x3043   :  { %6122 = vmax.xlane.f32.xlu1 %v6121_v32 }
0x304b   :  { %6116 = vmax.xlane.f32.xlu1 %v6115_v17 }
0x3064   :  { %6286 = vrot.lane.b32.xlu1 %v6003_v5, %s8296_s17 }
0x309f   :  { %v6120_v51 = vpop.xlane.xlu2 %6119 }
0x30a0   :  { %v6126_v28 = vsub.f32 %v6110_v18, %v6120_v51 }
0x30a2   :  { %v6132_v3 = vmul.f32 1.442695, %v6126_v28 }
0x30a4   :  { %8083 = vpow2.f32 %v6132_v3 }
0x30aa   :  { %v8084_v54 = vpop.eup %8083 }
0x30ab   :  { %v6142_v4 = vsel %vm794_vm4, %v8084_v54, 0.0 }
0x30ac   :  { %6143 = vadd.xlane.f32.xlu2 %v6142_v4 }
0x30b6   :  { %v6123_v22 = vpop.xlane.xlu1 %6122 }
0x30b7   :  { %v6127_v48 = vsub.f32 %v6111_v25, %v6123_v22 }
0x30b9   :  { %v6134_v38 = vmul.f32 1.442695, %v6127_v48 }
0x30bb   :  { %8085 = vpow2.f32 %v6134_v38 }
0x30bc   :  { %8087 = vpow2.f32 %v6128_v26 }
0x30be   :  { %v6117_v0 = vpop.xlane.xlu1 %6116 }
0x30bf   :  { %v6125_v37 = vsub.f32 %v6109_v23, %v6117_v0 }
0x30c1   :  { %v8086_v36 = vpop.eup %8085  ;;  %v6130_v24 = vmul.f32 1.442695, %v6125_v37 }
0x30c2   :  { %v6145_v39 = vsel %vm794_vm4, %v8086_v36, 0.0  ;;  %v9274_v43 = vpop.eup %8087 }
0x30c3   :  { %6146 = vadd.xlane.f32.xlu2 %v6145_v39  ;;  %8089 = vpow2.f32 %v6130_v24  ;;  %v6136_v46 = vsel %vm794_vm4, %v9274_v43, 0.0  ;;  %v6362_v24 = vld [vmem:[#allocation7 + $0xd30] sm:$0xff] }
0x30c9   :  { %v9278_v45 = vpop.eup %8089 }
0x30ca   :  { %v6139_v59 = vsel %vm794_vm4, %v9278_v45, 0.0 }
0x30cb   :  { %6137 = vadd.xlane.f32.xlu2 %v6136_v46 }
0x30d3   :  { %6140 = vadd.xlane.f32.xlu2 %v6139_v59 }
0x30d6   :  { %v6287_v49 = vpop.permute.xlu1 %6286 }
0x30d7   :  { %6307 = vmatpush.msra.mxu3 %v6287_v49 }
0x30eb   :  { %6234 = vrot.lane.b32.xlu2 %v9248_v58, %s8296_s17 }
0x3114   :  { %6690 = vadd.xlane.f32.xlu2 %v6689_v35 }
0x311f   :  { %v6144_v63 = vpop.xlane.xlu2 %6143 }
0x3120   :  { %8091 = vrcp.f32 %v6144_v63  ;;  %v6189_v61 = vand.u32 2147483648, %v6144_v63  ;;  %v6187_v31 = vand.u32 2147483647, %v6144_v63  ;;  %vm6183_vm0 = vweird.f32 %v6144_v63 }
0x3122   :  { %v6190_v13 = vor.u32 1.1754944e-38, %v6189_v61  ;;  %vm6188_vm3 = vcmp.eq.f32.partialorder %v6187_v31, 8.507059e+37  ;;  %v6359_v31 = vld [vmem:[#allocation7 + $0xd18] sm:$0xff] }
0x3126   :  { %v8092_v1 = vpop.eup %8091 }
0x3127   :  { %v6179_v5 = vmul.f32 %v8092_v1, %v6144_v63  ;;  %vm6184_vm1 = vweird.f32 %v8092_v1 }
0x3128   :  { %vm6185_vm2 = vmor %vm6183_vm0, %vm6184_vm1 }
0x3129   :  { %v6180_v7 = vsub.f32 1.0, %v6179_v5 }
0x312b   :  { %v6181_v30 = vmul.f32 %v8092_v1, %v6180_v7  ;;  %v6360_v7 = vld [vmem:[#allocation7 + $0xd20] sm:$0xff] }
0x312d   :  { %v6182_v10 = vadd.f32 %v8092_v1, %v6181_v30 }
0x312f   :  { %v6186_v12 = vsel %vm6185_vm2, %v8092_v1, %v6182_v10 }
0x3130   :  { %v6191_v58 = vsel %vm6188_vm3, %v6190_v13, %v6186_v12 }
0x3131   :  { %v6192_v44 = vmul.f32 %v8084_v54, %v6191_v58 }
0x3133   :  { %7678 = vmatmul.msk.f32.vlgmr.msrb.gmra.mxu2 %vm794_vm4, %v6192_v44 }
0x3136   :  { %v6147_v60 = vpop.xlane.xlu2 %6146 }
0x3137   :  { %8093 = vrcp.f32 %v6147_v60  ;;  %v6204_v25 = vand.u32 2147483648, %v6147_v60  ;;  %v6202_v16 = vand.u32 2147483647, %v6147_v60  ;;  %vm6198_vm6 = vweird.f32 %v6147_v60 }
0x3139   :  { %v6205_v51 = vor.u32 1.1754944e-38, %v6204_v25  ;;  %vm6203_vm11 = vcmp.eq.f32.partialorder %v6202_v16, 8.507059e+37  ;;  %v6325_v25 = vld [vmem:[#allocation7 + $0xd08] sm:$0xff]  ;;  %v6323_v16 = vld [vmem:[#allocation7 + $0xcf8] sm:$0xff] }
0x313a   :  { %6346 = vmatpush.msrb.mxu0 %v6325_v25  ;;  %v9345_v25 = vld [vmem:[#allocation7 + $0xd40] sm:$0xff] }
0x313d   :  { %v8094_v18 = vpop.eup %8093 }
0x313e   :  { %v6194_v47 = vmul.f32 %v8094_v18, %v6147_v60  ;;  %v6138_v50 = vpop.xlane.xlu2 %6137  ;;  %vm6199_vm5 = vweird.f32 %v8094_v18 }
0x313f   :  { %8095 = vrcp.f32 %v6138_v50  ;;  %vm6200_vm10 = vmor %vm6198_vm6, %vm6199_vm5  ;;  %v6159_v34 = vand.u32 2147483648, %v6138_v50  ;;  %v6157_v26 = vand.u32 2147483647, %v6138_v50  ;;  %vm6153_vm13 = vweird.f32 %v6138_v50 }
0x3140   :  { %v6195_v21 = vsub.f32 1.0, %v6194_v47 }
0x3141   :  { %v6160_v39 = vor.u32 1.1754944e-38, %v6159_v34  ;;  %vm6158_vm15 = vcmp.eq.f32.partialorder %v6157_v26, 8.507059e+37 }
0x3142   :  { %v6196_v32 = vmul.f32 %v8094_v18, %v6195_v21 }
0x3144   :  { %v6197_v23 = vadd.f32 %v8094_v18, %v6196_v32  ;;  %v6324_v32 = vld [vmem:[#allocation7 + $0xd00] sm:$0xff] }
0x3145   :  { %v8096_v17 = vpop.eup %8095  ;;  %6347 = vmatpush.msrb.mxu0 %v6324_v32 }
0x3146   :  { %v6201_v28 = vsel %vm6200_vm10, %v8094_v18, %v6197_v23  ;;  %v6149_v3 = vmul.f32 %v8096_v17, %v6138_v50  ;;  %v6141_v54 = vpop.xlane.xlu2 %6140  ;;  %vm6154_vm12 = vweird.f32 %v8096_v17 }
0x3147   :  { %v6206_v4 = vsel %vm6203_vm11, %v6205_v51, %v6201_v28  ;;  %8097 = vrcp.f32 %v6141_v54  ;;  %vm6155_vm14 = vmor %vm6153_vm13, %vm6154_vm12  ;;  %v6174_v5 = vand.u32 2147483648, %v6141_v54  ;;  %v6172_v30 = vand.u32 2147483647, %v6141_v54  ;;  %6348 = vmatpush.msrb.mxu0 %v6323_v16 }
0x3148   :  { %v6207_v22 = vmul.f32 %v8086_v36, %v6206_v4  ;;  %v6150_v48 = vsub.f32 1.0, %v6149_v3  ;;  %v6361_v36 = vld [vmem:[#allocation7 + $0xd28] sm:$0xff]  ;;  %vm6168_vm0 = vweird.f32 %v6141_v54  ;;  %v7821_v4 = vld [vmem:[#allocation7 + $0xd38] ss:$0 sm:$0xff] }
0x3149   :  { %v6175_v13 = vor.u32 1.1754944e-38, %v6174_v5  ;;  %vm6173_vm3 = vcmp.eq.f32.partialorder %v6172_v30, 8.507059e+37 }
0x314a   :  { %v6151_v38 = vmul.f32 %v8096_v17, %v6150_v48  ;;  %7679 = vmatmul.msk.f32.vlgmr.msra.gmra.mxu3 %vm794_vm4, %v6207_v22  ;;  %v7824_v48 = vld [vmem:[#allocation7 + $0xd10] ss:$0 sm:$0xff] }
0x314c   :  { %v6152_v0 = vadd.f32 %v8096_v17, %v6151_v38 }
0x314d   :  { %v8098_v37 = vpop.eup %8097 }
0x314e   :  { %v6156_v46 = vsel %vm6155_vm14, %v8096_v17, %v6152_v0  ;;  %v6164_v59 = vmul.f32 %v8098_v37, %v6141_v54  ;;  %v6235_v49 = vpop.permute.xlu2 %6234  ;;  %vm6169_vm1 = vweird.f32 %v8098_v37 }
0x314f   :  { %v6161_v35 = vsel %vm6158_vm15, %v6160_v39, %v6156_v46  ;;  %6255 = vmatpush.msrb.mxu1 %v6235_v49  ;;  %vm6170_vm2 = vmor %vm6168_vm0, %vm6169_vm1  ;;  %v6692_v46 = vsel %vm1314_vm9, %v9178_v62, 0.0 }
0x3150   :  { %v6162_v63 = vmul.f32 %v9274_v43, %v6161_v35  ;;  %v6165_v1 = vsub.f32 1.0, %v6164_v59 }
0x3151   :  { %6377 = vmatpush.msra.mxu1 %v6362_v24 }
0x3152   :  { %v6166_v61 = vmul.f32 %v8098_v37, %v6165_v1  ;;  %7676 = vmatmul.msk.f32.vlgmr.msra.gmra.mxu0 %vm794_vm4, %v6162_v63 }
0x3153   :  { %6378 = vmatpush.msra.mxu1 %v6361_v36 }
0x3154   :  { %v6167_v10 = vadd.f32 %v8098_v37, %v6166_v61 }
0x3155   :  { %6379 = vmatpush.msra.mxu1 %v6360_v7 }
0x3156   :  { %v6171_v12 = vsel %vm6170_vm2, %v8098_v37, %v6167_v10 }
0x3157   :  { %6380 = vmatpush.msra.mxu1 %v6359_v31  ;;  %v6176_v43 = vsel %vm6173_vm3, %v6175_v13, %v6171_v12 }
0x3158   :  { %v6177_v58 = vmul.f32 %v9278_v45, %v6176_v43 }
0x315a   :  { %7677 = vmatmul.msk.f32.vlgmr.msrb.gmra.mxu1 %vm794_vm4, %v6177_v58 }
0x3162   :  { %7682 = vmatmul.msk.f32.vlgmr.msra.gmra.mxu1 %vm477_vm7, %v8423_v57 }
0x3187   :  { %v6691_v44 = vpop.xlane.xlu2 %6690 }
0x3188   :  { %v6695_v60 = vmul.f32 %v6691_v44, %v8528_v52 }
0x318a   :  { %v9296_v18 = vsub.f32 %v9173_v6, %v6695_v60  ;;  %v6322_v6 = vld [vmem:[#allocation7 + $0xcf0] sm:$0xff] }
0x318b   :  { %6349 = vmatpush.msrb.mxu0 %v6322_v6 }
0x318c   :  { %v6699_v47 = vmul.f32 %v9296_v18, %v9296_v18 }
0x318e   :  { %v6701_v50 = vsel %vm1314_vm9, %v6699_v47, 0.0 }
0x318f   :  { %6702 = vadd.xlane.f32.xlu2 %v6701_v50 }
0x31b6   :  { %v6283_v21 = vpop.f32.mrf.mxu2 }
0x31b7   :  { %6314 = vrot.lane.b32.xlu0 %v6283_v21, %s8292_s1  ;;  %v9339_v21 = vld [vmem:[#allocation7 + $0xd50] sm:$0xff] }
0x31cd   :  { %v6309_v45 = vpop.f32.mrf.mxu3 }
0x31ce   :  { %6316 = vrot.lane.b32.xlu1 %v6309_v45, %s8292_s1  ;;  %v9342_v45 = vld [vmem:[#allocation7 + $0xd48] sm:$0xff] }
0x31cf   :  { %v6231_v23 = vpop.f32.mrf.mxu0 }
0x31d7   :  { %v6257_v28 = vpop.f32.mrf.mxu1 }
0x31df   :  { %v6382_v22 = vpop.f32.mrf.mxu1 }
0x31e0   :  { %v6383_v34 = vadd.f32 %v7821_v4, %v6382_v22  ;;  %v7825_v4 = vld [vmem:[#allocation7 + $0xcb8] ss:$0 sm:$0xff] }
0x31e2   :  { %v6387_v0 = vperm.slane %v6383_v34, 0  ;;  %v6386_v59 = vrot.slane %v6383_v34, 1 }
0x31e4   :  { %v6388_v36 = vperm.slane %v6386_v59, 0 }
0x3229   :  { %v6315_v17 = vpop.permute.xlu0 %6314 }
0x322a   :  { %v6320_v51 = vsel %vm469_vm8, %v6231_v23, %v6315_v17  ;;  %v6703_v23 = vpop.xlane.xlu2 %6702 }
0x322b   :  { %7680 = vmatmul.msk.f32.vlgmr.msrb.gmra.mxu0 %vm477_vm7, %v6320_v51  ;;  %v6707_v17 = vmul.f32 %v6703_v23, %v8528_v52 }
0x3240   :  { %v6317_v3 = vpop.permute.xlu1 %6316 }
0x3241   :  { %v6321_v54 = vsel %vm469_vm8, %v6257_v28, %v6317_v3 }
0x3242   :  { %7681 = vmatmul.msk.f32.gmra.mxu0 %vm477_vm7, %v6321_v54 }
0x32a8   :  { %v6351_v38 = vpop.f32.mrf.mxu0 }
0x32a9   :  { %v6352_v26 = vadd.f32 %v7824_v48, %v6351_v38 }
0x32ab   :  { %v6357_v37 = vadd.f32 %v6352_v26, %v9215_v27 }
0x32ad   :  { %v9308_v39 = vadd.f32 %v6387_v0, %v6357_v37 }
0x32af   :  { %v6393_v24 = vsel %vm477_vm7, %v9308_v39, 0.0 }
0x32b0   :  { %6394 = vadd.xlane.f32.xlu0 %v6393_v24 }
0x32b8   :  { %6693 = vadd.xlane.f32.xlu0 %v6692_v46  ;;  %v6542_v46 = vld [vmem:[#allocation7 + $0xe58] sm:$0xff] }
0x32b9   :  { %6559 = vmatpush.msrb.mxu1 %v6542_v46  ;;  %v7827_v46 = vld [vmem:[#allocation7 + $0xd60] ss:$0 sm:$0xff] }
0x32bf   :  { %v6354_v49 = vpop.f32.mrf.mxu0 }
0x32c0   :  { %v6355_v35 = vadd.f32 %v7824_v48, %v6354_v49  ;;  %v7826_v48 = vld [vmem:[#allocation7 + $0xcc0] ss:$0 sm:$0xff] }
0x32c2   :  { %v6358_v63 = vadd.f32 %v6355_v35, %v9220_v9  ;;  %v8147_v35 = vld [vmem:[#allocation5] sm:$0x3] }
0x32c4   :  { %v9315_v1 = vadd.f32 %v6388_v36, %v6358_v63 }
0x32c6   :  { %v6396_v27 = vsel %vm477_vm7, %v9315_v1, 0.0 }
0x32c7   :  { %6397 = vadd.xlane.f32.xlu1 %v6396_v27 }
0x3323   :  { %v6395_v5 = vpop.xlane.xlu0 %6394 }
0x3324   :  { %v6399_v7 = vmul.f32 %v6395_v5, %v8415_v33 }
0x3326   :  { %v6401_v61 = vsub.f32 %v9308_v39, %v6399_v7  ;;  %v9362_v7 = vld [vmem:[#allocation7 + $0xde0] sm:$0xff] }
0x3327   :  { %6516 = vmatpush.msrb.mxu3 %v9362_v7 }
0x3328   :  { %v6403_v30 = vmul.f32 %v6401_v61, %v6401_v61 }
0x332a   :  { %v6405_v31 = vsel %vm477_vm7, %v6403_v30, 0.0 }
0x332b   :  { %v6694_v10 = vpop.xlane.xlu0 %6693  ;;  %6406 = vadd.xlane.f32.xlu1 %v6405_v31  ;;  %v9367_v31 = vld [vmem:[#allocation7 + $0xdd0] sm:$0xff] }
0x332c   :  { %v6696_v13 = vmul.f32 %v6694_v10, %v8528_v52 }
0x332e   :  { %v9324_v9 = vsub.f32 %v9178_v62, %v6696_v13  ;;  %v9336_v62 = vld [vmem:[#allocation7 + $0xd58] sm:$0xff] }
0x332f   :  { %6469 = vmatpush.msra.mxu2 %v9336_v62 }
0x3330   :  { %v6700_v12 = vmul.f32 %v9324_v9, %v9324_v9 }
0x3331   :  { %6470 = vmatpush.msra.mxu2 %v9339_v21 }
0x3332   :  { %v6704_v43 = vsel %vm1314_vm9, %v6700_v12, 0.0 }
0x3333   :  { %6705 = vadd.xlane.f32.xlu1 %v6704_v43  ;;  %6471 = vmatpush.msra.mxu2 %v9342_v45 }
0x3335   :  { %6472 = vmatpush.msra.mxu2 %v9345_v25 }
0x3337   :  { %6765 = vmatpush.msrb.mxu2 %v9186_v2  ;;  %v6709_v2 = vadd.f32 1e-05, %v6707_v17  ;;  %v7822_v17 = vld [vmem:[#allocation7 + $0xc50] ss:$0 sm:$0xff] }
0x3339   :  { %6766 = vmatpush.msrb.mxu2 %v9189_v19  ;;  %vm6717_vm15 = vweird.f32 %v6709_v2 }
0x333a   :  { %v6398_v58 = vpop.xlane.xlu1 %6397 }
0x333b   :  { %v6400_v44 = vmul.f32 %v6398_v58, %v8415_v33  ;;  %6767 = vmatpush.msrb.mxu2 %v9192_v11 }
0x333d   :  { %v9331_v60 = vsub.f32 %v9315_v1, %v6400_v44  ;;  %6768 = vmatpush.msrb.mxu2 %v9195_v56 }
0x333f   :  { %v6404_v47 = vmul.f32 %v9331_v60, %v9331_v60  ;;  %6769 = vmatpush.msrb.mxu2 %v9198_v42 }
0x3341   :  { %v6408_v50 = vsel %vm477_vm7, %v6404_v47, 0.0  ;;  %6770 = vmatpush.msrb.mxu2 %v9201_v8 }
0x3342   :  { %6409 = vadd.xlane.f32.xlu0 %v6408_v50 }
0x3343   :  { %6771 = vmatpush.msrb.mxu2 %v9204_v55 }
0x3345   :  { %6772 = vmatpush.msrb.mxu2 %v9207_v41 }
0x339e   :  { %v6407_v32 = vpop.xlane.xlu1 %6406 }
0x339f   :  { %v6411_v16 = vmul.f32 %v6407_v32, %v8415_v33 }
0x33a1   :  { %v6413_v6 = vadd.f32 1e-05, %v6411_v16 }
0x33a3   :  { %8099 = vrsqrt.f32 %v6413_v6  ;;  %vm6421_vm6 = vweird.f32 %v6413_v6 }
0x33a4   :  { %8101 = vrsqrt.f32 %v6709_v2 }
0x33a6   :  { %v6706_v19 = vpop.xlane.xlu1 %6705 }
0x33a7   :  { %v6708_v56 = vmul.f32 %v6706_v19, %v8528_v52  ;;  %v6541_v52 = vld [vmem:[#allocation7 + $0xe50] sm:$0xff]  ;;  %v7823_v19 = vld [vmem:[#allocation7 + $0xc58] ss:$0 sm:$0xff] }
0x33a8   :  { %6560 = vmatpush.msrb.mxu1 %v6541_v52  ;;  %v6567_v52 = vld [vmem:[#allocation7 + $0xe78] sm:$0xff] }
0x33a9   :  { %v8100_v51 = vpop.eup %8099  ;;  %v6710_v22 = vadd.f32 1e-05, %v6708_v56  ;;  %7685 = vmatmul.msk.f32.vlgmr.msrb.gmra.mxu1 %vm469_vm8, %v8147_v35 }
0x33aa   :  { %v6416_v28 = vmul.f32 %v8100_v51, %v6413_v6  ;;  %vm6422_vm5 = vweird.f32 %v8100_v51  ;;  %v8102_v38 = vpop.eup %8101 }
0x33ab   :  { %vm6423_vm10 = vmor %vm6421_vm6, %vm6422_vm5  ;;  %8103 = vrsqrt.f32 %v6710_v22  ;;  %v6712_v37 = vmul.f32 %v8102_v38, %v6709_v2  ;;  %vm6718_vm12 = vweird.f32 %v8102_v38  ;;  %vm6727_vm2 = vweird.f32 %v6710_v22 }
0x33ac   :  { %v6417_v3 = vmul.f32 %v8100_v51, %v6416_v28  ;;  %vm6719_vm1 = vmor %vm6717_vm15, %vm6718_vm12 }
0x33ad   :  { %v6713_v59 = vmul.f32 %v8102_v38, %v6712_v37  ;;  %v9413_v37 = vld [vmem:[#allocation7 + $0xd68] sm:$0xff] }
0x33ae   :  { %v6418_v11 = vmul.f32 0.5, %v6417_v3 }
0x33af   :  { %v6714_v63 = vmul.f32 0.5, %v6713_v59  ;;  %v7828_v59 = vld [vmem:[#allocation7 + $0xe60] ss:$0 sm:$0xff] }
0x33b0   :  { %v6419_v54 = vsub.f32 1.5, %v6418_v11 }
0x33b1   :  { %v8104_v49 = vpop.eup %8103  ;;  %v6715_v10 = vsub.f32 1.5, %v6714_v63  ;;  %v6565_v63 = vld [vmem:[#allocation7 + $0xe68] sm:$0xff] }
0x33b2   :  { %v6420_v42 = vmul.f32 %v8100_v51, %v6419_v54  ;;  %v6722_v27 = vmul.f32 %v8104_v49, %v6710_v22  ;;  %vm6728_vm0 = vweird.f32 %v8104_v49  ;;  %v9386_v22 = vld [vmem:[#allocation7 + $0xdb0] sm:$0xff] }
0x33b3   :  { %v6716_v58 = vmul.f32 %v8102_v38, %v6715_v10  ;;  %vm6729_vm3 = vmor %vm6727_vm2, %vm6728_vm0 }
0x33b4   :  { %v6424_v8 = vsel %vm6423_vm10, %v8100_v51, %v6420_v42  ;;  %v6723_v13 = vmul.f32 %v8104_v49, %v6722_v27 }
0x33b5   :  { %v6435_v34 = vmul.f32 %v6424_v8, %v6401_v61  ;;  %v6410_v55 = vpop.xlane.xlu0 %6409  ;;  %v9364_v61 = vld [vmem:[#allocation7 + $0xdd8] sm:$0xff]  ;;  %v6720_v16 = vsel %vm6719_vm1, %v8102_v38, %v6716_v58  ;;  %v9401_v38 = vld [vmem:[#allocation7 + $0xd88] sm:$0xff] }
0x33b6   :  { %v6412_v26 = vmul.f32 %v6410_v55, %v8415_v33  ;;  %6517 = vmatpush.msrb.mxu3 %v9364_v61  ;;  %v6724_v44 = vmul.f32 0.5, %v6723_v13  ;;  %v6731_v51 = vmul.f32 %v6720_v16, %v9296_v18  ;;  %v9377_v18 = vld [vmem:[#allocation7 + $0xdc8] sm:$0xff]  ;;  %v9383_v8 = vld [vmem:[#allocation7 + $0xdb8] sm:$0xff]  ;;  %v9398_v55 = vld [vmem:[#allocation7 + $0xd90] sm:$0xff] }
0x33b7   :  { %v6439_v41 = vmul.f32 %v7825_v4, %v6435_v34  ;;  %v9395_v34 = vld [vmem:[#allocation7 + $0xd98] sm:$0xff] }
0x33b8   :  { %v6414_v0 = vadd.f32 1e-05, %v6412_v26  ;;  %6518 = vmatpush.msrb.mxu3 %v9367_v31  ;;  %v6725_v6 = vsub.f32 1.5, %v6724_v44  ;;  %v6735_v11 = vmul.f32 %v7822_v17, %v6731_v51  ;;  %v9404_v26 = vld [vmem:[#allocation7 + $0xd80] sm:$0xff] }
0x33b9   :  { %v6443_v24 = vadd.f32 %v7826_v48, %v6439_v41  ;;  %v9407_v41 = vld [vmem:[#allocation7 + $0xd78] sm:$0xff] }
0x33ba   :  { %8105 = vrsqrt.f32 %v6414_v0  ;;  %vm6431_vm13 = vweird.f32 %v6414_v0  ;;  %v6726_v3 = vmul.f32 %v8104_v49, %v6725_v6  ;;  %v6739_v54 = vadd.f32 %v7823_v19, %v6735_v11  ;;  %6519 = vmatpush.msrb.mxu3 %v9377_v18 }
0x33bb   :  { %7683 = vmatmul.msk.f32.vlgmr.msra.gmra.mxu2 %vm477_vm7, %v6443_v24  ;;  %v6568_v24 = vld [vmem:[#allocation7 + $0xe80] sm:$0xff] }
0x33bc   :  { %v6730_v2 = vsel %vm6729_vm3, %v8104_v49, %v6726_v3  ;;  %6586 = vmatpush.msra.mxu0 %v6568_v24  ;;  %v6566_v49 = vld [vmem:[#allocation7 + $0xe70] sm:$0xff]  ;;  %v7831_v24 = vld [vmem:[#allocation7 + $0xe88] ss:$0 sm:$0xff] }
0x33bd   :  { %v6732_v56 = vmul.f32 %v6730_v2, %v9324_v9  ;;  %v9389_v9 = vld [vmem:[#allocation7 + $0xda8] sm:$0xff] }
0x33be   :  { %6587 = vmatpush.msra.mxu0 %v6567_v52 }
0x33c0   :  { %v8106_v36 = vpop.eup %8105  ;;  %6588 = vmatpush.msra.mxu0 %v6566_v49  ;;  %v7830_v49 = vld [vmem:[#allocation7 + $0xde8] ss:$0 sm:$0xff] }
0x33c1   :  { %v6426_v5 = vmul.f32 %v8106_v36, %v6414_v0  ;;  %vm6432_vm11 = vweird.f32 %v8106_v36  ;;  %v9410_v0 = vld [vmem:[#allocation7 + $0xd70] sm:$0xff] }
0x33c2   :  { %vm6433_vm14 = vmor %vm6431_vm13, %vm6432_vm11  ;;  %6589 = vmatpush.msra.mxu0 %v6565_v63 }
0x33c3   :  { %v6427_v30 = vmul.f32 %v8106_v36, %v6426_v5 }
0x33c4   :  { %6858 = vmatpush.msrb.mxu0 %v9230_v15 }
0x33c5   :  { %v6428_v12 = vmul.f32 0.5, %v6427_v30 }
0x33c6   :  { %6859 = vmatpush.msrb.mxu0 %v9233_v14 }
0x33c7   :  { %v6429_v43 = vsub.f32 1.5, %v6428_v12 }
0x33c8   :  { %6860 = vmatpush.msrb.mxu0 %v9236_v40 }
0x33c9   :  { %v6430_v47 = vmul.f32 %v8106_v36, %v6429_v43 }
0x33ca   :  { %6861 = vmatpush.msrb.mxu0 %v9239_v20 }
0x33cb   :  { %v6434_v50 = vsel %vm6433_vm14, %v8106_v36, %v6430_v47 }
0x33cc   :  { %v6436_v32 = vmul.f32 %v6434_v50, %v9331_v60  ;;  %v6736_v60 = vmul.f32 %v7822_v17, %v6732_v56 }
0x33ce   :  { %v6440_v23 = vmul.f32 %v7825_v4, %v6436_v32  ;;  %v6740_v42 = vadd.f32 %v7823_v19, %v6736_v60  ;;  %v9380_v4 = vld [vmem:[#allocation7 + $0xdc0] sm:$0xff] }
0x33cf   :  { %6520 = vmatpush.msrb.mxu3 %v9380_v4 }
0x33d0   :  { %v6444_v28 = vadd.f32 %v7826_v48, %v6440_v23  ;;  %v9392_v48 = vld [vmem:[#allocation7 + $0xda0] sm:$0xff] }
0x33d1   :  { %6521 = vmatpush.msrb.mxu3 %v9383_v8  ;;  %v7829_v23 = vld [vmem:[#allocation7 + $0xca0] ss:$0 sm:$0xff] }
0x33d2   :  { %7684 = vmatmul.msk.f32.gmra.mxu2 %vm477_vm7, %v6444_v28 }
0x33d3   :  { %6522 = vmatpush.msrb.mxu3 %v9386_v22 }
0x33d5   :  { %6523 = vmatpush.msrb.mxu3 %v9389_v9 }
0x33d7   :  { %6524 = vmatpush.msrb.mxu3 %v9392_v48 }
0x33d9   :  { %6525 = vmatpush.msrb.mxu3 %v9395_v34 }
0x33da   :  { %7689 = vmatmul.msk.f32.vlgmr.msrb.gmra.mxu2 %vm1314_vm9, %v6739_v54 }
0x33db   :  { %6526 = vmatpush.msrb.mxu3 %v9398_v55 }
0x33dd   :  { %6527 = vmatpush.msrb.mxu3 %v9401_v38 }
0x33df   :  { %6528 = vmatpush.msrb.mxu3 %v9404_v26 }
0x33e1   :  { %6529 = vmatpush.msrb.mxu3 %v9407_v41 }
0x33e2   :  { %7690 = vmatmul.msk.f32.gmra.mxu2 %vm1314_vm9, %v6740_v42 }
0x33e3   :  { %6530 = vmatpush.msrb.mxu3 %v9410_v0 }
0x33e5   :  { %6531 = vmatpush.msrb.mxu3 %v9413_v37 }
0x3426   :  { %v6562_v36 = vpop.f32.mrf.mxu1 }
0x3427   :  { %v6563_v5 = vadd.f32 %v7828_v59, %v6562_v36 }
0x3429   :  { %7686 = vmatmul.msk.f32.vlgmr.msra.gmra.mxu0 %vm477_vm7, %v6563_v5 }
0x343e   :  { %v6474_v35 = vpop.f32.mrf.mxu2 }
0x343f   :  { %v6475_v27 = vadd.f32 %v7827_v46, %v6474_v35 }
0x3441   :  { %v6480_v30 = vmul.f32 %v6475_v27, %v6475_v27 }
0x3443   :  { %v6482_v10 = vmul.f32 %v6480_v30, %v6475_v27 }
0x3445   :  { %v6484_v13 = vmul.f32 0.044715, %v6482_v10 }
0x3447   :  { %v6486_v12 = vadd.f32 %v6484_v13, %v6475_v27 }
0x3449   :  { %v6488_v43 = vmul.f32 0.7978846, %v6486_v12 }
0x344b   :  { %8107 = vtanh.f32 %v6488_v43 }
0x3451   :  { %v8108_v58 = vpop.eup %8107 }
0x3452   :  { %v6492_v44 = vadd.f32 1.0, %v8108_v58 }
0x3454   :  { %v6494_v47 = vmul.f32 0.5, %v6492_v44 }
0x3455   :  { %v6477_v50 = vpop.f32.mrf.mxu2 }
0x3456   :  { %v6496_v32 = vmul.f32 %v6494_v47, %v6475_v27  ;;  %v6478_v16 = vadd.f32 %v7827_v46, %v6477_v50 }
0x3458   :  { %v6481_v6 = vmul.f32 %v6478_v16, %v6478_v16  ;;  %6532 = vmatmul.f32.vlgmr.msrb.gmra.mxu3 %v6496_v32 }
0x345a   :  { %v6483_v15 = vmul.f32 %v6481_v6, %v6478_v16 }
0x345c   :  { %v6485_v17 = vmul.f32 0.044715, %v6483_v15 }
0x345d   :  { %v6774_v14 = vpop.f32.mrf.mxu2 }
0x345e   :  { %v6487_v51 = vadd.f32 %v6485_v17, %v6478_v16  ;;  %v6775_v28 = vadd.f32 %v7829_v23, %v6774_v14 }
0x3460   :  { %v9422_v40 = vadd.f32 %v6775_v28, %v8501_v53  ;;  %v6489_v20 = vmul.f32 0.7978846, %v6487_v51 }
0x3462   :  { %v6782_v3 = vsel %vm477_vm7, %v9422_v40, 0.0  ;;  %8109 = vtanh.f32 %v6489_v20 }
0x3463   :  { %6783 = vadd.xlane.f32.xlu0 %v6782_v3 }
0x3465   :  { %v6777_v19 = vpop.f32.mrf.mxu2 }
0x3466   :  { %v6778_v11 = vadd.f32 %v7829_v23, %v6777_v19 }
0x3468   :  { %v8110_v2 = vpop.eup %8109  ;;  %v9427_v54 = vadd.f32 %v6778_v11, %v8506_v29 }
0x3469   :  { %v6493_v56 = vadd.f32 1.0, %v8110_v2 }
0x346a   :  { %v6785_v60 = vsel %vm477_vm7, %v9427_v54, 0.0 }
0x346b   :  { %6786 = vadd.xlane.f32.xlu2 %v6785_v60  ;;  %v6495_v42 = vmul.f32 0.5, %v6493_v56 }
0x346d   :  { %v6497_v53 = vmul.f32 %v6495_v42, %v6478_v16 }
0x346f   :  { %6535 = vmatmul.f32.gmra.mxu3 %v6497_v53 }
0x34a6   :  { %v6591_v46 = vpop.f32.mrf.mxu0 }
0x34a7   :  { %v6592_v35 = vadd.f32 %v7831_v24, %v6591_v46 }
0x34a9   :  { %v6596_v5 = vperm.slane %v6592_v35, 0  ;;  %v6595_v32 = vrot.slane %v6592_v35, 1 }
0x34ab   :  { %v6597_v6 = vperm.slane %v6595_v32, 0 }
0x34d6   :  { %v6784_v52 = vpop.xlane.xlu0 %6783 }
0x34d7   :  { %v6788_v59 = vmul.f32 %v6784_v52, %v8415_v33 }
0x34d9   :  { %v6790_v36 = vsub.f32 %v9422_v40, %v6788_v59 }
0x34db   :  { %v6533_v63 = vpop.f32.mrf.mxu3  ;;  %v6792_v29 = vmul.f32 %v6790_v36, %v6790_v36 }
0x34dc   :  { %v6534_v27 = vadd.f32 %v7830_v49, %v6533_v63  ;;  %v7832_v63 = vld [vmem:[#allocation7 + $0xca8] ss:$0 sm:$0xff] }
0x34dd   :  { %v6794_v30 = vsel %vm477_vm7, %v6792_v29, 0.0 }
0x34de   :  { %v6539_v10 = vadd.f32 %v6534_v27, %v9308_v39  ;;  %v6787_v13 = vpop.xlane.xlu2 %6786  ;;  %6795 = vadd.xlane.f32.xlu1 %v6794_v30 }
0x34df   :  { %v6789_v12 = vmul.f32 %v6787_v13, %v8415_v33 }
0x34e0   :  { %v6600_v43 = vadd.f32 %v6596_v5, %v6539_v10  ;;  %v7833_v5 = vld [vmem:[#allocation7 + $0xcb0] ss:$0 sm:$0xff] }
0x34e1   :  { %v6791_v58 = vsub.f32 %v9427_v54, %v6789_v12 }
0x34e2   :  { %v6602_v44 = vsel %vm477_vm7, %v6600_v43, 0.0 }
0x34e3   :  { %6603 = vadd.xlane.f32.xlu2 %v6602_v44  ;;  %v6793_v47 = vmul.f32 %v6791_v58, %v6791_v58 }
0x34e5   :  { %v6797_v50 = vsel %vm477_vm7, %v6793_v47, 0.0 }
0x34e6   :  { %6798 = vadd.xlane.f32.xlu0 %v6797_v50 }
0x34f2   :  { %v6536_v16 = vpop.f32.mrf.mxu3 }
0x34f3   :  { %v6537_v15 = vadd.f32 %v7830_v49, %v6536_v16 }
0x34f5   :  { %v6540_v39 = vadd.f32 %v6537_v15, %v9315_v1 }
0x34f7   :  { %v6601_v23 = vadd.f32 %v6597_v6, %v6540_v39 }
0x34f9   :  { %v6605_v17 = vsel %vm477_vm7, %v6601_v23, 0.0 }
0x34fa   :  { %6606 = vadd.xlane.f32.xlu1 %v6605_v17 }
0x3551   :  { %v6796_v14 = vpop.xlane.xlu1 %6795 }
0x3552   :  { %v6800_v51 = vmul.f32 %v6796_v14, %v8415_v33  ;;  %v9453_v14 = vld [vmem:[#allocation7 + $0xeb8] sm:$0xff] }
0x3553   :  { %6678 = vmatpush.msra.mxu1 %v9453_v14 }
0x3554   :  { %v6802_v28 = vadd.f32 1e-05, %v6800_v51  ;;  %v9456_v51 = vld [vmem:[#allocation7 + $0xeb0] sm:$0xff] }
0x3555   :  { %6679 = vmatpush.msra.mxu1 %v9456_v51 }
0x3556   :  { %8111 = vrsqrt.f32 %v6802_v28  ;;  %v6604_v20 = vpop.xlane.xlu2 %6603  ;;  %vm6810_vm5 = vweird.f32 %v6802_v28 }
0x3557   :  { %v6608_v3 = vmul.f32 %v6604_v20, %v8415_v33 }
0x3559   :  { %v9443_v19 = vsub.f32 %v6600_v43, %v6608_v3  ;;  %v6799_v11 = vpop.xlane.xlu0 %6798 }
0x355a   :  { %v6801_v2 = vmul.f32 %v6799_v11, %v8415_v33 }
0x355b   :  { %v6612_v1 = vmul.f32 %v9443_v19, %v9443_v19 }
0x355c   :  { %v8112_v56 = vpop.eup %8111  ;;  %v6803_v60 = vadd.f32 1e-05, %v6801_v2 }
0x355d   :  { %v6805_v42 = vmul.f32 %v8112_v56, %v6802_v28  ;;  %v6614_v53 = vsel %vm477_vm7, %v6612_v1, 0.0  ;;  %vm6811_vm9 = vweird.f32 %v8112_v56  ;;  %v9459_v28 = vld [vmem:[#allocation7 + $0xea8] sm:$0xff] }
0x355e   :  { %8113 = vrsqrt.f32 %v6803_v60  ;;  %6615 = vadd.xlane.f32.xlu0 %v6614_v53  ;;  %vm6812_vm6 = vmor %vm6810_vm5, %vm6811_vm9  ;;  %vm6820_vm11 = vweird.f32 %v6803_v60  ;;  %6680 = vmatpush.msra.mxu1 %v9459_v28  ;;  %v7834_v53 = vld [vmem:[#allocation7 + $0xe90] ss:$0 sm:$0xff] }
0x355f   :  { %v6806_v24 = vmul.f32 %v8112_v56, %v6805_v42 }
0x3561   :  { %v6807_v46 = vmul.f32 0.5, %v6806_v24 }
0x3563   :  { %v6808_v52 = vsub.f32 1.5, %v6807_v46  ;;  %v7835_v46 = vld [vmem:[#allocation7 + $0xe98] ss:$0 sm:$0xff] }
0x3564   :  { %v8114_v59 = vpop.eup %8113 }
0x3565   :  { %v6809_v49 = vmul.f32 %v8112_v56, %v6808_v52  ;;  %v6815_v35 = vmul.f32 %v8114_v59, %v6803_v60  ;;  %vm6821_vm10 = vweird.f32 %v8114_v59 }
0x3566   :  { %vm6822_vm12 = vmor %vm6820_vm11, %vm6821_vm10 }
0x3567   :  { %v6813_v29 = vsel %vm6812_vm6, %v8112_v56, %v6809_v49  ;;  %v6816_v27 = vmul.f32 %v8114_v59, %v6815_v35  ;;  %v7836_v49 = vld [vmem:[#allocation7 + $0xce8] ss:$0 sm:$0xff] }
0x3568   :  { %v6824_v30 = vmul.f32 %v6813_v29, %v6790_v36 }
0x3569   :  { %v6817_v10 = vmul.f32 0.5, %v6816_v27 }
0x356a   :  { %v6828_v13 = vmul.f32 %v7832_v63, %v6824_v30 }
0x356b   :  { %v6818_v12 = vsub.f32 1.5, %v6817_v10 }
0x356c   :  { %v6832_v43 = vadd.f32 %v7833_v5, %v6828_v13 }
0x356d   :  { %v6819_v44 = vmul.f32 %v8114_v59, %v6818_v12  ;;  %v6607_v47 = vpop.xlane.xlu1 %6606 }
0x356e   :  { %v6609_v50 = vmul.f32 %v6607_v47, %v8415_v33  ;;  %7691 = vmatmul.msk.f32.vlgmr.msrb.gmra.mxu0 %vm477_vm7, %v6832_v43 }
0x356f   :  { %v6823_v32 = vsel %vm6822_vm12, %v8114_v59, %v6819_v44 }
0x3570   :  { %v6825_v16 = vmul.f32 %v6823_v32, %v6791_v58  ;;  %v6611_v6 = vsub.f32 %v6601_v23, %v6609_v50  ;;  %v9462_v58 = vld [vmem:[#allocation7 + $0xea0] sm:$0xff] }
0x3571   :  { %6681 = vmatpush.msra.mxu1 %v9462_v58 }
0x3572   :  { %v6613_v15 = vmul.f32 %v6611_v6, %v6611_v6  ;;  %v6829_v39 = vmul.f32 %v7832_v63, %v6825_v16 }
0x3574   :  { %v6617_v36 = vsel %vm477_vm7, %v6613_v15, 0.0  ;;  %v6833_v17 = vadd.f32 %v7833_v5, %v6829_v39 }
0x3575   :  { %6618 = vadd.xlane.f32.xlu1 %v6617_v36 }
0x3576   :  { %7692 = vmatmul.msk.f32.gmra.mxu0 %vm477_vm7, %v6833_v17 }
0x35d1   :  { %v6616_v23 = vpop.xlane.xlu0 %6615 }
0x35d2   :  { %v6620_v20 = vmul.f32 %v6616_v23, %v8415_v33 }
0x35d4   :  { %v6622_v3 = vadd.f32 1e-05, %v6620_v20 }
0x35d6   :  { %8115 = vrsqrt.f32 %v6622_v3  ;;  %vm6630_vm14 = vweird.f32 %v6622_v3 }
0x35dc   :  { %v8116_v11 = vpop.eup %8115 }
0x35dd   :  { %v6625_v2 = vmul.f32 %v8116_v11, %v6622_v3  ;;  %vm6631_vm13 = vweird.f32 %v8116_v11 }
0x35de   :  { %vm6632_vm15 = vmor %vm6630_vm14, %vm6631_vm13 }
0x35df   :  { %v6626_v1 = vmul.f32 %v8116_v11, %v6625_v2 }
0x35e1   :  { %v6627_v56 = vmul.f32 0.5, %v6626_v1 }
0x35e3   :  { %v6628_v60 = vsub.f32 1.5, %v6627_v56 }
0x35e5   :  { %v6629_v42 = vmul.f32 %v8116_v11, %v6628_v60 }
0x35e7   :  { %v6633_v24 = vsel %vm6632_vm15, %v8116_v11, %v6629_v42 }
0x35e8   :  { %v6644_v52 = vmul.f32 %v6633_v24, %v9443_v19  ;;  %v6619_v59 = vpop.xlane.xlu1 %6618 }
0x35e9   :  { %v6621_v35 = vmul.f32 %v6619_v59, %v8415_v33 }
0x35ea   :  { %v6648_v63 = vmul.f32 %v7834_v53, %v6644_v52 }
0x35eb   :  { %v6623_v29 = vadd.f32 1e-05, %v6621_v35  ;;  %v6863_v27 = vpop.f32.mrf.mxu0 }
0x35ec   :  { %v6652_v5 = vadd.f32 %v7835_v46, %v6648_v63  ;;  %v9468_v30 = vadd.f32 %v7836_v49, %v6863_v27 }
0x35ed   :  { %8117 = vrsqrt.f32 %v6623_v29  ;;  %vm6640_vm0 = vweird.f32 %v6623_v29 }
0x35ee   :  { %6871 = vrot.lane.b32.xlu2 %v9468_v30, %s8294_s15  ;;  %6875 = vrot.lane.b32.xlu1 %v9468_v30, %s8295_s16 }
0x35ef   :  { %7687 = vmatmul.msk.f32.vlgmr.msra.gmra.mxu1 %vm477_vm7, %v6652_v5 }
0x35f3   :  { %v8118_v19 = vpop.eup %8117  ;;  %v6866_v10 = vpop.f32.mrf.mxu0 }
0x35f4   :  { %v6635_v13 = vmul.f32 %v8118_v19, %v6623_v29  ;;  %v9475_v12 = vadd.f32 %v7836_v49, %v6866_v10  ;;  %vm6641_vm1 = vweird.f32 %v8118_v19 }
0x35f5   :  { %vm6642_vm2 = vmor %vm6640_vm0, %vm6641_vm1 }
0x35f6   :  { %v6636_v43 = vmul.f32 %v8118_v19, %v6635_v13  ;;  %6873 = vrot.lane.b32.xlu0 %v9475_v12, %s8294_s15 }
0x35f8   :  { %v6637_v44 = vmul.f32 0.5, %v6636_v43 }
0x35fa   :  { %v6638_v47 = vsub.f32 1.5, %v6637_v44 }
0x35fc   :  { %v6639_v50 = vmul.f32 %v8118_v19, %v6638_v47 }
0x35fe   :  { %v6643_v32 = vsel %vm6642_vm2, %v8118_v19, %v6639_v50 }
0x35ff   :  { %v6645_v16 = vmul.f32 %v6643_v32, %v6611_v6 }
0x3601   :  { %v6649_v15 = vmul.f32 %v7834_v53, %v6645_v16 }
0x3603   :  { %v6653_v39 = vadd.f32 %v7835_v46, %v6649_v15 }
0x3605   :  { %7688 = vmatmul.msk.f32.gmra.mxu1 %vm477_vm7, %v6653_v39 }
0x3648   :  { %v6872_v36 = vpop.permute.xlu2 %6871 }
0x3649   :  { %6927 = vrot.lane.b32.xlu2 %v6872_v36, %s8295_s16 }
0x3651   :  { %6901 = vrot.lane.b32.xlu2 %v9475_v12, %s8295_s16 }
0x3660   :  { %v6876_v17 = vpop.permute.xlu1 %6875 }
0x3661   :  { %7693 = vmatpush.xpose.msk.msrb.mxu1 %vm469_vm8, %v6876_v17 }
0x3664   :  { %7694 = vmatmul.msk.f32.vlgmr.msrb.gmra.mxu1 %vm469_vm8, %v9468_v30 }
0x3668   :  { %v6874_v23 = vpop.permute.xlu0 %6873 }
0x3669   :  { %6953 = vrot.lane.b32.xlu0 %v6874_v23, %s8295_s16  ;;  %v7758_v49 = vpack.i.bf16 %v6874_v23, %v6872_v36 }
0x366c   :  { %v9492_v3 = vpop.f32.mrf.mxu1 }
0x3682   :  { %v9494_v11 = vpop.f32.mrf.mxu1 }
0x36a3   :  { %v6928_v6 = vpop.permute.xlu2 %6927 }
0x36a4   :  { %7697 = vmatpush.xpose.msk.msra.mxu0 %vm469_vm8, %v6928_v6 }
0x36a7   :  { %7698 = vmatmul.msk.f32.vlgmr.msra.gmra.mxu0 %vm469_vm8, %v6872_v36 }
0x36ab   :  { %v6902_v20 = vpop.permute.xlu2 %6901 }
0x36ac   :  { %7695 = vmatpush.xpose.msk.msra.mxu2 %vm469_vm8, %v6902_v20 }
0x36af   :  { %7696 = vmatmul.msk.f32.vlgmr.msra.gmra.mxu2 %vm469_vm8, %v9475_v12 }
0x36db   :  { %v6954_v2 = vpop.permute.xlu0 %6953 }
0x36dc   :  { %7699 = vmatpush.xpose.msk.msra.mxu1 %vm469_vm8, %v6954_v2 }
0x36df   :  { %7700 = vmatmul.msk.f32.vlgmr.msra.gmra.mxu1 %vm469_vm8, %v6874_v23 }
0x36e1   :  { %v6898_v1 = vpop.f32.mrf.mxu1 }
0x36e2   :  { %v6979_v56 = vmul.f32 0.25, %v6898_v1 }
0x36e4   :  { %v6983_v60 = vsel %vm794_vm4, %v6979_v56, -inf }
0x36e5   :  { %6984 = vmax.xlane.f32.xlu2 %v6983_v60 }
0x3724   :  { %v6950_v42 = vpop.f32.mrf.mxu0 }
0x3725   :  { %v6981_v53 = vmul.f32 0.25, %v6950_v42 }
0x3727   :  { %v6989_v24 = vsel %vm794_vm4, %v6981_v53, -inf }
0x3728   :  { %6990 = vmax.xlane.f32.xlu0 %v6989_v24 }
0x3732   :  { %v6924_v46 = vpop.f32.mrf.mxu2 }
0x3733   :  { %v6980_v52 = vmul.f32 0.25, %v6924_v46 }
0x3735   :  { %v6986_v59 = vsel %vm794_vm4, %v6980_v52, -inf }
0x3736   :  { %6987 = vmax.xlane.f32.xlu0 %v6986_v59 }
0x374a   :  { %7759 = vrot.lane.b32.xlu0 %v7758_v49, %s8296_s17 }
0x3758   :  { %v6985_v27 = vpop.xlane.xlu2 %6984 }
0x3759   :  { %v6995_v10 = vsub.f32 %v6979_v56, %v6985_v27 }
0x375b   :  { %v6999_v43 = vmul.f32 1.442695, %v6995_v10 }
0x375c   :  { %v6976_v35 = vpop.f32.mrf.mxu1 }
0x375d   :  { %v6982_v63 = vmul.f32 0.25, %v6976_v35 }
0x375f   :  { %v6992_v29 = vsel %vm794_vm4, %v6982_v63, -inf }
0x3760   :  { %6993 = vmax.xlane.f32.xlu1 %v6992_v29 }
0x379b   :  { %v6991_v5 = vpop.xlane.xlu0 %6990 }
0x379c   :  { %v6997_v19 = vsub.f32 %v6981_v53, %v6991_v5 }
0x379e   :  { %v7003_v13 = vmul.f32 1.442695, %v6997_v19 }
0x37a0   :  { %8119 = vpow2.f32 %v7003_v13 }
0x37a1   :  { %8121 = vpow2.f32 %v6999_v43  ;;  %v7233_v43 = vld [vmem:[#allocation7 + $0xd30] sm:$0xff] }
0x37a6   :  { %v9503_v44 = vpop.eup %8119 }
0x37a7   :  { %v7013_v47 = vsel %vm794_vm4, %v9503_v44, 0.0  ;;  %v9507_v50 = vpop.eup %8121 }
0x37a8   :  { %7014 = vadd.xlane.f32.xlu1 %v7013_v47  ;;  %v7007_v32 = vsel %vm794_vm4, %v9507_v50, 0.0 }
0x37a9   :  { %v6988_v16 = vpop.xlane.xlu0 %6987 }
0x37b0   :  { %7008 = vadd.xlane.f32.xlu1 %v7007_v32 }
0x37bc   :  { %v7760_v15 = vpop.permute.xlu0 %7759 }
0x37bd   :  { %v7762_v39 = vunpack.i.h.bf16 %v7760_v15  ;;  %v7761_v36 = vunpack.i.l.bf16 %v7760_v15 }
0x37bf   :  { %7152 = vmatpush.msrb.mxu0 %v7761_v36  ;;  %7178 = vmatpush.msrb.mxu1 %v7762_v39 }
0x37c1   :  { %7340 = vmatpush.msra.mxu0 %v9336_v62  ;;  %7387 = vmatpush.msra.mxu1 %v9362_v7 }
0x37c3   :  { %7341 = vmatpush.msra.mxu0 %v9339_v21  ;;  %7388 = vmatpush.msra.mxu1 %v9364_v61 }
0x37c5   :  { %7342 = vmatpush.msra.mxu0 %v9342_v45  ;;  %7389 = vmatpush.msra.mxu1 %v9367_v31  ;;  %v6996_v45 = vsub.f32 %v6980_v52, %v6988_v16  ;;  %v7232_v16 = vld [vmem:[#allocation7 + $0xd28] sm:$0xff] }
0x37c7   :  { %7343 = vmatpush.msra.mxu0 %v9345_v25  ;;  %7390 = vmatpush.msra.mxu1 %v9377_v18  ;;  %v7001_v7 = vmul.f32 1.442695, %v6996_v45 }
0x37c9   :  { %7391 = vmatpush.msra.mxu1 %v9380_v4  ;;  %7079 = vrot.lane.b32.xlu1 %v9468_v30, %s8296_s17 }
0x37cb   :  { %7392 = vmatpush.msra.mxu1 %v9383_v8 }
0x37cd   :  { %7393 = vmatpush.msra.mxu1 %v9386_v22 }
0x37cf   :  { %7394 = vmatpush.msra.mxu1 %v9389_v9 }
0x37d1   :  { %7395 = vmatpush.msra.mxu1 %v9392_v48 }
0x37d3   :  { %7396 = vmatpush.msra.mxu1 %v9395_v34  ;;  %v6994_v62 = vpop.xlane.xlu1 %6993 }
0x37d4   :  { %v6998_v21 = vsub.f32 %v6982_v63, %v6994_v62  ;;  %v7231_v62 = vld [vmem:[#allocation7 + $0xd20] sm:$0xff] }
0x37d5   :  { %7397 = vmatpush.msra.mxu1 %v9398_v55 }
0x37d6   :  { %v7005_v25 = vmul.f32 1.442695, %v6998_v21 }
0x37d7   :  { %7398 = vmatpush.msra.mxu1 %v9401_v38 }
0x37d8   :  { %8123 = vpow2.f32 %v7005_v25  ;;  %v7230_v25 = vld [vmem:[#allocation7 + $0xd18] sm:$0xff] }
0x37d9   :  { %7399 = vmatpush.msra.mxu1 %v9404_v26  ;;  %8125 = vpow2.f32 %v7001_v7 }
0x37db   :  { %7400 = vmatpush.msra.mxu1 %v9407_v41 }
0x37dd   :  { %7401 = vmatpush.msra.mxu1 %v9410_v0 }
0x37de   :  { %v9532_v61 = vpop.eup %8123 }
0x37df   :  { %7402 = vmatpush.msra.mxu1 %v9413_v37  ;;  %v7016_v31 = vsel %vm794_vm4, %v9532_v61, 0.0  ;;  %v9537_v18 = vpop.eup %8125 }
0x37e0   :  { %7017 = vadd.xlane.f32.xlu2 %v7016_v31  ;;  %v7010_v4 = vsel %vm794_vm4, %v9537_v18, 0.0 }
0x37e8   :  { %7011 = vadd.xlane.f32.xlu2 %v7010_v4 }
0x3800   :  { %7105 = vrot.lane.b32.xlu2 %v9475_v12, %s8296_s17 }
0x381b   :  { %v7015_v8 = vpop.xlane.xlu1 %7014 }
0x381c   :  { %8127 = vrcp.f32 %v7015_v8  ;;  %v7060_v55 = vand.u32 2147483648, %v7015_v8  ;;  %v7058_v26 = vand.u32 2147483647, %v7015_v8  ;;  %vm7054_vm9 = vweird.f32 %v7015_v8 }
0x381e   :  { %v7061_v37 = vor.u32 1.1754944e-38, %v7060_v55  ;;  %vm7059_vm6 = vcmp.eq.f32.partialorder %v7058_v26, 8.507059e+37  ;;  %v7838_v26 = vld [vmem:[#allocation7 + $0xd38] ss:$0 sm:$0xff] }
0x3822   :  { %v8128_v22 = vpop.eup %8127 }
0x3823   :  { %v7050_v9 = vmul.f32 %v8128_v22, %v7015_v8  ;;  %v7009_v48 = vpop.xlane.xlu1 %7008  ;;  %vm7055_vm3 = vweird.f32 %v8128_v22 }
0x3824   :  { %8129 = vrcp.f32 %v7009_v48  ;;  %vm7056_vm5 = vmor %vm7054_vm9, %vm7055_vm3  ;;  %v7030_v1 = vand.u32 2147483648, %v7009_v48  ;;  %vm7024_vm11 = vweird.f32 %v7009_v48  ;;  %v7028_v56 = vand.u32 2147483647, %v7009_v48 }
0x3825   :  { %v7051_v34 = vsub.f32 1.0, %v7050_v9  ;;  %v7196_v9 = vld [vmem:[#allocation7 + $0xd08] sm:$0xff] }
0x3826   :  { %v7031_v42 = vor.u32 1.1754944e-38, %v7030_v1  ;;  %vm7029_vm13 = vcmp.eq.f32.partialorder %v7028_v56, 8.507059e+37 }
0x3827   :  { %v7052_v38 = vmul.f32 %v8128_v22, %v7051_v34 }
0x3829   :  { %v7053_v41 = vadd.f32 %v8128_v22, %v7052_v38 }
0x382a   :  { %v8130_v0 = vpop.eup %8129 }
0x382b   :  { %v7057_v30 = vsel %vm7056_vm5, %v8128_v22, %v7053_v41  ;;  %v7020_v17 = vmul.f32 %v8130_v0, %v7009_v48  ;;  %vm7025_vm10 = vweird.f32 %v8130_v0  ;;  %v7195_v48 = vld [vmem:[#allocation7 + $0xd00] sm:$0xff] }
0x382c   :  { %v7062_v12 = vsel %vm7059_vm6, %v7061_v37, %v7057_v30  ;;  %vm7026_vm12 = vmor %vm7024_vm11, %vm7025_vm10 }
0x382d   :  { %v7063_v23 = vmul.f32 %v9503_v44, %v7062_v12  ;;  %v7021_v6 = vsub.f32 1.0, %v7020_v17 }
0x382f   :  { %v7022_v20 = vmul.f32 %v8130_v0, %v7021_v6  ;;  %7703 = vmatmul.msk.f32.vlgmr.msrb.gmra.mxu0 %vm794_vm4, %v7063_v23 }
0x3831   :  { %v7023_v2 = vadd.f32 %v8130_v0, %v7022_v20 }
0x3833   :  { %v7027_v60 = vsel %vm7026_vm12, %v8130_v0, %v7023_v2  ;;  %v7839_v0 = vld [vmem:[#allocation7 + $0xd10] ss:$0 sm:$0xff] }
0x3834   :  { %v7032_v53 = vsel %vm7029_vm13, %v7031_v42, %v7027_v60 }
0x3835   :  { %v7033_v24 = vmul.f32 %v9507_v50, %v7032_v53 }
0x383b   :  { %v7080_v46 = vpop.permute.xlu1 %7079 }
0x383c   :  { %7100 = vmatpush.msrb.mxu2 %v7080_v46 }
0x383d   :  { %7701 = vmatmul.msk.f32.vlgmr.msrb.gmra.mxu2 %vm794_vm4, %v7033_v24 }
0x383e   :  { %7217 = vmatpush.msra.mxu2 %v7196_v9 }
0x3840   :  { %7218 = vmatpush.msra.mxu2 %v7195_v48 }
0x3853   :  { %v7018_v52 = vpop.xlane.xlu2 %7017 }
0x3854   :  { %8131 = vrcp.f32 %v7018_v52  ;;  %v7075_v29 = vand.u32 2147483648, %v7018_v52  ;;  %v7073_v5 = vand.u32 2147483647, %v7018_v52  ;;  %vm7069_vm15 = vweird.f32 %v7018_v52 }
0x3856   :  { %v7076_v13 = vor.u32 1.1754944e-38, %v7075_v29  ;;  %vm7074_vm0 = vcmp.eq.f32.partialorder %v7073_v5, 8.507059e+37 }
0x385a   :  { %v8132_v59 = vpop.eup %8131 }
0x385b   :  { %v7065_v49 = vmul.f32 %v8132_v59, %v7018_v52  ;;  %v7012_v35 = vpop.xlane.xlu2 %7011  ;;  %vm7070_vm14 = vweird.f32 %v8132_v59 }
0x385c   :  { %8133 = vrcp.f32 %v7012_v35  ;;  %vm7071_vm1 = vmor %vm7069_vm15, %vm7070_vm14  ;;  %v7045_v36 = vand.u32 2147483648, %v7012_v35  ;;  %v7043_v45 = vand.u32 2147483647, %v7012_v35  ;;  %vm7039_vm3 = vweird.f32 %v7012_v35 }
0x385d   :  { %v7066_v63 = vsub.f32 1.0, %v7065_v49 }
0x385e   :  { %v7046_v31 = vor.u32 1.1754944e-38, %v7045_v36  ;;  %vm7044_vm5 = vcmp.eq.f32.partialorder %v7043_v45, 8.507059e+37 }
0x385f   :  { %v7067_v27 = vmul.f32 %v8132_v59, %v7066_v63 }
0x3861   :  { %v7068_v19 = vadd.f32 %v8132_v59, %v7067_v27 }
0x3862   :  { %v8134_v10 = vpop.eup %8133 }
0x3863   :  { %v7072_v44 = vsel %vm7071_vm1, %v8132_v59, %v7068_v19  ;;  %v7035_v47 = vmul.f32 %v8134_v10, %v7012_v35  ;;  %v7106_v50 = vpop.permute.xlu2 %7105  ;;  %vm7040_vm2 = vweird.f32 %v8134_v10 }
0x3864   :  { %v7077_v32 = vsel %vm7074_vm0, %v7076_v13, %v7072_v44  ;;  %7126 = vmatpush.msra.mxu3 %v7106_v50  ;;  %vm7041_vm9 = vmor %vm7039_vm3, %vm7040_vm2 }
0x3865   :  { %v7078_v15 = vmul.f32 %v9532_v61, %v7077_v32  ;;  %v7036_v39 = vsub.f32 1.0, %v7035_v47 }
0x3866   :  { %7248 = vmatpush.msrb.mxu3 %v7233_v43 }
0x3867   :  { %v7037_v21 = vmul.f32 %v8134_v10, %v7036_v39  ;;  %7704 = vmatmul.msk.f32.vlgmr.msrb.gmra.mxu1 %vm794_vm4, %v7078_v15  ;;  %v7841_v39 = vld [vmem:[#allocation7 + $0xcc0] ss:$0 sm:$0xff] }
0x3868   :  { %7249 = vmatpush.msrb.mxu3 %v7232_v16  ;;  %v7840_v16 = vld [vmem:[#allocation7 + $0xcb8] ss:$0 sm:$0xff] }
0x3869   :  { %v7038_v7 = vadd.f32 %v8134_v10, %v7037_v21 }
0x386a   :  { %7250 = vmatpush.msrb.mxu3 %v7231_v62 }
0x386b   :  { %v7042_v4 = vsel %vm7041_vm9, %v8134_v10, %v7038_v7 }
0x386c   :  { %7251 = vmatpush.msrb.mxu3 %v7230_v25  ;;  %v7047_v61 = vsel %vm7044_vm5, %v7046_v31, %v7042_v4 }
0x386d   :  { %v7048_v8 = vmul.f32 %v9537_v18, %v7047_v61  ;;  %v7194_v18 = vld [vmem:[#allocation7 + $0xcf8] sm:$0xff] }
0x386e   :  { %7219 = vmatpush.msra.mxu2 %v7194_v18 }
0x386f   :  { %7702 = vmatmul.msk.f32.vlgmr.msra.gmra.mxu3 %vm794_vm4, %v7048_v8 }
0x3870   :  { %7488 = vmatpush.msra.mxu3 %v9453_v14  ;;  %v7193_v14 = vld [vmem:[#allocation7 + $0xcf0] sm:$0xff] }
0x3871   :  { %7220 = vmatpush.msra.mxu2 %v7193_v14 }
0x3872   :  { %7489 = vmatpush.msra.mxu3 %v9456_v51 }
0x3874   :  { %7490 = vmatpush.msra.mxu3 %v9459_v28 }
0x3876   :  { %7491 = vmatpush.msra.mxu3 %v9462_v58 }
0x3877   :  { %7707 = vmatmul.msk.f32.vlgmr.msrb.gmra.mxu3 %vm477_vm7, %v8423_v57 }
0x38ac   :  { %v7154_v22 = vpop.f32.mrf.mxu0 }
0x38ad   :  { %7185 = vrot.lane.b32.xlu0 %v7154_v22, %s8292_s1 }
0x38c0   :  { %v7102_v51 = vpop.f32.mrf.mxu2 }
0x38e4   :  { %v7180_v34 = vpop.f32.mrf.mxu1 }
0x38e5   :  { %7187 = vrot.lane.b32.xlu0 %v7180_v34, %s8292_s1 }
0x38f2   :  { %v7128_v57 = vpop.f32.mrf.mxu3 }
0x38fa   :  { %v7253_v41 = vpop.f32.mrf.mxu3 }
0x38fb   :  { %v7254_v37 = vadd.f32 %v7838_v26, %v7253_v41 }
0x38fd   :  { %v7258_v12 = vperm.slane %v7254_v37, 0  ;;  %v7257_v2 = vrot.slane %v7254_v37, 1 }
0x38ff   :  { %v7259_v60 = vperm.slane %v7257_v2, 0 }
0x391f   :  { %v7186_v28 = vpop.permute.xlu0 %7185 }
0x3920   :  { %v7191_v58 = vsel %vm469_vm8, %v7102_v51, %v7186_v28  ;;  %v7842_v51 = vld [vmem:[#allocation7 + $0xd60] ss:$0 sm:$0xff] }
0x3921   :  { %7705 = vmatmul.msk.f32.vlgmr.msra.gmra.mxu2 %vm477_vm7, %v7191_v58 }
0x3957   :  { %v7188_v55 = vpop.permute.xlu0 %7187 }
0x3958   :  { %v7192_v38 = vsel %vm469_vm8, %v7128_v57, %v7188_v55 }
0x3959   :  { %7706 = vmatmul.msk.f32.gmra.mxu2 %vm477_vm7, %v7192_v38 }
0x39a4   :  { %v7222_v30 = vpop.f32.mrf.mxu2 }
0x39a5   :  { %v7223_v17 = vadd.f32 %v7839_v0, %v7222_v30 }
0x39a7   :  { %v7228_v23 = vadd.f32 %v7223_v17, %v9422_v40 }
0x39a9   :  { %v9564_v6 = vadd.f32 %v7258_v12, %v7228_v23 }
0x39ab   :  { %v7264_v20 = vsel %vm477_vm7, %v9564_v6, 0.0 }
0x39ac   :  { %7265 = vadd.xlane.f32.xlu1 %v7264_v20 }
0x39dc   :  { %v7225_v1 = vpop.f32.mrf.mxu2 }
0x39dd   :  { %v7226_v56 = vadd.f32 %v7839_v0, %v7225_v1 }
0x39df   :  { %v7229_v42 = vadd.f32 %v7226_v56, %v9427_v54 }
0x39e1   :  { %v9569_v53 = vadd.f32 %v7259_v60, %v7229_v42 }
0x39e3   :  { %v7267_v24 = vsel %vm477_vm7, %v9569_v53, 0.0 }
0x39e4   :  { %7268 = vadd.xlane.f32.xlu0 %v7267_v24 }
0x3a1f   :  { %v7266_v46 = vpop.xlane.xlu1 %7265 }
0x3a20   :  { %v7270_v40 = vmul.f32 %v7266_v46, %v8415_v33 }
0x3a22   :  { %v7272_v52 = vsub.f32 %v9564_v6, %v7270_v40 }
0x3a24   :  { %v7274_v59 = vmul.f32 %v7272_v52, %v7272_v52 }
0x3a26   :  { %v7276_v49 = vsel %vm477_vm7, %v7274_v59, 0.0 }
0x3a27   :  { %7277 = vadd.xlane.f32.xlu2 %v7276_v49 }
0x3a57   :  { %v7269_v35 = vpop.xlane.xlu0 %7268 }
0x3a58   :  { %v7271_v63 = vmul.f32 %v7269_v35, %v8415_v33 }
0x3a5a   :  { %v7273_v54 = vsub.f32 %v9569_v53, %v7271_v63 }
0x3a5c   :  { %v7275_v29 = vmul.f32 %v7273_v54, %v7273_v54 }
0x3a5e   :  { %v7279_v27 = vsel %vm477_vm7, %v7275_v29, 0.0 }
0x3a5f   :  { %7280 = vadd.xlane.f32.xlu1 %v7279_v27 }
0x3a9a   :  { %v7278_v5 = vpop.xlane.xlu2 %7277 }
0x3a9b   :  { %v7282_v19 = vmul.f32 %v7278_v5, %v8415_v33 }
0x3a9d   :  { %v7284_v10 = vadd.f32 1e-05, %v7282_v19 }
0x3a9f   :  { %8135 = vrsqrt.f32 %v7284_v10  ;;  %vm7292_vm4 = vweird.f32 %v7284_v10 }
0x3aa5   :  { %v8136_v13 = vpop.eup %8135 }
0x3aa6   :  { %v7287_v43 = vmul.f32 %v8136_v13, %v7284_v10  ;;  %vm7293_vm8 = vweird.f32 %v8136_v13 }
0x3aa7   :  { %vm7294_vm6 = vmor %vm7292_vm4, %vm7293_vm8 }
0x3aa8   :  { %v7288_v44 = vmul.f32 %v8136_v13, %v7287_v43 }
0x3aaa   :  { %v7289_v47 = vmul.f32 0.5, %v7288_v44 }
0x3aac   :  { %v7290_v50 = vsub.f32 1.5, %v7289_v47 }
0x3aae   :  { %v7291_v32 = vmul.f32 %v8136_v13, %v7290_v50 }
0x3ab0   :  { %v7295_v15 = vsel %vm7294_vm6, %v8136_v13, %v7291_v32 }
0x3ab1   :  { %v7306_v36 = vmul.f32 %v7295_v15, %v7272_v52  ;;  %v7843_v52 = vld [vmem:[#allocation7 + $0xde8] ss:$0 sm:$0xff] }
0x3ab3   :  { %v7310_v62 = vmul.f32 %v7840_v16, %v7306_v36 }
0x3ab5   :  { %v7314_v21 = vadd.f32 %v7841_v39, %v7310_v62 }
0x3ab7   :  { %7708 = vmatmul.msk.f32.vlgmr.msra.gmra.mxu0 %vm477_vm7, %v7314_v21 }
0x3ad2   :  { %v7281_v45 = vpop.xlane.xlu1 %7280 }
0x3ad3   :  { %v7283_v25 = vmul.f32 %v7281_v45, %v8415_v33 }
0x3ad5   :  { %v7285_v7 = vadd.f32 1e-05, %v7283_v25 }
0x3ad7   :  { %8137 = vrsqrt.f32 %v7285_v7  ;;  %vm7302_vm11 = vweird.f32 %v7285_v7 }
0x3add   :  { %v8138_v31 = vpop.eup %8137 }
0x3ade   :  { %v7297_v4 = vmul.f32 %v8138_v31, %v7285_v7  ;;  %vm7303_vm10 = vweird.f32 %v8138_v31 }
0x3adf   :  { %vm7304_vm12 = vmor %vm7302_vm11, %vm7303_vm10 }
0x3ae0   :  { %v7298_v61 = vmul.f32 %v8138_v31, %v7297_v4 }
0x3ae2   :  { %v7299_v8 = vmul.f32 0.5, %v7298_v61  ;;  %v7845_v61 = vld [vmem:[#allocation7 + $0xe98] ss:$0 sm:$0xff] }
0x3ae4   :  { %v7300_v22 = vsub.f32 1.5, %v7299_v8 }
0x3ae6   :  { %v7301_v9 = vmul.f32 %v8138_v31, %v7300_v22 }
0x3ae8   :  { %v7305_v48 = vsel %vm7304_vm12, %v8138_v31, %v7301_v9  ;;  %v7844_v31 = vld [vmem:[#allocation7 + $0xe90] ss:$0 sm:$0xff] }
0x3ae9   :  { %v7307_v18 = vmul.f32 %v7305_v48, %v7273_v54 }
0x3aeb   :  { %v7311_v34 = vmul.f32 %v7840_v16, %v7307_v18 }
0x3aed   :  { %v7315_v14 = vadd.f32 %v7841_v39, %v7311_v34 }
0x3aef   :  { %7709 = vmatmul.msk.f32.gmra.mxu0 %vm477_vm7, %v7315_v14 }
0x3b34   :  { %v7345_v28 = vpop.f32.mrf.mxu0 }
0x3b35   :  { %v7346_v58 = vadd.f32 %v7842_v51, %v7345_v28 }
0x3b37   :  { %v7351_v57 = vmul.f32 %v7346_v58, %v7346_v58 }
0x3b39   :  { %v7353_v55 = vmul.f32 %v7351_v57, %v7346_v58 }
0x3b3b   :  { %v7355_v38 = vmul.f32 0.044715, %v7353_v55 }
0x3b3d   :  { %v7357_v26 = vadd.f32 %v7355_v38, %v7346_v58 }
0x3b3f   :  { %v7359_v41 = vmul.f32 0.7978846, %v7357_v26 }
0x3b41   :  { %8139 = vtanh.f32 %v7359_v41 }
0x3b47   :  { %v8140_v0 = vpop.eup %8139 }
0x3b48   :  { %v7363_v37 = vadd.f32 1.0, %v8140_v0 }
0x3b4a   :  { %v7365_v30 = vmul.f32 0.5, %v7363_v37  ;;  %v7837_v37 = vld [vmem:[#allocation7 + $0xec0] ss:$0 sm:$0xff] }
0x3b4c   :  { %v7367_v17 = vmul.f32 %v7365_v30, %v7346_v58  ;;  %v7846_v30 = vld [vmem:[#allocation7 + $0xec0] ss:$0 sm:$0xff] }
0x3b4e   :  { %7403 = vmatmul.f32.vlgmr.msra.gmra.mxu1 %v7367_v17  ;;  %v6684_v17 = vadd.f32 %v7837_v37, %v9492_v3 }
0x3b6c   :  { %v7348_v12 = vpop.f32.mrf.mxu0 }
0x3b6d   :  { %v7349_v23 = vadd.f32 %v7842_v51, %v7348_v12 }
0x3b6f   :  { %v7352_v20 = vmul.f32 %v7349_v23, %v7349_v23 }
0x3b71   :  { %v7354_v2 = vmul.f32 %v7352_v20, %v7349_v23 }
0x3b73   :  { %v7356_v1 = vmul.f32 0.044715, %v7354_v2 }
0x3b75   :  { %v7358_v56 = vadd.f32 %v7356_v1, %v7349_v23 }
0x3b77   :  { %v7360_v60 = vmul.f32 0.7978846, %v7358_v56  ;;  %v6687_v56 = vadd.f32 %v7837_v37, %v9494_v11 }
0x3b79   :  { %8141 = vtanh.f32 %v7360_v60 }
0x3b7f   :  { %v8142_v42 = vpop.eup %8141 }
0x3b80   :  { %v7364_v24 = vadd.f32 1.0, %v8142_v42 }
0x3b82   :  { %v7366_v46 = vmul.f32 0.5, %v7364_v24 }
0x3b84   :  { %v7368_v40 = vmul.f32 %v7366_v46, %v7349_v23 }
0x3b86   :  { %7406 = vmatmul.f32.gmra.mxu1 %v7368_v40 }
0x3bcb   :  { %v7404_v59 = vpop.f32.mrf.mxu1 }
0x3bcc   :  { %v7405_v49 = vadd.f32 %v7843_v52, %v7404_v59 }
0x3bce   :  { %v7410_v35 = vadd.f32 %v7405_v49, %v9564_v6 }
0x3bd0   :  { %v7412_v63 = vsel %vm477_vm7, %v7410_v35, 0.0 }
0x3bd1   :  { %7413 = vadd.xlane.f32.xlu0 %v7412_v63 }
0x3c03   :  { %v7407_v54 = vpop.f32.mrf.mxu1 }
0x3c04   :  { %v7408_v29 = vadd.f32 %v7843_v52, %v7407_v54 }
0x3c06   :  { %v7411_v27 = vadd.f32 %v7408_v29, %v9569_v53 }
0x3c08   :  { %v7415_v5 = vsel %vm477_vm7, %v7411_v27, 0.0 }
0x3c09   :  { %7416 = vadd.xlane.f32.xlu2 %v7415_v5 }
0x3c44   :  { %v7414_v19 = vpop.xlane.xlu0 %7413 }
0x3c45   :  { %v7418_v10 = vmul.f32 %v7414_v19, %v8415_v33 }
0x3c47   :  { %v7420_v13 = vsub.f32 %v7410_v35, %v7418_v10 }
0x3c49   :  { %v7422_v43 = vmul.f32 %v7420_v13, %v7420_v13 }
0x3c4b   :  { %v7424_v44 = vsel %vm477_vm7, %v7422_v43, 0.0 }
0x3c4c   :  { %7425 = vadd.xlane.f32.xlu1 %v7424_v44 }
0x3c7c   :  { %v7417_v47 = vpop.xlane.xlu2 %7416 }
0x3c7d   :  { %v7419_v6 = vmul.f32 %v7417_v47, %v8415_v33 }
0x3c7f   :  { %v7421_v50 = vsub.f32 %v7411_v27, %v7419_v6 }
0x3c81   :  { %v7423_v32 = vmul.f32 %v7421_v50, %v7421_v50 }
0x3c83   :  { %v7427_v16 = vsel %vm477_vm7, %v7423_v32, 0.0 }
0x3c84   :  { %7428 = vadd.xlane.f32.xlu0 %v7427_v16 }
0x3cbf   :  { %v7426_v53 = vpop.xlane.xlu1 %7425 }
0x3cc0   :  { %v7430_v15 = vmul.f32 %v7426_v53, %v8415_v33 }
0x3cc2   :  { %v7432_v39 = vadd.f32 1e-05, %v7430_v15 }
0x3cc4   :  { %8143 = vrsqrt.f32 %v7432_v39  ;;  %vm7440_vm14 = vweird.f32 %v7432_v39 }
0x3cca   :  { %v8144_v36 = vpop.eup %8143 }
0x3ccb   :  { %v7435_v62 = vmul.f32 %v8144_v36, %v7432_v39  ;;  %vm7441_vm13 = vweird.f32 %v8144_v36 }
0x3ccc   :  { %vm7442_vm15 = vmor %vm7440_vm14, %vm7441_vm13 }
0x3ccd   :  { %v7436_v21 = vmul.f32 %v8144_v36, %v7435_v62 }
0x3ccf   :  { %v7437_v45 = vmul.f32 0.5, %v7436_v21 }
0x3cd1   :  { %v7438_v25 = vsub.f32 1.5, %v7437_v45 }
0x3cd3   :  { %v7439_v7 = vmul.f32 %v8144_v36, %v7438_v25 }
0x3cd5   :  { %v7443_v4 = vsel %vm7442_vm15, %v8144_v36, %v7439_v7 }
0x3cd6   :  { %v7454_v8 = vmul.f32 %v7443_v4, %v7420_v13 }
0x3cd8   :  { %v7458_v22 = vmul.f32 %v7844_v31, %v7454_v8 }
0x3cda   :  { %v7462_v9 = vadd.f32 %v7845_v61, %v7458_v22 }
0x3cdc   :  { %7710 = vmatmul.msk.f32.vlgmr.msra.gmra.mxu3 %vm477_vm7, %v7462_v9 }
0x3cf7   :  { %v7429_v48 = vpop.xlane.xlu0 %7428 }
0x3cf8   :  { %v7431_v18 = vmul.f32 %v7429_v48, %v8415_v33 }
0x3cfa   :  { %v7433_v34 = vadd.f32 1e-05, %v7431_v18 }
0x3cfc   :  { %8145 = vrsqrt.f32 %v7433_v34  ;;  %vm7450_vm0 = vweird.f32 %v7433_v34 }
0x3d02   :  { %v8146_v14 = vpop.eup %8145 }
0x3d03   :  { %v7445_v51 = vmul.f32 %v8146_v14, %v7433_v34  ;;  %vm7451_vm1 = vweird.f32 %v8146_v14 }
0x3d04   :  { %vm7452_vm2 = vmor %vm7450_vm0, %vm7451_vm1 }
0x3d05   :  { %v7446_v28 = vmul.f32 %v8146_v14, %v7445_v51 }
0x3d07   :  { %v7447_v58 = vmul.f32 0.5, %v7446_v28 }
0x3d09   :  { %v7448_v57 = vsub.f32 1.5, %v7447_v58 }
0x3d0b   :  { %v7449_v55 = vmul.f32 %v8146_v14, %v7448_v57 }
0x3d0d   :  { %v7453_v38 = vsel %vm7452_vm2, %v8146_v14, %v7449_v55 }
0x3d0e   :  { %v7455_v26 = vmul.f32 %v7453_v38, %v7421_v50 }
0x3d10   :  { %v7459_v41 = vmul.f32 %v7844_v31, %v7455_v26 }
0x3d12   :  { %v7463_v0 = vadd.f32 %v7845_v61, %v7459_v41 }
0x3d14   :  { %7711 = vmatmul.msk.f32.gmra.mxu3 %vm477_vm7, %v7463_v0 }
0x3d5f   :  { %v7493_v33 = vpop.f32.mrf.mxu3 }
0x3d60   :  { %v7494_v12 = vadd.f32 %v7846_v30, %v7493_v33 }
0x3d62   :  { %v7499_v23 = vsub.f32 %v6684_v17, %v7494_v12 }
0x3d64   :  { %v7501_v20 = vmul.f32 2.0, %v7499_v23 }
0x3d66   :  { %v7503_v2 = vadd.f32 %v7501_v20, %v7494_v12 }
0x3d68   :  { %7505 = vst [vmem:[#allocation10] sm:$0xff] %v7503_v2 }
0x3d97   :  { %v7496_v1 = vpop.f32.mrf.mxu3 }
0x3d98   :  { %v7497_v60 = vadd.f32 %v7846_v30, %v7496_v1 }
0x3d9a   :  { %v7500_v42 = vsub.f32 %v6687_v56, %v7497_v60 }
0x3d9c   :  { %v7502_v24 = vmul.f32 2.0, %v7500_v42 }
0x3d9e   :  { %v7504_v46 = vadd.f32 %v7502_v24, %v7497_v60 }
0x3da0   :  { %7506 = vst [vmem:[#allocation10 + $0x8] sm:$0xff] %v7504_v46 }
0x3da1   :  { %7519 = dma.vmem_to_hbm [thread:$0]  %s7512_s19, 256, %s7514_s22, [#allocation4], %s8279_s10, %s8279_s10, %s8280_s0  }
0x3da2   :  { %8274 = dma.done.wait [#allocation4], 256  }
0x3da3   :  { %8275 = vsyncadd [#allocation4], 4294967040 }
0x3da4   :  { %7524 = vsyncpa [#allocation3], 1 }
0x3da5   :  { %7525 = vsyncpa [#allocation6], 1 }
0x3da6   :  { %7526 = vsyncpa [#allocation9], 1 }
0x3da7   :  { %7527 = vsyncpa [#allocation4], 1 }

</bundles_post_ra>
